<compile_context>
chip_gen: v5e
topology: v5e:2x2
jax: 0.10.0
libtpu: 0.0.40
codegen_flags: <defaults>
</compile_context>

<pallas_src>
import functools
import math

import jax
import jax.numpy as jnp
from jax.experimental import pallas as pl
from jax.experimental.pallas import tpu as pltpu

D_EMB = 1024   # pts_embedding / projection_dim
BN_EPS = 1e-5


def _model_kernel(pts_ref, we_ref, be_ref, g1_ref, b1_ref, w1_hbm, w2_hbm,
                  out_ref,
                  acc8, emb_acc, w1_vmem, w2_vmem, sems,
                  *, n_strips):
    b = pl.program_id(0)           # batch row (outer grid axis)
    i = pl.program_id(1)           # point-chunk index (inner grid axis)
    nb = pl.num_programs(0)
    nc = pl.num_programs(1)

    # Kick off the projection-weight DMAs on the very first grid step so the ~4 MiB of
    # bf16 weights stream from HBM while the whole encoder loop runs.
    @pl.when((b == 0) & (i == 0))
    def _():
        pltpu.make_async_copy(w1_hbm, w1_vmem, sems.at[0]).start()
        pltpu.make_async_copy(w2_hbm, w2_vmem, sems.at[1]).start()

    # New batch row -> reset the running-max accumulator. Post-ReLU features are >= 0,
    # so zero-init is equivalent to -inf for the max-pool.
    @pl.when(i == 0)
    def _():
        acc8[...] = jnp.zeros_like(acc8)

    # ---- surrogate encoder, strip-mined -------------------------------------------------
    # per-point MLP 3 -> 1024 as three VPU broadcast-MACs (K=3 is too narrow for the MXU),
    # + bias + ReLU, folded 8 points at a time into an (8, 1024) running max held in vregs.
    we = we_ref[...]                           # (3, D) f32
    we0 = we[0:1, :]
    we1 = we[1:2, :]
    we2 = we[2:3, :]
    be = be_ref[...]                           # (1, D) f32

    def strip_body(s, carry):
        off = pl.multiple_of(s * 8, 8)
        p = pts_ref[pl.ds(off, 8), :]                              # (8, 3)
        f = p[:, 0:1] * we0 + p[:, 1:2] * we1 + p[:, 2:3] * we2 + be
        f = jnp.maximum(f, 0.0)                                    # ReLU
        return jnp.maximum(carry, f)                               # running max, 8 vregs

    unroll = 8 if n_strips >= 8 else n_strips
    acc8[...] = jax.lax.fori_loop(0, n_strips, strip_body, acc8[...], unroll=unroll)

    # Last chunk of this batch row: collapse the 8 partial maxima and store the row ONCE.
    @pl.when(i == nc - 1)
    def _():
        emb_acc[b] = jnp.max(acc8[...], axis=0, keepdims=True)     # (1, D)

    # ---- projection head: runs once, after the very last encoder chunk ------------------
    @pl.when((b == nb - 1) & (i == nc - 1))
    def _():
        emb = emb_acc[...][:, 0, :]                                # (B, D) f32

        # w1 (nn.Linear, bias=False): wait only on W1's DMA; bf16 operands, f32 accumulate.
        pltpu.make_async_copy(w1_hbm, w1_vmem, sems.at[0]).wait()
        h = jnp.dot(emb.astype(jnp.bfloat16), w1_vmem[...],
                    preferred_element_type=jnp.float32)            # (B, D)

        # bn1: BatchNorm1d (training-mode batch stats, biased variance), affine.
        mu1 = jnp.mean(h, axis=0, keepdims=True)
        var1 = jnp.mean((h - mu1) ** 2, axis=0, keepdims=True)
        h = (h - mu1) * jax.lax.rsqrt(var1 + BN_EPS)
        h = h * g1_ref[...] + b1_ref[...]
        h = jnp.maximum(h, 0.0)                                    # ReLU

        # w2 (nn.Linear, bias=False): W2's stream got extra overlap until just now.
        pltpu.make_async_copy(w2_hbm, w2_vmem, sems.at[1]).wait()
        z = jnp.dot(h.astype(jnp.bfloat16), w2_vmem[...],
                    preferred_element_type=jnp.float32)            # (B, D)

        # bn2: BatchNorm1d(affine=False), training-mode batch stats.
        mu2 = jnp.mean(z, axis=0, keepdims=True)
        var2 = jnp.mean((z - mu2) ** 2, axis=0, keepdims=True)
        out_ref[...] = ((z - mu2) * jax.lax.rsqrt(var2 + BN_EPS)).astype(out_ref.dtype)


def model_trans_all_forward(batch, params, *, tile_n=2048):
    """JAX wrapper reproducing Model_Trans_all.forward(batch) -> (bs, 1024)."""
    pts = batch["pts"].astype(jnp.float32)                 # (B, N, 3)
    B, N, C = pts.shape
    assert C == 3 and N >= 1

    # elementwise consumers stay f32 (v5e VPU has no bf16 path)
    we = params["we"].astype(jnp.float32)                  # (3, D)
    be = params["be"].astype(jnp.float32)                  # (1, D)
    g1 = params["g1"].astype(jnp.float32)                  # (1, D)
    b1 = params["b1"].astype(jnp.float32)                  # (1, D)
    # MXU consumers go bf16 (halves the weight DMA bytes; f32 accumulation in-kernel)
    w1 = params["w1"].astype(jnp.bfloat16)                 # (D, D) = weight.T
    w2 = params["w2"].astype(jnp.bfloat16)                 # (D, D) = weight.T

    # point-axis tiling: chunk sublane dim must be a multiple of 8
    assert tile_n % 8 == 0
    tn = tile_n if N >= tile_n else ((N + 7) // 8) * 8
    n_chunks = (N + tn - 1) // tn
    n_pad = n_chunks * tn
    if n_pad != N:
        # Pad with copies of the first real point: duplicates cannot change the max-pool,
        # so the kernel needs no padding mask at all.
        fill = jnp.broadcast_to(pts[:, :1, :], (B, n_pad - N, 3))
        pts = jnp.concatenate([pts, fill], axis=1)

    kernel = functools.partial(_model_kernel, n_strips=tn // 8)
    const2d = lambda b, i: (0, 0)

    return pl.pallas_call(
        kernel,
        out_shape=jax.ShapeDtypeStruct((B, D_EMB), jnp.float32),
        grid=(B, n_chunks),
        in_specs=[
            pl.BlockSpec((pl.Squeezed(), tn, 3), lambda b, i: (b, i, 0)),  # pts -> (tn, 3)
            pl.BlockSpec((3, D_EMB), const2d),                   # We
            pl.BlockSpec((1, D_EMB), const2d),                   # be
            pl.BlockSpec((1, D_EMB), const2d),                   # bn1 gamma
            pl.BlockSpec((1, D_EMB), const2d),                   # bn1 beta
            pl.BlockSpec(memory_space=pl.ANY),                   # W1^T in HBM (manual DMA)
            pl.BlockSpec(memory_space=pl.ANY),                   # W2^T in HBM (manual DMA)
        ],
        out_specs=pl.BlockSpec((B, D_EMB), const2d),
        scratch_shapes=[
            pltpu.VMEM((8, D_EMB), jnp.float32),                 # per-row running max (8 strips)
            pltpu.VMEM((B, 1, D_EMB), jnp.float32),              # per-batch-row embedding
            pltpu.VMEM((D_EMB, D_EMB), jnp.bfloat16),            # W1 landing buffer
            pltpu.VMEM((D_EMB, D_EMB), jnp.bfloat16),            # W2 landing buffer
            pltpu.SemaphoreType.DMA((2,)),
        ],
        compiler_params=pltpu.CompilerParams(
            # Both axes must stay "arbitrary": acc8/emb_acc are shared scratch and the
            # projection head runs only on the final grid step.
            dimension_semantics=("arbitrary", "arbitrary"),
            vmem_limit_bytes=32 << 20,
        ),
    )(pts, we, be, g1, b1, w1, w2)


def init_params(key):
    """Deterministic parameter init (shapes follow the module __init__)."""
    k0, k1, k2 = jax.random.split(key, 3)
    we = jax.random.normal(k0, (3, D_EMB), jnp.float32) * (1.0 / math.sqrt(3.0))
    be = jnp.zeros((1, D_EMB), jnp.float32)
    # nn.Linear(D, D, bias=False).weight is (out, in); we store weight.T = (in, out)
    w1 = jax.random.normal(k1, (D_EMB, D_EMB), jnp.float32) * (1.0 / math.sqrt(D_EMB))
    g1 = jnp.ones((1, D_EMB), jnp.float32)    # bn1 gamma (default init 1)
    b1 = jnp.zeros((1, D_EMB), jnp.float32)   # bn1 beta  (default init 0)
    w2 = jax.random.normal(k2, (D_EMB, D_EMB), jnp.float32) * (1.0 / math.sqrt(D_EMB))
    return {"we": we, "be": be, "w1": w1, "g1": g1, "b1": b1, "w2": w2}


if __name__ == "__main__":
    key = jax.random.PRNGKey(0)
    pkey, dkey = jax.random.split(key)

    params = init_params(pkey)

    B, N = 2, 64
    pts = jax.random.normal(dkey, (B, N, 3), jnp.float32)
    batch = {"pts": pts}

    out = model_trans_all_forward(batch, params)
    out = jax.block_until_ready(out)

    assert out.shape == (B, D_EMB) and out.dtype == jnp.float32
    assert bool(jnp.all(jnp.isfinite(out)))
    print("KERNEL_OK")
</pallas_src>

<mosaic_0001>
module attributes {stable_mosaic.version = 11 : i64} {
  func.func @_model_kernel(%arg0: i32, %arg1: i32, %arg2: memref<1x64x3xf32, #tpu.memory_space<vmem>>, %arg3: memref<3x1024xf32, #tpu.memory_space<vmem>>, %arg4: memref<1x1024xf32, #tpu.memory_space<vmem>>, %arg5: memref<1x1024xf32, #tpu.memory_space<vmem>>, %arg6: memref<1x1024xf32, #tpu.memory_space<vmem>>, %arg7: memref<1024x1024xbf16, #tpu.memory_space<any>>, %arg8: memref<1024x1024xbf16, #tpu.memory_space<any>>, %arg9: memref<2x1024xf32, #tpu.memory_space<vmem>>, %arg10: memref<8x1024xf32, #tpu.memory_space<vmem>>, %arg11: memref<2x1x1024xf32, #tpu.memory_space<vmem>>, %arg12: memref<1024x1024xbf16, #tpu.memory_space<vmem>>, %arg13: memref<1024x1024xbf16, #tpu.memory_space<vmem>>, %arg14: memref<2x!tpu.dma_semaphore, #tpu.memory_space<semaphore_mem>>) attributes {dimension_semantics = [#tpu.dimension_semantics<arbitrary>, #tpu.dimension_semantics<arbitrary>], iteration_bounds = array<i64: 2, 1>, scalar_prefetch = 0 : i64, scratch_operands = 5 : i64, tpu.core_type = #tpu.core_type<tc>, window_params = [{transform_indices = @transform_0, window_bounds = array<i64: 1, 64, 3>}, {pipeline_mode = #tpu.pipeline_mode<synchronous>, transform_indices = @transform_1, window_bounds = array<i64: 3, 1024>}, {pipeline_mode = #tpu.pipeline_mode<synchronous>, transform_indices = @transform_2, window_bounds = array<i64: 1, 1024>}, {pipeline_mode = #tpu.pipeline_mode<synchronous>, transform_indices = @transform_3, window_bounds = array<i64: 1, 1024>}, {pipeline_mode = #tpu.pipeline_mode<synchronous>, transform_indices = @transform_4, window_bounds = array<i64: 1, 1024>}, {}, {}, {pipeline_mode = #tpu.pipeline_mode<synchronous>, transform_indices = @transform_7, window_bounds = array<i64: 2, 1024>}]} {
    %c0_i32 = arith.constant 0 : i32
    %0 = arith.cmpi eq, %arg0, %c0_i32 : i32
    %c0_i32_0 = arith.constant 0 : i32
    %1 = arith.cmpi eq, %arg1, %c0_i32_0 : i32
    %2 = arith.andi %0, %1 : i1
    %3 = arith.extui %2 : i1 to i32
    %c0_i32_1 = arith.constant 0 : i32
    %4 = arith.cmpi ne, %3, %c0_i32_1 : i32
    scf.if %4 {
      %c0_i32_48 = arith.constant 0 : i32
      %215 = tpu.memref_slice %arg14[%c0_i32_48] : memref<2x!tpu.dma_semaphore, #tpu.memory_space<semaphore_mem>> -> memref<1x!tpu.dma_semaphore, #tpu.memory_space<semaphore_mem>>
      %216 = tpu.memref_squeeze %215 : memref<1x!tpu.dma_semaphore, #tpu.memory_space<semaphore_mem>> -> memref<!tpu.dma_semaphore, #tpu.memory_space<semaphore_mem>>
      tpu.enqueue_dma source(%arg7 : memref<1024x1024xbf16, #tpu.memory_space<any>>) target(%arg12 : memref<1024x1024xbf16, #tpu.memory_space<vmem>>) target_semaphore(%216 : memref<!tpu.dma_semaphore, #tpu.memory_space<semaphore_mem>>)
      %c1_i32_49 = arith.constant 1 : i32
      %217 = tpu.memref_slice %arg14[%c1_i32_49] : memref<2x!tpu.dma_semaphore, #tpu.memory_space<semaphore_mem>> -> memref<1x!tpu.dma_semaphore, #tpu.memory_space<semaphore_mem>>
      %218 = tpu.memref_squeeze %217 : memref<1x!tpu.dma_semaphore, #tpu.memory_space<semaphore_mem>> -> memref<!tpu.dma_semaphore, #tpu.memory_space<semaphore_mem>>
      tpu.enqueue_dma source(%arg8 : memref<1024x1024xbf16, #tpu.memory_space<any>>) target(%arg13 : memref<1024x1024xbf16, #tpu.memory_space<vmem>>) target_semaphore(%218 : memref<!tpu.dma_semaphore, #tpu.memory_space<semaphore_mem>>)
    } else {
    }
    %c0_i32_2 = arith.constant 0 : i32
    %5 = arith.cmpi eq, %arg1, %c0_i32_2 : i32
    %6 = arith.extui %5 : i1 to i32
    %c0_i32_3 = arith.constant 0 : i32
    %7 = arith.cmpi ne, %6, %c0_i32_3 : i32
    scf.if %7 {
      %cst_48 = arith.constant 0.000000e+00 : f32
      %215 = vector.broadcast %cst_48 : f32 to vector<8x1024xf32>
      %c0_49 = arith.constant 0 : index
      %c0_50 = arith.constant 0 : index
      %216 = vector.load %arg10[%c0_49, %c0_50] : memref<8x1024xf32, #tpu.memory_space<vmem>>, vector<8x1024xf32>
      tpu.vector_store %arg10[%c0_49, %c0_50], %215 {strides = array<i32>} : memref<8x1024xf32, #tpu.memory_space<vmem>>, vector<8x1024xf32>,
    } else {
    }
    %c0 = arith.constant 0 : index
    %c0_4 = arith.constant 0 : index
    %8 = vector.load %arg3[%c0, %c0_4] : memref<3x1024xf32, #tpu.memory_space<vmem>>, vector<3x1024xf32>
    %9 = vector.extract_strided_slice %8 {offsets = [0, 0], sizes = [1, 1024], strides = [1, 1]} : vector<3x1024xf32> to vector<1x1024xf32>
    %10 = vector.extract_strided_slice %8 {offsets = [1, 0], sizes = [1, 1024], strides = [1, 1]} : vector<3x1024xf32> to vector<1x1024xf32>
    %11 = vector.extract_strided_slice %8 {offsets = [2, 0], sizes = [1, 1024], strides = [1, 1]} : vector<3x1024xf32> to vector<1x1024xf32>
    %c0_5 = arith.constant 0 : index
    %c0_6 = arith.constant 0 : index
    %12 = vector.load %arg4[%c0_5, %c0_6] : memref<1x1024xf32, #tpu.memory_space<vmem>>, vector<1x1024xf32>
    %c0_7 = arith.constant 0 : index
    %c0_8 = arith.constant 0 : index
    %13 = vector.load %arg10[%c0_7, %c0_8] : memref<8x1024xf32, #tpu.memory_space<vmem>>, vector<8x1024xf32>
    %c0_i32_9 = arith.constant 0 : i32
    %c8_i32 = arith.constant 8 : i32
    %14 = arith.muli %c0_i32_9, %c8_i32 : i32
    %15 = tpu.assume_multiple %14, 8 : i32
    %c0_10 = arith.constant 0 : index
    %16 = arith.index_cast %15 : i32 to index
    %c0_11 = arith.constant 0 : index
    %17 = vector.load %arg2[%c0_10, %16, %c0_11] : memref<1x64x3xf32, #tpu.memory_space<vmem>>, vector<1x8x3xf32>
    %18 = vector.shape_cast %17 : vector<1x8x3xf32> to vector<8x3xf32>
    %19 = vector.extract_strided_slice %18 {offsets = [0, 0], sizes = [8, 1], strides = [1, 1]} : vector<8x3xf32> to vector<8x1xf32>
    %20 = vector.broadcast %19 : vector<8x1xf32> to vector<8x1024xf32>
    %21 = vector.broadcast %9 : vector<1x1024xf32> to vector<8x1024xf32>
    %22 = arith.mulf %20, %21 : vector<8x1024xf32>
    %23 = vector.extract_strided_slice %18 {offsets = [0, 1], sizes = [8, 1], strides = [1, 1]} : vector<8x3xf32> to vector<8x1xf32>
    %24 = vector.broadcast %23 : vector<8x1xf32> to vector<8x1024xf32>
    %25 = vector.broadcast %10 : vector<1x1024xf32> to vector<8x1024xf32>
    %26 = arith.mulf %24, %25 : vector<8x1024xf32>
    %27 = arith.addf %22, %26 : vector<8x1024xf32>
    %28 = vector.extract_strided_slice %18 {offsets = [0, 2], sizes = [8, 1], strides = [1, 1]} : vector<8x3xf32> to vector<8x1xf32>
    %29 = vector.broadcast %28 : vector<8x1xf32> to vector<8x1024xf32>
    %30 = vector.broadcast %11 : vector<1x1024xf32> to vector<8x1024xf32>
    %31 = arith.mulf %29, %30 : vector<8x1024xf32>
    %32 = arith.addf %27, %31 : vector<8x1024xf32>
    %33 = vector.broadcast %12 : vector<1x1024xf32> to vector<8x1024xf32>
    %34 = arith.addf %32, %33 : vector<8x1024xf32>
    %cst = arith.constant 0.000000e+00 : f32
    %35 = vector.broadcast %cst : f32 to vector<8x1024xf32>
    %36 = arith.maximumf %34, %35 : vector<8x1024xf32>
    %37 = arith.maximumf %13, %36 : vector<8x1024xf32>
    %c1_i32 = arith.constant 1 : i32
    %c8_i32_12 = arith.constant 8 : i32
    %38 = arith.muli %c1_i32, %c8_i32_12 : i32
    %39 = tpu.assume_multiple %38, 8 : i32
    %c0_13 = arith.constant 0 : index
    %40 = arith.index_cast %39 : i32 to index
    %c0_14 = arith.constant 0 : index
    %41 = vector.load %arg2[%c0_13, %40, %c0_14] : memref<1x64x3xf32, #tpu.memory_space<vmem>>, vector<1x8x3xf32>
    %42 = vector.shape_cast %41 : vector<1x8x3xf32> to vector<8x3xf32>
    %43 = vector.extract_strided_slice %42 {offsets = [0, 0], sizes = [8, 1], strides = [1, 1]} : vector<8x3xf32> to vector<8x1xf32>
    %44 = vector.broadcast %43 : vector<8x1xf32> to vector<8x1024xf32>
    %45 = vector.broadcast %9 : vector<1x1024xf32> to vector<8x1024xf32>
    %46 = arith.mulf %44, %45 : vector<8x1024xf32>
    %47 = vector.extract_strided_slice %42 {offsets = [0, 1], sizes = [8, 1], strides = [1, 1]} : vector<8x3xf32> to vector<8x1xf32>
    %48 = vector.broadcast %47 : vector<8x1xf32> to vector<8x1024xf32>
    %49 = vector.broadcast %10 : vector<1x1024xf32> to vector<8x1024xf32>
    %50 = arith.mulf %48, %49 : vector<8x1024xf32>
    %51 = arith.addf %46, %50 : vector<8x1024xf32>
    %52 = vector.extract_strided_slice %42 {offsets = [0, 2], sizes = [8, 1], strides = [1, 1]} : vector<8x3xf32> to vector<8x1xf32>
    %53 = vector.broadcast %52 : vector<8x1xf32> to vector<8x1024xf32>
    %54 = vector.broadcast %11 : vector<1x1024xf32> to vector<8x1024xf32>
    %55 = arith.mulf %53, %54 : vector<8x1024xf32>
    %56 = arith.addf %51, %55 : vector<8x1024xf32>
    %57 = vector.broadcast %12 : vector<1x1024xf32> to vector<8x1024xf32>
    %58 = arith.addf %56, %57 : vector<8x1024xf32>
    %cst_15 = arith.constant 0.000000e+00 : f32
    %59 = vector.broadcast %cst_15 : f32 to vector<8x1024xf32>
    %60 = arith.maximumf %58, %59 : vector<8x1024xf32>
    %61 = arith.maximumf %37, %60 : vector<8x1024xf32>
    %c2_i32 = arith.constant 2 : i32
    %c8_i32_16 = arith.constant 8 : i32
    %62 = arith.muli %c2_i32, %c8_i32_16 : i32
    %63 = tpu.assume_multiple %62, 8 : i32
    %c0_17 = arith.constant 0 : index
    %64 = arith.index_cast %63 : i32 to index
    %c0_18 = arith.constant 0 : index
    %65 = vector.load %arg2[%c0_17, %64, %c0_18] : memref<1x64x3xf32, #tpu.memory_space<vmem>>, vector<1x8x3xf32>
    %66 = vector.shape_cast %65 : vector<1x8x3xf32> to vector<8x3xf32>
    %67 = vector.extract_strided_slice %66 {offsets = [0, 0], sizes = [8, 1], strides = [1, 1]} : vector<8x3xf32> to vector<8x1xf32>
    %68 = vector.broadcast %67 : vector<8x1xf32> to vector<8x1024xf32>
    %69 = vector.broadcast %9 : vector<1x1024xf32> to vector<8x1024xf32>
    %70 = arith.mulf %68, %69 : vector<8x1024xf32>
    %71 = vector.extract_strided_slice %66 {offsets = [0, 1], sizes = [8, 1], strides = [1, 1]} : vector<8x3xf32> to vector<8x1xf32>
    %72 = vector.broadcast %71 : vector<8x1xf32> to vector<8x1024xf32>
    %73 = vector.broadcast %10 : vector<1x1024xf32> to vector<8x1024xf32>
    %74 = arith.mulf %72, %73 : vector<8x1024xf32>
    %75 = arith.addf %70, %74 : vector<8x1024xf32>
    %76 = vector.extract_strided_slice %66 {offsets = [0, 2], sizes = [8, 1], strides = [1, 1]} : vector<8x3xf32> to vector<8x1xf32>
    %77 = vector.broadcast %76 : vector<8x1xf32> to vector<8x1024xf32>
    %78 = vector.broadcast %11 : vector<1x1024xf32> to vector<8x1024xf32>
    %79 = arith.mulf %77, %78 : vector<8x1024xf32>
    %80 = arith.addf %75, %79 : vector<8x1024xf32>
    %81 = vector.broadcast %12 : vector<1x1024xf32> to vector<8x1024xf32>
    %82 = arith.addf %80, %81 : vector<8x1024xf32>
    %cst_19 = arith.constant 0.000000e+00 : f32
    %83 = vector.broadcast %cst_19 : f32 to vector<8x1024xf32>
    %84 = arith.maximumf %82, %83 : vector<8x1024xf32>
    %85 = arith.maximumf %61, %84 : vector<8x1024xf32>
    %c3_i32 = arith.constant 3 : i32
    %c8_i32_20 = arith.constant 8 : i32
    %86 = arith.muli %c3_i32, %c8_i32_20 : i32
    %87 = tpu.assume_multiple %86, 8 : i32
    %c0_21 = arith.constant 0 : index
    %88 = arith.index_cast %87 : i32 to index
    %c0_22 = arith.constant 0 : index
    %89 = vector.load %arg2[%c0_21, %88, %c0_22] : memref<1x64x3xf32, #tpu.memory_space<vmem>>, vector<1x8x3xf32>
    %90 = vector.shape_cast %89 : vector<1x8x3xf32> to vector<8x3xf32>
    %91 = vector.extract_strided_slice %90 {offsets = [0, 0], sizes = [8, 1], strides = [1, 1]} : vector<8x3xf32> to vector<8x1xf32>
    %92 = vector.broadcast %91 : vector<8x1xf32> to vector<8x1024xf32>
    %93 = vector.broadcast %9 : vector<1x1024xf32> to vector<8x1024xf32>
    %94 = arith.mulf %92, %93 : vector<8x1024xf32>
    %95 = vector.extract_strided_slice %90 {offsets = [0, 1], sizes = [8, 1], strides = [1, 1]} : vector<8x3xf32> to vector<8x1xf32>
    %96 = vector.broadcast %95 : vector<8x1xf32> to vector<8x1024xf32>
    %97 = vector.broadcast %10 : vector<1x1024xf32> to vector<8x1024xf32>
    %98 = arith.mulf %96, %97 : vector<8x1024xf32>
    %99 = arith.addf %94, %98 : vector<8x1024xf32>
    %100 = vector.extract_strided_slice %90 {offsets = [0, 2], sizes = [8, 1], strides = [1, 1]} : vector<8x3xf32> to vector<8x1xf32>
    %101 = vector.broadcast %100 : vector<8x1xf32> to vector<8x1024xf32>
    %102 = vector.broadcast %11 : vector<1x1024xf32> to vector<8x1024xf32>
    %103 = arith.mulf %101, %102 : vector<8x1024xf32>
    %104 = arith.addf %99, %103 : vector<8x1024xf32>
    %105 = vector.broadcast %12 : vector<1x1024xf32> to vector<8x1024xf32>
    %106 = arith.addf %104, %105 : vector<8x1024xf32>
    %cst_23 = arith.constant 0.000000e+00 : f32
    %107 = vector.broadcast %cst_23 : f32 to vector<8x1024xf32>
    %108 = arith.maximumf %106, %107 : vector<8x1024xf32>
    %109 = arith.maximumf %85, %108 : vector<8x1024xf32>
    %c4_i32 = arith.constant 4 : i32
    %c8_i32_24 = arith.constant 8 : i32
    %110 = arith.muli %c4_i32, %c8_i32_24 : i32
    %111 = tpu.assume_multiple %110, 8 : i32
    %c0_25 = arith.constant 0 : index
    %112 = arith.index_cast %111 : i32 to index
    %c0_26 = arith.constant 0 : index
    %113 = vector.load %arg2[%c0_25, %112, %c0_26] : memref<1x64x3xf32, #tpu.memory_space<vmem>>, vector<1x8x3xf32>
    %114 = vector.shape_cast %113 : vector<1x8x3xf32> to vector<8x3xf32>
    %115 = vector.extract_strided_slice %114 {offsets = [0, 0], sizes = [8, 1], strides = [1, 1]} : vector<8x3xf32> to vector<8x1xf32>
    %116 = vector.broadcast %115 : vector<8x1xf32> to vector<8x1024xf32>
    %117 = vector.broadcast %9 : vector<1x1024xf32> to vector<8x1024xf32>
    %118 = arith.mulf %116, %117 : vector<8x1024xf32>
    %119 = vector.extract_strided_slice %114 {offsets = [0, 1], sizes = [8, 1], strides = [1, 1]} : vector<8x3xf32> to vector<8x1xf32>
    %120 = vector.broadcast %119 : vector<8x1xf32> to vector<8x1024xf32>
    %121 = vector.broadcast %10 : vector<1x1024xf32> to vector<8x1024xf32>
    %122 = arith.mulf %120, %121 : vector<8x1024xf32>
    %123 = arith.addf %118, %122 : vector<8x1024xf32>
    %124 = vector.extract_strided_slice %114 {offsets = [0, 2], sizes = [8, 1], strides = [1, 1]} : vector<8x3xf32> to vector<8x1xf32>
    %125 = vector.broadcast %124 : vector<8x1xf32> to vector<8x1024xf32>
    %126 = vector.broadcast %11 : vector<1x1024xf32> to vector<8x1024xf32>
    %127 = arith.mulf %125, %126 : vector<8x1024xf32>
    %128 = arith.addf %123, %127 : vector<8x1024xf32>
    %129 = vector.broadcast %12 : vector<1x1024xf32> to vector<8x1024xf32>
    %130 = arith.addf %128, %129 : vector<8x1024xf32>
    %cst_27 = arith.constant 0.000000e+00 : f32
    %131 = vector.broadcast %cst_27 : f32 to vector<8x1024xf32>
    %132 = arith.maximumf %130, %131 : vector<8x1024xf32>
    %133 = arith.maximumf %109, %132 : vector<8x1024xf32>
    %c5_i32 = arith.constant 5 : i32
    %c8_i32_28 = arith.constant 8 : i32
    %134 = arith.muli %c5_i32, %c8_i32_28 : i32
    %135 = tpu.assume_multiple %134, 8 : i32
    %c0_29 = arith.constant 0 : index
    %136 = arith.index_cast %135 : i32 to index
    %c0_30 = arith.constant 0 : index
    %137 = vector.load %arg2[%c0_29, %136, %c0_30] : memref<1x64x3xf32, #tpu.memory_space<vmem>>, vector<1x8x3xf32>
    %138 = vector.shape_cast %137 : vector<1x8x3xf32> to vector<8x3xf32>
    %139 = vector.extract_strided_slice %138 {offsets = [0, 0], sizes = [8, 1], strides = [1, 1]} : vector<8x3xf32> to vector<8x1xf32>
    %140 = vector.broadcast %139 : vector<8x1xf32> to vector<8x1024xf32>
    %141 = vector.broadcast %9 : vector<1x1024xf32> to vector<8x1024xf32>
    %142 = arith.mulf %140, %141 : vector<8x1024xf32>
    %143 = vector.extract_strided_slice %138 {offsets = [0, 1], sizes = [8, 1], strides = [1, 1]} : vector<8x3xf32> to vector<8x1xf32>
    %144 = vector.broadcast %143 : vector<8x1xf32> to vector<8x1024xf32>
    %145 = vector.broadcast %10 : vector<1x1024xf32> to vector<8x1024xf32>
    %146 = arith.mulf %144, %145 : vector<8x1024xf32>
    %147 = arith.addf %142, %146 : vector<8x1024xf32>
    %148 = vector.extract_strided_slice %138 {offsets = [0, 2], sizes = [8, 1], strides = [1, 1]} : vector<8x3xf32> to vector<8x1xf32>
    %149 = vector.broadcast %148 : vector<8x1xf32> to vector<8x1024xf32>
    %150 = vector.broadcast %11 : vector<1x1024xf32> to vector<8x1024xf32>
    %151 = arith.mulf %149, %150 : vector<8x1024xf32>
    %152 = arith.addf %147, %151 : vector<8x1024xf32>
    %153 = vector.broadcast %12 : vector<1x1024xf32> to vector<8x1024xf32>
    %154 = arith.addf %152, %153 : vector<8x1024xf32>
    %cst_31 = arith.constant 0.000000e+00 : f32
    %155 = vector.broadcast %cst_31 : f32 to vector<8x1024xf32>
    %156 = arith.maximumf %154, %155 : vector<8x1024xf32>
    %157 = arith.maximumf %133, %156 : vector<8x1024xf32>
    %c6_i32 = arith.constant 6 : i32
    %c8_i32_32 = arith.constant 8 : i32
    %158 = arith.muli %c6_i32, %c8_i32_32 : i32
    %159 = tpu.assume_multiple %158, 8 : i32
    %c0_33 = arith.constant 0 : index
    %160 = arith.index_cast %159 : i32 to index
    %c0_34 = arith.constant 0 : index
    %161 = vector.load %arg2[%c0_33, %160, %c0_34] : memref<1x64x3xf32, #tpu.memory_space<vmem>>, vector<1x8x3xf32>
    %162 = vector.shape_cast %161 : vector<1x8x3xf32> to vector<8x3xf32>
    %163 = vector.extract_strided_slice %162 {offsets = [0, 0], sizes = [8, 1], strides = [1, 1]} : vector<8x3xf32> to vector<8x1xf32>
    %164 = vector.broadcast %163 : vector<8x1xf32> to vector<8x1024xf32>
    %165 = vector.broadcast %9 : vector<1x1024xf32> to vector<8x1024xf32>
    %166 = arith.mulf %164, %165 : vector<8x1024xf32>
    %167 = vector.extract_strided_slice %162 {offsets = [0, 1], sizes = [8, 1], strides = [1, 1]} : vector<8x3xf32> to vector<8x1xf32>
    %168 = vector.broadcast %167 : vector<8x1xf32> to vector<8x1024xf32>
    %169 = vector.broadcast %10 : vector<1x1024xf32> to vector<8x1024xf32>
    %170 = arith.mulf %168, %169 : vector<8x1024xf32>
    %171 = arith.addf %166, %170 : vector<8x1024xf32>
    %172 = vector.extract_strided_slice %162 {offsets = [0, 2], sizes = [8, 1], strides = [1, 1]} : vector<8x3xf32> to vector<8x1xf32>
    %173 = vector.broadcast %172 : vector<8x1xf32> to vector<8x1024xf32>
    %174 = vector.broadcast %11 : vector<1x1024xf32> to vector<8x1024xf32>
    %175 = arith.mulf %173, %174 : vector<8x1024xf32>
    %176 = arith.addf %171, %175 : vector<8x1024xf32>
    %177 = vector.broadcast %12 : vector<1x1024xf32> to vector<8x1024xf32>
    %178 = arith.addf %176, %177 : vector<8x1024xf32>
    %cst_35 = arith.constant 0.000000e+00 : f32
    %179 = vector.broadcast %cst_35 : f32 to vector<8x1024xf32>
    %180 = arith.maximumf %178, %179 : vector<8x1024xf32>
    %181 = arith.maximumf %157, %180 : vector<8x1024xf32>
    %c7_i32 = arith.constant 7 : i32
    %c8_i32_36 = arith.constant 8 : i32
    %182 = arith.muli %c7_i32, %c8_i32_36 : i32
    %183 = tpu.assume_multiple %182, 8 : i32
    %c0_37 = arith.constant 0 : index
    %184 = arith.index_cast %183 : i32 to index
    %c0_38 = arith.constant 0 : index
    %185 = vector.load %arg2[%c0_37, %184, %c0_38] : memref<1x64x3xf32, #tpu.memory_space<vmem>>, vector<1x8x3xf32>
    %186 = vector.shape_cast %185 : vector<1x8x3xf32> to vector<8x3xf32>
    %187 = vector.extract_strided_slice %186 {offsets = [0, 0], sizes = [8, 1], strides = [1, 1]} : vector<8x3xf32> to vector<8x1xf32>
    %188 = vector.broadcast %187 : vector<8x1xf32> to vector<8x1024xf32>
    %189 = vector.broadcast %9 : vector<1x1024xf32> to vector<8x1024xf32>
    %190 = arith.mulf %188, %189 : vector<8x1024xf32>
    %191 = vector.extract_strided_slice %186 {offsets = [0, 1], sizes = [8, 1], strides = [1, 1]} : vector<8x3xf32> to vector<8x1xf32>
    %192 = vector.broadcast %191 : vector<8x1xf32> to vector<8x1024xf32>
    %193 = vector.broadcast %10 : vector<1x1024xf32> to vector<8x1024xf32>
    %194 = arith.mulf %192, %193 : vector<8x1024xf32>
    %195 = arith.addf %190, %194 : vector<8x1024xf32>
    %196 = vector.extract_strided_slice %186 {offsets = [0, 2], sizes = [8, 1], strides = [1, 1]} : vector<8x3xf32> to vector<8x1xf32>
    %197 = vector.broadcast %196 : vector<8x1xf32> to vector<8x1024xf32>
    %198 = vector.broadcast %11 : vector<1x1024xf32> to vector<8x1024xf32>
    %199 = arith.mulf %197, %198 : vector<8x1024xf32>
    %200 = arith.addf %195, %199 : vector<8x1024xf32>
    %201 = vector.broadcast %12 : vector<1x1024xf32> to vector<8x1024xf32>
    %202 = arith.addf %200, %201 : vector<8x1024xf32>
    %cst_39 = arith.constant 0.000000e+00 : f32
    %203 = vector.broadcast %cst_39 : f32 to vector<8x1024xf32>
    %204 = arith.maximumf %202, %203 : vector<8x1024xf32>
    %205 = arith.maximumf %181, %204 : vector<8x1024xf32>
    %c8_i32_40 = arith.constant 8 : i32
    %c0_41 = arith.constant 0 : index
    %c0_42 = arith.constant 0 : index
    %206 = vector.load %arg10[%c0_41, %c0_42] : memref<8x1024xf32, #tpu.memory_space<vmem>>, vector<8x1024xf32>
    tpu.vector_store %arg10[%c0_41, %c0_42], %205 {strides = array<i32>} : memref<8x1024xf32, #tpu.memory_space<vmem>>, vector<8x1024xf32>,
    %c0_i32_43 = arith.constant 0 : i32
    %207 = arith.cmpi eq, %arg1, %c0_i32_43 : i32
    %208 = arith.extui %207 : i1 to i32
    %c0_i32_44 = arith.constant 0 : i32
    %209 = arith.cmpi ne, %208, %c0_i32_44 : i32
    scf.if %209 {
      %c0_48 = arith.constant 0 : index
      %c0_49 = arith.constant 0 : index
      %215 = vector.load %arg10[%c0_48, %c0_49] : memref<8x1024xf32, #tpu.memory_space<vmem>>, vector<8x1024xf32>
      %cst_50 = arith.constant dense<0xFF800000> : vector<1024xf32>
      %216 = vector.multi_reduction <maximumf>, %215, %cst_50 [0] : vector<8x1024xf32> to vector<1024xf32>
      %217 = vector.shape_cast %216 : vector<1024xf32> to vector<1x1024xf32>
      %218 = arith.index_cast %arg0 : i32 to index
      %c0_51 = arith.constant 0 : index
      %c0_52 = arith.constant 0 : index
      %219 = vector.load %arg11[%218, %c0_51, %c0_52] : memref<2x1x1024xf32, #tpu.memory_space<vmem>>, vector<1x1x1024xf32>
      %220 = vector.shape_cast %219 : vector<1x1x1024xf32> to vector<1x1024xf32>
      %221 = vector.shape_cast %217 : vector<1x1024xf32> to vector<1x1x1024xf32>
      tpu.vector_store %arg11[%218, %c0_51, %c0_52], %221 {strides = array<i32>} : memref<2x1x1024xf32, #tpu.memory_space<vmem>>, vector<1x1x1024xf32>,
    } else {
    }
    %c1_i32_45 = arith.constant 1 : i32
    %210 = arith.cmpi eq, %arg0, %c1_i32_45 : i32
    %c0_i32_46 = arith.constant 0 : i32
    %211 = arith.cmpi eq, %arg1, %c0_i32_46 : i32
    %212 = arith.andi %210, %211 : i1
    %213 = arith.extui %212 : i1 to i32
    %c0_i32_47 = arith.constant 0 : i32
    %214 = arith.cmpi ne, %213, %c0_i32_47 : i32
    scf.if %214 {
      %c0_48 = arith.constant 0 : index
      %c0_49 = arith.constant 0 : index
      %c0_50 = arith.constant 0 : index
      %215 = vector.load %arg11[%c0_48, %c0_49, %c0_50] : memref<2x1x1024xf32, #tpu.memory_space<vmem>>, vector<2x1x1024xf32>
      %216 = vector.shape_cast %215 : vector<2x1x1024xf32> to vector<2x1024xf32>
      %c0_i32_51 = arith.constant 0 : i32
      %217 = tpu.memref_slice %arg14[%c0_i32_51] : memref<2x!tpu.dma_semaphore, #tpu.memory_space<semaphore_mem>> -> memref<1x!tpu.dma_semaphore, #tpu.memory_space<semaphore_mem>>
      %218 = tpu.memref_squeeze %217 : memref<1x!tpu.dma_semaphore, #tpu.memory_space<semaphore_mem>> -> memref<!tpu.dma_semaphore, #tpu.memory_space<semaphore_mem>>
      tpu.wait_dma2 semaphore(%218 : memref<!tpu.dma_semaphore, #tpu.memory_space<semaphore_mem>>) src(%arg7 : memref<1024x1024xbf16, #tpu.memory_space<any>>) dst(%arg12 : memref<1024x1024xbf16, #tpu.memory_space<vmem>>)
      %219 = arith.truncf %216 : vector<2x1024xf32> to vector<2x1024xbf16>
      %c0_52 = arith.constant 0 : index
      %c0_53 = arith.constant 0 : index
      %220 = vector.load %arg12[%c0_52, %c0_53] : memref<1024x1024xbf16, #tpu.memory_space<vmem>>, vector<1024x1024xbf16>
      %cst_54 = arith.constant dense<0.000000e+00> : vector<2x1024xf32>
      %221 = tpu.matmul %219, %220, %cst_54 {dimension_numbers = #tpu.dot_dimension_numbers<[1], [0], [0], [1], [0, 0, 1, 1], [], []>} : vector<2x1024xbf16>, vector<1024x1024xbf16>, vector<2x1024xf32> -> vector<2x1024xf32>
      %cst_55 = arith.constant dense<0.000000e+00> : vector<1024xf32>
      %222 = vector.multi_reduction <add>, %221, %cst_55 [0] : vector<2x1024xf32> to vector<1024xf32>
      %223 = vector.shape_cast %222 : vector<1024xf32> to vector<1x1024xf32>
      %cst_56 = arith.constant 2.000000e+00 : f32
      %224 = vector.broadcast %cst_56 : f32 to vector<1x1024xf32>
      %225 = arith.divf %223, %224 : vector<1x1024xf32>
      %226 = vector.broadcast %225 : vector<1x1024xf32> to vector<2x1024xf32>
      %227 = arith.subf %221, %226 : vector<2x1024xf32>
      %228 = arith.mulf %227, %227 : vector<2x1024xf32>
      %cst_57 = arith.constant dense<0.000000e+00> : vector<1024xf32>
      %229 = vector.multi_reduction <add>, %228, %cst_57 [0] : vector<2x1024xf32> to vector<1024xf32>
      %230 = vector.shape_cast %229 : vector<1024xf32> to vector<1x1024xf32>
      %cst_58 = arith.constant 2.000000e+00 : f32
      %231 = vector.broadcast %cst_58 : f32 to vector<1x1024xf32>
      %232 = arith.divf %230, %231 : vector<1x1024xf32>
      %233 = vector.broadcast %225 : vector<1x1024xf32> to vector<2x1024xf32>
      %234 = arith.subf %221, %233 : vector<2x1024xf32>
      %cst_59 = arith.constant 9.99999974E-6 : f32
      %235 = vector.broadcast %cst_59 : f32 to vector<1x1024xf32>
      %236 = arith.addf %232, %235 : vector<1x1024xf32>
      %237 = math.rsqrt %236 : vector<1x1024xf32>
      %238 = vector.broadcast %237 : vector<1x1024xf32> to vector<2x1024xf32>
      %239 = arith.mulf %234, %238 : vector<2x1024xf32>
      %c0_60 = arith.constant 0 : index
      %c0_61 = arith.constant 0 : index
      %240 = vector.load %arg5[%c0_60, %c0_61] : memref<1x1024xf32, #tpu.memory_space<vmem>>, vector<1x1024xf32>
      %241 = vector.broadcast %240 : vector<1x1024xf32> to vector<2x1024xf32>
      %242 = arith.mulf %239, %241 : vector<2x1024xf32>
      %c0_62 = arith.constant 0 : index
      %c0_63 = arith.constant 0 : index
      %243 = vector.load %arg6[%c0_62, %c0_63] : memref<1x1024xf32, #tpu.memory_space<vmem>>, vector<1x1024xf32>
      %244 = vector.broadcast %243 : vector<1x1024xf32> to vector<2x1024xf32>
      %245 = arith.addf %242, %244 : vector<2x1024xf32>
      %cst_64 = arith.constant 0.000000e+00 : f32
      %246 = vector.broadcast %cst_64 : f32 to vector<2x1024xf32>
      %247 = arith.maximumf %245, %246 : vector<2x1024xf32>
      %c1_i32_65 = arith.constant 1 : i32
      %248 = tpu.memref_slice %arg14[%c1_i32_65] : memref<2x!tpu.dma_semaphore, #tpu.memory_space<semaphore_mem>> -> memref<1x!tpu.dma_semaphore, #tpu.memory_space<semaphore_mem>>
      %249 = tpu.memref_squeeze %248 : memref<1x!tpu.dma_semaphore, #tpu.memory_space<semaphore_mem>> -> memref<!tpu.dma_semaphore, #tpu.memory_space<semaphore_mem>>
      tpu.wait_dma2 semaphore(%249 : memref<!tpu.dma_semaphore, #tpu.memory_space<semaphore_mem>>) src(%arg8 : memref<1024x1024xbf16, #tpu.memory_space<any>>) dst(%arg13 : memref<1024x1024xbf16, #tpu.memory_space<vmem>>)
      %250 = arith.truncf %247 : vector<2x1024xf32> to vector<2x1024xbf16>
      %c0_66 = arith.constant 0 : index
      %c0_67 = arith.constant 0 : index
      %251 = vector.load %arg13[%c0_66, %c0_67] : memref<1024x1024xbf16, #tpu.memory_space<vmem>>, vector<1024x1024xbf16>
      %cst_68 = arith.constant dense<0.000000e+00> : vector<2x1024xf32>
      %252 = tpu.matmul %250, %251, %cst_68 {dimension_numbers = #tpu.dot_dimension_numbers<[1], [0], [0], [1], [0, 0, 1, 1], [], []>} : vector<2x1024xbf16>, vector<1024x1024xbf16>, vector<2x1024xf32> -> vector<2x1024xf32>
      %cst_69 = arith.constant dense<0.000000e+00> : vector<1024xf32>
      %253 = vector.multi_reduction <add>, %252, %cst_69 [0] : vector<2x1024xf32> to vector<1024xf32>
      %254 = vector.shape_cast %253 : vector<1024xf32> to vector<1x1024xf32>
      %cst_70 = arith.constant 2.000000e+00 : f32
      %255 = vector.broadcast %cst_70 : f32 to vector<1x1024xf32>
      %256 = arith.divf %254, %255 : vector<1x1024xf32>
      %257 = vector.broadcast %256 : vector<1x1024xf32> to vector<2x1024xf32>
      %258 = arith.subf %252, %257 : vector<2x1024xf32>
      %259 = arith.mulf %258, %258 : vector<2x1024xf32>
      %cst_71 = arith.constant dense<0.000000e+00> : vector<1024xf32>
      %260 = vector.multi_reduction <add>, %259, %cst_71 [0] : vector<2x1024xf32> to vector<1024xf32>
      %261 = vector.shape_cast %260 : vector<1024xf32> to vector<1x1024xf32>
      %cst_72 = arith.constant 2.000000e+00 : f32
      %262 = vector.broadcast %cst_72 : f32 to vector<1x1024xf32>
      %263 = arith.divf %261, %262 : vector<1x1024xf32>
      %264 = vector.broadcast %256 : vector<1x1024xf32> to vector<2x1024xf32>
      %265 = arith.subf %252, %264 : vector<2x1024xf32>
      %cst_73 = arith.constant 9.99999974E-6 : f32
      %266 = vector.broadcast %cst_73 : f32 to vector<1x1024xf32>
      %267 = arith.addf %263, %266 : vector<1x1024xf32>
      %268 = math.rsqrt %267 : vector<1x1024xf32>
      %269 = vector.broadcast %268 : vector<1x1024xf32> to vector<2x1024xf32>
      %270 = arith.mulf %265, %269 : vector<2x1024xf32>
      %c0_74 = arith.constant 0 : index
      %c0_75 = arith.constant 0 : index
      %271 = vector.load %arg9[%c0_74, %c0_75] : memref<2x1024xf32, #tpu.memory_space<vmem>>, vector<2x1024xf32>
      tpu.vector_store %arg9[%c0_74, %c0_75], %270 {strides = array<i32>} : memref<2x1024xf32, #tpu.memory_space<vmem>>, vector<2x1024xf32>,
    } else {
    }
    return
  }
  func.func @transform_0(%arg0: i32, %arg1: i32) -> (i32, i32, i32) {
    %c0_i32 = arith.constant 0 : i32
    %c0_i32_0 = arith.constant 0 : i32
    return %arg0, %arg1, %c0_i32 : i32, i32, i32
  }
  func.func @transform_1(%arg0: i32, %arg1: i32) -> (i32, i32) {
    %c0_i32 = arith.constant 0 : i32
    %c0_i32_0 = arith.constant 0 : i32
    %c0_i32_1 = arith.constant 0 : i32
    return %c0_i32, %c0_i32_0 : i32, i32
  }
  func.func @transform_2(%arg0: i32, %arg1: i32) -> (i32, i32) {
    %c0_i32 = arith.constant 0 : i32
    %c0_i32_0 = arith.constant 0 : i32
    %c0_i32_1 = arith.constant 0 : i32
    return %c0_i32, %c0_i32_0 : i32, i32
  }
  func.func @transform_3(%arg0: i32, %arg1: i32) -> (i32, i32) {
    %c0_i32 = arith.constant 0 : i32
    %c0_i32_0 = arith.constant 0 : i32
    %c0_i32_1 = arith.constant 0 : i32
    return %c0_i32, %c0_i32_0 : i32, i32
  }
  func.func @transform_4(%arg0: i32, %arg1: i32) -> (i32, i32) {
    %c0_i32 = arith.constant 0 : i32
    %c0_i32_0 = arith.constant 0 : i32
    %c0_i32_1 = arith.constant 0 : i32
    return %c0_i32, %c0_i32_0 : i32, i32
  }
  func.func @transform_7(%arg0: i32, %arg1: i32) -> (i32, i32) {
    %c0_i32 = arith.constant 0 : i32
    %c0_i32_0 = arith.constant 0 : i32
    %c0_i32_1 = arith.constant 0 : i32
    return %c0_i32, %c0_i32_0 : i32, i32
  }
}

</mosaic_0001>

<bundles_post_ra>
// kernel: tpu_custom_call.1
= control target key start
LH: loop header
LB: loop body
LE: loop exit
PB: predicated region body
PF: predicated region fallthrough
CT: control target
= control target key end

     0   :  { %12 = vsyncpa [#allocation8], 0  ;;  %s16832_s0 = inlined_call_operand.vmem [shape: f32[2,64,3], index: 0, kind: input, shape index: {}]   ;;  %s16833_s1 = inlined_call_operand.hbm [shape: f32[3,1024], index: 1, kind: input, shape index: {}]   ;;  %s16834_s2 = inlined_call_operand.hbm [shape: f32[1,1024], index: 2, kind: input, shape index: {}]   ;;  %s16835_s3 = inlined_call_operand.hbm [shape: f32[1,1024], index: 3, kind: input, shape index: {}]   ;;  %s16836_s4 = inlined_call_operand.hbm [shape: f32[1,1024], index: 4, kind: input, shape index: {}]   ;;  %s16837_s5 = inlined_call_operand.hbm [shape: bf16[1024,1024], index: 5, kind: input, shape index: {}]   ;;  %s16838_s6 = inlined_call_operand.hbm [shape: bf16[1024,1024], index: 6, kind: input, shape index: {}]   ;;  %s16839_s7 = inlined_call_operand.hbm [shape: f32[2,1024], index: 7, kind: output, shape index: {}]  }
   0x1   :  { %13 = vsyncpa [#allocation11], 0 }
   0x2   :  { %14 = vsyncpa [#allocation14], 0 }
   0x3   :  { %15 = vsyncpa [#allocation9], 0  ;;  %s15404_s24 = smov 0   ;;  %s15406_s25 = smov 0  }
   0x4   :  { %s15408_s26 = smov 0  }
   0x5 LB: > { %s195_s29 = sshll.u32 %s16834_s2, 4  ;;  %s9819_s30 = sadd.s32 4294967295, %s15351_s26   ;;  %s15351_s26 = sphi %s15408_s26, %s21_s26   ;;  %s15347_s25 = sphi %s15406_s25, %s17130_s25   ;;  %s15343_s24 = sphi %s15404_s24, %s17129_s24   ;;  %s196_s29 = int_to_ptr.hbm [resolvable:$true] %s195_s29 }
   0x6   : > { %p9820_p0 = scmp.ge.s32.totalorder %s15351_s26, 1  ;;  %p171_p1 = scmp.lt.s32.totalorder %s15351_s26, 3 }
   0x7   : > { %p15427_p2 = scmp.eq.s32.totalorder %s9819_s30, 0  ;;  %s15353_s10 = smov [#allocation10]  }
   0x8   : > { %p15431_p3 = pnand %p9820_p0, %p171_p1  ;;  %s197_s11 = sshll.u32 %s15353_s10, 4  ;;  %s198_s11 = int_to_ptr.vmem [resolvable:$true] %s197_s11 }
   0x9   : > { %s33_s13 = sadd.s32 1, %s15347_s25  ;;  %s183_s16 = sshll.u32 %s16833_s1, 4  ;;  %s184_s16 = int_to_ptr.hbm [resolvable:$true] %s183_s16 }
   0xa   : > { %p14994_p4 = pneg %p15431_p3  ;;  %p35_p6 = scmp.ge.s32.totalorder %s33_s13, 2 }
   0xb   : > { %s207_s19 = sshll.u32 %s16835_s3, 4  ;;  %s15354_s20 = smov [#allocation7]   ;;  %s208_s19 = int_to_ptr.hbm [resolvable:$true] %s207_s19 }
   0xc   : > { %p15439_p5 = pnand %p15427_p2, %p14994_p4  ;;  %s17132_s13 = smov (%p35_p6, %s33_s13), 0 }
   0xd   : > { %s185_s21 = sshll.u32 %s15354_s20, 4  ;;  %s15355_s22 = smov [#allocation12]   ;;  %s186_s21 = int_to_ptr.vmem [resolvable:$true] %s185_s21 }
   0xe   : > { %15000 = dma.hbm_to_vmem [thread:$0]  (!%p15439_p5), %s196_s29, 128, %s198_s11, [#allocation11]  }
   0xf   : > { %14997 = dma.hbm_to_vmem [thread:$0]  (!%p15439_p5), %s184_s16, 512, %s186_s21, [#allocation8]  }
  0x10   : > { %s209_s23 = sshll.u32 %s15355_s22, 4  ;;  %s219_s10 = sshll.u32 %s16836_s4, 4  ;;  %s210_s23 = int_to_ptr.vmem [resolvable:$true] %s209_s23  ;;  %s220_s10 = int_to_ptr.hbm [resolvable:$true] %s219_s10 }
  0x11   : > { %15003 = dma.hbm_to_vmem [thread:$0]  (!%p15439_p5), %s208_s19, 128, %s210_s23, [#allocation11]  }
  0x12   : > { %s15356_s29 = smov [#allocation13]   ;;  %247 = sbr.rel (%p15431_p3) target bundleno = 2306 (0x902), region = 40 }
  0x13   : > { %s221_s11 = sshll.u32 %s15356_s29, 4  ;;  %s222_s11 = int_to_ptr.vmem [resolvable:$true] %s221_s11 }
  0x14   : > { %15006 = dma.hbm_to_vmem [thread:$0]  (!%p15439_p5), %s220_s10, 128, %s222_s11, [#allocation14]  }
  0x17   : > { %15322 = dma.done.wait (%p15427_p2), [#allocation8], 512  }
  0x18   : > { %15324 = vsyncadd (%p15427_p2), [#allocation8], 4294966784 }
  0x19   : > { %15326 = dma.done.wait (%p15427_p2), [#allocation11], 256  }
  0x1a   : > { %15328 = vsyncadd (%p15427_p2), [#allocation11], 4294967040 }
  0x1b   : > { %15330 = dma.done.wait (%p15427_p2), [#allocation14], 128  }
  0x1c   : > { %15332 = vsyncadd (%p15427_p2), [#allocation14], 4294967168  ;;  %p291_p7 = scmp.lt.s32.totalorder %s15343_s24, 1  ;;  %v15357_v0 = vmov 2   ;;  %v15358_v1 = vmov 1   ;;  %v15359_v5 = vmov 0  }
  0x1d   : > { %15057 = vset.pattern.permute.xlu0 %v15357_v0  ;;  %15052 = vset.pattern.permute.xlu1 %v15357_v0  ;;  %v344_v12 = vld [vmem:[#allocation7] sm:$0x77]  ;;  %v345_v13 = vld [vmem:[#allocation7 + $0x8] sm:$0x77]  ;;  %v346_v14 = vld [vmem:[#allocation7 + $0x10] sm:$0x77] }
  0x1e   : > { %s292_s9 = scalar_select %p291_p7, %s15343_s24, 1  ;;  %15054 = vset.pattern.permute.xlu2 %v15358_v1  ;;  %v403_v15 = vperm.slane %v344_v12, 1  ;;  %v347_v16 = vld [vmem:[#allocation7 + $0x18] sm:$0x77]  ;;  %v404_v17 = vperm.slane %v344_v12, 5  ;;  %v405_v18 = vperm.slane %v345_v13, 1 }
  0x1f   : > { %v406_v19 = vperm.slane %v345_v13, 5  ;;  %v407_v20 = vperm.slane %v346_v14, 1  ;;  %v408_v21 = vperm.slane %v346_v14, 5  ;;  %v409_v22 = vperm.slane %v347_v16, 1  ;;  %v348_v60 = vld [vmem:[#allocation10] sm:$0xff]  ;;  %p300_p8 = scmp.eq.s32.totalorder %s15343_s24, 0 }
  0x20   : > { %s13945_s12 = sshll.u32 %s292_s9, 6  ;;  %v410_v23 = vperm.slane %v347_v16, 5  ;;  %v15492_v24 = vperm.slane %v403_v15, 1  ;;  %v15496_v26 = vperm.slane %v404_v17, 1  ;;  %v15498_v27 = vperm.slane %v405_v18, 1  ;;  %s313_s18 = sshll.u32 %s16837_s5, 4  ;;  %s314_s18 = int_to_ptr.hbm [resolvable:$true] %s313_s18 }
  0x21   : > { %s15482_s16 = scalar_lea.vmem %s16832_s0, %s13945_s12  ;;  %v15500_v28 = vperm.slane %v406_v19, 1  ;;  %v447_v29 = vperm.slane %v344_v12, 2  ;;  %v448_v30 = vperm.slane %v344_v12, 6  ;;  %v449_v31 = vperm.slane %v345_v13, 2  ;;  %s15360_s19 = smov [#allocation4]  }
  0x22   : > { %v9835_v2 = vld [vmem:[%s15482_s16 + $0x10] sm:$0xff]  ;;  %v357_v3 = vld [vmem:[%s15482_s16] sm:$0xff]  ;;  %v9834_v4 = vld [vmem:[%s15482_s16 + $0x8] sm:$0xff]  ;;  %16922 = vst [vmem:[#allocation28_spill] sm:$0xff] %v15492_v24  ;;  %v450_v32 = vperm.slane %v345_v13, 6  ;;  %v451_v33 = vperm.slane %v346_v14, 2 }
  0x23   : > { %643 = vperm.xlu0 %15057, %v9835_v2   ;;  %444 = vperm.xlu1 %15052, %v357_v3   ;;  %v9837_v6 = vld [vmem:[%s15482_s16 + $0x20] sm:$0xff]  ;;  %v9836_v7 = vld [vmem:[%s15482_s16 + $0x18] sm:$0xff]  ;;  %v9839_v8 = vld [vmem:[%s15482_s16 + $0x30] sm:$0xff]  ;;  %16923 = vst [vmem:[#allocation29_spill] sm:$0xff] %v15496_v26  ;;  %v15502_v34 = vperm.slane %v407_v20, 1  ;;  %v452_v35 = vperm.slane %v346_v14, 6 }
  0x24   : > { %544 = vperm.xlu2 %15054, %v9834_v4   ;;  %v9840_v9 = vld [vmem:[%s15482_s16 + $0x38] sm:$0xff]  ;;  %v9838_v10 = vld [vmem:[%s15482_s16 + $0x28] sm:$0xff]  ;;  %16924 = vst [vmem:[#allocation30_spill] sm:$0xff] %v15498_v27  ;;  %v453_v36 = vperm.slane %v347_v16, 2  ;;  %v454_v37 = vperm.slane %v347_v16, 6  ;;  %v15504_v38 = vperm.slane %v408_v21, 1 }
  0x25   : > { %16925 = vst [vmem:[#allocation31_spill] sm:$0xff] %v15500_v28  ;;  %v15506_v39 = vperm.slane %v409_v22, 1  ;;  %v15508_v40 = vperm.slane %v410_v23, 1  ;;  %v367_v41 = vperm.slane %v344_v12, 0  ;;  %v15510_v42 = vperm.slane %v447_v29, 2  ;;  %s315_s20 = sshll.u32 %s15360_s19, 4  ;;  %s316_s20 = int_to_ptr.vmem [resolvable:$true] %s315_s20 }
  0x26   : > { %16926 = vst [vmem:[#allocation32_spill] sm:$0xff] %v15502_v34  ;;  %v368_v43 = vperm.slane %v344_v12, 4  ;;  %v369_v44 = vperm.slane %v345_v13, 0  ;;  %v370_v45 = vperm.slane %v345_v13, 4  ;;  %v15512_v46 = vperm.slane %v448_v30, 2  ;;  %s327_s23 = sshll.u32 %s16838_s6, 4  ;;  %s328_s23 = int_to_ptr.hbm [resolvable:$true] %s327_s23 }
  0x27   : > { %16927 = vst [vmem:[#allocation33_spill] sm:$0xff] %v15504_v38  ;;  %v15514_v47 = vperm.slane %v449_v31, 2  ;;  %v15516_v48 = vperm.slane %v450_v32, 2  ;;  %v15518_v49 = vperm.slane %v451_v33, 2  ;;  %v15520_v50 = vperm.slane %v452_v35, 2  ;;  %s15361_s27 = smov [#allocation5]  }
  0x28   : > { %16928 = vst [vmem:[#allocation34_spill] sm:$0xff] %v15506_v39  ;;  %v15522_v51 = vperm.slane %v453_v36, 2  ;;  %v15524_v52 = vperm.slane %v454_v37, 2  ;;  %v371_v53 = vperm.slane %v346_v14, 0  ;;  %v372_v54 = vperm.slane %v346_v14, 4  ;;  %s329_s28 = sshll.u32 %s15361_s27, 4  ;;  %s330_s28 = int_to_ptr.vmem [resolvable:$true] %s329_s28 }
  0x29   : > { %16929 = vst [vmem:[#allocation35_spill] sm:$0xff] %v15508_v40  ;;  %v373_v55 = vperm.slane %v347_v16, 0  ;;  %v374_v56 = vperm.slane %v347_v16, 4  ;;  %v15526_v57 = vperm.slane %v367_v41, 0  ;;  %v15531_v61 = vperm.slane %v368_v43, 0  ;;  %p1181_p9 = scmp.eq.s32.totalorder %s15343_s24, 1 }
  0x2a   : > { %16930 = vst [vmem:[#allocation36_spill] sm:$0xff] %v15510_v42  ;;  %v15533_v62 = vperm.slane %v369_v44, 0  ;;  %v15535_v63 = vperm.slane %v370_v45, 0  ;;  %v15566_v12 = vperm.slane %v348_v60, 0  ;;  %v15568_v14 = vperm.slane %v348_v60, 1  ;;  %s9841_s10 = sshll.u32 %s15343_s24, 3 }
  0x2b   : > { %15058 = vset.pattern.permute.xlu0 %v15358_v1  ;;  %15053 = vset.pattern.permute.xlu1 %v15359_v5  ;;  %16931 = vst [vmem:[#allocation37_spill] sm:$0xff] %v15512_v46  ;;  %v15570_v15 = vperm.slane %v348_v60, 2  ;;  %v15572_v16 = vperm.slane %v348_v60, 3  ;;  %v15574_v17 = vperm.slane %v348_v60, 4  ;;  %v15578_v18 = vperm.slane %v348_v60, 5  ;;  %s1179_s29 = scalar_lea.vmem [#allocation3], %s9841_s10 }
  0x2c   : > { %400 = vperm.xlu0 %15058, %v357_v3   ;;  %532 = vperm.xlu1 %15053, %v9834_v4   ;;  %16932 = vst [vmem:[#allocation38_spill] sm:$0xff] %v15514_v47  ;;  %v15580_v19 = vperm.slane %v348_v60, 6  ;;  %v15582_v20 = vperm.slane %v348_v60, 7  ;;  %14988 = dma.hbm_to_vmem [thread:$0]  (%p300_p8), %s314_s18, 65536, %s316_s20, [#allocation6]  ;;  %vm1163_vm0 = vcmask 1040384  }
  0x2d   : > { %15055 = vset.pattern.permute.xlu2 %v15357_v0  ;;  %16933 = vst [vmem:[#allocation39_spill] sm:$0xff] %v15516_v48  ;;  %14989 = dma.hbm_to_vmem [thread:$0]  (%p300_p8), %s328_s23, 65536, %s330_s28, [#allocation6 + $0x1]  ;;  %vm1165_vm1 = vcmask 1042434   ;;  %vm1167_vm2 = vcmask 1041408   ;;  %vm1169_vm3 = vcmask 1044484  }
  0x2e   : > { %564 = vperm.xlu2 %15055, %v9834_v4   ;;  %16934 = vst [vmem:[#allocation40_spill] sm:$0xff] %v15518_v49  ;;  %vm1171_vm4 = vcmask 1046534   ;;  %vm1173_vm5 = vcmask 1045508   ;;  %vm1175_vm6 = vcmask 1043456  }
  0x2f   : > { %16935 = vst [vmem:[#allocation41_spill] sm:$0xff] %v15520_v50 }
  0x30   : > { %16936 = vst [vmem:[#allocation42_spill] sm:$0xff] %v15522_v51 }
  0x31   : > { %16937 = vst [vmem:[#allocation43_spill] sm:$0xff] %v15524_v52 }
  0x32   : > { %16938 = vst [vmem:[#allocation44_spill] sm:$0xff] %v15526_v57 }
  0x33   : > { %16939 = vst [vmem:[#allocation45_spill] sm:$0xff] %v15531_v61 }
  0x34   : > { %781 = vperm.xlu0 %15058, %v9837_v6   ;;  %611 = vperm.xlu1 %15053, %v9835_v2   ;;  %16940 = vst [vmem:[#allocation46_spill] sm:$0xff] %v15533_v62 }
  0x35   : > { %16941 = vst [vmem:[#allocation47_spill] sm:$0xff] %v15535_v63 }
  0x36   : > { %15056 = vset.pattern.permute.xlu2 %v15358_v1  ;;  %16946 = vst [vmem:[#allocation52_spill] sm:$0xff] %v15572_v16 }
  0x37   : > { %623 = vperm.xlu2 %15056, %v9835_v2   ;;  %16947 = vst [vmem:[#allocation53_spill] sm:$0xff] %v15574_v17 }
  0x38   : > { %16948 = vst [vmem:[#allocation54_spill] sm:$0xff] %v15578_v18 }
  0x39   : > { %16949 = vst [vmem:[#allocation55_spill] sm:$0xff] %v15580_v19 }
  0x3a   : > { %16950 = vst [vmem:[#allocation56_spill] sm:$0xff] %v15582_v20 }
  0x3c   : > { %15061 = vset.pattern.permute.xlu0 %v15359_v5  ;;  %690 = vperm.xlu1 %15053, %v9836_v7  }
  0x3d   : > { %360 = vperm.xlu0 %15061, %v357_v3  }
  0x3f   : > { %702 = vperm.xlu2 %15056, %v9836_v7  }
  0x44   : > { %15059 = vset.pattern.permute.xlu1 %v15357_v0 }
  0x45   : > { %722 = vperm.xlu1 %15059, %v9836_v7   ;;  %927 = vperm.xlu0 %15061, %v9839_v8   ;;  %v15558_v7 = vperm.slane %v371_v53, 0 }
  0x47   : > { %15060 = vset.pattern.permute.xlu2 %v15359_v5  ;;  %16942 = vst [vmem:[#allocation48_spill] sm:$0xff] %v15558_v7 }
  0x48   : > { %769 = vperm.xlu2 %15060, %v9837_v6  }
  0x4d   : > { %801 = vperm.xlu1 %15059, %v9837_v6   ;;  %15066 = vset.pattern.permute.xlu0 %v15357_v0 }
  0x4e   : > { %1038 = vperm.xlu0 %15066, %v9840_v9  }
  0x50   : > { %848 = vperm.xlu2 %15060, %v9838_v10  }
  0x55   : > { %15062 = vset.pattern.permute.xlu1 %v15358_v1 }
  0x56   : > { %860 = vperm.xlu1 %15062, %v9838_v10  }
  0x58   : > { %15063 = vset.pattern.permute.xlu2 %v15357_v0 }
  0x59   : > { %880 = vperm.xlu2 %15063, %v9838_v10   ;;  %v15564_v10 = vperm.slane %v374_v56, 0 }
  0x5b   : > { %16945 = vst [vmem:[#allocation51_spill] sm:$0xff] %v15564_v10 }
  0x5e   : > { %939 = vperm.xlu1 %15062, %v9839_v8  }
  0x61   : > { %959 = vperm.xlu2 %15063, %v9839_v8   ;;  %v15560_v8 = vperm.slane %v372_v54, 0 }
  0x63   : > { %16943 = vst [vmem:[#allocation49_spill] sm:$0xff] %v15560_v8 }
  0x66   : > { %15064 = vset.pattern.permute.xlu1 %v15359_v5 }
  0x67   : > { %1006 = vperm.xlu1 %15064, %v9840_v9  }
  0x69   : > { %15065 = vset.pattern.permute.xlu2 %v15358_v1 }
  0x6a   : > { %1018 = vperm.xlu2 %15065, %v9840_v9   ;;  %v15562_v9 = vperm.slane %v373_v55, 0 }
  0x6c   : > { %16944 = vst [vmem:[#allocation50_spill] sm:$0xff] %v15562_v9 }
  0x7e   : > { %v545_v11 = vpop.permute.xlu2 %544 }
  0x7f   : > { %v15529_v58 = vmul.f32 %v545_v11, %v15492_v24  ;;  %v15538_v0 = vmul.f32 %v545_v11, %v15496_v26  ;;  %v15541_v1 = vmul.f32 %v545_v11, %v15498_v27  ;;  %v15544_v2 = vmul.f32 %v545_v11, %v15500_v28 }
  0x80   : > { %v15547_v3 = vmul.f32 %v545_v11, %v15502_v34  ;;  %v15550_v4 = vmul.f32 %v545_v11, %v15504_v38  ;;  %v15553_v5 = vmul.f32 %v545_v11, %v15506_v39  ;;  %v15556_v6 = vmul.f32 %v545_v11, %v15508_v40 }
  0x88   : > { %v15494_v25 = vpop.permute.xlu2 %564 }
  0x89   : > { %v567_v11 = vmul.f32 %v15494_v25, %v15510_v42  ;;  %v568_v21 = vmul.f32 %v15494_v25, %v15512_v46  ;;  %v569_v22 = vmul.f32 %v15494_v25, %v15514_v47  ;;  %v570_v23 = vmul.f32 %v15494_v25, %v15516_v48 }
  0x8a   : > { %v571_v29 = vmul.f32 %v15494_v25, %v15518_v49  ;;  %v572_v30 = vmul.f32 %v15494_v25, %v15520_v50  ;;  %v573_v31 = vmul.f32 %v15494_v25, %v15522_v51  ;;  %v574_v32 = vmul.f32 %v15494_v25, %v15524_v52 }
  0x91   : > { %v624_v59 = vpop.permute.xlu2 %623 }
  0x92   : > { %v15599_v33 = vmul.f32 %v624_v59, %v15492_v24  ;;  %v15602_v35 = vmul.f32 %v624_v59, %v15496_v26  ;;  %v15605_v36 = vmul.f32 %v624_v59, %v15498_v27  ;;  %v15608_v37 = vmul.f32 %v624_v59, %v15500_v28 }
  0x93   : > { %v15611_v41 = vmul.f32 %v624_v59, %v15502_v34  ;;  %v15617_v25 = vmul.f32 %v624_v59, %v15504_v38  ;;  %v15620_v44 = vmul.f32 %v624_v59, %v15506_v39  ;;  %v15623_v45 = vmul.f32 %v624_v59, %v15508_v40 }
  0x94   : > { %16951 = vst [vmem:[#allocation57_spill] sm:$0xff] %v15605_v36 }
  0x95   : > { %v445_v13 = vpop.permute.xlu1 %444  ;;  %16952 = vst [vmem:[#allocation58_spill] sm:$0xff] %v15608_v37  ;;  %v644_v60 = vpop.permute.xlu0 %643 }
  0x96   : > { %16953 = vst [vmem:[#allocation59_spill] sm:$0xff] %v15611_v41  ;;  %v15614_v43 = vmul.f32 %v15510_v42, %v445_v13  ;;  %v15626_v53 = vmul.f32 %v15512_v46, %v445_v13  ;;  %v15629_v54 = vmul.f32 %v15514_v47, %v445_v13  ;;  %v15632_v55 = vmul.f32 %v15516_v48, %v445_v13 }
  0x97   : > { %16955 = vst [vmem:[#allocation61_spill] sm:$0xff] %v15617_v25  ;;  %v15635_v56 = vmul.f32 %v15518_v49, %v445_v13  ;;  %v15638_v25 = vmul.f32 %v15520_v50, %v445_v13  ;;  %v15641_v59 = vmul.f32 %v15522_v51, %v445_v13 }
  0x98   : > { %16954 = vst [vmem:[#allocation60_spill] sm:$0xff] %v15614_v43 }
  0x99   : > { %16956 = vst [vmem:[#allocation62_spill] sm:$0xff] %v15620_v44  ;;  %v703_v43 = vpop.permute.xlu2 %702 }
  0x9a   : > { %16957 = vst [vmem:[#allocation63_spill] sm:$0xff] %v15623_v45  ;;  %v15644_v45 = vmul.f32 %v15524_v52, %v445_v13  ;;  %v15665_v13 = vmul.f32 %v644_v60, %v15522_v51 }
  0x9b   : > { %16958 = vst [vmem:[#allocation64_spill] sm:$0xff] %v15626_v53  ;;  %v15647_v53 = vmul.f32 %v644_v60, %v15510_v42  ;;  %v15668_v42 = vmul.f32 %v644_v60, %v15524_v52 }
  0x9c   : > { %16959 = vst [vmem:[#allocation65_spill] sm:$0xff] %v15629_v54  ;;  %v15650_v54 = vmul.f32 %v644_v60, %v15512_v46 }
  0x9d   : > { %16960 = vst [vmem:[#allocation66_spill] sm:$0xff] %v15632_v55  ;;  %v15653_v55 = vmul.f32 %v644_v60, %v15514_v47 }
  0x9e   : > { %16961 = vst [vmem:[#allocation67_spill] sm:$0xff] %v15635_v56  ;;  %v15656_v56 = vmul.f32 %v644_v60, %v15516_v48  ;;  %v533_v46 = vpop.permute.xlu1 %532 }
  0x9f   : > { %16962 = vst [vmem:[#allocation68_spill] sm:$0xff] %v15638_v25  ;;  %v15659_v25 = vmul.f32 %v644_v60, %v15518_v49  ;;  %v535_v47 = vmul.f32 %v533_v46, %v15526_v57  ;;  %v536_v48 = vmul.f32 %v533_v46, %v15531_v61  ;;  %v537_v49 = vmul.f32 %v533_v46, %v15533_v62 }
  0xa0   : > { %16963 = vst [vmem:[#allocation69_spill] sm:$0xff] %v15641_v59  ;;  %v15662_v59 = vmul.f32 %v644_v60, %v15520_v50  ;;  %v539_v50 = vmul.f32 %v533_v46, %v15558_v7  ;;  %v540_v51 = vmul.f32 %v533_v46, %v15560_v8  ;;  %v542_v60 = vmul.f32 %v533_v46, %v15564_v10 }
  0xa1   : > { %16964 = vst [vmem:[#allocation70_spill] sm:$0xff] %v15644_v45  ;;  %v15671_v45 = vmul.f32 %v703_v43, %v15492_v24  ;;  %v555_v52 = vadd.f32 %v15529_v58, %v535_v47 }
  0xa2   : > { %16965 = vst [vmem:[#allocation71_spill] sm:$0xff] %v15647_v53  ;;  %v562_v53 = vadd.f32 %v15556_v6, %v542_v60  ;;  %v15723_v6 = vmul.f32 %v703_v43, %v15502_v34 }
  0xa3   : > { %16966 = vst [vmem:[#allocation72_spill] sm:$0xff] %v15650_v54  ;;  %v575_v44 = vadd.f32 %v567_v11, %v555_v52 }
  0xa4   : > { %16967 = vst [vmem:[#allocation73_spill] sm:$0xff] %v15653_v55  ;;  %v560_v55 = vadd.f32 %v15550_v4, %v540_v51  ;;  %v582_v58 = vadd.f32 %v574_v32, %v562_v53  ;;  %v15717_v4 = vmul.f32 %v703_v43, %v15498_v27 }
  0xa5   : > { %16968 = vst [vmem:[#allocation74_spill] sm:$0xff] %v15656_v56  ;;  %v559_v56 = vadd.f32 %v15547_v3, %v539_v50  ;;  %v15714_v3 = vmul.f32 %v703_v43, %v15496_v26 }
  0xa6   : > { %16969 = vst [vmem:[#allocation75_spill] sm:$0xff] %v15659_v25  ;;  %v538_v25 = vmul.f32 %v533_v46, %v15535_v63  ;;  %v580_v47 = vadd.f32 %v572_v30, %v560_v55  ;;  %v612_v30 = vpop.permute.xlu1 %611 }
  0xa7   : > { %16970 = vst [vmem:[#allocation76_spill] sm:$0xff] %v15662_v59  ;;  %v579_v36 = vadd.f32 %v571_v29, %v559_v56  ;;  %v15739_v29 = vmul.f32 %v703_v43, %v15508_v40  ;;  %v615_v53 = vmul.f32 %v612_v30, %v15531_v61  ;;  %v617_v55 = vmul.f32 %v612_v30, %v15535_v63 }
  0xa8   : > { %16971 = vst [vmem:[#allocation77_spill] sm:$0xff] %v15665_v13  ;;  %v541_v13 = vmul.f32 %v533_v46, %v15562_v9  ;;  %v558_v59 = vadd.f32 %v15544_v2, %v538_v25  ;;  %v15705_v52 = vadd.f32 %v580_v47, %v15578_v18  ;;  %v15711_v2 = vadd.f32 %v582_v58, %v15582_v20  ;;  %v16979_v25 = vld [vmem:[#allocation58_spill] sm:$0xff] }
  0xa9   : > { %16972 = vst [vmem:[#allocation78_spill] sm:$0xff] %v15668_v42  ;;  %v557_v42 = vadd.f32 %v15541_v1, %v537_v49  ;;  %v15690_v49 = vadd.f32 %v575_v44, %v15566_v12  ;;  %v618_v56 = vmul.f32 %v612_v30, %v15558_v7  ;;  %v621_v60 = vmul.f32 %v612_v30, %v15564_v10 }
  0xaa   : > { %16973 = vst [vmem:[#allocation79_spill] sm:$0xff] %v15671_v45  ;;  %v556_v45 = vadd.f32 %v15538_v0, %v536_v48  ;;  %v561_v54 = vadd.f32 %v15553_v5, %v541_v13  ;;  %v578_v46 = vadd.f32 %v570_v23, %v558_v59  ;;  %v15720_v5 = vmul.f32 %v703_v43, %v15500_v28 }
  0xab   : > { %v577_v37 = vadd.f32 %v569_v22, %v557_v42  ;;  %v15702_v42 = vadd.f32 %v579_v36, %v15574_v17  ;;  %16975 = vst [vmem:[#allocation81_spill] sm:$0xff] %v15705_v52  ;;  %v15733_v22 = vmul.f32 %v703_v43, %v15504_v38  ;;  %v15736_v23 = vmul.f32 %v703_v43, %v15506_v39  ;;  %v16981_v36 = vld [vmem:[#allocation61_spill] sm:$0xff] }
  0xac   : > { %v576_v41 = vadd.f32 %v568_v21, %v556_v45  ;;  %v581_v48 = vadd.f32 %v573_v31, %v561_v54  ;;  %v15699_v0 = vadd.f32 %v578_v46, %v15572_v16  ;;  %16977 = vst [vmem:[#allocation83_spill] sm:$0xff] %v15711_v2  ;;  %v15730_v21 = vpop.permute.xlu0 %400  ;;  %v614_v45 = vmul.f32 %v612_v30, %v15526_v57  ;;  %v16982_v31 = vld [vmem:[#allocation62_spill] sm:$0xff]  ;;  %v16983_v2 = vld [vmem:[#allocation63_spill] sm:$0xff] }
  0xad   : > { %v15696_v51 = vadd.f32 %v577_v37, %v15570_v15  ;;  %16974 = vst [vmem:[#allocation80_spill] sm:$0xff] %v15702_v42  ;;  %v15753_v44 = vmul.f32 %v15492_v24, %v15730_v21  ;;  %v616_v54 = vmul.f32 %v612_v30, %v15533_v62  ;;  %v619_v59 = vmul.f32 %v612_v30, %v15560_v8 }
  0xae   : > { %v15693_v50 = vadd.f32 %v576_v41, %v15568_v14  ;;  %v15708_v1 = vadd.f32 %v581_v48, %v15580_v19  ;;  %v620_v13 = vmul.f32 %v612_v30, %v15562_v9  ;;  %v634_v46 = vadd.f32 %v15599_v33, %v614_v45  ;;  %v16978_v48 = vld [vmem:[#allocation57_spill] sm:$0xff]  ;;  %v16980_v41 = vld [vmem:[#allocation59_spill] sm:$0xff]  ;;  %v16985_v33 = vld [vmem:[#allocation72_spill] sm:$0xff] }
  0xaf   : > { %v635_v47 = vadd.f32 %v15602_v35, %v615_v53  ;;  %v636_v58 = vadd.f32 %v16978_v48, %v616_v54  ;;  %v637_v43 = vadd.f32 %v16979_v25, %v617_v55  ;;  %v638_v37 = vadd.f32 %v16980_v41, %v618_v56  ;;  %v16986_v35 = vld [vmem:[#allocation73_spill] sm:$0xff]  ;;  %v16987_v54 = vld [vmem:[#allocation74_spill] sm:$0xff]  ;;  %v16988_v25 = vld [vmem:[#allocation75_spill] sm:$0xff] }
  0xb0   : > { %16976 = vst [vmem:[#allocation82_spill] sm:$0xff] %v15708_v1  ;;  %v639_v32 = vadd.f32 %v16981_v36, %v619_v59  ;;  %v640_v11 = vadd.f32 %v16982_v31, %v620_v13  ;;  %v641_v30 = vadd.f32 %v16983_v2, %v621_v60  ;;  %v16984_v1 = vld [vmem:[#allocation71_spill] sm:$0xff]  ;;  %v16989_v42 = vld [vmem:[#allocation76_spill] sm:$0xff]  ;;  %v16990_v56 = vld [vmem:[#allocation77_spill] sm:$0xff] }
  0xb1   : > { %v654_v52 = vadd.f32 %v16984_v1, %v634_v46  ;;  %v655_v45 = vadd.f32 %v16985_v33, %v635_v47  ;;  %v656_v53 = vadd.f32 %v16986_v35, %v636_v58  ;;  %v657_v48 = vadd.f32 %v16987_v54, %v637_v43  ;;  %v16991_v59 = vld [vmem:[#allocation78_spill] sm:$0xff] }
  0xb2   : > { %v658_v55 = vadd.f32 %v16988_v25, %v638_v37  ;;  %v659_v41 = vadd.f32 %v16989_v42, %v639_v32  ;;  %v660_v36 = vadd.f32 %v16990_v56, %v640_v11  ;;  %v661_v31 = vadd.f32 %v16991_v59, %v641_v30 }
  0xb3   : > { %v15785_v2 = vadd.f32 %v654_v52, %v15566_v12  ;;  %v15788_v13 = vadd.f32 %v655_v45, %v15568_v14  ;;  %v15791_v1 = vadd.f32 %v656_v53, %v15570_v15  ;;  %v15794_v60 = vadd.f32 %v657_v48, %v15572_v16  ;;  %v691_v53 = vpop.permute.xlu1 %690 }
  0xb4   : > { %v15797_v37 = vadd.f32 %v658_v55, %v15574_v17  ;;  %v15800_v42 = vadd.f32 %v659_v41, %v15578_v18  ;;  %v15803_v11 = vadd.f32 %v660_v36, %v15580_v19  ;;  %v15806_v52 = vadd.f32 %v661_v31, %v15582_v20  ;;  %v782_v32 = vpop.permute.xlu0 %781 }
  0xb5   : > { %16992 = vst [vmem:[#allocation57_spill] sm:$0xff] %v15785_v2  ;;  %v428_v43 = vmul.f32 %v15496_v26, %v15730_v21  ;;  %v429_v46 = vmul.f32 %v15498_v27, %v15730_v21  ;;  %v430_v47 = vmul.f32 %v15500_v28, %v15730_v21  ;;  %v431_v58 = vmul.f32 %v15502_v34, %v15730_v21  ;;  %v17012_v2 = vld [vmem:[#allocation65_spill] sm:$0xff] }
  0xb6   : > { %16993 = vst [vmem:[#allocation58_spill] sm:$0xff] %v15788_v13  ;;  %v432_v30 = vmul.f32 %v15504_v38, %v15730_v21  ;;  %v433_v33 = vmul.f32 %v15506_v39, %v15730_v21  ;;  %v434_v45 = vmul.f32 %v15508_v40, %v15730_v21  ;;  %v784_v59 = vmul.f32 %v782_v32, %v15492_v24 }
  0xb7   : > { %16994 = vst [vmem:[#allocation59_spill] sm:$0xff] %v15791_v1  ;;  %v693_v21 = vmul.f32 %v691_v53, %v15526_v57  ;;  %v694_v31 = vmul.f32 %v691_v53, %v15531_v61  ;;  %v695_v54 = vmul.f32 %v691_v53, %v15533_v62  ;;  %v696_v48 = vmul.f32 %v691_v53, %v15535_v63 }
  0xb8   : > { %16995 = vst [vmem:[#allocation61_spill] sm:$0xff] %v15794_v60  ;;  %v697_v25 = vmul.f32 %v691_v53, %v15558_v7  ;;  %v698_v55 = vmul.f32 %v691_v53, %v15560_v8  ;;  %v699_v41 = vmul.f32 %v691_v53, %v15562_v9  ;;  %v700_v56 = vmul.f32 %v691_v53, %v15564_v10 }
  0xb9   : > { %16996 = vst [vmem:[#allocation62_spill] sm:$0xff] %v15797_v37  ;;  %v15840_v36 = vmul.f32 %v782_v32, %v15496_v26  ;;  %v15843_v35 = vmul.f32 %v782_v32, %v15498_v27  ;;  %v15846_v24 = vmul.f32 %v782_v32, %v15500_v28  ;;  %v15858_v53 = vmul.f32 %v782_v32, %v15508_v40  ;;  %v17000_v26 = vld [vmem:[#allocation79_spill] sm:$0xff]  ;;  %v770_v27 = vpop.permute.xlu2 %769 }
  0xba   : > { %16997 = vst [vmem:[#allocation63_spill] sm:$0xff] %v15800_v42  ;;  %v15855_v42 = vmul.f32 %v782_v32, %v15506_v39  ;;  %v15861_v37 = vadd.f32 %v17000_v26, %v693_v21  ;;  %v15864_v60 = vadd.f32 %v15714_v3, %v694_v31  ;;  %v15867_v28 = vadd.f32 %v15717_v4, %v695_v54 }
  0xbb   : > { %16998 = vst [vmem:[#allocation71_spill] sm:$0xff] %v15803_v11  ;;  %v15852_v11 = vmul.f32 %v782_v32, %v15504_v38  ;;  %v772_v38 = vmul.f32 %v770_v27, %v15526_v57  ;;  %v15874_v39 = vadd.f32 %v15723_v6, %v697_v25  ;;  %v15880_v26 = vadd.f32 %v15736_v23, %v699_v41 }
  0xbc   : > { %16999 = vst [vmem:[#allocation72_spill] sm:$0xff] %v15806_v52  ;;  %v15849_v52 = vmul.f32 %v782_v32, %v15502_v34  ;;  %v15870_v34 = vadd.f32 %v15720_v5, %v696_v48  ;;  %v15877_v32 = vadd.f32 %v15733_v22, %v698_v55  ;;  %v15883_v3 = vadd.f32 %v15739_v29, %v700_v56  ;;  %v361_v21 = vpop.permute.xlu0 %360 }
  0xbd   : > { %17001 = vst [vmem:[#allocation73_spill] sm:$0xff] %v15861_v37  ;;  %v773_v4 = vmul.f32 %v770_v27, %v15531_v61  ;;  %v774_v5 = vmul.f32 %v770_v27, %v15533_v62  ;;  %v775_v54 = vmul.f32 %v770_v27, %v15535_v63  ;;  %v776_v48 = vmul.f32 %v770_v27, %v15558_v7 }
  0xbe   : > { %17002 = vst [vmem:[#allocation74_spill] sm:$0xff] %v15864_v60  ;;  %v777_v6 = vmul.f32 %v770_v27, %v15560_v8  ;;  %v778_v22 = vmul.f32 %v770_v27, %v15562_v9  ;;  %v779_v25 = vmul.f32 %v770_v27, %v15564_v10  ;;  %v15892_v23 = vadd.f32 %v784_v59, %v772_v38  ;;  %v17011_v60 = vld [vmem:[#allocation64_spill] sm:$0xff] }
  0xbf   : > { %17003 = vst [vmem:[#allocation75_spill] sm:$0xff] %v15867_v28  ;;  %v391_v29 = vmul.f32 %v15526_v57, %v361_v21  ;;  %v392_v55 = vmul.f32 %v15531_v61, %v361_v21  ;;  %v393_v41 = vmul.f32 %v15533_v62, %v361_v21  ;;  %v394_v56 = vmul.f32 %v15535_v63, %v361_v21 }
  0xc0   : > { %17004 = vst [vmem:[#allocation76_spill] sm:$0xff] %v15870_v34  ;;  %v395_v31 = vmul.f32 %v15558_v7, %v361_v21  ;;  %v396_v40 = vmul.f32 %v15560_v8, %v361_v21  ;;  %v397_v1 = vmul.f32 %v15562_v9, %v361_v21  ;;  %v398_v13 = vmul.f32 %v15564_v10, %v361_v21  ;;  %v17010_v34 = vld [vmem:[#allocation60_spill] sm:$0xff]  ;;  %v17013_v8 = vld [vmem:[#allocation66_spill] sm:$0xff]  ;;  %v17014_v9 = vld [vmem:[#allocation67_spill] sm:$0xff] }
  0xc1   : > { %17005 = vst [vmem:[#allocation77_spill] sm:$0xff] %v15874_v39  ;;  %v435_v27 = vadd.f32 %v15753_v44, %v391_v29  ;;  %v436_v38 = vadd.f32 %v428_v43, %v392_v55  ;;  %v437_v59 = vadd.f32 %v429_v46, %v393_v41  ;;  %v17015_v21 = vld [vmem:[#allocation68_spill] sm:$0xff]  ;;  %v17016_v44 = vld [vmem:[#allocation69_spill] sm:$0xff]  ;;  %v17017_v46 = vld [vmem:[#allocation70_spill] sm:$0xff]  ;;  %v15920_v55 = vadd.f32 %v15840_v36, %v773_v4 }
  0xc2   : > { %17006 = vst [vmem:[#allocation78_spill] sm:$0xff] %v15877_v32  ;;  %v441_v32 = vadd.f32 %v433_v33, %v397_v1  ;;  %v442_v39 = vadd.f32 %v434_v45, %v398_v13  ;;  %v15923_v41 = vadd.f32 %v15843_v35, %v774_v5  ;;  %v17018_v36 = vmax.f32 %v15690_v49, 0.0  ;;  %v17028_v49 = vld [vmem:[#allocation83_spill] sm:$0xff] }
  0xc3   : > { %17007 = vst [vmem:[#allocation79_spill] sm:$0xff] %v15880_v26  ;;  %v440_v26 = vadd.f32 %v432_v30, %v396_v40  ;;  %v479_v28 = vadd.f32 %v17010_v34, %v435_v27  ;;  %v480_v37 = vadd.f32 %v17011_v60, %v436_v38  ;;  %v481_v7 = vadd.f32 %v17012_v2, %v437_v59  ;;  %v849_v27 = vpop.permute.xlu2 %848 }
  0xc4   : > { %17008 = vst [vmem:[#allocation84_spill] sm:$0xff] %v15883_v3  ;;  %v439_v3 = vadd.f32 %v431_v58, %v395_v31  ;;  %v485_v43 = vadd.f32 %v17016_v44, %v441_v32  ;;  %v15929_v31 = vadd.f32 %v15849_v52, %v776_v48  ;;  %v15932_v38 = vadd.f32 %v15852_v11, %v777_v6  ;;  %v17022_v11 = vld [vmem:[#allocation80_spill] sm:$0xff] }
  0xc5   : > { %17009 = vst [vmem:[#allocation85_spill] sm:$0xff] %v15892_v23  ;;  %v438_v23 = vadd.f32 %v430_v47, %v394_v56  ;;  %v484_v10 = vadd.f32 %v17015_v21, %v440_v26  ;;  %v486_v47 = vadd.f32 %v17017_v46, %v442_v39  ;;  %v504_v40 = vadd.f32 %v15566_v12, %v479_v28 }
  0xc6   : > { %v483_v62 = vadd.f32 %v17014_v9, %v439_v3  ;;  %v505_v13 = vadd.f32 %v15568_v14, %v480_v37  ;;  %v506_v34 = vadd.f32 %v15570_v15, %v481_v7  ;;  %v510_v9 = vadd.f32 %v15580_v19, %v485_v43 }
  0xc7   : > { %v482_v63 = vadd.f32 %v17013_v8, %v438_v23  ;;  %v509_v8 = vadd.f32 %v15578_v18, %v484_v10  ;;  %v511_v60 = vadd.f32 %v15582_v20, %v486_v47  ;;  %v512_v58 = vmax.f32 %v504_v40, 0.0 }
  0xc8   : > { %v508_v2 = vadd.f32 %v15574_v17, %v483_v62  ;;  %v513_v30 = vmax.f32 %v505_v13, 0.0  ;;  %v514_v33 = vmax.f32 %v506_v34, 0.0  ;;  %v518_v32 = vmax.f32 %v510_v9, 0.0 }
  0xc9   : > { %v507_v1 = vadd.f32 %v15572_v16, %v482_v63  ;;  %v517_v28 = vmax.f32 %v509_v8, 0.0  ;;  %v519_v37 = vmax.f32 %v511_v60, 0.0  ;;  %v520_v26 = vmax.f32 %v512_v58, 0.0  ;;  %v17032_v8 = vld [vmem:[#allocation48_spill] sm:$0xff]  ;;  %v17034_v60 = vld [vmem:[#allocation49_spill] sm:$0xff] }
  0xca   : > { %v516_v45 = vmax.f32 %v508_v2, 0.0  ;;  %v521_v7 = vmax.f32 %v513_v30, 0.0  ;;  %v522_v3 = vmax.f32 %v514_v33, 0.0  ;;  %v526_v29 = vmax.f32 %v518_v32, 0.0  ;;  %v17036_v30 = vld [vmem:[#allocation50_spill] sm:$0xff] }
  0xcb   : > { %v515_v39 = vmax.f32 %v507_v1, 0.0  ;;  %v525_v62 = vmax.f32 %v517_v28, 0.0  ;;  %v527_v10 = vmax.f32 %v519_v37, 0.0  ;;  %v15926_v56 = vadd.f32 %v15846_v24, %v775_v54  ;;  %v17031_v1 = vld [vmem:[#allocation47_spill] sm:$0xff]  ;;  %v17040_v28 = vld [vmem:[#allocation57_spill] sm:$0xff] }
  0xcc   : > { %v524_v23 = vmax.f32 %v516_v45, 0.0  ;;  %v15935_v59 = vadd.f32 %v15855_v42, %v778_v22  ;;  %v15938_v21 = vadd.f32 %v15858_v53, %v779_v25  ;;  %v599_v35 = vmax.f32 %v520_v26, %v17018_v36  ;;  %v17024_v42 = vld [vmem:[#allocation81_spill] sm:$0xff]  ;;  %v17026_v53 = vld [vmem:[#allocation82_spill] sm:$0xff]  ;;  %v17042_v26 = vld [vmem:[#allocation36_spill] sm:$0xff] }
  0xcd   : > { %v523_v63 = vmax.f32 %v515_v39, 0.0  ;;  %v17019_v4 = vmax.f32 %v15693_v50, 0.0  ;;  %v17020_v5 = vmax.f32 %v15696_v51, 0.0  ;;  %v17021_v54 = vmax.f32 %v15699_v0, 0.0  ;;  %v723_v51 = vpop.permute.xlu1 %722  ;;  %v17030_v0 = vld [vmem:[#allocation46_spill] sm:$0xff]  ;;  %v17038_v39 = vld [vmem:[#allocation51_spill] sm:$0xff] }
  0xce   : > { %v17023_v6 = vmax.f32 %v17022_v11, 0.0  ;;  %v17025_v22 = vmax.f32 %v17024_v42, 0.0  ;;  %v17027_v25 = vmax.f32 %v17026_v53, 0.0  ;;  %v17029_v47 = vmax.f32 %v17028_v49, 0.0  ;;  %v17046_v36 = vld [vmem:[#allocation40_spill] sm:$0xff]  ;;  %v17048_v11 = vld [vmem:[#allocation42_spill] sm:$0xff] }
  0xcf   : > { %v600_v24 = vmax.f32 %v521_v7, %v17019_v4  ;;  %v601_v52 = vmax.f32 %v522_v3, %v17020_v5  ;;  %v602_v48 = vmax.f32 %v523_v63, %v17021_v54  ;;  %v15957_v50 = vmul.f32 %v849_v27, %v15526_v57  ;;  %v17043_v3 = vld [vmem:[#allocation37_spill] sm:$0xff]  ;;  %v17049_v42 = vld [vmem:[#allocation43_spill] sm:$0xff] }
  0xd0   : > { %v603_v44 = vmax.f32 %v524_v23, %v17023_v6  ;;  %v604_v43 = vmax.f32 %v525_v62, %v17025_v22  ;;  %v605_v46 = vmax.f32 %v526_v29, %v17027_v25  ;;  %v606_v40 = vmax.f32 %v527_v10, %v17029_v47  ;;  %v17044_v23 = vld [vmem:[#allocation38_spill] sm:$0xff]  ;;  %v17045_v29 = vld [vmem:[#allocation39_spill] sm:$0xff]  ;;  %v17047_v5 = vld [vmem:[#allocation41_spill] sm:$0xff] }
  0xd1   : > { %v15960_v13 = vmul.f32 %v849_v27, %v15531_v61  ;;  %v15963_v34 = vmul.f32 %v849_v27, %v17030_v0  ;;  %v15966_v2 = vmul.f32 %v849_v27, %v17031_v1  ;;  %v15969_v9 = vmul.f32 %v849_v27, %v17032_v8  ;;  %v17050_v22 = vld [vmem:[#allocation73_spill] sm:$0xff]  ;;  %v17051_v25 = vld [vmem:[#allocation74_spill] sm:$0xff]  ;;  %v17052_v49 = vld [vmem:[#allocation75_spill] sm:$0xff] }
  0xd2   : > { %v15972_v58 = vmul.f32 %v849_v27, %v17034_v60  ;;  %v15975_v33 = vmul.f32 %v849_v27, %v17036_v30  ;;  %v15978_v45 = vmul.f32 %v849_v27, %v17038_v39  ;;  %v17041_v32 = vmax.f32 %v17040_v28, 0.0  ;;  %v17053_v28 = vld [vmem:[#allocation76_spill] sm:$0xff]  ;;  %v17054_v39 = vld [vmem:[#allocation77_spill] sm:$0xff]  ;;  %v17055_v60 = vld [vmem:[#allocation78_spill] sm:$0xff] }
  0xd3   : > { %17033 = vst [vmem:[#allocation60_spill] sm:$0xff] %v15969_v9  ;;  %v725_v7 = vmul.f32 %v723_v51, %v17042_v26  ;;  %v726_v63 = vmul.f32 %v723_v51, %v17043_v3  ;;  %v727_v62 = vmul.f32 %v723_v51, %v17044_v23  ;;  %v728_v10 = vmul.f32 %v723_v51, %v17045_v29  ;;  %v17056_v1 = vld [vmem:[#allocation79_spill] sm:$0xff]  ;;  %v17057_v61 = vld [vmem:[#allocation84_spill] sm:$0xff] }
  0xd4   : > { %17035 = vst [vmem:[#allocation64_spill] sm:$0xff] %v15972_v58  ;;  %v678_v37 = vmax.f32 %v599_v35, %v17041_v32  ;;  %v729_v4 = vmul.f32 %v723_v51, %v17046_v36  ;;  %v730_v54 = vmul.f32 %v723_v51, %v17047_v5  ;;  %v731_v6 = vmul.f32 %v723_v51, %v17048_v11 }
  0xd5   : > { %17037 = vst [vmem:[#allocation65_spill] sm:$0xff] %v15975_v33  ;;  %v732_v27 = vmul.f32 %v723_v51, %v17049_v42  ;;  %v733_v53 = vadd.f32 %v725_v7, %v17050_v22  ;;  %v734_v35 = vadd.f32 %v726_v63, %v17051_v25  ;;  %v735_v47 = vadd.f32 %v727_v62, %v17052_v49  ;;  %v17062_v22 = vld [vmem:[#allocation61_spill] sm:$0xff]  ;;  %v17064_v49 = vld [vmem:[#allocation62_spill] sm:$0xff]  ;;  %v17068_v33 = vld [vmem:[#allocation71_spill] sm:$0xff] }
  0xd6   : > { %17039 = vst [vmem:[#allocation66_spill] sm:$0xff] %v15978_v45  ;;  %v736_v32 = vadd.f32 %v728_v10, %v17053_v28  ;;  %v737_v30 = vadd.f32 %v729_v4, %v17054_v39  ;;  %v738_v8 = vadd.f32 %v730_v54, %v17055_v60  ;;  %v739_v0 = vadd.f32 %v731_v6, %v17056_v1  ;;  %v17058_v4 = vld [vmem:[#allocation58_spill] sm:$0xff] }
  0xd7   : > { %v740_v57 = vadd.f32 %v732_v27, %v17057_v61  ;;  %v741_v45 = vadd.f32 %v733_v53, %v15566_v12  ;;  %v742_v51 = vadd.f32 %v734_v35, %v15568_v14  ;;  %v743_v7 = vadd.f32 %v735_v47, %v15570_v15  ;;  %v17060_v61 = vld [vmem:[#allocation59_spill] sm:$0xff] }
  0xd8   : > { %v744_v63 = vadd.f32 %v736_v32, %v15572_v16  ;;  %v745_v62 = vadd.f32 %v737_v30, %v15574_v17  ;;  %v746_v10 = vadd.f32 %v738_v8, %v15578_v18  ;;  %v747_v39 = vadd.f32 %v739_v0, %v15580_v19  ;;  %v17066_v30 = vld [vmem:[#allocation63_spill] sm:$0xff] }
  0xd9   : > { %v748_v60 = vadd.f32 %v740_v57, %v15582_v20  ;;  %v17059_v1 = vmax.f32 %v17058_v4, 0.0  ;;  %v17061_v6 = vmax.f32 %v17060_v61, 0.0  ;;  %v17063_v53 = vmax.f32 %v17062_v22, 0.0  ;;  %v17070_v57 = vld [vmem:[#allocation72_spill] sm:$0xff] }
  0xda   : > { %v749_v35 = vmax.f32 %v741_v45, 0.0  ;;  %v17065_v47 = vmax.f32 %v17064_v49, 0.0  ;;  %v17067_v32 = vmax.f32 %v17066_v30, 0.0  ;;  %v17069_v0 = vmax.f32 %v17068_v33, 0.0  ;;  %v881_v33 = vpop.permute.xlu2 %880 }
  0xdb   : > { %v679_v54 = vmax.f32 %v600_v24, %v17059_v1  ;;  %v680_v27 = vmax.f32 %v601_v52, %v17061_v6  ;;  %v681_v25 = vmax.f32 %v602_v48, %v17063_v53  ;;  %v17071_v9 = vmax.f32 %v17070_v57, 0.0  ;;  %v802_v24 = vpop.permute.xlu1 %801 }
  0xdc   : > { %v682_v28 = vmax.f32 %v603_v44, %v17065_v47  ;;  %v683_v8 = vmax.f32 %v604_v43, %v17067_v32  ;;  %v684_v58 = vmax.f32 %v605_v46, %v17069_v0  ;;  %v750_v1 = vmax.f32 %v742_v51, 0.0 }
  0xdd   : > { %v685_v4 = vmax.f32 %v606_v40, %v17071_v9  ;;  %v751_v61 = vmax.f32 %v743_v7, 0.0  ;;  %v752_v52 = vmax.f32 %v744_v63, 0.0  ;;  %v753_v6 = vmax.f32 %v745_v62, 0.0  ;;  %v17072_v63 = vld [vmem:[#allocation85_spill] sm:$0xff] }
  0xde   : > { %v754_v22 = vmax.f32 %v746_v10, 0.0  ;;  %v755_v48 = vmax.f32 %v747_v39, 0.0  ;;  %v756_v45 = vmax.f32 %v748_v60, 0.0  ;;  %v757_v53 = vmax.f32 %v678_v37, %v749_v35 }
  0xdf   : > { %v804_v44 = vmul.f32 %v802_v24, %v17042_v26  ;;  %v805_v49 = vmul.f32 %v802_v24, %v17043_v3  ;;  %v806_v43 = vmul.f32 %v802_v24, %v17044_v23  ;;  %v807_v46 = vmul.f32 %v802_v24, %v17045_v29 }
  0xe0   : > { %v808_v40 = vmul.f32 %v802_v24, %v17046_v36  ;;  %v809_v9 = vmul.f32 %v802_v24, %v17047_v5  ;;  %v810_v51 = vmul.f32 %v802_v24, %v17048_v11  ;;  %v811_v7 = vmul.f32 %v802_v24, %v17049_v42 }
  0xe1   : > { %v812_v62 = vadd.f32 %v804_v44, %v17072_v63  ;;  %v813_v37 = vadd.f32 %v805_v49, %v15920_v55  ;;  %v814_v10 = vadd.f32 %v806_v43, %v15923_v41  ;;  %v815_v39 = vadd.f32 %v807_v46, %v15926_v56 }
  0xe2   : > { %v816_v60 = vadd.f32 %v808_v40, %v15929_v31  ;;  %v817_v35 = vadd.f32 %v809_v9, %v15932_v38  ;;  %v818_v47 = vadd.f32 %v810_v51, %v15935_v59  ;;  %v819_v30 = vadd.f32 %v811_v7, %v15938_v21 }
  0xe3   : > { %v820_v32 = vadd.f32 %v812_v62, %v15566_v12  ;;  %v821_v0 = vadd.f32 %v813_v37, %v15568_v14  ;;  %v822_v57 = vadd.f32 %v814_v10, %v15570_v15  ;;  %v823_v55 = vadd.f32 %v815_v39, %v15572_v16 }
  0xe4   : > { %v824_v41 = vadd.f32 %v816_v60, %v15574_v17  ;;  %v825_v56 = vadd.f32 %v817_v35, %v15578_v18  ;;  %v826_v31 = vadd.f32 %v818_v47, %v15580_v19  ;;  %v827_v38 = vadd.f32 %v819_v30, %v15582_v20 }
  0xe5   : > { %v828_v24 = vmax.f32 %v820_v32, 0.0  ;;  %v829_v59 = vmax.f32 %v821_v0, 0.0  ;;  %v830_v44 = vmax.f32 %v822_v57, 0.0  ;;  %v831_v21 = vmax.f32 %v823_v55, 0.0  ;;  %v960_v32 = vpop.permute.xlu2 %959  ;;  %v17083_v55 = vld [vmem:[#allocation30_spill] sm:$0xff] }
  0xe6   : > { %v832_v49 = vmax.f32 %v824_v41, 0.0  ;;  %v833_v43 = vmax.f32 %v825_v56, 0.0  ;;  %v834_v46 = vmax.f32 %v826_v31, 0.0  ;;  %v835_v40 = vmax.f32 %v827_v38, 0.0  ;;  %v17084_v56 = vld [vmem:[#allocation31_spill] sm:$0xff]  ;;  %v17085_v38 = vld [vmem:[#allocation32_spill] sm:$0xff] }
  0xe7   : > { %v758_v9 = vmax.f32 %v679_v54, %v750_v1  ;;  %v759_v51 = vmax.f32 %v680_v27, %v751_v61  ;;  %v760_v7 = vmax.f32 %v681_v25, %v752_v52  ;;  %v761_v63 = vmax.f32 %v682_v28, %v753_v6  ;;  %v861_v25 = vpop.permute.xlu1 %860 }
  0xe8   : > { %v762_v62 = vmax.f32 %v683_v8, %v754_v22  ;;  %v763_v37 = vmax.f32 %v684_v58, %v755_v48  ;;  %v764_v10 = vmax.f32 %v685_v4, %v756_v45  ;;  %v16044_v39 = vmax.f32 %v757_v53, %v828_v24  ;;  %v17081_v48 = vld [vmem:[#allocation28_spill] sm:$0xff]  ;;  %v17082_v53 = vld [vmem:[#allocation29_spill] sm:$0xff] }
  0xe9   : > { %v16046_v60 = vmax.f32 %v758_v9, %v829_v59  ;;  %v16048_v35 = vmax.f32 %v759_v51, %v830_v44  ;;  %v16050_v47 = vmax.f32 %v760_v7, %v831_v21  ;;  %v16052_v30 = vmax.f32 %v761_v63, %v832_v49  ;;  %v17086_v59 = vld [vmem:[#allocation33_spill] sm:$0xff]  ;;  %v17087_v21 = vld [vmem:[#allocation34_spill] sm:$0xff]  ;;  %v17089_v7 = vld [vmem:[#allocation60_spill] sm:$0xff] }
  0xea   : > { %17073 = vst [vmem:[#allocation67_spill] sm:$0xff] %v16044_v39  ;;  %v16054_v0 = vmax.f32 %v762_v62, %v833_v43  ;;  %v16056_v54 = vmax.f32 %v763_v37, %v834_v46  ;;  %v16058_v27 = vmax.f32 %v764_v10, %v835_v40  ;;  %v883_v58 = vmul.f32 %v881_v33, %v17042_v26  ;;  %v17088_v43 = vld [vmem:[#allocation35_spill] sm:$0xff]  ;;  %v17090_v62 = vld [vmem:[#allocation64_spill] sm:$0xff]  ;;  %v17091_v10 = vld [vmem:[#allocation65_spill] sm:$0xff] }
  0xeb   : > { %17074 = vst [vmem:[#allocation68_spill] sm:$0xff] %v16046_v60  ;;  %v884_v28 = vmul.f32 %v881_v33, %v17043_v3  ;;  %v885_v8 = vmul.f32 %v881_v33, %v17044_v23  ;;  %v886_v4 = vmul.f32 %v881_v33, %v17045_v29  ;;  %v887_v1 = vmul.f32 %v881_v33, %v17046_v36 }
  0xec   : > { %17075 = vst [vmem:[#allocation69_spill] sm:$0xff] %v16048_v35  ;;  %v888_v61 = vmul.f32 %v881_v33, %v17047_v5  ;;  %v889_v52 = vmul.f32 %v881_v33, %v17048_v11  ;;  %v890_v6 = vmul.f32 %v881_v33, %v17049_v42  ;;  %v16069_v22 = vmul.f32 %v960_v32, %v17042_v26 }
  0xed   : > { %17076 = vst [vmem:[#allocation70_spill] sm:$0xff] %v16050_v47  ;;  %v863_v45 = vmul.f32 %v861_v25, %v17081_v48  ;;  %v864_v57 = vmul.f32 %v861_v25, %v17082_v53  ;;  %v865_v41 = vmul.f32 %v861_v25, %v17083_v55  ;;  %v866_v31 = vmul.f32 %v861_v25, %v17084_v56 }
  0xee   : > { %17077 = vst [vmem:[#allocation80_spill] sm:$0xff] %v16052_v30  ;;  %v867_v24 = vmul.f32 %v861_v25, %v17085_v38  ;;  %v868_v44 = vmul.f32 %v861_v25, %v17086_v59  ;;  %v869_v49 = vmul.f32 %v861_v25, %v17087_v21  ;;  %v870_v46 = vmul.f32 %v861_v25, %v17088_v43 }
  0xef   : > { %17078 = vst [vmem:[#allocation81_spill] sm:$0xff] %v16054_v0  ;;  %v871_v33 = vadd.f32 %v863_v45, %v15957_v50  ;;  %v872_v40 = vadd.f32 %v864_v57, %v15960_v13  ;;  %v873_v9 = vadd.f32 %v865_v41, %v15963_v34  ;;  %v874_v51 = vadd.f32 %v866_v31, %v15966_v2 }
  0xf0   : > { %17079 = vst [vmem:[#allocation82_spill] sm:$0xff] %v16056_v54  ;;  %v875_v63 = vadd.f32 %v867_v24, %v17089_v7  ;;  %v876_v37 = vadd.f32 %v868_v44, %v17090_v62  ;;  %v877_v26 = vadd.f32 %v869_v49, %v17091_v10  ;;  %v963_v34 = vmul.f32 %v960_v32, %v17043_v3  ;;  %v17095_v24 = vld [vmem:[#allocation45_spill] sm:$0xff]  ;;  %v17096_v49 = vld [vmem:[#allocation46_spill] sm:$0xff] }
  0xf1   : > { %17080 = vst [vmem:[#allocation83_spill] sm:$0xff] %v16058_v27  ;;  %v17092_v27 = vld [vmem:[#allocation66_spill] sm:$0xff]  ;;  %v891_v0 = vadd.f32 %v883_v58, %v871_v33  ;;  %v892_v30 = vadd.f32 %v884_v28, %v872_v40  ;;  %v893_v47 = vadd.f32 %v885_v8, %v873_v9  ;;  %v894_v25 = vadd.f32 %v886_v4, %v874_v51  ;;  %v928_v8 = vpop.permute.xlu0 %927  ;;  %v17098_v40 = vld [vmem:[#allocation48_spill] sm:$0xff]  ;;  %v17099_v51 = vld [vmem:[#allocation49_spill] sm:$0xff] }
  0xf2   : > { %v878_v54 = vadd.f32 %v870_v46, %v17092_v27  ;;  %v895_v35 = vadd.f32 %v887_v1, %v875_v63  ;;  %v896_v50 = vadd.f32 %v888_v61, %v876_v37  ;;  %v897_v45 = vadd.f32 %v889_v52, %v877_v26  ;;  %v940_v52 = vpop.permute.xlu1 %939  ;;  %v17100_v63 = vld [vmem:[#allocation50_spill] sm:$0xff]  ;;  %v17101_v37 = vld [vmem:[#allocation51_spill] sm:$0xff] }
  0xf3   : > { %v964_v2 = vmul.f32 %v960_v32, %v17044_v23  ;;  %v965_v57 = vmul.f32 %v960_v32, %v17045_v29  ;;  %v16091_v41 = vadd.f32 %v891_v0, %v15566_v12  ;;  %v966_v31 = vmul.f32 %v960_v32, %v17046_v36 }
  0xf4   : > { %v898_v13 = vadd.f32 %v890_v6, %v878_v54  ;;  %v967_v27 = vmul.f32 %v960_v32, %v17047_v5  ;;  %v968_v58 = vmul.f32 %v960_v32, %v17048_v11  ;;  %v969_v28 = vmul.f32 %v960_v32, %v17049_v42 }
  0xf5   : > { %17093 = vst [vmem:[#allocation57_spill] sm:$0xff] %v16091_v41  ;;  %v16098_v26 = vadd.f32 %v892_v30, %v15568_v14  ;;  %v16101_v54 = vadd.f32 %v893_v47, %v15570_v15  ;;  %v16104_v4 = vadd.f32 %v894_v25, %v15572_v16  ;;  %v16107_v0 = vadd.f32 %v895_v35, %v15574_v17  ;;  %v17094_v47 = vld [vmem:[#allocation44_spill] sm:$0xff]  ;;  %v17097_v35 = vld [vmem:[#allocation47_spill] sm:$0xff] }
  0xf6   : > { %v16110_v1 = vadd.f32 %v896_v50, %v15578_v18  ;;  %v16113_v61 = vadd.f32 %v897_v45, %v15580_v19  ;;  %v16116_v32 = vadd.f32 %v898_v13, %v15582_v20  ;;  %v930_v6 = vmul.f32 %v928_v8, %v17094_v47 }
  0xf7   : > { %v931_v44 = vmul.f32 %v928_v8, %v17095_v24  ;;  %v932_v46 = vmul.f32 %v928_v8, %v17096_v49  ;;  %v933_v33 = vmul.f32 %v928_v8, %v17097_v35  ;;  %v934_v9 = vmul.f32 %v928_v8, %v17098_v40 }
  0xf8   : > { %v935_v7 = vmul.f32 %v928_v8, %v17099_v51  ;;  %v936_v62 = vmul.f32 %v928_v8, %v17100_v63  ;;  %v937_v10 = vmul.f32 %v928_v8, %v17101_v37  ;;  %v942_v25 = vmul.f32 %v940_v52, %v17081_v48 }
  0xf9   : > { %v943_v50 = vmul.f32 %v940_v52, %v17082_v53  ;;  %v944_v45 = vmul.f32 %v940_v52, %v17083_v55  ;;  %v945_v13 = vmul.f32 %v940_v52, %v17084_v56  ;;  %v946_v30 = vmul.f32 %v940_v52, %v17085_v38 }
  0xfa   : > { %v947_v42 = vmul.f32 %v940_v52, %v17086_v59  ;;  %v948_v11 = vmul.f32 %v940_v52, %v17087_v21  ;;  %v949_v5 = vmul.f32 %v940_v52, %v17088_v43  ;;  %v950_v36 = vadd.f32 %v942_v25, %v930_v6 }
  0xfb   : > { %v951_v29 = vadd.f32 %v943_v50, %v931_v44  ;;  %v952_v23 = vadd.f32 %v944_v45, %v932_v46  ;;  %v953_v8 = vadd.f32 %v945_v13, %v933_v33  ;;  %v954_v3 = vadd.f32 %v946_v30, %v934_v9  ;;  %v1019_v30 = vpop.permute.xlu2 %1018  ;;  %v1007_v9 = vpop.permute.xlu1 %1006  ;;  %v17110_v50 = vld [vmem:[#allocation68_spill] sm:$0xff]  ;;  %v17111_v13 = vld [vmem:[#allocation69_spill] sm:$0xff] }
  0xfc   : > { %v955_v60 = vadd.f32 %v947_v42, %v935_v7  ;;  %v956_v39 = vadd.f32 %v948_v11, %v936_v62  ;;  %v957_v41 = vadd.f32 %v949_v5, %v937_v10  ;;  %v908_v20 = vmax.f32 %v16098_v26, 0.0  ;;  %v17107_v62 = vld [vmem:[#allocation57_spill] sm:$0xff]  ;;  %v17109_v10 = vld [vmem:[#allocation67_spill] sm:$0xff] }
  0xfd   : > { %v909_v19 = vmax.f32 %v16101_v54, 0.0  ;;  %v910_v18 = vmax.f32 %v16104_v4, 0.0  ;;  %v970_v17 = vadd.f32 %v16069_v22, %v950_v36  ;;  %v911_v16 = vmax.f32 %v16107_v0, 0.0 }
  0xfe   : > { %v912_v52 = vmax.f32 %v16110_v1, 0.0  ;;  %v913_v6 = vmax.f32 %v16113_v61, 0.0  ;;  %v914_v44 = vmax.f32 %v16116_v32, 0.0  ;;  %v971_v42 = vadd.f32 %v963_v34, %v951_v29 }
  0xff   : > { %v972_v11 = vadd.f32 %v964_v2, %v952_v23  ;;  %v973_v5 = vadd.f32 %v965_v57, %v953_v8  ;;  %v974_v46 = vadd.f32 %v966_v31, %v954_v3  ;;  %v975_v26 = vadd.f32 %v967_v27, %v955_v60  ;;  %v17103_v2 = vld [vmem:[#allocation53_spill] sm:$0xff]  ;;  %v17105_v27 = vld [vmem:[#allocation55_spill] sm:$0xff] }
 0x100   : > { %v976_v33 = vadd.f32 %v968_v58, %v956_v39  ;;  %v977_v54 = vadd.f32 %v969_v28, %v957_v41  ;;  %v978_v4 = vadd.f32 %v970_v17, %v15566_v12  ;;  %v1021_v36 = vmul.f32 %v1019_v30, %v17081_v48  ;;  %v17104_v41 = vld [vmem:[#allocation54_spill] sm:$0xff]  ;;  %v17106_v28 = vld [vmem:[#allocation56_spill] sm:$0xff] }
 0x101   : > { %v1022_v22 = vmul.f32 %v1019_v30, %v17082_v53  ;;  %v1023_v0 = vmul.f32 %v1019_v30, %v17083_v55  ;;  %v1024_v1 = vmul.f32 %v1019_v30, %v17084_v56  ;;  %v1025_v61 = vmul.f32 %v1019_v30, %v17085_v38 }
 0x102   : > { %v1026_v23 = vmul.f32 %v1019_v30, %v17086_v59  ;;  %v1027_v3 = vmul.f32 %v1019_v30, %v17087_v21  ;;  %v1028_v29 = vmul.f32 %v1019_v30, %v17088_v43  ;;  %v1009_v39 = vmul.f32 %v1007_v9, %v17094_v47  ;;  %v17102_v43 = vld [vmem:[#allocation52_spill] sm:$0xff]  ;;  %v17112_v30 = vld [vmem:[#allocation70_spill] sm:$0xff] }
 0x103   : > { %v1010_v17 = vmul.f32 %v1007_v9, %v17095_v24  ;;  %v1011_v60 = vmul.f32 %v1007_v9, %v17096_v49  ;;  %v1012_v48 = vmul.f32 %v1007_v9, %v17097_v35  ;;  %v1013_v53 = vmul.f32 %v1007_v9, %v17098_v40 }
 0x104   : > { %v1014_v55 = vmul.f32 %v1007_v9, %v17099_v51  ;;  %v1015_v56 = vmul.f32 %v1007_v9, %v17100_v63  ;;  %v1016_v38 = vmul.f32 %v1007_v9, %v17101_v37  ;;  %v979_v59 = vadd.f32 %v971_v42, %v15568_v14  ;;  %v17116_v9 = vld [vmem:[#allocation83_spill] sm:$0xff] }
 0x105   : > { %v980_v21 = vadd.f32 %v972_v11, %v15570_v15  ;;  %v981_v34 = vadd.f32 %v973_v5, %v17102_v43  ;;  %v982_v57 = vadd.f32 %v974_v46, %v17103_v2  ;;  %v983_v31 = vadd.f32 %v975_v26, %v17104_v41  ;;  %v17113_v11 = vld [vmem:[#allocation80_spill] sm:$0xff]  ;;  %v17114_v46 = vld [vmem:[#allocation81_spill] sm:$0xff] }
 0x106   : > { %v984_v58 = vadd.f32 %v976_v33, %v17105_v27  ;;  %v985_v32 = vadd.f32 %v977_v54, %v17106_v28  ;;  %v1029_v47 = vadd.f32 %v1021_v36, %v1009_v39  ;;  %v1030_v24 = vadd.f32 %v1022_v22, %v1010_v17  ;;  %v17115_v33 = vld [vmem:[#allocation82_spill] sm:$0xff] }
 0x107   : > { %v1031_v49 = vadd.f32 %v1023_v0, %v1011_v60  ;;  %v1032_v35 = vadd.f32 %v1024_v1, %v1012_v48  ;;  %v1033_v40 = vadd.f32 %v1025_v61, %v1013_v53  ;;  %v1034_v51 = vadd.f32 %v1026_v23, %v1014_v55  ;;  %v1039_v0 = vpop.permute.xlu0 %1038 }
 0x108   : > { %v1035_v7 = vadd.f32 %v1027_v3, %v1015_v56  ;;  %v1036_v63 = vadd.f32 %v1028_v29, %v1016_v38  ;;  %v17108_v37 = vmax.f32 %v17107_v62, 0.0  ;;  %v916_v45 = vmax.f32 %v17110_v50, %v908_v20  ;;  %v17119_v56 = vld [vmem:[#allocation38_spill] sm:$0xff] }
 0x109   : > { %v917_v8 = vmax.f32 %v17111_v13, %v909_v19  ;;  %v918_v42 = vmax.f32 %v17112_v30, %v910_v18  ;;  %v919_v5 = vmax.f32 %v17113_v11, %v911_v16  ;;  %v920_v26 = vmax.f32 %v17114_v46, %v912_v52 }
 0x10a   : > { %v915_v25 = vmax.f32 %v17109_v10, %v17108_v37  ;;  %v921_v54 = vmax.f32 %v17115_v33, %v913_v6  ;;  %v922_v36 = vmax.f32 %v17116_v9, %v914_v44  ;;  %v986_v22 = vmax.f32 %v978_v4, 0.0  ;;  %v17117_v6 = vld [vmem:[#allocation36_spill] sm:$0xff]  ;;  %v17118_v44 = vld [vmem:[#allocation37_spill] sm:$0xff]  ;;  %v17124_v37 = vld [vmem:[#allocation43_spill] sm:$0xff] }
 0x10b   : > { %v987_v1 = vmax.f32 %v979_v59, 0.0  ;;  %v988_v61 = vmax.f32 %v980_v21, 0.0  ;;  %v989_v23 = vmax.f32 %v981_v34, 0.0  ;;  %v990_v3 = vmax.f32 %v982_v57, 0.0  ;;  %v17120_v59 = vld [vmem:[#allocation39_spill] sm:$0xff]  ;;  %v17121_v34 = vld [vmem:[#allocation40_spill] sm:$0xff] }
 0x10c   : > { %v991_v29 = vmax.f32 %v983_v31, 0.0  ;;  %v992_v20 = vmax.f32 %v984_v58, 0.0  ;;  %v993_v39 = vmax.f32 %v985_v32, 0.0  ;;  %v994_v19 = vmax.f32 %v915_v25, %v986_v22  ;;  %v17122_v31 = vld [vmem:[#allocation41_spill] sm:$0xff]  ;;  %v17123_v32 = vld [vmem:[#allocation42_spill] sm:$0xff] }
 0x10d   : > { %v995_v17 = vmax.f32 %v916_v45, %v987_v1  ;;  %v996_v18 = vmax.f32 %v917_v8, %v988_v61  ;;  %v997_v60 = vmax.f32 %v918_v42, %v989_v23  ;;  %v998_v16 = vmax.f32 %v919_v5, %v990_v3 }
 0x10e   : > { %v999_v48 = vmax.f32 %v920_v26, %v991_v29  ;;  %v1000_v52 = vmax.f32 %v921_v54, %v992_v20  ;;  %v1001_v53 = vmax.f32 %v922_v36, %v993_v39  ;;  %v1041_v55 = vmul.f32 %v1039_v0, %v17117_v6 }
 0x10f   : > { %v1042_v4 = vmul.f32 %v1039_v0, %v17118_v44  ;;  %v1043_v38 = vmul.f32 %v1039_v0, %v17119_v56  ;;  %v1044_v21 = vmul.f32 %v1039_v0, %v17120_v59  ;;  %v1045_v57 = vmul.f32 %v1039_v0, %v17121_v34 }
 0x110   : > { %v1046_v58 = vmul.f32 %v1039_v0, %v17122_v31  ;;  %v1047_v62 = vmul.f32 %v1039_v0, %v17123_v32  ;;  %v1048_v10 = vmul.f32 %v1039_v0, %v17124_v37  ;;  %v1049_v25 = vadd.f32 %v1041_v55, %v1029_v47 }
 0x111   : > { %v1050_v50 = vadd.f32 %v1042_v4, %v1030_v24  ;;  %v1051_v45 = vadd.f32 %v1043_v38, %v1031_v49  ;;  %v1052_v13 = vadd.f32 %v1044_v21, %v1032_v35  ;;  %v1053_v8 = vadd.f32 %v1045_v57, %v1033_v40 }
 0x112   : > { %v1054_v30 = vadd.f32 %v1046_v58, %v1034_v51  ;;  %v1055_v42 = vadd.f32 %v1047_v62, %v1035_v7  ;;  %v1056_v11 = vadd.f32 %v1048_v10, %v1036_v63  ;;  %v1057_v5 = vadd.f32 %v1049_v25, %v15566_v12 }
 0x113   : > { %v1058_v46 = vadd.f32 %v1050_v50, %v15568_v14  ;;  %v1059_v26 = vadd.f32 %v1051_v45, %v15570_v15  ;;  %v1060_v33 = vadd.f32 %v1052_v13, %v17102_v43  ;;  %v1061_v54 = vadd.f32 %v1053_v8, %v17103_v2 }
 0x114   : > { %v1062_v9 = vadd.f32 %v1054_v30, %v17104_v41  ;;  %v1063_v47 = vadd.f32 %v1055_v42, %v17105_v27  ;;  %v1064_v24 = vadd.f32 %v1056_v11, %v17106_v28  ;;  %v1065_v49 = vmax.f32 %v1057_v5, 0.0 }
 0x115   : > { %v1066_v35 = vmax.f32 %v1058_v46, 0.0  ;;  %v1067_v40 = vmax.f32 %v1059_v26, 0.0  ;;  %v1068_v51 = vmax.f32 %v1060_v33, 0.0  ;;  %v1069_v7 = vmax.f32 %v1061_v54, 0.0 }
 0x116   : > { %v1070_v12 = vmax.f32 %v1062_v9, 0.0  ;;  %v1071_v63 = vmax.f32 %v1063_v47, 0.0  ;;  %v1072_v14 = vmax.f32 %v1064_v24, 0.0  ;;  %v1073_v36 = vmax.f32 %v994_v19, %v1065_v49 }
 0x117   : > { %v1074_v15 = vmax.f32 %v995_v17, %v1066_v35  ;;  %v1075_v22 = vmax.f32 %v996_v18, %v1067_v40  ;;  %v1076_v43 = vmax.f32 %v997_v60, %v1068_v51  ;;  %v1077_v0 = vmax.f32 %v998_v16, %v1069_v7 }
 0x118   : > { %v1078_v2 = vmax.f32 %v999_v48, %v1070_v12  ;;  %v1079_v1 = vmax.f32 %v1000_v52, %v1071_v63  ;;  %v1080_v41 = vmax.f32 %v1001_v53, %v1072_v14  ;;  %v1100_v61 = vrot.slane %v1073_v36, 4 }
 0x119   : > { %v1106_v27 = vrot.slane %v1074_v15, 4  ;;  %v1112_v23 = vrot.slane %v1075_v22, 4  ;;  %v1118_v28 = vrot.slane %v1076_v43, 4  ;;  %v1124_v3 = vrot.slane %v1077_v0, 4 }
 0x11a   : > { %v1101_v29 = vmax.f32 %v1073_v36, %v1100_v61  ;;  %v1130_v20 = vrot.slane %v1078_v2, 4  ;;  %v1136_v39 = vrot.slane %v1079_v1, 4  ;;  %v1142_v6 = vrot.slane %v1080_v41, 4 }
 0x11b   : > { %v1107_v55 = vmax.f32 %v1074_v15, %v1106_v27  ;;  %v1113_v44 = vmax.f32 %v1075_v22, %v1112_v23  ;;  %v1119_v4 = vmax.f32 %v1076_v43, %v1118_v28  ;;  %v1125_v19 = vmax.f32 %v1077_v0, %v1124_v3 }
 0x11c   : > { %v1102_v17 = vrot.slane %v1101_v29, 2  ;;  %v1131_v18 = vmax.f32 %v1078_v2, %v1130_v20  ;;  %v1137_v60 = vmax.f32 %v1079_v1, %v1136_v39  ;;  %v1143_v16 = vmax.f32 %v1080_v41, %v1142_v6 }
 0x11d   : > { %v1108_v48 = vrot.slane %v1107_v55, 2  ;;  %v1114_v52 = vrot.slane %v1113_v44, 2  ;;  %v1120_v53 = vrot.slane %v1119_v4, 2  ;;  %v1126_v56 = vrot.slane %v1125_v19, 2 }
 0x11e   : > { %v1103_v38 = vmax.f32 %v1101_v29, %v1102_v17  ;;  %v1132_v59 = vrot.slane %v1131_v18, 2  ;;  %v1138_v21 = vrot.slane %v1137_v60, 2  ;;  %v1144_v34 = vrot.slane %v1143_v16, 2 }
 0x11f   : > { %v1109_v57 = vmax.f32 %v1107_v55, %v1108_v48  ;;  %v1115_v31 = vmax.f32 %v1113_v44, %v1114_v52  ;;  %v1121_v58 = vmax.f32 %v1119_v4, %v1120_v53  ;;  %v1127_v32 = vmax.f32 %v1125_v19, %v1126_v56 }
 0x120   : > { %v1104_v62 = vrot.slane %v1103_v38, 1  ;;  %v1133_v37 = vmax.f32 %v1131_v18, %v1132_v59  ;;  %v1139_v10 = vmax.f32 %v1137_v60, %v1138_v21  ;;  %v1145_v25 = vmax.f32 %v1143_v16, %v1144_v34 }
 0x121   : > { %v1110_v50 = vrot.slane %v1109_v57, 1  ;;  %v1116_v45 = vrot.slane %v1115_v31, 1  ;;  %v1122_v13 = vrot.slane %v1121_v58, 1  ;;  %v1128_v8 = vrot.slane %v1127_v32, 1 }
 0x122   : > { %v1134_v30 = vrot.slane %v1133_v37, 1  ;;  %v1140_v42 = vrot.slane %v1139_v10, 1  ;;  %v1146_v11 = vrot.slane %v1145_v25, 1  ;;  %v1105_v54 = vmax.f32 %v1103_v38, %v1104_v62 }
 0x123   : > { %v1111_v5 = vmax.f32 %v1109_v57, %v1110_v50  ;;  %v1117_v46 = vmax.f32 %v1115_v31, %v1116_v45  ;;  %v1123_v26 = vmax.f32 %v1121_v58, %v1122_v13  ;;  %v1129_v33 = vmax.f32 %v1127_v32, %v1128_v8 }
 0x124   : > { %v1135_v9 = vmax.f32 %v1133_v37, %v1134_v30  ;;  %v1141_v47 = vmax.f32 %v1139_v10, %v1140_v42  ;;  %v1147_v24 = vmax.f32 %v1145_v25, %v1146_v11 }
 0x125   : > { %v1156_v49 = vrot.slane %v1111_v5, 7  ;;  %v1157_v35 = vrot.slane %v1117_v46, 6  ;;  %v1158_v40 = vrot.slane %v1123_v26, 5  ;;  %v1159_v51 = vrot.slane %v1129_v33, 4 }
 0x126   : > { %v1160_v7 = vrot.slane %v1135_v9, 3  ;;  %v1161_v12 = vrot.slane %v1141_v47, 2  ;;  %v1162_v63 = vrot.slane %v1147_v24, 1 }
 0x127   : > { %v1164_v14 = vsel %vm1163_vm0, %v1105_v54, %v1156_v49  ;;  %v1166_v36 = vsel %vm1165_vm1, %v1157_v35, %v1158_v40  ;;  %1185 = sbr.rel (!%p1181_p9) target bundleno = 2300 (0x8fc), region = 80 }
 0x128   : > { %v1168_v15 = vsel %vm1167_vm2, %v1164_v14, %v1166_v36  ;;  %v1170_v22 = vsel %vm1169_vm3, %v1159_v51, %v1160_v7  ;;  %v1172_v43 = vsel %vm1171_vm4, %v1161_v12, %v1162_v63 }
 0x129   : > { %v1174_v0 = vsel %vm1173_vm5, %v1170_v22, %v1172_v43 }
 0x12a   : > { %v1176_v2 = vsel %vm1175_vm6, %v1168_v15, %v1174_v0 }
 0x12b   : > { %1180 = vst [vmem:[%s1179_s29] sm:$0xff] %v1176_v2 }
 0x132   : > { %v16203_v1 = vld [vmem:[#allocation3] sm:$0xff]  ;;  %v16205_v41 = vld [vmem:[#allocation3 + $0x8] sm:$0xff] }
 0x133   : > { %15333 = dma.done.wait [#allocation6], 65536 }
 0x134   : > { %15334 = vsyncadd [#allocation6], 4294901760  ;;  %v10069_v61 = vld [vmem:[#allocation4 + $0x1c0] sm:$0xf]  ;;  %vm1787_vm7 = vcmask 1041409  }
 0x135   : > { %v14008_v27 = vld [vmem:[#allocation4 + $0x1dc] sm:$0xf0] }
 0x136   : > { %v10325_v23 = vld [vmem:[#allocation4 + $0x3c0] sm:$0xf]  ;;  %v10070_v28 = vor.u32 %v14008_v27, %v10069_v61 }
 0x137   : > { %v14072_v3 = vld [vmem:[#allocation4 + $0x3dc] sm:$0xf0] }
 0x138   : > { %v10581_v29 = vld [vmem:[#allocation4 + $0x5c0] sm:$0xf]  ;;  %v10326_v39 = vor.u32 %v14072_v3, %v10325_v23  ;;  %4379 = vmatpush.bf16.msra.mxu0 %v10070_v28 }
 0x139   : > { %v14136_v20 = vld [vmem:[#allocation4 + $0x5dc] sm:$0xf0] }
 0x13a   : > { %v10582_v6 = vor.u32 %v14136_v20, %v10581_v29  ;;  %v10837_v55 = vld [vmem:[#allocation4 + $0x7c0] sm:$0xf]  ;;  %4392 = vmatpush.bf16.msra.mxu1 %v10326_v39 }
 0x13b   : > { %v14200_v44 = vld [vmem:[#allocation4 + $0x7dc] sm:$0xf0] }
 0x13c   : > { %v10037_v4 = vld [vmem:[#allocation4 + $0x180] sm:$0xf]  ;;  %v10838_v19 = vor.u32 %v14200_v44, %v10837_v55  ;;  %4405 = vmatpush.bf16.msra.mxu2 %v10582_v6 }
 0x13d   : > { %v14000_v17 = vld [vmem:[#allocation4 + $0x19c] sm:$0xf0] }
 0x13e   : > { %v10293_v18 = vld [vmem:[#allocation4 + $0x380] sm:$0xf]  ;;  %v10038_v16 = vor.u32 %v14000_v17, %v10037_v4  ;;  %4418 = vmatpush.bf16.msra.mxu3 %v10838_v19 }
 0x13f   : > { %v14064_v60 = vld [vmem:[#allocation4 + $0x39c] sm:$0xf0] }
 0x140   : > { %v10294_v48 = vor.u32 %v14064_v60, %v10293_v18  ;;  %v10549_v52 = vld [vmem:[#allocation4 + $0x580] sm:$0xf]  ;;  %4380 = vmatpush.bf16.msra.mxu0 %v10038_v16 }
 0x141   : > { %v14128_v53 = vld [vmem:[#allocation4 + $0x59c] sm:$0xf0] }
 0x142   : > { %v10805_v56 = vld [vmem:[#allocation4 + $0x780] sm:$0xf]  ;;  %v10550_v38 = vor.u32 %v14128_v53, %v10549_v52  ;;  %4393 = vmatpush.bf16.msra.mxu1 %v10294_v48 }
 0x143   : > { %v14192_v59 = vld [vmem:[#allocation4 + $0x79c] sm:$0xf0] }
 0x144   : > { %v10005_v21 = vld [vmem:[#allocation4 + $0x140] sm:$0xf]  ;;  %v10806_v57 = vor.u32 %v14192_v59, %v10805_v56  ;;  %4406 = vmatpush.bf16.msra.mxu2 %v10550_v38 }
 0x145   : > { %v13992_v34 = vld [vmem:[#allocation4 + $0x15c] sm:$0xf0] }
 0x146   : > { %v10261_v31 = vld [vmem:[#allocation4 + $0x340] sm:$0xf]  ;;  %v10006_v62 = vor.u32 %v13992_v34, %v10005_v21  ;;  %4419 = vmatpush.bf16.msra.mxu3 %v10806_v57 }
 0x147   : > { %v14056_v58 = vld [vmem:[#allocation4 + $0x35c] sm:$0xf0] }
 0x148   : > { %v10517_v32 = vld [vmem:[#allocation4 + $0x540] sm:$0xf]  ;;  %v10262_v50 = vor.u32 %v14056_v58, %v10261_v31  ;;  %4381 = vmatpush.bf16.msra.mxu0 %v10006_v62 }
 0x149   : > { %v14120_v37 = vld [vmem:[#allocation4 + $0x55c] sm:$0xf0] }
 0x14a   : > { %v10773_v10 = vld [vmem:[#allocation4 + $0x740] sm:$0xf]  ;;  %v10518_v45 = vor.u32 %v14120_v37, %v10517_v32  ;;  %4394 = vmatpush.bf16.msra.mxu1 %v10262_v50 }
 0x14b   : > { %v14184_v25 = vld [vmem:[#allocation4 + $0x75c] sm:$0xf0] }
 0x14c   : > { %v9973_v13 = vld [vmem:[#allocation4 + $0x100] sm:$0xf]  ;;  %v10774_v42 = vor.u32 %v14184_v25, %v10773_v10  ;;  %4407 = vmatpush.bf16.msra.mxu2 %v10518_v45 }
 0x14d   : > { %v13984_v8 = vld [vmem:[#allocation4 + $0x11c] sm:$0xf0] }
 0x14e   : > { %v10229_v30 = vld [vmem:[#allocation4 + $0x300] sm:$0xf]  ;;  %v9974_v54 = vor.u32 %v13984_v8, %v9973_v13  ;;  %4420 = vmatpush.bf16.msra.mxu3 %v10774_v42 }
 0x14f   : > { %v14048_v11 = vld [vmem:[#allocation4 + $0x31c] sm:$0xf0] }
 0x150   : > { %v10485_v5 = vld [vmem:[#allocation4 + $0x500] sm:$0xf]  ;;  %v10230_v9 = vor.u32 %v14048_v11, %v10229_v30  ;;  %4382 = vmatpush.bf16.msra.mxu0 %v9974_v54 }
 0x151   : > { %v14112_v46 = vld [vmem:[#allocation4 + $0x51c] sm:$0xf0] }
 0x152   : > { %v10741_v26 = vld [vmem:[#allocation4 + $0x700] sm:$0xf]  ;;  %v10486_v47 = vor.u32 %v14112_v46, %v10485_v5  ;;  %4395 = vmatpush.bf16.msra.mxu1 %v10230_v9 }
 0x153   : > { %v14176_v33 = vld [vmem:[#allocation4 + $0x71c] sm:$0xf0] }
 0x154   : > { %v9941_v24 = vld [vmem:[#allocation4 + $0xc0] sm:$0xf]  ;;  %v10742_v40 = vor.u32 %v14176_v33, %v10741_v26  ;;  %4408 = vmatpush.bf16.msra.mxu2 %v10486_v47 }
 0x155   : > { %v13976_v49 = vld [vmem:[#allocation4 + $0xdc] sm:$0xf0] }
 0x156   : > { %v10197_v35 = vld [vmem:[#allocation4 + $0x2c0] sm:$0xf]  ;;  %v9942_v36 = vor.u32 %v13976_v49, %v9941_v24  ;;  %4421 = vmatpush.bf16.msra.mxu3 %v10742_v40 }
 0x157   : > { %v14040_v51 = vld [vmem:[#allocation4 + $0x2dc] sm:$0xf0] }
 0x158   : > { %v10453_v7 = vld [vmem:[#allocation4 + $0x4c0] sm:$0xf]  ;;  %v10198_v15 = vor.u32 %v14040_v51, %v10197_v35  ;;  %4383 = vmatpush.bf16.msra.mxu0 %v9942_v36  ;;  %v1196_v36 = vperm.slane %v16203_v1, 2 }
 0x159   : > { %v14104_v12 = vld [vmem:[#allocation4 + $0x4dc] sm:$0xf0] }
 0x15a   : > { %v10709_v63 = vld [vmem:[#allocation4 + $0x6c0] sm:$0xf]  ;;  %v10454_v22 = vor.u32 %v14104_v12, %v10453_v7  ;;  %4396 = vmatpush.bf16.msra.mxu1 %v10198_v15  ;;  %v1204_v15 = vperm.slane %v16205_v41, 2 }
 0x15b   : > { %v14168_v14 = vld [vmem:[#allocation4 + $0x6dc] sm:$0xf0] }
 0x15c   : > { %v9909_v43 = vld [vmem:[#allocation4 + $0x80] sm:$0xf]  ;;  %v10710_v61 = vor.u32 %v14168_v14, %v10709_v63  ;;  %4409 = vmatpush.bf16.msra.mxu2 %v10454_v22 }
 0x15d   : > { %v13968_v0 = vld [vmem:[#allocation4 + $0x9c] sm:$0xf0] }
 0x15e   : > { %v10165_v2 = vld [vmem:[#allocation4 + $0x280] sm:$0xf]  ;;  %v9910_v20 = vor.u32 %v13968_v0, %v9909_v43  ;;  %4422 = vmatpush.bf16.msra.mxu3 %v10710_v61 }
 0x15f   : > { %v14032_v27 = vld [vmem:[#allocation4 + $0x29c] sm:$0xf0] }
 0x160   : > { %v10421_v23 = vld [vmem:[#allocation4 + $0x480] sm:$0xf]  ;;  %v10166_v39 = vor.u32 %v14032_v27, %v10165_v2  ;;  %4384 = vmatpush.bf16.msra.mxu0 %v9910_v20  ;;  %v1194_v27 = vperm.slane %v16203_v1, 0 }
 0x161   : > { %v14096_v28 = vld [vmem:[#allocation4 + $0x49c] sm:$0xf0] }
 0x162   : > { %v10677_v3 = vld [vmem:[#allocation4 + $0x680] sm:$0xf]  ;;  %v10422_v6 = vor.u32 %v14096_v28, %v10421_v23  ;;  %4397 = vmatpush.bf16.msra.mxu1 %v10166_v39  ;;  %v1228_v28 = vpack.c.bf16 %v1196_v36, %v1196_v36 }
 0x163   : > { %v14160_v29 = vld [vmem:[#allocation4 + $0x69c] sm:$0xf0] }
 0x164   : > { %v9877_v55 = vld [vmem:[#allocation4 + $0x40] sm:$0xf]  ;;  %v10678_v19 = vor.u32 %v14160_v29, %v10677_v3  ;;  %4410 = vmatpush.bf16.msra.mxu2 %v10422_v6  ;;  %v1236_v3 = vpack.c.bf16 %v1204_v15, %v1204_v15  ;;  %v1202_v6 = vperm.slane %v16205_v41, 0 }
 0x165   : > { %v13960_v44 = vld [vmem:[#allocation4 + $0x5c] sm:$0xf0] }
 0x166   : > { %v10133_v4 = vld [vmem:[#allocation4 + $0x240] sm:$0xf]  ;;  %v9878_v52 = vor.u32 %v13960_v44, %v9877_v55  ;;  %4423 = vmatpush.bf16.msra.mxu3 %v10678_v19  ;;  %v1226_v55 = vpack.c.bf16 %v1194_v27, %v1194_v27  ;;  %v1197_v44 = vperm.slane %v16203_v1, 3 }
 0x167   : > { %v14024_v17 = vld [vmem:[#allocation4 + $0x25c] sm:$0xf0] }
 0x168   : > { %v10389_v18 = vld [vmem:[#allocation4 + $0x440] sm:$0xf]  ;;  %v10134_v38 = vor.u32 %v14024_v17, %v10133_v4  ;;  %4385 = vmatpush.bf16.msra.mxu0 %v9878_v52 }
 0x169   : > { %v14088_v60 = vld [vmem:[#allocation4 + $0x45c] sm:$0xf0] }
 0x16a   : > { %v10645_v16 = vld [vmem:[#allocation4 + $0x640] sm:$0xf]  ;;  %v10390_v59 = vor.u32 %v14088_v60, %v10389_v18  ;;  %4398 = vmatpush.bf16.msra.mxu1 %v10134_v38  ;;  %v1772_v18 = vunpack.c.l.b16 %v1228_v28  ;;  %v1780_v60 = vunpack.c.l.b16 %v1236_v3  ;;  %v1195_v38 = vperm.slane %v16203_v1, 1 }
 0x16b   : > { %v14152_v48 = vld [vmem:[#allocation4 + $0x65c] sm:$0xf0] }
 0x16c   : > { %v9845_v53 = vld [vmem:[#allocation4] sm:$0xf]  ;;  %v10646_v31 = vor.u32 %v14152_v48, %v10645_v16  ;;  %4411 = vmatpush.bf16.msra.mxu2 %v10390_v59  ;;  %v1205_v16 = vperm.slane %v16205_v41, 3 }
 0x16d   : > { %v13952_v56 = vld [vmem:[#allocation4 + $0x1c] sm:$0xf0] }
 0x16e   : > { %v10101_v21 = vld [vmem:[#allocation4 + $0x200] sm:$0xf]  ;;  %v9846_v50 = vor.u32 %v13952_v56, %v9845_v53  ;;  %4424 = vmatpush.bf16.msra.mxu3 %v10646_v31  ;;  %v1234_v53 = vpack.c.bf16 %v1202_v6, %v1202_v6  ;;  %v1229_v56 = vpack.c.bf16 %v1197_v44, %v1197_v44  ;;  %v1237_v31 = vpack.c.bf16 %v1205_v16, %v1205_v16 }
 0x16f   : > { %v14016_v34 = vld [vmem:[#allocation4 + $0x21c] sm:$0xf0] }
 0x170   : > { %v10357_v57 = vld [vmem:[#allocation4 + $0x400] sm:$0xf]  ;;  %v10102_v30 = vor.u32 %v14016_v34, %v10101_v21  ;;  %4386 = vmatpush.bf16.msra.mxu0 %v9846_v50  ;;  %v1227_v50 = vpack.c.bf16 %v1195_v38, %v1195_v38  ;;  %v1208_v38 = vperm.slane %v16205_v41, 6 }
 0x171   : > { %v14080_v58 = vld [vmem:[#allocation4 + $0x41c] sm:$0xf0] }
 0x172   : > { %v10613_v32 = vld [vmem:[#allocation4 + $0x600] sm:$0xf]  ;;  %v10358_v42 = vor.u32 %v14080_v58, %v10357_v57  ;;  %4399 = vmatpush.bf16.msra.mxu1 %v10102_v30  ;;  %v1791_v57 = vrot.slane %v1780_v60, 7  ;;  %v1203_v58 = vperm.slane %v16205_v41, 1 }
 0x173   : > { %v14144_v62 = vld [vmem:[#allocation4 + $0x61c] sm:$0xf0] }
 0x174   : > { %v11093_v37 = vld [vmem:[#allocation4 + $0x9c0] sm:$0xf]  ;;  %v10614_v46 = vor.u32 %v14144_v62, %v10613_v32  ;;  %4412 = vmatpush.bf16.msra.mxu2 %v10358_v42  ;;  %v1773_v42 = vunpack.c.l.b16 %v1229_v56  ;;  %v1200_v56 = vperm.slane %v16203_v1, 6 }
 0x175   : > { %v14264_v10 = vld [vmem:[#allocation4 + $0x9dc] sm:$0xf0] }
 0x176   : > { %v11349_v25 = vld [vmem:[#allocation4 + $0xbc0] sm:$0xf]  ;;  %v11094_v26 = vor.u32 %v14264_v10, %v11093_v37  ;;  %4425 = vmatpush.bf16.msra.mxu3 %v10614_v46  ;;  %v1770_v10 = vunpack.c.l.b16 %v1226_v55 }
 0x177   : > { %v14328_v45 = vld [vmem:[#allocation4 + $0xbdc] sm:$0xf0] }
 0x178   : > { %v11605_v13 = vld [vmem:[#allocation4 + $0xdc0] sm:$0xf]  ;;  %v11350_v47 = vor.u32 %v14328_v45, %v11349_v25  ;;  %4431 = vmatpush.bf16.msrb.mxu0 %v11094_v26  ;;  %v1778_v25 = vunpack.c.l.b16 %v1234_v53 }
 0x179   : > { %v14392_v8 = vld [vmem:[#allocation4 + $0xddc] sm:$0xf0] }
 0x17a   : > { %v11861_v11 = vld [vmem:[#allocation4 + $0xfc0] sm:$0xf]  ;;  %v11606_v24 = vor.u32 %v14392_v8, %v11605_v13  ;;  %4444 = vmatpush.bf16.msrb.mxu1 %v11350_v47  ;;  %v1792_v8 = vsel %vm1787_vm7, %v1791_v57, %v1772_v18  ;;  %v1786_v47 = vrot.slane %v1778_v25, 7  ;;  %v1206_v57 = vperm.slane %v16205_v41, 4 }
 0x17b   : > { %v14456_v5 = vld [vmem:[#allocation4 + $0xfdc] sm:$0xf0]  ;;  %v1232_v25 = vpack.c.bf16 %v1200_v56, %v1200_v56 }
 0x17c   : > { %v11061_v33 = vld [vmem:[#allocation4 + $0x980] sm:$0xf]  ;;  %v11862_v51 = vor.u32 %v14456_v5, %v11861_v11  ;;  %4457 = vmatpush.bf16.msrb.mxu2 %v11606_v24  ;;  %v1781_v11 = vunpack.c.l.b16 %v1237_v31  ;;  %v1235_v5 = vpack.c.bf16 %v1203_v58, %v1203_v58  ;;  %v1788_v15 = vsel %vm1787_vm7, %v1786_v47, %v1770_v10 }
 0x17d   : > { %v14256_v54 = vld [vmem:[#allocation4 + $0x99c] sm:$0xf0]  ;;  %v1201_v31 = vperm.slane %v16203_v1, 7  ;;  %v1209_v58 = vperm.slane %v16205_v41, 7 }
 0x17e   : > { %v11317_v9 = vld [vmem:[#allocation4 + $0xb80] sm:$0xf]  ;;  %v11062_v22 = vor.u32 %v14256_v54, %v11061_v33  ;;  %4470 = vmatpush.bf16.msrb.mxu3 %v11862_v51  ;;  %v16216_v33 = vpack.c.b16 %v1792_v8, %v1792_v8  ;;  %v1771_v51 = vunpack.c.l.b16 %v1227_v50  ;;  %v1240_v50 = vpack.c.bf16 %v1208_v38, %v1208_v38  ;;  %v13996_v38 = vld [vmem:[#allocation4 + $0x184] sm:$0xf] }
 0x17f   : > { %v14320_v49 = vld [vmem:[#allocation4 + $0xb9c] sm:$0xf0]  ;;  %v1233_v8 = vpack.c.bf16 %v1201_v31, %v1201_v31 }
 0x180   : > { %v11573_v35 = vld [vmem:[#allocation4 + $0xd80] sm:$0xf]  ;;  %v11318_v43 = vor.u32 %v14320_v49, %v11317_v9  ;;  %4432 = vmatpush.bf16.msrb.mxu0 %v11062_v22  ;;  %4413 = vmatmul.bf16.vlgmr.msra.gmra.mxu2 %v16216_v33  ;;  %v16220_v22 = vpack.c.b16 %v1788_v15, %v1788_v15 }
 0x181   : > { %v14384_v40 = vld [vmem:[#allocation4 + $0xd9c] sm:$0xf0] }
 0x182   : > { %v11829_v7 = vld [vmem:[#allocation4 + $0xf80] sm:$0xf]  ;;  %v11574_v0 = vor.u32 %v14384_v40, %v11573_v35  ;;  %4445 = vmatpush.bf16.msrb.mxu1 %v11318_v43  ;;  %v1793_v40 = vrot.slane %v1781_v11, 7  ;;  %4387 = vmatmul.bf16.vlgmr.msra.gmra.mxu0 %v16220_v22 }
 0x183   : > { %v14448_v12 = vld [vmem:[#allocation4 + $0xf9c] sm:$0xf0] }
 0x184   : > { %v11029_v63 = vld [vmem:[#allocation4 + $0x940] sm:$0xf]  ;;  %v11830_v23 = vor.u32 %v14448_v12, %v11829_v7  ;;  %4458 = vmatpush.bf16.msrb.mxu2 %v11574_v0  ;;  %v1779_v7 = vunpack.c.l.b16 %v1235_v5  ;;  %v1794_v43 = vsel %vm1787_vm7, %v1793_v40, %v1773_v42 }
 0x185   : > { %v14248_v14 = vld [vmem:[#allocation4 + $0x95c] sm:$0xf0] }
 0x186   : > { %v11285_v2 = vld [vmem:[#allocation4 + $0xb40] sm:$0xf]  ;;  %v11030_v29 = vor.u32 %v14248_v14, %v11029_v63  ;;  %4471 = vmatpush.bf16.msrb.mxu3 %v11830_v23  ;;  %v1789_v0 = vrot.slane %v1779_v7, 7  ;;  %v16223_v23 = vpack.c.b16 %v1794_v43, %v1794_v43  ;;  %v1776_v7 = vunpack.c.l.b16 %v1232_v25 }
 0x187   : > { %v14312_v61 = vld [vmem:[#allocation4 + $0xb5c] sm:$0xf0] }
 0x188   : > { %v11541_v20 = vld [vmem:[#allocation4 + $0xd40] sm:$0xf]  ;;  %v11286_v4 = vor.u32 %v14312_v61, %v11285_v2  ;;  %4433 = vmatpush.bf16.msrb.mxu0 %v11030_v29  ;;  %v1790_v6 = vsel %vm1787_vm7, %v1789_v0, %v1771_v51  ;;  %4426 = vmatmul.bf16.vlgmr.msra.gmra.mxu3 %v16223_v23 }
 0x189   : > { %v14376_v39 = vld [vmem:[#allocation4 + $0xd5c] sm:$0xf0] }
 0x18a   : > { %v11797_v19 = vld [vmem:[#allocation4 + $0xf40] sm:$0xf]  ;;  %v11542_v59 = vor.u32 %v14376_v39, %v11541_v20  ;;  %4446 = vmatpush.bf16.msrb.mxu1 %v11286_v4 }
 0x18b   : > { %v14440_v17 = vld [vmem:[#allocation4 + $0xf5c] sm:$0xf0] }
 0x18c   : > { %v10997_v48 = vld [vmem:[#allocation4 + $0x900] sm:$0xf]  ;;  %v11798_v32 = vor.u32 %v14440_v17, %v11797_v19  ;;  %4459 = vmatpush.bf16.msrb.mxu2 %v11542_v59  ;;  %v16227_v17 = vpack.c.b16 %v1790_v6, %v1790_v6  ;;  %v1198_v59 = vperm.slane %v16203_v1, 4 }
 0x18d   : > { %v14240_v52 = vld [vmem:[#allocation4 + $0x91c] sm:$0xf0] }
 0x18e   : > { %v11253_v21 = vld [vmem:[#allocation4 + $0xb00] sm:$0xf]  ;;  %v10998_v46 = vor.u32 %v14240_v52, %v10997_v48  ;;  %4472 = vmatpush.bf16.msrb.mxu3 %v11798_v32  ;;  %4400 = vmatmul.bf16.vlgmr.msra.gmra.mxu1 %v16227_v17 }
 0x18f   : > { %v14304_v34 = vld [vmem:[#allocation4 + $0xb1c] sm:$0xf0] }
 0x190   : > { %v11509_v62 = vld [vmem:[#allocation4 + $0xd00] sm:$0xf]  ;;  %v11254_v26 = vor.u32 %v14304_v34, %v11253_v21  ;;  %4434 = vmatpush.bf16.msrb.mxu0 %v10998_v46 }
 0x191   : > { %v14368_v37 = vld [vmem:[#allocation4 + $0xd1c] sm:$0xf0] }
 0x192   : > { %v11765_v45 = vld [vmem:[#allocation4 + $0xf00] sm:$0xf]  ;;  %v11510_v24 = vor.u32 %v14368_v37, %v11509_v62  ;;  %4447 = vmatpush.bf16.msrb.mxu1 %v11254_v26  ;;  %v1784_v26 = vunpack.c.l.b16 %v1240_v50 }
 0x193   : > { %v14432_v13 = vld [vmem:[#allocation4 + $0xf1c] sm:$0xf0] }
 0x194   : > { %v10965_v30 = vld [vmem:[#allocation4 + $0x8c0] sm:$0xf]  ;;  %v11766_v12 = vor.u32 %v14432_v13, %v11765_v45  ;;  %4460 = vmatpush.bf16.msrb.mxu2 %v11510_v24  ;;  %v1230_v45 = vpack.c.bf16 %v1198_v59, %v1198_v59  ;;  %v1238_v13 = vpack.c.bf16 %v1206_v57, %v1206_v57  ;;  %v14060_v57 = vld [vmem:[#allocation4 + $0x384] sm:$0xf] }
 0x195   : > { %v14232_v54 = vld [vmem:[#allocation4 + $0x8dc] sm:$0xf0] }
 0x196   : > { %v11221_v9 = vld [vmem:[#allocation4 + $0xac0] sm:$0xf]  ;;  %v10966_v27 = vor.u32 %v14232_v54, %v10965_v30  ;;  %4473 = vmatpush.bf16.msrb.mxu3 %v11766_v12  ;;  %v1241_v30 = vpack.c.bf16 %v1209_v58, %v1209_v58  ;;  %v1799_v12 = vrot.slane %v1784_v26, 7  ;;  %v1774_v43 = vunpack.c.l.b16 %v1230_v45  ;;  %v14188_v45 = vld [vmem:[#allocation4 + $0x784] sm:$0xf] }
 0x197   : > { %v14296_v49 = vld [vmem:[#allocation4 + $0xadc] sm:$0xf0]  ;;  %v10007_v26 = vld [vmem:[#allocation4 + $0x160] sm:$0xf0] }
 0x198   : > { %v11477_v35 = vld [vmem:[#allocation4 + $0xcc0] sm:$0xf]  ;;  %v11222_v20 = vor.u32 %v14296_v49, %v11221_v9  ;;  %4435 = vmatpush.bf16.msrb.mxu0 %v10966_v27  ;;  %v1785_v40 = vunpack.c.l.b16 %v1241_v30  ;;  %v14004_v27 = vld [vmem:[#allocation4 + $0x1c4] sm:$0xf] }
 0x199   : > { %v14360_v63 = vld [vmem:[#allocation4 + $0xcdc] sm:$0xf0] }
 0x19a   : > { %v11733_v14 = vld [vmem:[#allocation4 + $0xec0] sm:$0xf]  ;;  %v11478_v39 = vor.u32 %v14360_v63, %v11477_v35  ;;  %4448 = vmatpush.bf16.msrb.mxu1 %v11222_v20  ;;  %v1782_v35 = vunpack.c.l.b16 %v1238_v13  ;;  %v1199_v63 = vperm.slane %v16203_v1, 5  ;;  %v10583_v1 = vld [vmem:[#allocation4 + $0x5e0] sm:$0xf0] }
 0x19b   : > { %v14424_v36 = vld [vmem:[#allocation4 + $0xedc] sm:$0xf0]  ;;  %v10807_v13 = vld [vmem:[#allocation4 + $0x7a0] sm:$0xf0] }
 0x19c   : > { %v10933_v2 = vld [vmem:[#allocation4 + $0x880] sm:$0xf]  ;;  %v11734_v19 = vor.u32 %v14424_v36, %v11733_v14  ;;  %4461 = vmatpush.bf16.msrb.mxu2 %v11478_v39  ;;  %v1207_v14 = vperm.slane %v16205_v41, 5  ;;  %v1795_v0 = vrot.slane %v1782_v35, 7  ;;  %v14180_v35 = vld [vmem:[#allocation4 + $0x744] sm:$0xf] }
 0x19d   : > { %v14224_v61 = vld [vmem:[#allocation4 + $0x89c] sm:$0xf0] }
 0x19e   : > { %v11189_v28 = vld [vmem:[#allocation4 + $0xa80] sm:$0xf]  ;;  %v10934_v18 = vor.u32 %v14224_v61, %v10933_v2  ;;  %4474 = vmatpush.bf16.msrb.mxu3 %v11734_v19  ;;  %v1777_v2 = vunpack.c.l.b16 %v1233_v8  ;;  %v1801_v61 = vrot.slane %v1785_v40, 7  ;;  %v1239_v20 = vpack.c.bf16 %v1207_v14, %v1207_v14  ;;  %v10839_v19 = vld [vmem:[#allocation4 + $0x7e0] sm:$0xf0] }
 0x19f   : > { %v14288_v3 = vld [vmem:[#allocation4 + $0xa9c] sm:$0xf0]  ;;  %v10775_v40 = vld [vmem:[#allocation4 + $0x760] sm:$0xf0] }
 0x1a0   : > { %v11445_v29 = vld [vmem:[#allocation4 + $0xc80] sm:$0xf]  ;;  %v11190_v52 = vor.u32 %v14288_v3, %v11189_v28  ;;  %4436 = vmatpush.bf16.msrb.mxu0 %v10934_v18  ;;  %v10071_v28 = vld [vmem:[#allocation4 + $0x1e0] sm:$0xf0]  ;;  %v1800_v18 = vsel %vm1787_vm7, %v1799_v12, %v1776_v7  ;;  %v1802_v56 = vsel %vm1787_vm7, %v1801_v61, %v1777_v2 }
 0x1a1   : > { %v14352_v55 = vld [vmem:[#allocation4 + $0xc9c] sm:$0xf0]  ;;  %v14068_v3 = vld [vmem:[#allocation4 + $0x3c4] sm:$0xf]  ;;  %v16249_v50 = vpack.c.b16 %v1802_v56, %v1802_v56 }
 0x1a2   : > { %v11701_v44 = vld [vmem:[#allocation4 + $0xe80] sm:$0xf]  ;;  %v11446_v21 = vor.u32 %v14352_v55, %v11445_v29  ;;  %4449 = vmatpush.bf16.msrb.mxu1 %v11190_v52  ;;  %v1231_v29 = vpack.c.bf16 %v1199_v63, %v1199_v63  ;;  %v10327_v55 = vld [vmem:[#allocation4 + $0x3e0] sm:$0xf0]  ;;  %v10074_v52 = vor.u32 %v14004_v27, %v10071_v28 }
 0x1a3   : > { %v14416_v4 = vld [vmem:[#allocation4 + $0xe9c] sm:$0xf0]  ;;  %v10330_v59 = vor.u32 %v14068_v3, %v10327_v55  ;;  %v13980_v63 = vld [vmem:[#allocation4 + $0x104] sm:$0xf] }
 0x1a4   : > { %v10901_v60 = vld [vmem:[#allocation4 + $0x840] sm:$0xf]  ;;  %v11702_v32 = vor.u32 %v14416_v4, %v11701_v44  ;;  %4462 = vmatpush.bf16.msrb.mxu2 %v11446_v21  ;;  %v14132_v44 = vld [vmem:[#allocation4 + $0x5c4] sm:$0xf] }
 0x1a5   : > { %v14216_v16 = vld [vmem:[#allocation4 + $0x85c] sm:$0xf0]  ;;  %v14196_v4 = vld [vmem:[#allocation4 + $0x7c4] sm:$0xf]  ;;  %v10586_v21 = vor.u32 %v14132_v44, %v10583_v1 }
 0x1a6   : > { %v16229_v48 = vld [vmem:[#allocation4 + $0xa40] sm:$0xf]  ;;  %v10902_v42 = vor.u32 %v14216_v16, %v10901_v60  ;;  %4475 = vmatpush.bf16.msrb.mxu3 %v11702_v32  ;;  %v1775_v60 = vunpack.c.l.b16 %v1231_v29  ;;  %v1783_v16 = vunpack.c.l.b16 %v1239_v20  ;;  %v10842_v58 = vor.u32 %v14196_v4, %v10839_v19  ;;  %v9975_v14 = vld [vmem:[#allocation4 + $0x120] sm:$0xf0] }
 0x1a7   : > { %v14280_v53 = vld [vmem:[#allocation4 + $0xa5c] sm:$0xf0]  ;;  %v16245_v32 = vpack.c.b16 %v1800_v18, %v1800_v18  ;;  %v10487_v2 = vld [vmem:[#allocation4 + $0x520] sm:$0xf0]  ;;  %v9978_v28 = vor.u32 %v13980_v63, %v9975_v14 }
 0x1a8   : > { %v11413_v34 = vld [vmem:[#allocation4 + $0xc40] sm:$0xf]  ;;  %v11158_v11 = vor.u32 %v14280_v53, %v16229_v48  ;;  %4437 = vmatpush.bf16.msrb.mxu0 %v10902_v42  ;;  %v1796_v53 = vsel %vm1787_vm7, %v1795_v0, %v1774_v43  ;;  %v1797_v31 = vrot.slane %v1783_v16, 7  ;;  %v10231_v43 = vld [vmem:[#allocation4 + $0x320] sm:$0xf0] }
 0x1a9   : > { %v14344_v62 = vld [vmem:[#allocation4 + $0xc5c] sm:$0xf0]  ;;  %v16247_v25 = vpack.c.b16 %v1796_v53, %v1796_v53  ;;  %v14108_v0 = vld [vmem:[#allocation4 + $0x504] sm:$0xf] }
 0x1aa   : > { %v11669_v37 = vld [vmem:[#allocation4 + $0xe40] sm:$0xf]  ;;  %v11414_v54 = vor.u32 %v14344_v62, %v11413_v34  ;;  %4450 = vmatpush.bf16.msrb.mxu1 %v11158_v11  ;;  %v10039_v34 = vld [vmem:[#allocation4 + $0x1a0] sm:$0xf0]  ;;  %v1798_v8 = vsel %vm1787_vm7, %v1797_v31, %v1775_v60  ;;  %v10490_v29 = vor.u32 %v14108_v0, %v10487_v2 }
 0x1ab   : > { %v14408_v10 = vld [vmem:[#allocation4 + $0xe5c] sm:$0xf0]  ;;  %v10295_v62 = vld [vmem:[#allocation4 + $0x3a0] sm:$0xf0]  ;;  %v10042_v30 = vor.u32 %v13996_v38, %v10039_v34  ;;  %v16252_v42 = vpack.c.b16 %v1798_v8, %v1798_v8 }
 0x1ac   : > { %v10869_v5 = vld [vmem:[#allocation4 + $0x800] sm:$0xf]  ;;  %v11670_v9 = vor.u32 %v14408_v10, %v11669_v37  ;;  %4463 = vmatpush.bf16.msrb.mxu2 %v11414_v54  ;;  %v14124_v37 = vld [vmem:[#allocation4 + $0x584] sm:$0xf]  ;;  %v10298_v11 = vor.u32 %v14060_v57, %v10295_v62 }
 0x1ad   : > { %v14208_v46 = vld [vmem:[#allocation4 + $0x81c] sm:$0xf0]  ;;  %v10551_v10 = vld [vmem:[#allocation4 + $0x5a0] sm:$0xf0] }
 0x1ae   : > { %v11125_v47 = vld [vmem:[#allocation4 + $0xa00] sm:$0xf]  ;;  %v10870_v39 = vor.u32 %v14208_v46, %v10869_v5  ;;  %4476 = vmatpush.bf16.msrb.mxu3 %v11670_v9  ;;  %v10554_v5 = vor.u32 %v14124_v37, %v10551_v10  ;;  %v13988_v46 = vld [vmem:[#allocation4 + $0x144] sm:$0xf]  ;;  %v10810_v9 = vor.u32 %v14188_v45, %v10807_v13 }
 0x1af   : > { %v14272_v24 = vld [vmem:[#allocation4 + $0xa1c] sm:$0xf0]  ;;  %v14052_v54 = vld [vmem:[#allocation4 + $0x344] sm:$0xf] }
 0x1b0   : > { %v11381_v49 = vld [vmem:[#allocation4 + $0xc00] sm:$0xf]  ;;  %v11126_v6 = vor.u32 %v14272_v24, %v11125_v47  ;;  %4438 = vmatpush.bf16.msrb.mxu0 %v10870_v39  ;;  %v10263_v47 = vld [vmem:[#allocation4 + $0x360] sm:$0xf0] }
 0x1b1   : > { %v14336_v51 = vld [vmem:[#allocation4 + $0xc1c] sm:$0xf0]  ;;  %v14116_v24 = vld [vmem:[#allocation4 + $0x544] sm:$0xf]  ;;  %v10266_v7 = vor.u32 %v14052_v54, %v10263_v47 }
 0x1b2   : > { %v11637_v36 = vld [vmem:[#allocation4 + $0xe00] sm:$0xf]  ;;  %v11382_v41 = vor.u32 %v14336_v51, %v11381_v49  ;;  %4451 = vmatpush.bf16.msrb.mxu1 %v11126_v6  ;;  %v10519_v49 = vld [vmem:[#allocation4 + $0x560] sm:$0xf0]  ;;  %v10010_v51 = vor.u32 %v13988_v46, %v10007_v26 }
 0x1b3   : > { %v14400_v15 = vld [vmem:[#allocation4 + $0xe1c] sm:$0xf0]  ;;  %4439 = vmatmul.bf16.vlgmr.msrb.gmra.mxu0 %v16247_v25  ;;  %v10522_v12 = vor.u32 %v14116_v24, %v10519_v49  ;;  %v14172_v61 = vld [vmem:[#allocation4 + $0x704] sm:$0xf] }
 0x1b4   : > { %v11638_v48 = vor.u32 %v14400_v15, %v11637_v36  ;;  %4464 = vmatpush.bf16.msrb.mxu2 %v11382_v41  ;;  %4483 = vmatpush.bf16.msra.mxu0 %v10074_v52  ;;  %v14044_v36 = vld [vmem:[#allocation4 + $0x304] sm:$0xf]  ;;  %v10778_v15 = vor.u32 %v14180_v35, %v10775_v40 }
 0x1b5   : > { %4452 = vmatmul.bf16.vlgmr.msrb.gmra.mxu1 %v16252_v42  ;;  %v10743_v27 = vld [vmem:[#allocation4 + $0x720] sm:$0xf0]  ;;  %v10234_v3 = vor.u32 %v14044_v36, %v10231_v43 }
 0x1b6   : > { %4477 = vmatpush.bf16.msrb.mxu3 %v11638_v48  ;;  %4496 = vmatpush.bf16.msra.mxu1 %v10330_v59  ;;  %v13972_v20 = vld [vmem:[#allocation4 + $0xc4] sm:$0xf]  ;;  %v10746_v55 = vor.u32 %v14172_v61, %v10743_v27 }
 0x1b7   : > { %4465 = vmatmul.bf16.vlgmr.msrb.gmra.mxu2 %v16245_v32  ;;  %v9943_v39 = vld [vmem:[#allocation4 + $0xe0] sm:$0xf0] }
 0x1b8   : > { %4509 = vmatpush.bf16.msra.mxu2 %v10586_v21  ;;  %4484 = vmatpush.bf16.msra.mxu0 %v10042_v30  ;;  %v14036_v6 = vld [vmem:[#allocation4 + $0x2c4] sm:$0xf]  ;;  %v9946_v18 = vor.u32 %v13972_v20, %v9943_v39 }
 0x1b9   : > { %4478 = vmatmul.bf16.vlgmr.msrb.gmra.mxu3 %v16249_v50  ;;  %v10199_v44 = vld [vmem:[#allocation4 + $0x2e0] sm:$0xf0] }
 0x1ba   : > { %4522 = vmatpush.bf16.msra.mxu3 %v10842_v58  ;;  %4497 = vmatpush.bf16.msra.mxu1 %v10298_v11  ;;  %v14100_v1 = vld [vmem:[#allocation4 + $0x4c4] sm:$0xf]  ;;  %v10202_v60 = vor.u32 %v14036_v6, %v10199_v44 }
 0x1bb   : > { %v10455_v41 = vld [vmem:[#allocation4 + $0x4e0] sm:$0xf0] }
 0x1bc   : > { %4510 = vmatpush.bf16.msra.mxu2 %v10554_v5  ;;  %4485 = vmatpush.bf16.msra.mxu0 %v10010_v51  ;;  %v14164_v4 = vld [vmem:[#allocation4 + $0x6c4] sm:$0xf]  ;;  %v10458_v16 = vor.u32 %v14100_v1, %v10455_v41 }
 0x1bd   : > { %v10711_v19 = vld [vmem:[#allocation4 + $0x6e0] sm:$0xf0] }
 0x1be   : > { %4523 = vmatpush.bf16.msra.mxu3 %v10810_v9  ;;  %4498 = vmatpush.bf16.msra.mxu1 %v10266_v7  ;;  %v13964_v48 = vld [vmem:[#allocation4 + $0x84] sm:$0xf]  ;;  %v10714_v56 = vor.u32 %v14164_v4, %v10711_v19 }
 0x1bf   : > { %v9911_v52 = vld [vmem:[#allocation4 + $0xa0] sm:$0xf0] }
 0x1c0   : > { %4511 = vmatpush.bf16.msra.mxu2 %v10522_v12  ;;  %4486 = vmatpush.bf16.msra.mxu0 %v9978_v28  ;;  %v14028_v53 = vld [vmem:[#allocation4 + $0x284] sm:$0xf]  ;;  %v9914_v31 = vor.u32 %v13964_v48, %v9911_v52 }
 0x1c1   : > { %v10167_v38 = vld [vmem:[#allocation4 + $0x2a0] sm:$0xf0] }
 0x1c2   : > { %4524 = vmatpush.bf16.msra.mxu3 %v10778_v15  ;;  %4499 = vmatpush.bf16.msra.mxu1 %v10234_v3  ;;  %v14092_v59 = vld [vmem:[#allocation4 + $0x484] sm:$0xf]  ;;  %v10170_v58 = vor.u32 %v14028_v53, %v10167_v38 }
 0x1c3   : > { %v10423_v21 = vld [vmem:[#allocation4 + $0x4a0] sm:$0xf0] }
 0x1c4   : > { %4512 = vmatpush.bf16.msra.mxu2 %v10490_v29  ;;  %v14156_v34 = vld [vmem:[#allocation4 + $0x684] sm:$0xf]  ;;  %4487 = vmatpush.bf16.msra.mxu0 %v9946_v18  ;;  %v10426_v62 = vor.u32 %v14092_v59, %v10423_v21 }
 0x1c5   : > { %v10679_v57 = vld [vmem:[#allocation4 + $0x6a0] sm:$0xf0] }
 0x1c6   : > { %4525 = vmatpush.bf16.msra.mxu3 %v10746_v55  ;;  %4500 = vmatpush.bf16.msra.mxu1 %v10202_v60  ;;  %v13956_v37 = vld [vmem:[#allocation4 + $0x44] sm:$0xf]  ;;  %v10682_v13 = vor.u32 %v14156_v34, %v10679_v57 }
 0x1c7   : > { %v9879_v10 = vld [vmem:[#allocation4 + $0x60] sm:$0xf0] }
 0x1c8   : > { %4513 = vmatpush.bf16.msra.mxu2 %v10458_v16  ;;  %v14020_v45 = vld [vmem:[#allocation4 + $0x244] sm:$0xf]  ;;  %4488 = vmatpush.bf16.msra.mxu0 %v9914_v31  ;;  %v9882_v26 = vor.u32 %v13956_v37, %v9879_v10 }
 0x1c9   : > { %v10135_v8 = vld [vmem:[#allocation4 + $0x260] sm:$0xf0] }
 0x1ca   : > { %4526 = vmatpush.bf16.msra.mxu3 %v10714_v56  ;;  %v14084_v30 = vld [vmem:[#allocation4 + $0x444] sm:$0xf]  ;;  %4501 = vmatpush.bf16.msra.mxu1 %v10170_v58  ;;  %v10138_v47 = vor.u32 %v14020_v45, %v10135_v8 }
 0x1cb   : > { %v10391_v11 = vld [vmem:[#allocation4 + $0x460] sm:$0xf0] }
 0x1cc   : > { %v14148_v5 = vld [vmem:[#allocation4 + $0x644] sm:$0xf]  ;;  %4514 = vmatpush.bf16.msra.mxu2 %v10426_v62  ;;  %v10394_v24 = vor.u32 %v14084_v30, %v10391_v11  ;;  %4489 = vmatpush.bf16.msra.mxu0 %v9882_v26 }
 0x1cd   : > { %v10647_v46 = vld [vmem:[#allocation4 + $0x660] sm:$0xf0] }
 0x1ce   : > { %v13948_v54 = vld [vmem:[#allocation4 + $0x4] sm:$0xf]  ;;  %4527 = vmatpush.bf16.msra.mxu3 %v10682_v13  ;;  %v10650_v51 = vor.u32 %v14148_v5, %v10647_v46  ;;  %4502 = vmatpush.bf16.msra.mxu1 %v10138_v47 }
 0x1cf   : > { %v9847_v9 = vld [vmem:[#allocation4 + $0x20] sm:$0xf0] }
 0x1d0   : > { %v14012_v49 = vld [vmem:[#allocation4 + $0x204] sm:$0xf]  ;;  %v9850_v43 = vor.u32 %v13948_v54, %v9847_v9  ;;  %4515 = vmatpush.bf16.msra.mxu2 %v10394_v24 }
 0x1d1   : > { %v10103_v35 = vld [vmem:[#allocation4 + $0x220] sm:$0xf0] }
 0x1d2   : > { %v14076_v40 = vld [vmem:[#allocation4 + $0x404] sm:$0xf]  ;;  %v10106_v27 = vor.u32 %v14012_v49, %v10103_v35  ;;  %4528 = vmatpush.bf16.msra.mxu3 %v10650_v51  ;;  %4490 = vmatpush.bf16.msra.mxu0 %v9850_v43 }
 0x1d3   : > { %v10359_v7 = vld [vmem:[#allocation4 + $0x420] sm:$0xf0] }
 0x1d4   : > { %v14140_v12 = vld [vmem:[#allocation4 + $0x604] sm:$0xf]  ;;  %v10362_v28 = vor.u32 %v14076_v40, %v10359_v7  ;;  %4503 = vmatpush.bf16.msra.mxu1 %v10106_v27 }
 0x1d5   : > { %v10615_v63 = vld [vmem:[#allocation4 + $0x620] sm:$0xf0]  ;;  %4491 = vmatmul.bf16.vlgmr.msra.gmra.mxu0 %v16220_v22 }
 0x1d6   : > { %v14260_v14 = vld [vmem:[#allocation4 + $0x9c4] sm:$0xf]  ;;  %v10618_v20 = vor.u32 %v14140_v12, %v10615_v63  ;;  %4516 = vmatpush.bf16.msra.mxu2 %v10362_v28 }
 0x1d7   : > { %v11095_v36 = vld [vmem:[#allocation4 + $0x9e0] sm:$0xf0]  ;;  %4504 = vmatmul.bf16.vlgmr.msra.gmra.mxu1 %v16227_v17 }
 0x1d8   : > { %v14324_v15 = vld [vmem:[#allocation4 + $0xbc4] sm:$0xf]  ;;  %v11098_v39 = vor.u32 %v14260_v14, %v11095_v36  ;;  %4529 = vmatpush.bf16.msra.mxu3 %v10618_v20 }
 0x1d9   : > { %v11351_v0 = vld [vmem:[#allocation4 + $0xbe0] sm:$0xf0]  ;;  %4517 = vmatmul.bf16.vlgmr.msra.gmra.mxu2 %v16216_v33 }
 0x1da   : > { %v14388_v2 = vld [vmem:[#allocation4 + $0xdc4] sm:$0xf]  ;;  %v11354_v6 = vor.u32 %v14324_v15, %v11351_v0  ;;  %4535 = vmatpush.bf16.msrb.mxu0 %v11098_v39 }
 0x1db   : > { %v11607_v61 = vld [vmem:[#allocation4 + $0xde0] sm:$0xf0]  ;;  %4530 = vmatmul.bf16.vlgmr.msra.gmra.mxu3 %v16223_v23 }
 0x1dc   : > { %v14452_v3 = vld [vmem:[#allocation4 + $0xfc4] sm:$0xf]  ;;  %v11610_v55 = vor.u32 %v14388_v2, %v11607_v61  ;;  %4548 = vmatpush.bf16.msrb.mxu1 %v11354_v6 }
 0x1dd   : > { %v11863_v29 = vld [vmem:[#allocation4 + $0xfe0] sm:$0xf0] }
 0x1de   : > { %v14252_v44 = vld [vmem:[#allocation4 + $0x984] sm:$0xf]  ;;  %v11866_v4 = vor.u32 %v14452_v3, %v11863_v29  ;;  %4561 = vmatpush.bf16.msrb.mxu2 %v11610_v55 }
 0x1df   : > { %v11063_v1 = vld [vmem:[#allocation4 + $0x9a0] sm:$0xf0] }
 0x1e0   : > { %v14316_v41 = vld [vmem:[#allocation4 + $0xb84] sm:$0xf]  ;;  %v11066_v52 = vor.u32 %v14252_v44, %v11063_v1  ;;  %4574 = vmatpush.bf16.msrb.mxu3 %v11866_v4 }
 0x1e1   : > { %v11319_v19 = vld [vmem:[#allocation4 + $0xba0] sm:$0xf0] }
 0x1e2   : > { %v14380_v18 = vld [vmem:[#allocation4 + $0xd84] sm:$0xf]  ;;  %v11322_v53 = vor.u32 %v14316_v41, %v11319_v19  ;;  %4536 = vmatpush.bf16.msrb.mxu0 %v11066_v52 }
 0x1e3   : > { %v11575_v60 = vld [vmem:[#allocation4 + $0xda0] sm:$0xf0] }
 0x1e4   : > { %v14444_v16 = vld [vmem:[#allocation4 + $0xf84] sm:$0xf]  ;;  %v11578_v56 = vor.u32 %v14380_v18, %v11575_v60  ;;  %4549 = vmatpush.bf16.msrb.mxu1 %v11322_v53 }
 0x1e5   : > { %v11831_v48 = vld [vmem:[#allocation4 + $0xfa0] sm:$0xf0] }
 0x1e6   : > { %v14244_v38 = vld [vmem:[#allocation4 + $0x944] sm:$0xf]  ;;  %v11834_v34 = vor.u32 %v14444_v16, %v11831_v48  ;;  %4562 = vmatpush.bf16.msrb.mxu2 %v11578_v56 }
 0x1e7   : > { %v11031_v59 = vld [vmem:[#allocation4 + $0x960] sm:$0xf0] }
 0x1e8   : > { %v14308_v21 = vld [vmem:[#allocation4 + $0xb44] sm:$0xf]  ;;  %v11034_v10 = vor.u32 %v14244_v38, %v11031_v59  ;;  %4575 = vmatpush.bf16.msrb.mxu3 %v11834_v34 }
 0x1e9   : > { %v11287_v57 = vld [vmem:[#allocation4 + $0xb60] sm:$0xf0] }
 0x1ea   : > { %v14372_v31 = vld [vmem:[#allocation4 + $0xd44] sm:$0xf]  ;;  %v11290_v45 = vor.u32 %v14308_v21, %v11287_v57  ;;  %4537 = vmatpush.bf16.msrb.mxu0 %v11034_v10 }
 0x1eb   : > { %v11543_v58 = vld [vmem:[#allocation4 + $0xd60] sm:$0xf0] }
 0x1ec   : > { %v14436_v62 = vld [vmem:[#allocation4 + $0xf44] sm:$0xf]  ;;  %v11546_v13 = vor.u32 %v14372_v31, %v11543_v58  ;;  %4550 = vmatpush.bf16.msrb.mxu1 %v11290_v45 }
 0x1ed   : > { %v11799_v37 = vld [vmem:[#allocation4 + $0xf60] sm:$0xf0] }
 0x1ee   : > { %v14236_v8 = vld [vmem:[#allocation4 + $0x904] sm:$0xf]  ;;  %v11802_v5 = vor.u32 %v14436_v62, %v11799_v37  ;;  %4563 = vmatpush.bf16.msrb.mxu2 %v11546_v13 }
 0x1ef   : > { %v10999_v30 = vld [vmem:[#allocation4 + $0x920] sm:$0xf0] }
 0x1f0   : > { %v14300_v11 = vld [vmem:[#allocation4 + $0xb04] sm:$0xf]  ;;  %v11002_v24 = vor.u32 %v14236_v8, %v10999_v30  ;;  %4576 = vmatpush.bf16.msrb.mxu3 %v11802_v5  ;;  %v10077_v30 = vld [vmem:[#allocation4 + $0x1c8] sm:$0xf] }
 0x1f1   : > { %v11255_v46 = vld [vmem:[#allocation4 + $0xb20] sm:$0xf0]  ;;  %v10333_v5 = vld [vmem:[#allocation4 + $0x3c8] sm:$0xf] }
 0x1f2   : > { %v14364_v26 = vld [vmem:[#allocation4 + $0xd04] sm:$0xf]  ;;  %v11258_v49 = vor.u32 %v14300_v11, %v11255_v46  ;;  %4538 = vmatpush.bf16.msrb.mxu0 %v11002_v24  ;;  %v14009_v11 = vld [vmem:[#allocation4 + $0x1e4] sm:$0xf0] }
 0x1f3   : > { %v11511_v54 = vld [vmem:[#allocation4 + $0xd20] sm:$0xf0] }
 0x1f4   : > { %v14428_v9 = vld [vmem:[#allocation4 + $0xf04] sm:$0xf]  ;;  %v11514_v35 = vor.u32 %v14364_v26, %v11511_v54  ;;  %4551 = vmatpush.bf16.msrb.mxu1 %v11258_v49  ;;  %v14073_v26 = vld [vmem:[#allocation4 + $0x3e4] sm:$0xf0] }
 0x1f5   : > { %v11767_v47 = vld [vmem:[#allocation4 + $0xf20] sm:$0xf0]  ;;  %v10589_v54 = vld [vmem:[#allocation4 + $0x5c8] sm:$0xf] }
 0x1f6   : > { %v14228_v40 = vld [vmem:[#allocation4 + $0x8c4] sm:$0xf]  ;;  %v11770_v12 = vor.u32 %v14428_v9, %v11767_v47  ;;  %4564 = vmatpush.bf16.msrb.mxu2 %v11514_v35  ;;  %v14137_v9 = vld [vmem:[#allocation4 + $0x5e4] sm:$0xf0] }
 0x1f7   : > { %v10967_v51 = vld [vmem:[#allocation4 + $0x8e0] sm:$0xf0]  ;;  %v10845_v49 = vld [vmem:[#allocation4 + $0x7c8] sm:$0xf] }
 0x1f8   : > { %v14292_v7 = vld [vmem:[#allocation4 + $0xac4] sm:$0xf]  ;;  %v10970_v0 = vor.u32 %v14228_v40, %v10967_v51  ;;  %4577 = vmatpush.bf16.msrb.mxu3 %v11770_v12  ;;  %v14201_v35 = vld [vmem:[#allocation4 + $0x7e4] sm:$0xf0]  ;;  %v10078_v51 = vor.u32 %v14009_v11, %v10077_v30  ;;  %v10590_v12 = vor.u32 %v14137_v9, %v10589_v54 }
 0x1f9   : > { %v11223_v63 = vld [vmem:[#allocation4 + $0xae0] sm:$0xf0]  ;;  %v10461_v30 = vld [vmem:[#allocation4 + $0x4c8] sm:$0xf] }
 0x1fa   : > { %v14356_v14 = vld [vmem:[#allocation4 + $0xcc4] sm:$0xf]  ;;  %v11226_v2 = vor.u32 %v14292_v7, %v11223_v63  ;;  %4539 = vmatpush.bf16.msrb.mxu0 %v10970_v0  ;;  %v10334_v7 = vor.u32 %v14073_v26, %v10333_v5  ;;  %v10045_v63 = vld [vmem:[#allocation4 + $0x188] sm:$0xf] }
 0x1fb   : > { %v11479_v36 = vld [vmem:[#allocation4 + $0xce0] sm:$0xf0]  ;;  %v10557_v0 = vld [vmem:[#allocation4 + $0x588] sm:$0xf] }
 0x1fc   : > { %v14420_v15 = vld [vmem:[#allocation4 + $0xec4] sm:$0xf]  ;;  %v11482_v61 = vor.u32 %v14356_v14, %v11479_v36  ;;  %4552 = vmatpush.bf16.msrb.mxu1 %v11226_v2  ;;  %v14001_v14 = vld [vmem:[#allocation4 + $0x1a4] sm:$0xf0] }
 0x1fd   : > { %v11735_v43 = vld [vmem:[#allocation4 + $0xee0] sm:$0xf0]  ;;  %v10301_v36 = vld [vmem:[#allocation4 + $0x388] sm:$0xf] }
 0x1fe   : > { %v14220_v27 = vld [vmem:[#allocation4 + $0x884] sm:$0xf]  ;;  %v11738_v29 = vor.u32 %v14420_v15, %v11735_v43  ;;  %4565 = vmatpush.bf16.msrb.mxu2 %v11482_v61  ;;  %v10846_v15 = vor.u32 %v14201_v35, %v10845_v49  ;;  %v14065_v43 = vld [vmem:[#allocation4 + $0x3a4] sm:$0xf0] }
 0x1ff   : > { %v10935_v28 = vld [vmem:[#allocation4 + $0x8a0] sm:$0xf0]  ;;  %v14129_v2 = vld [vmem:[#allocation4 + $0x5a4] sm:$0xf0] }
 0x200   : > { %v14284_v3 = vld [vmem:[#allocation4 + $0xa84] sm:$0xf]  ;;  %v10938_v1 = vor.u32 %v14220_v27, %v10935_v28  ;;  %4578 = vmatpush.bf16.msrb.mxu3 %v11738_v29  ;;  %v10813_v61 = vld [vmem:[#allocation4 + $0x788] sm:$0xf]  ;;  %v10046_v28 = vor.u32 %v14001_v14, %v10045_v63  ;;  %v10558_v29 = vor.u32 %v14129_v2, %v10557_v0 }
 0x201   : > { %v11191_v20 = vld [vmem:[#allocation4 + $0xaa0] sm:$0xf0]  ;;  %v14193_v27 = vld [vmem:[#allocation4 + $0x7a4] sm:$0xf0] }
 0x202   : > { %v14348_v39 = vld [vmem:[#allocation4 + $0xc84] sm:$0xf]  ;;  %v11194_v41 = vor.u32 %v14284_v3, %v11191_v20  ;;  %4540 = vmatpush.bf16.msrb.mxu0 %v10938_v1  ;;  %v10302_v3 = vor.u32 %v14065_v43, %v10301_v36  ;;  %v10013_v20 = vld [vmem:[#allocation4 + $0x148] sm:$0xf] }
 0x203   : > { %v11447_v6 = vld [vmem:[#allocation4 + $0xca0] sm:$0xf0]  ;;  %v10525_v1 = vld [vmem:[#allocation4 + $0x548] sm:$0xf] }
 0x204   : > { %v14412_v55 = vld [vmem:[#allocation4 + $0xe84] sm:$0xf]  ;;  %v11450_v4 = vor.u32 %v14348_v39, %v11447_v6  ;;  %4553 = vmatpush.bf16.msrb.mxu1 %v11194_v41  ;;  %v13993_v39 = vld [vmem:[#allocation4 + $0x164] sm:$0xf0] }
 0x205   : > { %v11703_v44 = vld [vmem:[#allocation4 + $0xea0] sm:$0xf0]  ;;  %v10269_v6 = vld [vmem:[#allocation4 + $0x348] sm:$0xf] }
 0x206   : > { %v14212_v19 = vld [vmem:[#allocation4 + $0x844] sm:$0xf]  ;;  %v11706_v16 = vor.u32 %v14412_v55, %v11703_v44  ;;  %4566 = vmatpush.bf16.msrb.mxu2 %v11450_v4  ;;  %v10814_v55 = vor.u32 %v14193_v27, %v10813_v61  ;;  %v14057_v44 = vld [vmem:[#allocation4 + $0x364] sm:$0xf0] }
 0x207   : > { %v10903_v18 = vld [vmem:[#allocation4 + $0x860] sm:$0xf0]  ;;  %v14121_v41 = vld [vmem:[#allocation4 + $0x564] sm:$0xf0] }
 0x208   : > { %v14276_v60 = vld [vmem:[#allocation4 + $0xa44] sm:$0xf]  ;;  %v10906_v59 = vor.u32 %v14212_v19, %v10903_v18  ;;  %4579 = vmatpush.bf16.msrb.mxu3 %v11706_v16  ;;  %v10781_v4 = vld [vmem:[#allocation4 + $0x748] sm:$0xf]  ;;  %v10014_v18 = vor.u32 %v13993_v39, %v10013_v20  ;;  %v10526_v16 = vor.u32 %v14121_v41, %v10525_v1 }
 0x209   : > { %v11159_v48 = vld [vmem:[#allocation4 + $0xa60] sm:$0xf0]  ;;  %v14185_v19 = vld [vmem:[#allocation4 + $0x764] sm:$0xf0] }
 0x20a   : > { %v14340_v52 = vld [vmem:[#allocation4 + $0xc44] sm:$0xf]  ;;  %v11162_v57 = vor.u32 %v14276_v60, %v11159_v48  ;;  %4541 = vmatpush.bf16.msrb.mxu0 %v10906_v59  ;;  %v10270_v60 = vor.u32 %v14057_v44, %v10269_v6  ;;  %v9981_v48 = vld [vmem:[#allocation4 + $0x108] sm:$0xf] }
 0x20b   : > { %v11415_v53 = vld [vmem:[#allocation4 + $0xc60] sm:$0xf0]  ;;  %v10493_v59 = vld [vmem:[#allocation4 + $0x508] sm:$0xf] }
 0x20c   : > { %v14404_v56 = vld [vmem:[#allocation4 + $0xe44] sm:$0xf]  ;;  %v11418_v31 = vor.u32 %v14340_v52, %v11415_v53  ;;  %4554 = vmatpush.bf16.msrb.mxu1 %v11162_v57  ;;  %v13985_v52 = vld [vmem:[#allocation4 + $0x124] sm:$0xf0] }
 0x20d   : > { %v11671_v38 = vld [vmem:[#allocation4 + $0xe60] sm:$0xf0]  ;;  %v10237_v53 = vld [vmem:[#allocation4 + $0x308] sm:$0xf] }
 0x20e   : > { %v14204_v21 = vld [vmem:[#allocation4 + $0x804] sm:$0xf]  ;;  %v11674_v10 = vor.u32 %v14404_v56, %v11671_v38  ;;  %4567 = vmatpush.bf16.msrb.mxu2 %v11418_v31  ;;  %v10782_v56 = vor.u32 %v14185_v19, %v10781_v4  ;;  %v14049_v38 = vld [vmem:[#allocation4 + $0x324] sm:$0xf0]  ;;  %v9982_v31 = vor.u32 %v13985_v52, %v9981_v48 }
 0x20f   : > { %v10871_v34 = vld [vmem:[#allocation4 + $0x820] sm:$0xf0]  ;;  %v14177_v57 = vld [vmem:[#allocation4 + $0x724] sm:$0xf0] }
 0x210   : > { %v14268_v58 = vld [vmem:[#allocation4 + $0xa04] sm:$0xf]  ;;  %v10874_v46 = vor.u32 %v14204_v21, %v10871_v34  ;;  %4580 = vmatpush.bf16.msrb.mxu3 %v11674_v10  ;;  %v14113_v21 = vld [vmem:[#allocation4 + $0x524] sm:$0xf0] }
 0x211   : > { %v11127_v62 = vld [vmem:[#allocation4 + $0xa20] sm:$0xf0]  ;;  %v10749_v34 = vld [vmem:[#allocation4 + $0x708] sm:$0xf] }
 0x212   : > { %v14332_v37 = vld [vmem:[#allocation4 + $0xc04] sm:$0xf]  ;;  %v11130_v47 = vor.u32 %v14268_v58, %v11127_v62  ;;  %4542 = vmatpush.bf16.msrb.mxu0 %v10874_v46  ;;  %v10238_v58 = vor.u32 %v14049_v38, %v10237_v53  ;;  %v10494_v62 = vor.u32 %v14113_v21, %v10493_v59  ;;  %v13977_v10 = vld [vmem:[#allocation4 + $0xe4] sm:$0xf0] }
 0x213   : > { %v11383_v45 = vld [vmem:[#allocation4 + $0xc20] sm:$0xf0]  ;;  %v14105_v11 = vld [vmem:[#allocation4 + $0x4e4] sm:$0xf0] }
 0x214   : > { %v14396_v13 = vld [vmem:[#allocation4 + $0xe04] sm:$0xf]  ;;  %v11386_v24 = vor.u32 %v14332_v37, %v11383_v45  ;;  %4555 = vmatpush.bf16.msrb.mxu1 %v11130_v47  ;;  %v9949_v37 = vld [vmem:[#allocation4 + $0xc8] sm:$0xf]  ;;  %v10462_v9 = vor.u32 %v14105_v11, %v10461_v30 }
 0x215   : > { %v11639_v8 = vld [vmem:[#allocation4 + $0xe20] sm:$0xf0]  ;;  %4543 = vmatmul.bf16.vlgmr.msrb.gmra.mxu0 %v16247_v25  ;;  %v10205_v45 = vld [vmem:[#allocation4 + $0x2c8] sm:$0xf]  ;;  %v9950_v26 = vor.u32 %v13977_v10, %v9949_v37 }
 0x216   : > { %v11642_v40 = vor.u32 %v14396_v13, %v11639_v8  ;;  %4568 = vmatpush.bf16.msrb.mxu2 %v11386_v24  ;;  %4587 = vmatpush.bf16.msra.mxu0 %v10078_v51  ;;  %v10750_v13 = vor.u32 %v14177_v57, %v10749_v34  ;;  %v14041_v8 = vld [vmem:[#allocation4 + $0x2e4] sm:$0xf0] }
 0x217   : > { %4556 = vmatmul.bf16.vlgmr.msrb.gmra.mxu1 %v16252_v42  ;;  %v10717_v5 = vld [vmem:[#allocation4 + $0x6c8] sm:$0xf]  ;;  %v10206_v54 = vor.u32 %v14041_v8, %v10205_v45 }
 0x218   : > { %4581 = vmatpush.bf16.msrb.mxu3 %v11642_v40  ;;  %4600 = vmatpush.bf16.msra.mxu1 %v10334_v7  ;;  %v14169_v46 = vld [vmem:[#allocation4 + $0x6e4] sm:$0xf0] }
 0x219   : > { %4569 = vmatmul.bf16.vlgmr.msrb.gmra.mxu2 %v16245_v32  ;;  %v9917_v47 = vld [vmem:[#allocation4 + $0x88] sm:$0xf]  ;;  %v10718_v35 = vor.u32 %v14169_v46, %v10717_v5 }
 0x21a   : > { %4613 = vmatpush.bf16.msra.mxu2 %v10590_v12  ;;  %4588 = vmatpush.bf16.msra.mxu0 %v10046_v28  ;;  %v13969_v24 = vld [vmem:[#allocation4 + $0xa4] sm:$0xf0] }
 0x21b   : > { %4582 = vmatmul.bf16.vlgmr.msrb.gmra.mxu3 %v16249_v50  ;;  %v10173_v49 = vld [vmem:[#allocation4 + $0x288] sm:$0xf]  ;;  %v9918_v14 = vor.u32 %v13969_v24, %v9917_v47 }
 0x21c   : > { %4626 = vmatpush.bf16.msra.mxu3 %v10846_v15  ;;  %4601 = vmatpush.bf16.msra.mxu1 %v10302_v3  ;;  %v14033_v40 = vld [vmem:[#allocation4 + $0x2a4] sm:$0xf0] }
 0x21d   : > { %v10429_v51 = vld [vmem:[#allocation4 + $0x488] sm:$0xf]  ;;  %v10174_v36 = vor.u32 %v14033_v40, %v10173_v49 }
 0x21e   : > { %4614 = vmatpush.bf16.msra.mxu2 %v10558_v29  ;;  %4589 = vmatpush.bf16.msra.mxu0 %v10014_v18  ;;  %v14097_v7 = vld [vmem:[#allocation4 + $0x4a4] sm:$0xf0] }
 0x21f   : > { %v10685_v12 = vld [vmem:[#allocation4 + $0x688] sm:$0xf]  ;;  %v10430_v15 = vor.u32 %v14097_v7, %v10429_v51 }
 0x220   : > { %4627 = vmatpush.bf16.msra.mxu3 %v10814_v55  ;;  %4602 = vmatpush.bf16.msra.mxu1 %v10270_v60  ;;  %v14161_v63 = vld [vmem:[#allocation4 + $0x6a4] sm:$0xf0] }
 0x221   : > { %v9885_v43 = vld [vmem:[#allocation4 + $0x48] sm:$0xf]  ;;  %v10686_v61 = vor.u32 %v14161_v63, %v10685_v12 }
 0x222   : > { %4615 = vmatpush.bf16.msra.mxu2 %v10526_v16  ;;  %4590 = vmatpush.bf16.msra.mxu0 %v9982_v31  ;;  %v13961_v0 = vld [vmem:[#allocation4 + $0x64] sm:$0xf0] }
 0x223   : > { %v10141_v2 = vld [vmem:[#allocation4 + $0x248] sm:$0xf]  ;;  %v9886_v39 = vor.u32 %v13961_v0, %v9885_v43 }
 0x224   : > { %4628 = vmatpush.bf16.msra.mxu3 %v10782_v56  ;;  %4603 = vmatpush.bf16.msra.mxu1 %v10238_v58  ;;  %v14025_v27 = vld [vmem:[#allocation4 + $0x264] sm:$0xf0] }
 0x225   : > { %v10397_v28 = vld [vmem:[#allocation4 + $0x448] sm:$0xf]  ;;  %v10142_v44 = vor.u32 %v14025_v27, %v10141_v2 }
 0x226   : > { %4616 = vmatpush.bf16.msra.mxu2 %v10494_v62  ;;  %4591 = vmatpush.bf16.msra.mxu0 %v9950_v26  ;;  %v14089_v3 = vld [vmem:[#allocation4 + $0x464] sm:$0xf0] }
 0x227   : > { %v10653_v29 = vld [vmem:[#allocation4 + $0x648] sm:$0xf]  ;;  %v10398_v1 = vor.u32 %v14089_v3, %v10397_v28 }
 0x228   : > { %4629 = vmatpush.bf16.msra.mxu3 %v10750_v13  ;;  %4604 = vmatpush.bf16.msra.mxu1 %v10206_v54  ;;  %v14153_v20 = vld [vmem:[#allocation4 + $0x664] sm:$0xf0] }
 0x229   : > { %v9853_v6 = vld [vmem:[#allocation4 + $0x8] sm:$0xf]  ;;  %v10654_v18 = vor.u32 %v14153_v20, %v10653_v29 }
 0x22a   : > { %4617 = vmatpush.bf16.msra.mxu2 %v10462_v9  ;;  %4592 = vmatpush.bf16.msra.mxu0 %v9918_v14  ;;  %v13953_v55 = vld [vmem:[#allocation4 + $0x24] sm:$0xf0] }
 0x22b   : > { %v10109_v41 = vld [vmem:[#allocation4 + $0x208] sm:$0xf]  ;;  %v9854_v38 = vor.u32 %v13953_v55, %v9853_v6 }
 0x22c   : > { %4630 = vmatpush.bf16.msra.mxu3 %v10718_v35  ;;  %4605 = vmatpush.bf16.msra.mxu1 %v10174_v36  ;;  %v14017_v4 = vld [vmem:[#allocation4 + $0x224] sm:$0xf0] }
 0x22d   : > { %v10365_v19 = vld [vmem:[#allocation4 + $0x408] sm:$0xf]  ;;  %v10110_v57 = vor.u32 %v14017_v4, %v10109_v41 }
 0x22e   : > { %4618 = vmatpush.bf16.msra.mxu2 %v10430_v15  ;;  %v14081_v60 = vld [vmem:[#allocation4 + $0x424] sm:$0xf0]  ;;  %4593 = vmatpush.bf16.msra.mxu0 %v9886_v39 }
 0x22f   : > { %v10621_v16 = vld [vmem:[#allocation4 + $0x608] sm:$0xf]  ;;  %v10366_v31 = vor.u32 %v14081_v60, %v10365_v19 }
 0x230   : > { %4631 = vmatpush.bf16.msra.mxu3 %v10686_v61  ;;  %v14145_v48 = vld [vmem:[#allocation4 + $0x624] sm:$0xf0]  ;;  %4606 = vmatpush.bf16.msra.mxu1 %v10142_v44 }
 0x231   : > { %v11101_v52 = vld [vmem:[#allocation4 + $0x9c8] sm:$0xf]  ;;  %v10622_v37 = vor.u32 %v14145_v48, %v10621_v16 }
 0x232   : > { %v14265_v53 = vld [vmem:[#allocation4 + $0x9e4] sm:$0xf0]  ;;  %4619 = vmatpush.bf16.msra.mxu2 %v10398_v1  ;;  %4594 = vmatpush.bf16.msra.mxu0 %v9854_v38 }
 0x233   : > { %v11357_v56 = vld [vmem:[#allocation4 + $0xbc8] sm:$0xf]  ;;  %v11102_v10 = vor.u32 %v14265_v53, %v11101_v52 }
 0x234   : > { %v14329_v59 = vld [vmem:[#allocation4 + $0xbe4] sm:$0xf0]  ;;  %4632 = vmatpush.bf16.msra.mxu3 %v10654_v18  ;;  %4607 = vmatpush.bf16.msra.mxu1 %v10110_v57 }
 0x235   : > { %v11613_v21 = vld [vmem:[#allocation4 + $0xdc8] sm:$0xf]  ;;  %v11358_v45 = vor.u32 %v14329_v59, %v11357_v56  ;;  %4595 = vmatmul.bf16.vlgmr.msra.gmra.mxu0 %v16220_v22 }
 0x236   : > { %v14393_v34 = vld [vmem:[#allocation4 + $0xde4] sm:$0xf0]  ;;  %4620 = vmatpush.bf16.msra.mxu2 %v10366_v31  ;;  %4639 = vmatpush.bf16.msrb.mxu0 %v11102_v10 }
 0x237   : > { %v11869_v58 = vld [vmem:[#allocation4 + $0xfc8] sm:$0xf]  ;;  %v11614_v13 = vor.u32 %v14393_v34, %v11613_v21  ;;  %4608 = vmatmul.bf16.vlgmr.msra.gmra.mxu1 %v16227_v17 }
 0x238   : > { %v14457_v62 = vld [vmem:[#allocation4 + $0xfe4] sm:$0xf0]  ;;  %4633 = vmatpush.bf16.msra.mxu3 %v10622_v37  ;;  %4652 = vmatpush.bf16.msrb.mxu1 %v11358_v45 }
 0x239   : > { %v11069_v8 = vld [vmem:[#allocation4 + $0x988] sm:$0xf]  ;;  %v11870_v5 = vor.u32 %v14457_v62, %v11869_v58  ;;  %4621 = vmatmul.bf16.vlgmr.msra.gmra.mxu2 %v16216_v33 }
 0x23a   : > { %v14257_v30 = vld [vmem:[#allocation4 + $0x9a4] sm:$0xf0]  ;;  %4665 = vmatpush.bf16.msrb.mxu2 %v11614_v13 }
 0x23b   : > { %v11325_v11 = vld [vmem:[#allocation4 + $0xb88] sm:$0xf]  ;;  %v11070_v24 = vor.u32 %v14257_v30, %v11069_v8  ;;  %4634 = vmatmul.bf16.vlgmr.msra.gmra.mxu3 %v16223_v23 }
 0x23c   : > { %v14321_v46 = vld [vmem:[#allocation4 + $0xba4] sm:$0xf0]  ;;  %4678 = vmatpush.bf16.msrb.mxu3 %v11870_v5 }
 0x23d   : > { %v11581_v26 = vld [vmem:[#allocation4 + $0xd88] sm:$0xf]  ;;  %v11326_v49 = vor.u32 %v14321_v46, %v11325_v11  ;;  %4640 = vmatpush.bf16.msrb.mxu0 %v11070_v24 }
 0x23e   : > { %v14385_v54 = vld [vmem:[#allocation4 + $0xda4] sm:$0xf0] }
 0x23f   : > { %v11837_v9 = vld [vmem:[#allocation4 + $0xf88] sm:$0xf]  ;;  %v11582_v35 = vor.u32 %v14385_v54, %v11581_v26  ;;  %4653 = vmatpush.bf16.msrb.mxu1 %v11326_v49 }
 0x240   : > { %v14449_v47 = vld [vmem:[#allocation4 + $0xfa4] sm:$0xf0] }
 0x241   : > { %v11037_v40 = vld [vmem:[#allocation4 + $0x948] sm:$0xf]  ;;  %v11838_v12 = vor.u32 %v14449_v47, %v11837_v9  ;;  %4666 = vmatpush.bf16.msrb.mxu2 %v11582_v35 }
 0x242   : > { %v14249_v51 = vld [vmem:[#allocation4 + $0x964] sm:$0xf0] }
 0x243   : > { %v11293_v7 = vld [vmem:[#allocation4 + $0xb48] sm:$0xf]  ;;  %v11038_v0 = vor.u32 %v14249_v51, %v11037_v40  ;;  %4679 = vmatpush.bf16.msrb.mxu3 %v11838_v12  ;;  %v4388_v51 = vpop.f32.mrf.mxu0 }
 0x244   : > { %v14313_v63 = vld [vmem:[#allocation4 + $0xb64] sm:$0xf0] }
 0x245   : > { %v11549_v14 = vld [vmem:[#allocation4 + $0xd48] sm:$0xf]  ;;  %v11294_v2 = vor.u32 %v14313_v63, %v11293_v7  ;;  %4641 = vmatpush.bf16.msrb.mxu0 %v11038_v0 }
 0x246   : > { %v14377_v36 = vld [vmem:[#allocation4 + $0xd64] sm:$0xf0] }
 0x247   : > { %v11805_v15 = vld [vmem:[#allocation4 + $0xf48] sm:$0xf]  ;;  %v11550_v61 = vor.u32 %v14377_v36, %v11549_v14  ;;  %4654 = vmatpush.bf16.msrb.mxu1 %v11294_v2 }
 0x248   : > { %v14441_v43 = vld [vmem:[#allocation4 + $0xf64] sm:$0xf0] }
 0x249   : > { %v11005_v27 = vld [vmem:[#allocation4 + $0x908] sm:$0xf]  ;;  %v11806_v29 = vor.u32 %v14441_v43, %v11805_v15  ;;  %4667 = vmatpush.bf16.msrb.mxu2 %v11550_v61  ;;  %v4401_v15 = vpop.f32.mrf.mxu1  ;;  %v4414_v61 = vpop.f32.mrf.mxu2 }
 0x24a   : > { %v14241_v28 = vld [vmem:[#allocation4 + $0x924] sm:$0xf0] }
 0x24b   : > { %v11261_v3 = vld [vmem:[#allocation4 + $0xb08] sm:$0xf]  ;;  %v11006_v1 = vor.u32 %v14241_v28, %v11005_v27  ;;  %4680 = vmatpush.bf16.msrb.mxu3 %v11806_v29  ;;  %v4402_v28 = vadd.f32 %v4401_v15, %v4388_v51  ;;  %v14181_v51 = vld [vmem:[#allocation4 + $0x74c] sm:$0xf] }
 0x24c   : > { %v14305_v20 = vld [vmem:[#allocation4 + $0xb24] sm:$0xf0] }
 0x24d   : > { %v11517_v39 = vld [vmem:[#allocation4 + $0xd08] sm:$0xf]  ;;  %v11262_v41 = vor.u32 %v14305_v20, %v11261_v3  ;;  %4642 = vmatpush.bf16.msrb.mxu0 %v11006_v1  ;;  %v10335_v1 = vld [vmem:[#allocation4 + $0x3e8] sm:$0xf0] }
 0x24e   : > { %v14369_v6 = vld [vmem:[#allocation4 + $0xd24] sm:$0xf0] }
 0x24f   : > { %v11773_v55 = vld [vmem:[#allocation4 + $0xf08] sm:$0xf]  ;;  %v11518_v4 = vor.u32 %v14369_v6, %v11517_v39  ;;  %4655 = vmatpush.bf16.msrb.mxu1 %v11262_v41  ;;  %v14005_v39 = vld [vmem:[#allocation4 + $0x1cc] sm:$0xf] }
 0x250   : > { %v14433_v44 = vld [vmem:[#allocation4 + $0xf24] sm:$0xf0]  ;;  %v10079_v6 = vld [vmem:[#allocation4 + $0x1e8] sm:$0xf0] }
 0x251   : > { %v10973_v19 = vld [vmem:[#allocation4 + $0x8c8] sm:$0xf]  ;;  %v11774_v16 = vor.u32 %v14433_v44, %v11773_v55  ;;  %4668 = vmatpush.bf16.msrb.mxu2 %v11518_v4  ;;  %v14069_v55 = vld [vmem:[#allocation4 + $0x3cc] sm:$0xf] }
 0x252   : > { %v14233_v18 = vld [vmem:[#allocation4 + $0x8e4] sm:$0xf0]  ;;  %v14133_v41 = vld [vmem:[#allocation4 + $0x5cc] sm:$0xf] }
 0x253   : > { %v11229_v60 = vld [vmem:[#allocation4 + $0xac8] sm:$0xf]  ;;  %v10974_v59 = vor.u32 %v14233_v18, %v10973_v19  ;;  %4681 = vmatpush.bf16.msrb.mxu3 %v11774_v16  ;;  %v10591_v4 = vld [vmem:[#allocation4 + $0x5e8] sm:$0xf0]  ;;  %v4415_v19 = vadd.f32 %v4414_v61, %v4402_v28 }
 0x254   : > { %v14297_v48 = vld [vmem:[#allocation4 + $0xae4] sm:$0xf0]  ;;  %v14197_v16 = vld [vmem:[#allocation4 + $0x7cc] sm:$0xf] }
 0x255   : > { %v11485_v52 = vld [vmem:[#allocation4 + $0xcc8] sm:$0xf]  ;;  %v11230_v21 = vor.u32 %v14297_v48, %v11229_v60  ;;  %4643 = vmatpush.bf16.msrb.mxu0 %v10974_v59  ;;  %v10847_v48 = vld [vmem:[#allocation4 + $0x7e8] sm:$0xf0]  ;;  %v10594_v59 = vor.u32 %v14133_v41, %v10591_v4 }
 0x256   : > { %v14361_v53 = vld [vmem:[#allocation4 + $0xce4] sm:$0xf0]  ;;  %v14109_v28 = vld [vmem:[#allocation4 + $0x50c] sm:$0xf] }
 0x257   : > { %v11741_v56 = vld [vmem:[#allocation4 + $0xec8] sm:$0xf]  ;;  %v11486_v34 = vor.u32 %v14361_v53, %v11485_v52  ;;  %4656 = vmatpush.bf16.msrb.mxu1 %v11230_v21  ;;  %v10082_v53 = vor.u32 %v14005_v39, %v10079_v6 }
 0x258   : > { %v14425_v38 = vld [vmem:[#allocation4 + $0xee4] sm:$0xf0] }
 0x259   : > { %v10941_v57 = vld [vmem:[#allocation4 + $0x888] sm:$0xf]  ;;  %v11742_v62 = vor.u32 %v14425_v38, %v11741_v56  ;;  %4669 = vmatpush.bf16.msrb.mxu2 %v11486_v34  ;;  %v4427_v56 = vpop.f32.mrf.mxu3  ;;  %v10338_v38 = vor.u32 %v14069_v55, %v10335_v1  ;;  %v13997_v34 = vld [vmem:[#allocation4 + $0x18c] sm:$0xf] }
 0x25a   : > { %v14225_v31 = vld [vmem:[#allocation4 + $0x8a4] sm:$0xf0]  ;;  %v16270_v21 = vadd.f32 %v4427_v56, %v4415_v19  ;;  %v13973_v19 = vld [vmem:[#allocation4 + $0xcc] sm:$0xf] }
 0x25b   : > { %v11197_v58 = vld [vmem:[#allocation4 + $0xa88] sm:$0xf]  ;;  %v10942_v30 = vor.u32 %v14225_v31, %v10941_v57  ;;  %4682 = vmatpush.bf16.msrb.mxu3 %v11742_v62  ;;  %v10047_v57 = vld [vmem:[#allocation4 + $0x1a8] sm:$0xf0]  ;;  %v10850_v62 = vor.u32 %v14197_v16, %v10847_v48 }
 0x25c   : > { %v14289_v37 = vld [vmem:[#allocation4 + $0xaa4] sm:$0xf0]  ;;  %v14061_v31 = vld [vmem:[#allocation4 + $0x38c] sm:$0xf] }
 0x25d   : > { %v11453_v10 = vld [vmem:[#allocation4 + $0xc88] sm:$0xf]  ;;  %v11198_v11 = vor.u32 %v14289_v37, %v11197_v58  ;;  %4644 = vmatpush.bf16.msrb.mxu0 %v10942_v30  ;;  %v4390_v58 = vpop.f32.mrf.mxu0  ;;  %v10303_v37 = vld [vmem:[#allocation4 + $0x3a8] sm:$0xf0]  ;;  %v4403_v30 = vpop.f32.mrf.mxu1 }
 0x25e   : > { %v14353_v45 = vld [vmem:[#allocation4 + $0xca4] sm:$0xf0]  ;;  %v10207_v48 = vld [vmem:[#allocation4 + $0x2e8] sm:$0xf0] }
 0x25f   : > { %v11709_v13 = vld [vmem:[#allocation4 + $0xe88] sm:$0xf]  ;;  %v11454_v5 = vor.u32 %v14353_v45, %v11453_v10  ;;  %4657 = vmatpush.bf16.msrb.mxu1 %v11198_v11  ;;  %v14125_v10 = vld [vmem:[#allocation4 + $0x58c] sm:$0xf]  ;;  %v4416_v11 = vpop.f32.mrf.mxu2 }
 0x260   : > { %v14417_v8 = vld [vmem:[#allocation4 + $0xea4] sm:$0xf0]  ;;  %v10559_v45 = vld [vmem:[#allocation4 + $0x5a8] sm:$0xf0] }
 0x261   : > { %v10909_v46 = vld [vmem:[#allocation4 + $0x848] sm:$0xf]  ;;  %v11710_v9 = vor.u32 %v14417_v8, %v11709_v13  ;;  %4670 = vmatpush.bf16.msrb.mxu2 %v11454_v5  ;;  %v14189_v13 = vld [vmem:[#allocation4 + $0x78c] sm:$0xf]  ;;  %v10050_v5 = vor.u32 %v13997_v34, %v10047_v57 }
 0x262   : > { %v14217_v26 = vld [vmem:[#allocation4 + $0x864] sm:$0xf0]  ;;  %v10815_v8 = vld [vmem:[#allocation4 + $0x7a8] sm:$0xf0] }
 0x263   : > { %v11165_v54 = vld [vmem:[#allocation4 + $0xa48] sm:$0xf]  ;;  %v10910_v7 = vor.u32 %v14217_v26, %v10909_v46  ;;  %4683 = vmatpush.bf16.msrb.mxu3 %v11710_v9  ;;  %v10306_v46 = vor.u32 %v14061_v31, %v10303_v37  ;;  %v10562_v26 = vor.u32 %v14125_v10, %v10559_v45  ;;  %v10015_v9 = vld [vmem:[#allocation4 + $0x168] sm:$0xf0] }
 0x264   : > { %v14281_v47 = vld [vmem:[#allocation4 + $0xa64] sm:$0xf0]  ;;  %v9919_v37 = vld [vmem:[#allocation4 + $0xa8] sm:$0xf0] }
 0x265   : > { %v11421_v24 = vld [vmem:[#allocation4 + $0xc48] sm:$0xf]  ;;  %v11166_v14 = vor.u32 %v14281_v47, %v11165_v54  ;;  %4645 = vmatpush.bf16.msrb.mxu0 %v10910_v7  ;;  %v13989_v54 = vld [vmem:[#allocation4 + $0x14c] sm:$0xf]  ;;  %v4440_v6 = vpop.f32.mrf.mxu0  ;;  %v4453_v4 = vpop.f32.mrf.mxu1 }
 0x266   : > { %v14345_v49 = vld [vmem:[#allocation4 + $0xc64] sm:$0xf0]  ;;  %v14053_v47 = vld [vmem:[#allocation4 + $0x34c] sm:$0xf]  ;;  %v4441_v41 = vadd.f32 %v4440_v6, %v16270_v21 }
 0x267   : > { %v11677_v35 = vld [vmem:[#allocation4 + $0xe48] sm:$0xf]  ;;  %v11422_v36 = vor.u32 %v14345_v49, %v11421_v24  ;;  %4658 = vmatpush.bf16.msrb.mxu1 %v11166_v14  ;;  %v10818_v24 = vor.u32 %v14189_v13, %v10815_v8  ;;  %v10271_v49 = vld [vmem:[#allocation4 + $0x368] sm:$0xf0]  ;;  %v4429_v14 = vpop.f32.mrf.mxu3  ;;  %v4466_v58 = vpop.f32.mrf.mxu2 }
 0x268   : > { %v14409_v40 = vld [vmem:[#allocation4 + $0xe64] sm:$0xf0]  ;;  %v10783_v7 = vld [vmem:[#allocation4 + $0x768] sm:$0xf0]  ;;  %v4454_v56 = vadd.f32 %v4453_v4, %v4441_v41 }
 0x269   : > { %v10877_v12 = vld [vmem:[#allocation4 + $0x808] sm:$0xf]  ;;  %v11678_v27 = vor.u32 %v14409_v40, %v11677_v35  ;;  %4671 = vmatpush.bf16.msrb.mxu2 %v11422_v36  ;;  %v14117_v35 = vld [vmem:[#allocation4 + $0x54c] sm:$0xf]  ;;  %v10274_v36 = vor.u32 %v14053_v47, %v10271_v49  ;;  %v10786_v61 = vor.u32 %v14181_v51, %v10783_v7 }
 0x26a   : > { %v14209_v63 = vld [vmem:[#allocation4 + $0x824] sm:$0xf0]  ;;  %v10527_v40 = vld [vmem:[#allocation4 + $0x568] sm:$0xf0]  ;;  %v4467_v13 = vadd.f32 %v4466_v58, %v4454_v56 }
 0x26b   : > { %v11133_v43 = vld [vmem:[#allocation4 + $0xa08] sm:$0xf]  ;;  %v10878_v44 = vor.u32 %v14209_v63, %v10877_v12  ;;  %4684 = vmatpush.bf16.msrb.mxu3 %v11678_v27  ;;  %v15362_v12 = vmov 2.0   ;;  %v10018_v63 = vor.u32 %v13989_v54, %v10015_v9  ;;  %v10530_v15 = vor.u32 %v14117_v35, %v10527_v40  ;;  %v10239_v27 = vld [vmem:[#allocation4 + $0x328] sm:$0xf0] }
 0x26c   : > { %v14273_v0 = vld [vmem:[#allocation4 + $0xa24] sm:$0xf0]  ;;  %15067 = vrcp.f32 %v15362_v12  ;;  %v14029_v10 = vld [vmem:[#allocation4 + $0x28c] sm:$0xf] }
 0x26d   : > { %v11389_v2 = vld [vmem:[#allocation4 + $0xc08] sm:$0xf]  ;;  %v11134_v18 = vor.u32 %v14273_v0, %v11133_v43  ;;  %4646 = vmatpush.bf16.msrb.mxu0 %v10878_v44  ;;  %v13981_v43 = vld [vmem:[#allocation4 + $0x10c] sm:$0xf]  ;;  %v4442_v49 = vpop.f32.mrf.mxu0 }
 0x26e   : > { %v14337_v3 = vld [vmem:[#allocation4 + $0xc24] sm:$0xf0]  ;;  %v9983_v0 = vld [vmem:[#allocation4 + $0x128] sm:$0xf0] }
 0x26f   : > { %v11645_v29 = vld [vmem:[#allocation4 + $0xe08] sm:$0xf]  ;;  %v11390_v60 = vor.u32 %v14337_v3, %v11389_v2  ;;  %4659 = vmatpush.bf16.msrb.mxu1 %v11134_v18  ;;  %v14045_v2 = vld [vmem:[#allocation4 + $0x30c] sm:$0xf]  ;;  %v9986_v39 = vor.u32 %v13981_v43, %v9983_v0  ;;  %v4479_v8 = vpop.f32.mrf.mxu3 }
 0x270   : > { %v14401_v20 = vld [vmem:[#allocation4 + $0xe24] sm:$0xf0]  ;;  %4647 = vmatmul.bf16.vlgmr.msrb.gmra.mxu0 %v16247_v25  ;;  %v10495_v3 = vld [vmem:[#allocation4 + $0x528] sm:$0xf0]  ;;  %v10242_v44 = vor.u32 %v14045_v2, %v10239_v27  ;;  %v16280_v54 = vadd.f32 %v4479_v8, %v4467_v13 }
 0x271   : > { %v11646_v52 = vor.u32 %v14401_v20, %v11645_v29  ;;  %4672 = vmatpush.bf16.msrb.mxu2 %v11390_v60  ;;  %4691 = vmatpush.bf16.msra.mxu0 %v10082_v53  ;;  %v14173_v29 = vld [vmem:[#allocation4 + $0x70c] sm:$0xf]  ;;  %v10498_v1 = vor.u32 %v14109_v28, %v10495_v3 }
 0x272   : > { %4660 = vmatmul.bf16.vlgmr.msrb.gmra.mxu1 %v16252_v42  ;;  %v10751_v20 = vld [vmem:[#allocation4 + $0x728] sm:$0xf0]  ;;  %v16276_v55 = vpop.eup %15067  ;;  %v5212_v14 = vsel %vm1167_vm2, %v16280_v54, 0.0 }
 0x273   : > { %4685 = vmatpush.bf16.msrb.mxu3 %v11646_v52  ;;  %4704 = vmatpush.bf16.msra.mxu1 %v10338_v38  ;;  %v9951_v18 = vld [vmem:[#allocation4 + $0xe8] sm:$0xf0]  ;;  %v10754_v16 = vor.u32 %v14173_v29, %v10751_v20  ;;  %v5269_v57 = vmul.f32 2.0, %v16276_v55  ;;  %v5213_v0 = vrot.slane %v5212_v14, 4  ;;  %vm5273_vm8 = vweird.f32 %v16276_v55 }
 0x274   : > { %4673 = vmatmul.bf16.vlgmr.msrb.gmra.mxu2 %v16245_v32  ;;  %v14037_v60 = vld [vmem:[#allocation4 + $0x2cc] sm:$0xf]  ;;  %v9954_v34 = vor.u32 %v13973_v19, %v9951_v18  ;;  %v4468_v19 = vpop.f32.mrf.mxu2 }
 0x275   : > { %4717 = vmatpush.bf16.msra.mxu2 %v10594_v59  ;;  %4692 = vmatpush.bf16.msra.mxu0 %v10050_v5  ;;  %v14101_v52 = vld [vmem:[#allocation4 + $0x4cc] sm:$0xf]  ;;  %v10210_v31 = vor.u32 %v14037_v60, %v10207_v48  ;;  %v5270_v9 = vsub.f32 1.0, %v5269_v57 }
 0x276   : > { %4686 = vmatmul.bf16.vlgmr.msrb.gmra.mxu3 %v16249_v50  ;;  %v10463_v53 = vld [vmem:[#allocation4 + $0x4e8] sm:$0xf0] }
 0x277   : > { %4730 = vmatpush.bf16.msra.mxu3 %v10850_v62  ;;  %4705 = vmatpush.bf16.msra.mxu1 %v10306_v46  ;;  %v14165_v38 = vld [vmem:[#allocation4 + $0x6cc] sm:$0xf]  ;;  %v10466_v21 = vor.u32 %v14101_v52, %v10463_v53  ;;  %v5271_v27 = vmul.f32 %v16276_v55, %v5270_v9  ;;  %v4481_v52 = vpop.f32.mrf.mxu3 }
 0x278   : > { %v10719_v59 = vld [vmem:[#allocation4 + $0x6e8] sm:$0xf0] }
 0x279   : > { %4718 = vmatpush.bf16.msra.mxu2 %v10562_v26  ;;  %4693 = vmatpush.bf16.msra.mxu0 %v10018_v63  ;;  %v13965_v62 = vld [vmem:[#allocation4 + $0x8c] sm:$0xf]  ;;  %v10722_v45 = vor.u32 %v14165_v38, %v10719_v59  ;;  %v4455_v63 = vpop.f32.mrf.mxu1  ;;  %v5272_v59 = vadd.f32 %v16276_v55, %v5271_v27 }
 0x27a   : > { %v10175_v30 = vld [vmem:[#allocation4 + $0x2a8] sm:$0xf0]  ;;  %v9922_v47 = vor.u32 %v13965_v62, %v9919_v37 }
 0x27b   : > { %4731 = vmatpush.bf16.msra.mxu3 %v10818_v24  ;;  %4706 = vmatpush.bf16.msra.mxu1 %v10274_v36  ;;  %v14093_v11 = vld [vmem:[#allocation4 + $0x48c] sm:$0xf]  ;;  %v10178_v35 = vor.u32 %v14029_v10, %v10175_v30 }
 0x27c   : > { %v10431_v5 = vld [vmem:[#allocation4 + $0x4a8] sm:$0xf0] }
 0x27d   : > { %4719 = vmatpush.bf16.msra.mxu2 %v10530_v15  ;;  %4694 = vmatpush.bf16.msra.mxu0 %v9986_v39  ;;  %v14157_v46 = vld [vmem:[#allocation4 + $0x68c] sm:$0xf]  ;;  %v10434_v40 = vor.u32 %v14093_v11, %v10431_v5  ;;  %v5214_v39 = vadd.f32 %v5213_v0, %v5212_v14 }
 0x27e   : > { %v10687_v26 = vld [vmem:[#allocation4 + $0x6a8] sm:$0xf0] }
 0x27f   : > { %4732 = vmatpush.bf16.msra.mxu3 %v10786_v61  ;;  %4707 = vmatpush.bf16.msra.mxu1 %v10242_v44  ;;  %v13957_v24 = vld [vmem:[#allocation4 + $0x4c] sm:$0xf]  ;;  %v10690_v36 = vor.u32 %v14157_v46, %v10687_v26  ;;  %v5215_v53 = vrot.slane %v5214_v39, 2 }
 0x280   : > { %v9887_v51 = vld [vmem:[#allocation4 + $0x68] sm:$0xf0] }
 0x281   : > { %4720 = vmatpush.bf16.msra.mxu2 %v10498_v1  ;;  %4695 = vmatpush.bf16.msra.mxu0 %v9954_v34  ;;  %v14021_v7 = vld [vmem:[#allocation4 + $0x24c] sm:$0xf]  ;;  %v9890_v28 = vor.u32 %v13957_v24, %v9887_v51  ;;  %v5216_v58 = vadd.f32 %v5215_v53, %v5214_v39 }
 0x282   : > { %v10143_v12 = vld [vmem:[#allocation4 + $0x268] sm:$0xf0] }
 0x283   : > { %4733 = vmatpush.bf16.msra.mxu3 %v10754_v16  ;;  %4708 = vmatpush.bf16.msra.mxu1 %v10210_v31  ;;  %v14085_v15 = vld [vmem:[#allocation4 + $0x44c] sm:$0xf]  ;;  %v10146_v6 = vor.u32 %v14021_v7, %v10143_v12  ;;  %v5217_v11 = vrot.slane %v5216_v58, 1 }
 0x284   : > { %v10399_v43 = vld [vmem:[#allocation4 + $0x468] sm:$0xf0] }
 0x285   : > { %4721 = vmatpush.bf16.msra.mxu2 %v10466_v21  ;;  %v14149_v2 = vld [vmem:[#allocation4 + $0x64c] sm:$0xf]  ;;  %4696 = vmatpush.bf16.msra.mxu0 %v9922_v47  ;;  %v10402_v44 = vor.u32 %v14085_v15, %v10399_v43  ;;  %v16290_v47 = vsel %vm5273_vm8, %v16276_v55, %v5272_v59  ;;  %v5218_v51 = vadd.f32 %v5217_v11, %v5216_v58  ;;  %v4492_v59 = vpop.f32.mrf.mxu0 }
 0x286   : > { %v10655_v61 = vld [vmem:[#allocation4 + $0x668] sm:$0xf0] }
 0x287   : > { %4734 = vmatpush.bf16.msra.mxu3 %v10722_v45  ;;  %v13949_v3 = vld [vmem:[#allocation4 + $0xc] sm:$0xf]  ;;  %4709 = vmatpush.bf16.msra.mxu1 %v10178_v35  ;;  %v10658_v18 = vor.u32 %v14149_v2, %v10655_v61  ;;  %v5275_v14 = vmul.f32 %v16290_v47, %v5218_v51  ;;  %v4518_v51 = vpop.f32.mrf.mxu2 }
 0x288   : > { %v9855_v29 = vld [vmem:[#allocation4 + $0x28] sm:$0xf0] }
 0x289   : > { %v14013_v20 = vld [vmem:[#allocation4 + $0x20c] sm:$0xf]  ;;  %4722 = vmatpush.bf16.msra.mxu2 %v10434_v40  ;;  %4697 = vmatpush.bf16.msra.mxu0 %v9890_v28  ;;  %v9858_v34 = vor.u32 %v13949_v3, %v9855_v29  ;;  %v16295_v3 = vsub.f32 %v16280_v54, %v5275_v14 }
 0x28a   : > { %v10111_v1 = vld [vmem:[#allocation4 + $0x228] sm:$0xf0] }
 0x28b   : > { %v14077_v41 = vld [vmem:[#allocation4 + $0x40c] sm:$0xf]  ;;  %4735 = vmatpush.bf16.msra.mxu3 %v10690_v36  ;;  %4710 = vmatpush.bf16.msra.mxu1 %v10146_v6  ;;  %v10114_v62 = vor.u32 %v14013_v20, %v10111_v1  ;;  %v5291_v6 = vmul.f32 %v16295_v3, %v16295_v3 }
 0x28c   : > { %v10367_v4 = vld [vmem:[#allocation4 + $0x428] sm:$0xf0] }
 0x28d   : > { %v14141_v60 = vld [vmem:[#allocation4 + $0x60c] sm:$0xf]  ;;  %4723 = vmatpush.bf16.msra.mxu2 %v10402_v44  ;;  %v10370_v37 = vor.u32 %v14077_v41, %v10367_v4  ;;  %4698 = vmatpush.bf16.msra.mxu0 %v9858_v34 }
 0x28e   : > { %v10623_v16 = vld [vmem:[#allocation4 + $0x628] sm:$0xf0] }
 0x28f   : > { %v14261_v48 = vld [vmem:[#allocation4 + $0x9cc] sm:$0xf]  ;;  %4736 = vmatpush.bf16.msra.mxu3 %v10658_v18  ;;  %v10626_v13 = vor.u32 %v14141_v60, %v10623_v16  ;;  %4711 = vmatpush.bf16.msra.mxu1 %v10114_v62  ;;  %v4505_v62 = vpop.f32.mrf.mxu1 }
 0x290   : > { %v11103_v56 = vld [vmem:[#allocation4 + $0x9e8] sm:$0xf0]  ;;  %4699 = vmatmul.bf16.vlgmr.msra.gmra.mxu0 %v16220_v22 }
 0x291   : > { %v14325_v38 = vld [vmem:[#allocation4 + $0xbcc] sm:$0xf]  ;;  %v11106_v8 = vor.u32 %v14261_v48, %v11103_v56  ;;  %4724 = vmatpush.bf16.msra.mxu2 %v10370_v37  ;;  %v5299_v48 = vsel %vm1167_vm2, %v5291_v6, 0.0 }
 0x292   : > { %v11359_v57 = vld [vmem:[#allocation4 + $0xbe8] sm:$0xf0]  ;;  %4712 = vmatmul.bf16.vlgmr.msra.gmra.mxu1 %v16227_v17  ;;  %v5300_v56 = vrot.slane %v5299_v48, 4 }
 0x293   : > { %v14389_v31 = vld [vmem:[#allocation4 + $0xdcc] sm:$0xf]  ;;  %v11362_v5 = vor.u32 %v14325_v38, %v11359_v57  ;;  %4737 = vmatpush.bf16.msra.mxu3 %v10626_v13  ;;  %4743 = vmatpush.bf16.msrb.mxu0 %v11106_v8 }
 0x294   : > { %v11615_v21 = vld [vmem:[#allocation4 + $0xde8] sm:$0xf0]  ;;  %4725 = vmatmul.bf16.vlgmr.msra.gmra.mxu2 %v16216_v33  ;;  %v5301_v37 = vadd.f32 %v5300_v56, %v5299_v48 }
 0x295   : > { %v14453_v10 = vld [vmem:[#allocation4 + $0xfcc] sm:$0xf]  ;;  %v11618_v46 = vor.u32 %v14389_v31, %v11615_v21  ;;  %4756 = vmatpush.bf16.msrb.mxu1 %v11362_v5 }
 0x296   : > { %v11871_v45 = vld [vmem:[#allocation4 + $0xfe8] sm:$0xf0]  ;;  %4738 = vmatmul.bf16.vlgmr.msra.gmra.mxu3 %v16223_v23 }
 0x297   : > { %v14253_v30 = vld [vmem:[#allocation4 + $0x98c] sm:$0xf]  ;;  %v11874_v24 = vor.u32 %v14453_v10, %v11871_v45  ;;  %4769 = vmatpush.bf16.msrb.mxu2 %v11618_v46  ;;  %v5302_v46 = vrot.slane %v5301_v37, 2 }
 0x298   : > { %v11071_v26 = vld [vmem:[#allocation4 + $0x9a8] sm:$0xf0] }
 0x299   : > { %v14317_v9 = vld [vmem:[#allocation4 + $0xb8c] sm:$0xf]  ;;  %v11074_v63 = vor.u32 %v14253_v30, %v11071_v26  ;;  %4782 = vmatpush.bf16.msrb.mxu3 %v11874_v24  ;;  %v4506_v30 = vadd.f32 %v4505_v62, %v4492_v59 }
 0x29a   : > { %v11327_v49 = vld [vmem:[#allocation4 + $0xba8] sm:$0xf0] }
 0x29b   : > { %v14381_v35 = vld [vmem:[#allocation4 + $0xd8c] sm:$0xf]  ;;  %v11330_v36 = vor.u32 %v14317_v9, %v11327_v49  ;;  %4744 = vmatpush.bf16.msrb.mxu0 %v11074_v63 }
 0x29c   : > { %v11583_v40 = vld [vmem:[#allocation4 + $0xda8] sm:$0xf0] }
 0x29d   : > { %v14445_v7 = vld [vmem:[#allocation4 + $0xf8c] sm:$0xf]  ;;  %v11586_v55 = vor.u32 %v14381_v35, %v11583_v40  ;;  %4757 = vmatpush.bf16.msrb.mxu1 %v11330_v36 }
 0x29e   : > { %v11839_v12 = vld [vmem:[#allocation4 + $0xfa8] sm:$0xf0] }
 0x29f   : > { %v14245_v15 = vld [vmem:[#allocation4 + $0x94c] sm:$0xf]  ;;  %v11842_v2 = vor.u32 %v14445_v7, %v11839_v12  ;;  %4770 = vmatpush.bf16.msrb.mxu2 %v11586_v55  ;;  %v5303_v7 = vadd.f32 %v5302_v46, %v5301_v37  ;;  %v4519_v55 = vadd.f32 %v4518_v51, %v4506_v30  ;;  %v14010_v30 = vld [vmem:[#allocation4 + $0x1ec] sm:$0xf0] }
 0x2a0   : > { %v11039_v43 = vld [vmem:[#allocation4 + $0x968] sm:$0xf0]  ;;  %v14074_v46 = vld [vmem:[#allocation4 + $0x3ec] sm:$0xf0] }
 0x2a1   : > { %v14309_v0 = vld [vmem:[#allocation4 + $0xb4c] sm:$0xf]  ;;  %v11042_v39 = vor.u32 %v14245_v15, %v11039_v43  ;;  %4783 = vmatpush.bf16.msrb.mxu3 %v11842_v2  ;;  %v4531_v15 = vpop.f32.mrf.mxu3  ;;  %v5304_v2 = vrot.slane %v5303_v7, 1 }
 0x2a2   : > { %v11295_v61 = vld [vmem:[#allocation4 + $0xb68] sm:$0xf0] }
 0x2a3   : > { %v14373_v27 = vld [vmem:[#allocation4 + $0xd4c] sm:$0xf]  ;;  %v11298_v44 = vor.u32 %v14309_v0, %v11295_v61  ;;  %4745 = vmatpush.bf16.msrb.mxu0 %v11042_v39 }
 0x2a4   : > { %v11551_v28 = vld [vmem:[#allocation4 + $0xd68] sm:$0xf0] }
 0x2a5   : > { %v14437_v29 = vld [vmem:[#allocation4 + $0xf4c] sm:$0xf]  ;;  %v11554_v1 = vor.u32 %v14373_v27, %v11551_v28  ;;  %4758 = vmatpush.bf16.msrb.mxu1 %v11298_v44  ;;  %v16303_v27 = vadd.f32 %v4531_v15, %v4519_v55  ;;  %v4494_v28 = vpop.f32.mrf.mxu0  ;;  %v10309_v55 = vld [vmem:[#allocation4 + $0x390] sm:$0xf] }
 0x2a6   : > { %v11807_v20 = vld [vmem:[#allocation4 + $0xf68] sm:$0xf0]  ;;  %v14194_v28 = vld [vmem:[#allocation4 + $0x7ac] sm:$0xf0] }
 0x2a7   : > { %v14237_v41 = vld [vmem:[#allocation4 + $0x90c] sm:$0xf]  ;;  %v11810_v19 = vor.u32 %v14437_v29, %v11807_v20  ;;  %4771 = vmatpush.bf16.msrb.mxu2 %v11554_v1  ;;  %v4507_v1 = vpop.f32.mrf.mxu1 }
 0x2a8   : > { %v11007_v54 = vld [vmem:[#allocation4 + $0x928] sm:$0xf0]  ;;  %v10021_v1 = vld [vmem:[#allocation4 + $0x150] sm:$0xf] }
 0x2a9   : > { %v14301_v4 = vld [vmem:[#allocation4 + $0xb0c] sm:$0xf]  ;;  %v11010_v38 = vor.u32 %v14237_v41, %v11007_v54  ;;  %4784 = vmatpush.bf16.msrb.mxu3 %v11810_v19  ;;  %v5305_v41 = vadd.f32 %v5304_v2, %v5303_v7  ;;  %v14130_v2 = vld [vmem:[#allocation4 + $0x5ac] sm:$0xf0] }
 0x2aa   : > { %v11263_v18 = vld [vmem:[#allocation4 + $0xb28] sm:$0xf0] }
 0x2ab   : > { %v14365_v60 = vld [vmem:[#allocation4 + $0xd0c] sm:$0xf]  ;;  %v11266_v34 = vor.u32 %v14301_v4, %v11263_v18  ;;  %4746 = vmatpush.bf16.msrb.mxu0 %v11010_v38  ;;  %v5355_v48 = vmul.f32 %v5305_v41, %v16290_v47  ;;  %v13994_v41 = vld [vmem:[#allocation4 + $0x16c] sm:$0xf0] }
 0x2ac   : > { %v11519_v16 = vld [vmem:[#allocation4 + $0xd28] sm:$0xf0] }
 0x2ad   : > { %v14429_v52 = vld [vmem:[#allocation4 + $0xf0c] sm:$0xf]  ;;  %v11522_v57 = vor.u32 %v14365_v60, %v11519_v16  ;;  %4759 = vmatpush.bf16.msrb.mxu1 %v11266_v34  ;;  %v16306_v62 = vadd.f32 1e-05, %v5355_v48  ;;  %v10789_v48 = vld [vmem:[#allocation4 + $0x750] sm:$0xf] }
 0x2ae   : > { %v11775_v53 = vld [vmem:[#allocation4 + $0xf28] sm:$0xf0] }
 0x2af   : > { %v14229_v31 = vld [vmem:[#allocation4 + $0x8cc] sm:$0xf]  ;;  %v11778_v10 = vor.u32 %v14429_v52, %v11775_v53  ;;  %4772 = vmatpush.bf16.msrb.mxu2 %v11522_v57  ;;  %15069 = vrsqrt.f32 %v16306_v62  ;;  %vm5377_vm10 = vweird.f32 %v16306_v62 }
 0x2b0   : > { %v10975_v21 = vld [vmem:[#allocation4 + $0x8e8] sm:$0xf0] }
 0x2b1   : > { %v14293_v58 = vld [vmem:[#allocation4 + $0xacc] sm:$0xf]  ;;  %v10978_v26 = vor.u32 %v14229_v31, %v10975_v21  ;;  %4785 = vmatpush.bf16.msrb.mxu3 %v11778_v10 }
 0x2b2   : > { %v11231_v45 = vld [vmem:[#allocation4 + $0xae8] sm:$0xf0] }
 0x2b3   : > { %v14357_v13 = vld [vmem:[#allocation4 + $0xccc] sm:$0xf]  ;;  %v11234_v9 = vor.u32 %v14293_v58, %v11231_v45  ;;  %4747 = vmatpush.bf16.msrb.mxu0 %v10978_v26  ;;  %v4520_v58 = vpop.f32.mrf.mxu2  ;;  %v10597_v26 = vld [vmem:[#allocation4 + $0x5d0] sm:$0xf] }
 0x2b4   : > { %v11487_v8 = vld [vmem:[#allocation4 + $0xce8] sm:$0xf0] }
 0x2b5   : > { %v14421_v11 = vld [vmem:[#allocation4 + $0xecc] sm:$0xf]  ;;  %v11490_v24 = vor.u32 %v14357_v13, %v11487_v8  ;;  %4760 = vmatpush.bf16.msrb.mxu1 %v11234_v9  ;;  %v4533_v13 = vpop.f32.mrf.mxu3  ;;  %v10085_v8 = vld [vmem:[#allocation4 + $0x1d0] sm:$0xf] }
 0x2b6   : > { %v11743_v5 = vld [vmem:[#allocation4 + $0xee8] sm:$0xf0]  ;;  %v14138_v9 = vld [vmem:[#allocation4 + $0x5ec] sm:$0xf0]  ;;  %v10086_v7 = vor.u32 %v14010_v30, %v10085_v8 }
 0x2b7   : > { %v14221_v49 = vld [vmem:[#allocation4 + $0x88c] sm:$0xf]  ;;  %v11746_v12 = vor.u32 %v14421_v11, %v11743_v5  ;;  %4773 = vmatpush.bf16.msrb.mxu2 %v11490_v24  ;;  %v10341_v11 = vld [vmem:[#allocation4 + $0x3d0] sm:$0xf] }
 0x2b8   : > { %v10943_v35 = vld [vmem:[#allocation4 + $0x8a8] sm:$0xf0]  ;;  %v10757_v8 = vld [vmem:[#allocation4 + $0x710] sm:$0xf] }
 0x2b9   : > { %v14285_v40 = vld [vmem:[#allocation4 + $0xa8c] sm:$0xf]  ;;  %v10946_v61 = vor.u32 %v14221_v49, %v10943_v35  ;;  %4786 = vmatpush.bf16.msrb.mxu3 %v11746_v12  ;;  %v10853_v35 = vld [vmem:[#allocation4 + $0x7d0] sm:$0xf]  ;;  %v10342_v12 = vor.u32 %v14074_v46, %v10341_v11 }
 0x2ba   : > { %v11199_v63 = vld [vmem:[#allocation4 + $0xaa8] sm:$0xf0]  ;;  %v14178_v30 = vld [vmem:[#allocation4 + $0x72c] sm:$0xf0] }
 0x2bb   : > { %v14349_v14 = vld [vmem:[#allocation4 + $0xc8c] sm:$0xf]  ;;  %v11202_v29 = vor.u32 %v14285_v40, %v11199_v63  ;;  %4748 = vmatpush.bf16.msrb.mxu0 %v10946_v61  ;;  %v14202_v40 = vld [vmem:[#allocation4 + $0x7ec] sm:$0xf0]  ;;  %v10598_v63 = vor.u32 %v14138_v9, %v10597_v26  ;;  %v4544_v26 = vpop.f32.mrf.mxu0 }
 0x2bc   : > { %v11455_v36 = vld [vmem:[#allocation4 + $0xca8] sm:$0xf0]  ;;  %v10854_v15 = vor.u32 %v14202_v40, %v10853_v35  ;;  %v10821_v61 = vld [vmem:[#allocation4 + $0x790] sm:$0xf]  ;;  %v4545_v35 = vadd.f32 %v4544_v26, %v16303_v27  ;;  %v4557_v40 = vpop.f32.mrf.mxu1 }
 0x2bd   : > { %v14413_v43 = vld [vmem:[#allocation4 + $0xe8c] sm:$0xf]  ;;  %v11458_v20 = vor.u32 %v14349_v14, %v11455_v36  ;;  %4761 = vmatpush.bf16.msrb.mxu1 %v11202_v29  ;;  %v10053_v14 = vld [vmem:[#allocation4 + $0x190] sm:$0xf]  ;;  %v16309_v29 = vpop.eup %15069 }
 0x2be   : > { %v11711_v0 = vld [vmem:[#allocation4 + $0xea8] sm:$0xf0]  ;;  %v14002_v36 = vld [vmem:[#allocation4 + $0x1ac] sm:$0xf0]  ;;  %vm5378_vm9 = vweird.f32 %v16309_v29 }
 0x2bf   : > { %v14213_v39 = vld [vmem:[#allocation4 + $0x84c] sm:$0xf]  ;;  %v11714_v54 = vor.u32 %v14413_v43, %v11711_v0  ;;  %4774 = vmatpush.bf16.msrb.mxu2 %v11458_v20  ;;  %v14066_v43 = vld [vmem:[#allocation4 + $0x3ac] sm:$0xf0]  ;;  %v10054_v20 = vor.u32 %v14002_v36, %v10053_v14  ;;  %vm5379_vm11 = vmor %vm5377_vm10, %vm5378_vm9  ;;  %v10758_v14 = vor.u32 %v14178_v30, %v10757_v8 }
 0x2c0   : > { %v10911_v6 = vld [vmem:[#allocation4 + $0x868] sm:$0xf0]  ;;  %v10565_v0 = vld [vmem:[#allocation4 + $0x590] sm:$0xf] }
 0x2c1   : > { %v14277_v44 = vld [vmem:[#allocation4 + $0xa4c] sm:$0xf]  ;;  %v10914_v52 = vor.u32 %v14213_v39, %v10911_v6  ;;  %4787 = vmatpush.bf16.msrb.mxu3 %v11714_v54  ;;  %v5372_v39 = vmul.f32 %v16309_v29, %v16306_v62  ;;  %v10310_v6 = vor.u32 %v14066_v43, %v10309_v55  ;;  %v10277_v54 = vld [vmem:[#allocation4 + $0x350] sm:$0xf] }
 0x2c2   : > { %v11167_v4 = vld [vmem:[#allocation4 + $0xa68] sm:$0xf0]  ;;  %v16321_v11 = vld [vmem:[#allocation13] sm:$0xff] }
 0x2c3   : > { %v14341_v19 = vld [vmem:[#allocation4 + $0xc4c] sm:$0xf]  ;;  %v11170_v59 = vor.u32 %v14277_v44, %v11167_v4  ;;  %4749 = vmatpush.bf16.msrb.mxu0 %v10914_v52  ;;  %v10566_v44 = vor.u32 %v14130_v2, %v10565_v0  ;;  %v10822_v4 = vor.u32 %v14194_v28, %v10821_v61  ;;  %v14186_v52 = vld [vmem:[#allocation4 + $0x76c] sm:$0xf0]  ;;  %v5487_v2 = vperm.slane %v16321_v11, 0 }
 0x2c4   : > { %v11423_v18 = vld [vmem:[#allocation4 + $0xc68] sm:$0xf0]  ;;  %v10790_v58 = vor.u32 %v14186_v52, %v10789_v48  ;;  %v9957_v9 = vld [vmem:[#allocation4 + $0xd0] sm:$0xf] }
 0x2c5   : > { %v14405_v60 = vld [vmem:[#allocation4 + $0xe4c] sm:$0xf]  ;;  %v11426_v34 = vor.u32 %v14341_v19, %v11423_v18  ;;  %4762 = vmatpush.bf16.msrb.mxu1 %v11170_v59  ;;  %v14058_v19 = vld [vmem:[#allocation4 + $0x36c] sm:$0xf0] }
 0x2c6   : > { %v11679_v16 = vld [vmem:[#allocation4 + $0xe68] sm:$0xf0]  ;;  %v10533_v18 = vld [vmem:[#allocation4 + $0x550] sm:$0xf] }
 0x2c7   : > { %v14205_v53 = vld [vmem:[#allocation4 + $0x80c] sm:$0xf]  ;;  %v11682_v37 = vor.u32 %v14405_v60, %v11679_v16  ;;  %4775 = vmatpush.bf16.msrb.mxu2 %v11426_v34  ;;  %v14122_v60 = vld [vmem:[#allocation4 + $0x56c] sm:$0xf0]  ;;  %v5373_v16 = vmul.f32 %v16309_v29, %v5372_v39  ;;  %v10278_v34 = vor.u32 %v14058_v19, %v10277_v54  ;;  %v4570_v39 = vpop.f32.mrf.mxu2 }
 0x2c8   : > { %v10879_v56 = vld [vmem:[#allocation4 + $0x828] sm:$0xf0]  ;;  %v10469_v36 = vld [vmem:[#allocation4 + $0x4d0] sm:$0xf] }
 0x2c9   : > { %v14269_v38 = vld [vmem:[#allocation4 + $0xa0c] sm:$0xf]  ;;  %v10882_v5 = vor.u32 %v14205_v53, %v10879_v56  ;;  %4788 = vmatpush.bf16.msrb.mxu3 %v11682_v37  ;;  %v10022_v53 = vor.u32 %v13994_v41, %v10021_v1  ;;  %v9989_v56 = vld [vmem:[#allocation4 + $0x110] sm:$0xf]  ;;  %v5374_v59 = vmul.f32 0.5, %v5373_v16 }
 0x2ca   : > { %v11135_v57 = vld [vmem:[#allocation4 + $0xa28] sm:$0xf0]  ;;  %v10501_v37 = vld [vmem:[#allocation4 + $0x510] sm:$0xf] }
 0x2cb   : > { %v14333_v31 = vld [vmem:[#allocation4 + $0xc0c] sm:$0xf]  ;;  %v11138_v24 = vor.u32 %v14269_v38, %v11135_v57  ;;  %4750 = vmatpush.bf16.msrb.mxu0 %v10882_v5  ;;  %v13986_v38 = vld [vmem:[#allocation4 + $0x12c] sm:$0xf0]  ;;  %v10534_v57 = vor.u32 %v14122_v60, %v10533_v18 }
 0x2cc   : > { %v11391_v21 = vld [vmem:[#allocation4 + $0xc28] sm:$0xf0]  ;;  %v9990_v5 = vor.u32 %v13986_v38, %v9989_v56  ;;  %v14106_v55 = vld [vmem:[#allocation4 + $0x4ec] sm:$0xf0]  ;;  %v4546_v38 = vpop.f32.mrf.mxu0 }
 0x2cd   : > { %v14397_v10 = vld [vmem:[#allocation4 + $0xe0c] sm:$0xf]  ;;  %v11394_v49 = vor.u32 %v14333_v31, %v11391_v21  ;;  %4763 = vmatpush.bf16.msrb.mxu1 %v11138_v24  ;;  %v10245_v31 = vld [vmem:[#allocation4 + $0x310] sm:$0xf] }
 0x2ce   : > { %v11647_v45 = vld [vmem:[#allocation4 + $0xe28] sm:$0xf0]  ;;  %4751 = vmatmul.bf16.vlgmr.msrb.gmra.mxu0 %v16247_v25  ;;  %v14050_v21 = vld [vmem:[#allocation4 + $0x32c] sm:$0xf0] }
 0x2cf   : > { %v11650_v51 = vor.u32 %v14397_v10, %v11647_v45  ;;  %4776 = vmatpush.bf16.msrb.mxu2 %v11394_v49  ;;  %4795 = vmatpush.bf16.msra.mxu0 %v10086_v7  ;;  %v14114_v10 = vld [vmem:[#allocation4 + $0x52c] sm:$0xf0]  ;;  %v5375_v45 = vsub.f32 1.5, %v5374_v59  ;;  %v16319_v13 = vld [vmem:[#allocation12] sm:$0xff]  ;;  %v10246_v46 = vor.u32 %v14050_v21, %v10245_v31 }
 0x2d0   : > { %4764 = vmatmul.bf16.vlgmr.msrb.gmra.mxu1 %v16252_v42  ;;  %v10502_v49 = vor.u32 %v14114_v10, %v10501_v37  ;;  %v10213_v7 = vld [vmem:[#allocation4 + $0x2d0] sm:$0xf] }
 0x2d1   : > { %4789 = vmatpush.bf16.msrb.mxu3 %v11650_v51  ;;  %4808 = vmatpush.bf16.msra.mxu1 %v10342_v12  ;;  %v5376_v24 = vmul.f32 %v16309_v29, %v5375_v45  ;;  %v13978_v51 = vld [vmem:[#allocation4 + $0xec] sm:$0xf0] }
 0x2d2   : > { %4777 = vmatmul.bf16.vlgmr.msrb.gmra.mxu2 %v16245_v32  ;;  %v14042_v12 = vld [vmem:[#allocation4 + $0x2ec] sm:$0xf0]  ;;  %v9958_v61 = vor.u32 %v13978_v51, %v9957_v9 }
 0x2d3   : > { %4821 = vmatpush.bf16.msra.mxu2 %v10598_v63  ;;  %4796 = vmatpush.bf16.msra.mxu0 %v10054_v20  ;;  %v5461_v63 = vperm.slane %v16319_v13, 0  ;;  %v5380_v62 = vsel %vm5379_vm11, %v16309_v29, %v5376_v24  ;;  %v10725_v43 = vld [vmem:[#allocation4 + $0x6d0] sm:$0xf]  ;;  %v10214_v28 = vor.u32 %v14042_v12, %v10213_v7  ;;  %v10470_v20 = vor.u32 %v14106_v55, %v10469_v36  ;;  %v4572_v36 = vpop.f32.mrf.mxu2 }
 0x2d4   : > { %4790 = vmatmul.bf16.vlgmr.msrb.gmra.mxu3 %v16249_v50  ;;  %v14170_v0 = vld [vmem:[#allocation4 + $0x6ec] sm:$0xf0]  ;;  %v5451_v27 = vmul.f32 %v5380_v62, %v16295_v3 }
 0x2d5   : > { %4834 = vmatpush.bf16.msra.mxu3 %v10854_v15  ;;  %4809 = vmatpush.bf16.msra.mxu1 %v10310_v6  ;;  %v4558_v15 = vadd.f32 %v4557_v40, %v4545_v35  ;;  %v9925_v6 = vld [vmem:[#allocation4 + $0x90] sm:$0xf]  ;;  %v10726_v29 = vor.u32 %v14170_v0, %v10725_v43 }
 0x2d6   : > { %v10181_v1 = vld [vmem:[#allocation4 + $0x290] sm:$0xf]  ;;  %v5477_v41 = vmul.f32 %v5461_v63, %v5451_v27 }
 0x2d7   : > { %4822 = vmatpush.bf16.msra.mxu2 %v10566_v44  ;;  %4797 = vmatpush.bf16.msra.mxu0 %v10022_v53  ;;  %v13970_v44 = vld [vmem:[#allocation4 + $0xac] sm:$0xf0]  ;;  %v4571_v54 = vadd.f32 %v4570_v39, %v4558_v15 }
 0x2d8   : > { %v14034_v19 = vld [vmem:[#allocation4 + $0x2ac] sm:$0xf0]  ;;  %v16332_v48 = vadd.f32 %v5487_v2, %v5477_v41  ;;  %v9926_v53 = vor.u32 %v13970_v44, %v9925_v6 }
 0x2d9   : > { %4835 = vmatpush.bf16.msra.mxu3 %v10822_v4  ;;  %4810 = vmatpush.bf16.msra.mxu1 %v10278_v34  ;;  %v4583_v4 = vpop.f32.mrf.mxu3  ;;  %v10437_v18 = vld [vmem:[#allocation4 + $0x490] sm:$0xf]  ;;  %v10182_v59 = vor.u32 %v14034_v19, %v10181_v1 }
 0x2da   : > { %v14098_v3 = vld [vmem:[#allocation4 + $0x4ac] sm:$0xf0]  ;;  %v16334_v52 = vadd.f32 %v4583_v4, %v4571_v54  ;;  %v5511_v37 = vmax.f32 %v16332_v48, 0.0 }
 0x2db   : > { %4823 = vmatpush.bf16.msra.mxu2 %v10534_v57  ;;  %4798 = vmatpush.bf16.msra.mxu0 %v9990_v5  ;;  %v10693_v60 = vld [vmem:[#allocation4 + $0x690] sm:$0xf]  ;;  %v10438_v34 = vor.u32 %v14098_v3, %v10437_v18 }
 0x2dc   : > { %v14162_v16 = vld [vmem:[#allocation4 + $0x6ac] sm:$0xf0]  ;;  %v5219_v10 = vsel %vm1167_vm2, %v16334_v52, 0.0 }
 0x2dd   : > { %4836 = vmatpush.bf16.msra.mxu3 %v10790_v58  ;;  %4811 = vmatpush.bf16.msra.mxu1 %v10246_v46  ;;  %v9893_v56 = vld [vmem:[#allocation4 + $0x50] sm:$0xf]  ;;  %v4559_v58 = vpop.f32.mrf.mxu1  ;;  %v10694_v45 = vor.u32 %v14162_v16, %v10693_v60  ;;  %v5220_v5 = vrot.slane %v5219_v10, 4 }
 0x2de   : > { %v13962_v57 = vld [vmem:[#allocation4 + $0x6c] sm:$0xf0] }
 0x2df   : > { %4824 = vmatpush.bf16.msra.mxu2 %v10502_v49  ;;  %4799 = vmatpush.bf16.msra.mxu0 %v9958_v61  ;;  %v10149_v31 = vld [vmem:[#allocation4 + $0x250] sm:$0xf]  ;;  %v9894_v9 = vor.u32 %v13962_v57, %v9893_v56  ;;  %v5221_v40 = vadd.f32 %v5220_v5, %v5219_v10 }
 0x2e0   : > { %v14026_v21 = vld [vmem:[#allocation4 + $0x26c] sm:$0xf0] }
 0x2e1   : > { %4837 = vmatpush.bf16.msra.mxu3 %v10758_v14  ;;  %4812 = vmatpush.bf16.msra.mxu1 %v10214_v28  ;;  %v10405_v8 = vld [vmem:[#allocation4 + $0x450] sm:$0xf]  ;;  %v10150_v51 = vor.u32 %v14026_v21, %v10149_v31  ;;  %v4585_v0 = vpop.f32.mrf.mxu3  ;;  %v5222_v27 = vrot.slane %v5221_v40, 2 }
 0x2e2   : > { %v14090_v30 = vld [vmem:[#allocation4 + $0x46c] sm:$0xf0] }
 0x2e3   : > { %4825 = vmatpush.bf16.msra.mxu2 %v10470_v20  ;;  %v10661_v46 = vld [vmem:[#allocation4 + $0x650] sm:$0xf]  ;;  %4800 = vmatpush.bf16.msra.mxu0 %v9926_v53  ;;  %v10406_v7 = vor.u32 %v14090_v30, %v10405_v8  ;;  %v5223_v44 = vadd.f32 %v5222_v27, %v5221_v40 }
 0x2e4   : > { %v14154_v26 = vld [vmem:[#allocation4 + $0x66c] sm:$0xf0] }
 0x2e5   : > { %4838 = vmatpush.bf16.msra.mxu3 %v10726_v29  ;;  %v9861_v24 = vld [vmem:[#allocation4 + $0x10] sm:$0xf]  ;;  %4813 = vmatpush.bf16.msra.mxu1 %v10182_v59  ;;  %v10662_v55 = vor.u32 %v14154_v26, %v10661_v46  ;;  %v5224_v3 = vrot.slane %v5223_v44, 1 }
 0x2e6   : > { %v13954_v49 = vld [vmem:[#allocation4 + $0x2c] sm:$0xf0] }
 0x2e7   : > { %v10117_v35 = vld [vmem:[#allocation4 + $0x210] sm:$0xf]  ;;  %4826 = vmatpush.bf16.msra.mxu2 %v10438_v34  ;;  %4801 = vmatpush.bf16.msra.mxu0 %v9894_v9  ;;  %v9862_v28 = vor.u32 %v13954_v49, %v9861_v24  ;;  %v5225_v31 = vadd.f32 %v5224_v3, %v5223_v44 }
 0x2e8   : > { %v14018_v12 = vld [vmem:[#allocation4 + $0x22c] sm:$0xf0] }
 0x2e9   : > { %v10373_v63 = vld [vmem:[#allocation4 + $0x410] sm:$0xf]  ;;  %4839 = vmatpush.bf16.msra.mxu3 %v10694_v45  ;;  %4814 = vmatpush.bf16.msra.mxu1 %v10150_v51  ;;  %v10118_v1 = vor.u32 %v14018_v12, %v10117_v35  ;;  %v5276_v45 = vmul.f32 %v16290_v47, %v5225_v31 }
 0x2ea   : > { %v14082_v14 = vld [vmem:[#allocation4 + $0x42c] sm:$0xf0] }
 0x2eb   : > { %v10629_v62 = vld [vmem:[#allocation4 + $0x610] sm:$0xf]  ;;  %4827 = vmatpush.bf16.msra.mxu2 %v10406_v7  ;;  %v10374_v41 = vor.u32 %v14082_v14, %v10373_v63  ;;  %4802 = vmatpush.bf16.msra.mxu0 %v9862_v28  ;;  %v16342_v40 = vsub.f32 %v16334_v52, %v5276_v45  ;;  %v4622_v45 = vpop.f32.mrf.mxu2 }
 0x2ec   : > { %v14146_v15 = vld [vmem:[#allocation4 + $0x62c] sm:$0xf0] }
 0x2ed   : > { %v11109_v43 = vld [vmem:[#allocation4 + $0x9d0] sm:$0xf]  ;;  %4840 = vmatpush.bf16.msra.mxu3 %v10662_v55  ;;  %v10630_v4 = vor.u32 %v14146_v15, %v10629_v62  ;;  %4815 = vmatpush.bf16.msra.mxu1 %v10118_v1  ;;  %v5292_v63 = vmul.f32 %v16342_v40, %v16342_v40 }
 0x2ee   : > { %v14266_v2 = vld [vmem:[#allocation4 + $0x9ec] sm:$0xf0]  ;;  %4803 = vmatmul.bf16.vlgmr.msra.gmra.mxu0 %v16220_v22 }
 0x2ef   : > { %v11365_v61 = vld [vmem:[#allocation4 + $0xbd0] sm:$0xf]  ;;  %v11110_v19 = vor.u32 %v14266_v2, %v11109_v43  ;;  %4828 = vmatpush.bf16.msra.mxu2 %v10374_v41  ;;  %v5306_v2 = vsel %vm1167_vm2, %v5292_v63, 0.0 }
 0x2f0   : > { %v14330_v20 = vld [vmem:[#allocation4 + $0xbec] sm:$0xf0]  ;;  %4816 = vmatmul.bf16.vlgmr.msra.gmra.mxu1 %v16227_v17 }
 0x2f1   : > { %v11621_v39 = vld [vmem:[#allocation4 + $0xdd0] sm:$0xf]  ;;  %v11366_v60 = vor.u32 %v14330_v20, %v11365_v61  ;;  %4841 = vmatpush.bf16.msra.mxu3 %v10630_v4  ;;  %4847 = vmatpush.bf16.msrb.mxu0 %v11110_v19  ;;  %v5307_v20 = vrot.slane %v5306_v2, 4  ;;  %v4609_v4 = vpop.f32.mrf.mxu1 }
 0x2f2   : > { %v14394_v6 = vld [vmem:[#allocation4 + $0xdec] sm:$0xf0]  ;;  %4829 = vmatmul.bf16.vlgmr.msra.gmra.mxu2 %v16216_v33 }
 0x2f3   : > { %v11877_v29 = vld [vmem:[#allocation4 + $0xfd0] sm:$0xf]  ;;  %v11622_v16 = vor.u32 %v14394_v6, %v11621_v39  ;;  %4860 = vmatpush.bf16.msrb.mxu1 %v11366_v60  ;;  %v4596_v6 = vpop.f32.mrf.mxu0  ;;  %v5308_v19 = vadd.f32 %v5307_v20, %v5306_v2 }
 0x2f4   : > { %v14458_v54 = vld [vmem:[#allocation4 + $0xfec] sm:$0xf0]  ;;  %4842 = vmatmul.bf16.vlgmr.msra.gmra.mxu3 %v16223_v23 }
 0x2f5   : > { %v11077_v18 = vld [vmem:[#allocation4 + $0x990] sm:$0xf]  ;;  %v11878_v38 = vor.u32 %v14458_v54, %v11877_v29  ;;  %4873 = vmatpush.bf16.msrb.mxu2 %v11622_v16 }
 0x2f6   : > { %v14258_v53 = vld [vmem:[#allocation4 + $0x9ac] sm:$0xf0] }
 0x2f7   : > { %v11333_v56 = vld [vmem:[#allocation4 + $0xb90] sm:$0xf]  ;;  %v11078_v10 = vor.u32 %v14258_v53, %v11077_v18  ;;  %4886 = vmatpush.bf16.msrb.mxu3 %v11878_v38  ;;  %v4610_v53 = vadd.f32 %v4609_v4, %v4596_v6 }
 0x2f8   : > { %v14322_v59 = vld [vmem:[#allocation4 + $0xbac] sm:$0xf0] }
 0x2f9   : > { %v11589_v34 = vld [vmem:[#allocation4 + $0xd90] sm:$0xf]  ;;  %v11334_v8 = vor.u32 %v14322_v59, %v11333_v56  ;;  %4848 = vmatpush.bf16.msrb.mxu0 %v11078_v10  ;;  %v5309_v59 = vrot.slane %v5308_v19, 2 }
 0x2fa   : > { %v14386_v57 = vld [vmem:[#allocation4 + $0xdac] sm:$0xf0] }
 0x2fb   : > { %v11845_v21 = vld [vmem:[#allocation4 + $0xf90] sm:$0xf]  ;;  %v11590_v30 = vor.u32 %v14386_v57, %v11589_v34  ;;  %4861 = vmatpush.bf16.msrb.mxu1 %v11334_v8  ;;  %v5310_v8 = vadd.f32 %v5309_v59, %v5308_v19  ;;  %v4598_v63 = vpop.f32.mrf.mxu0  ;;  %v14006_v59 = vld [vmem:[#allocation4 + $0x1d4] sm:$0xf] }
 0x2fc   : > { %v14450_v58 = vld [vmem:[#allocation4 + $0xfac] sm:$0xf0]  ;;  %v10311_v63 = vld [vmem:[#allocation4 + $0x3b0] sm:$0xf0] }
 0x2fd   : > { %v11045_v5 = vld [vmem:[#allocation4 + $0x950] sm:$0xf]  ;;  %v11846_v9 = vor.u32 %v14450_v58, %v11845_v21  ;;  %4874 = vmatpush.bf16.msrb.mxu2 %v11590_v30 }
 0x2fe   : > { %v14250_v46 = vld [vmem:[#allocation4 + $0x96c] sm:$0xf0] }
 0x2ff   : > { %v11301_v26 = vld [vmem:[#allocation4 + $0xb50] sm:$0xf]  ;;  %v11046_v12 = vor.u32 %v14250_v46, %v11045_v5  ;;  %4887 = vmatpush.bf16.msrb.mxu3 %v11846_v9  ;;  %v4623_v9 = vadd.f32 %v4622_v45, %v4610_v53 }
 0x300   : > { %v14314_v24 = vld [vmem:[#allocation4 + $0xb6c] sm:$0xf0] }
 0x301   : > { %v11557_v49 = vld [vmem:[#allocation4 + $0xd50] sm:$0xf]  ;;  %v11302_v14 = vor.u32 %v14314_v24, %v11301_v26  ;;  %4849 = vmatpush.bf16.msrb.mxu0 %v11046_v12  ;;  %v4635_v24 = vpop.f32.mrf.mxu3 }
 0x302   : > { %v14378_v35 = vld [vmem:[#allocation4 + $0xd6c] sm:$0xf0]  ;;  %v16350_v12 = vadd.f32 %v4635_v24, %v4623_v9 }
 0x303   : > { %v11813_v51 = vld [vmem:[#allocation4 + $0xf50] sm:$0xf]  ;;  %v11558_v36 = vor.u32 %v14378_v35, %v11557_v49  ;;  %4862 = vmatpush.bf16.msrb.mxu1 %v11302_v14 }
 0x304   : > { %v14442_v7 = vld [vmem:[#allocation4 + $0xf6c] sm:$0xf0] }
 0x305   : > { %v11013_v55 = vld [vmem:[#allocation4 + $0x910] sm:$0xf]  ;;  %v11814_v15 = vor.u32 %v14442_v7, %v11813_v51  ;;  %4875 = vmatpush.bf16.msrb.mxu2 %v11558_v36  ;;  %v5311_v51 = vrot.slane %v5310_v8, 1 }
 0x306   : > { %v14242_v52 = vld [vmem:[#allocation4 + $0x92c] sm:$0xf0] }
 0x307   : > { %v11269_v62 = vld [vmem:[#allocation4 + $0xb10] sm:$0xf]  ;;  %v11014_v39 = vor.u32 %v14242_v52, %v11013_v55  ;;  %4888 = vmatpush.bf16.msrb.mxu3 %v11814_v15  ;;  %v4611_v15 = vpop.f32.mrf.mxu1 }
 0x308   : > { %v14306_v43 = vld [vmem:[#allocation4 + $0xb2c] sm:$0xf0] }
 0x309   : > { %v11525_v0 = vld [vmem:[#allocation4 + $0xd10] sm:$0xf]  ;;  %v11270_v44 = vor.u32 %v14306_v43, %v11269_v62  ;;  %4850 = vmatpush.bf16.msrb.mxu0 %v11014_v39  ;;  %v5312_v43 = vadd.f32 %v5311_v51, %v5310_v8  ;;  %v14062_v51 = vld [vmem:[#allocation4 + $0x394] sm:$0xf] }
 0x30a   : > { %v14370_v27 = vld [vmem:[#allocation4 + $0xd2c] sm:$0xf0] }
 0x30b   : > { %v11781_v61 = vld [vmem:[#allocation4 + $0xf10] sm:$0xf]  ;;  %v11526_v1 = vor.u32 %v14370_v27, %v11525_v0  ;;  %4863 = vmatpush.bf16.msrb.mxu1 %v11270_v44  ;;  %v5356_v39 = vmul.f32 %v5312_v43, %v16290_v47 }
 0x30c   : > { %v14434_v28 = vld [vmem:[#allocation4 + $0xf2c] sm:$0xf0] }
 0x30d   : > { %v10981_v41 = vld [vmem:[#allocation4 + $0x8d0] sm:$0xf]  ;;  %v11782_v18 = vor.u32 %v14434_v28, %v11781_v61  ;;  %4876 = vmatpush.bf16.msrb.mxu2 %v11526_v1 }
 0x30e   : > { %v14234_v29 = vld [vmem:[#allocation4 + $0x8ec] sm:$0xf0] }
 0x30f   : > { %v11237_v54 = vld [vmem:[#allocation4 + $0xad0] sm:$0xf]  ;;  %v10982_v34 = vor.u32 %v14234_v29, %v10981_v41  ;;  %4889 = vmatpush.bf16.msrb.mxu3 %v11782_v18 }
 0x310   : > { %v14298_v3 = vld [vmem:[#allocation4 + $0xaec] sm:$0xf0] }
 0x311   : > { %v11493_v60 = vld [vmem:[#allocation4 + $0xcd0] sm:$0xf]  ;;  %v11238_v57 = vor.u32 %v14298_v3, %v11237_v54  ;;  %4851 = vmatpush.bf16.msrb.mxu0 %v10982_v34  ;;  %v4624_v3 = vpop.f32.mrf.mxu2  ;;  %v10087_v34 = vld [vmem:[#allocation4 + $0x1f0] sm:$0xf0] }
 0x312   : > { %v14362_v16 = vld [vmem:[#allocation4 + $0xcec] sm:$0xf0] }
 0x313   : > { %v11749_v56 = vld [vmem:[#allocation4 + $0xed0] sm:$0xf]  ;;  %v11494_v31 = vor.u32 %v14362_v16, %v11493_v60  ;;  %4864 = vmatpush.bf16.msrb.mxu1 %v11238_v57  ;;  %v16353_v60 = vadd.f32 1e-05, %v5356_v39  ;;  %v14070_v57 = vld [vmem:[#allocation4 + $0x3d4] sm:$0xf] }
 0x314   : > { %v14426_v38 = vld [vmem:[#allocation4 + $0xeec] sm:$0xf0]  ;;  %v10279_v39 = vld [vmem:[#allocation4 + $0x370] sm:$0xf0] }
 0x315   : > { %v10949_v21 = vld [vmem:[#allocation4 + $0x890] sm:$0xf]  ;;  %v11750_v30 = vor.u32 %v14426_v38, %v11749_v56  ;;  %4877 = vmatpush.bf16.msrb.mxu2 %v11494_v31  ;;  %v4637_v38 = vpop.f32.mrf.mxu3  ;;  %15071 = vrsqrt.f32 %v16353_v60  ;;  %vm5387_vm13 = vweird.f32 %v16353_v60 }
 0x316   : > { %v14226_v58 = vld [vmem:[#allocation4 + $0x8ac] sm:$0xf0] }
 0x317   : > { %v11205_v10 = vld [vmem:[#allocation4 + $0xa90] sm:$0xf]  ;;  %v10950_v7 = vor.u32 %v14226_v58, %v10949_v21  ;;  %4890 = vmatpush.bf16.msrb.mxu3 %v11750_v30  ;;  %v10343_v21 = vld [vmem:[#allocation4 + $0x3f0] sm:$0xf0] }
 0x318   : > { %v14290_v5 = vld [vmem:[#allocation4 + $0xaac] sm:$0xf0]  ;;  %v14134_v58 = vld [vmem:[#allocation4 + $0x5d4] sm:$0xf]  ;;  %v10346_v9 = vor.u32 %v14070_v57, %v10343_v21 }
 0x319   : > { %v11461_v46 = vld [vmem:[#allocation4 + $0xc90] sm:$0xf]  ;;  %v11206_v14 = vor.u32 %v14290_v5, %v11205_v10  ;;  %4852 = vmatpush.bf16.msrb.mxu0 %v10950_v7  ;;  %v10599_v10 = vld [vmem:[#allocation4 + $0x5f0] sm:$0xf0] }
 0x31a   : > { %v14354_v26 = vld [vmem:[#allocation4 + $0xcac] sm:$0xf0]  ;;  %v14198_v30 = vld [vmem:[#allocation4 + $0x7d4] sm:$0xf]  ;;  %v10602_v24 = vor.u32 %v14134_v58, %v10599_v10 }
 0x31b   : > { %v11717_v49 = vld [vmem:[#allocation4 + $0xe90] sm:$0xf]  ;;  %v11462_v36 = vor.u32 %v14354_v26, %v11461_v46  ;;  %4865 = vmatpush.bf16.msrb.mxu1 %v11206_v14  ;;  %v10855_v5 = vld [vmem:[#allocation4 + $0x7f0] sm:$0xf0]  ;;  %v10090_v26 = vor.u32 %v14006_v59, %v10087_v34 }
 0x31c   : > { %v14418_v35 = vld [vmem:[#allocation4 + $0xeac] sm:$0xf0]  ;;  %v10858_v7 = vor.u32 %v14198_v30, %v10855_v5  ;;  %v14126_v14 = vld [vmem:[#allocation4 + $0x594] sm:$0xf] }
 0x31d   : > { %v10917_v55 = vld [vmem:[#allocation4 + $0x850] sm:$0xf]  ;;  %v11718_v0 = vor.u32 %v14418_v35, %v11717_v49  ;;  %4878 = vmatpush.bf16.msrb.mxu2 %v11462_v36  ;;  %v13998_v49 = vld [vmem:[#allocation4 + $0x194] sm:$0xf] }
 0x31e   : > { %v14218_v52 = vld [vmem:[#allocation4 + $0x86c] sm:$0xf0]  ;;  %v10055_v35 = vld [vmem:[#allocation4 + $0x1b0] sm:$0xf0] }
 0x31f   : > { %v11173_v62 = vld [vmem:[#allocation4 + $0xa50] sm:$0xf]  ;;  %v10918_v6 = vor.u32 %v14218_v52, %v10917_v55  ;;  %4891 = vmatpush.bf16.msrb.mxu3 %v11718_v0  ;;  %v10567_v36 = vld [vmem:[#allocation4 + $0x5b0] sm:$0xf0]  ;;  %v10058_v15 = vor.u32 %v13998_v49, %v10055_v35  ;;  %v10314_v0 = vor.u32 %v14062_v51, %v10311_v63  ;;  %v5462_v35 = vperm.slane %v16319_v13, 1  ;;  %v4674_v13 = vpop.f32.mrf.mxu2 }
 0x320   : > { %v14282_v27 = vld [vmem:[#allocation4 + $0xa6c] sm:$0xf0]  ;;  %v14190_v55 = vld [vmem:[#allocation4 + $0x794] sm:$0xf] }
 0x321   : > { %v11429_v2 = vld [vmem:[#allocation4 + $0xc50] sm:$0xf]  ;;  %v11174_v29 = vor.u32 %v14282_v27, %v11173_v62  ;;  %4853 = vmatpush.bf16.msrb.mxu0 %v10918_v6  ;;  %v10823_v52 = vld [vmem:[#allocation4 + $0x7b0] sm:$0xf0]  ;;  %v16356_v62 = vpop.eup %15071  ;;  %v10570_v27 = vor.u32 %v14126_v14, %v10567_v36 }
 0x322   : > { %v14346_v61 = vld [vmem:[#allocation4 + $0xc6c] sm:$0xf0]  ;;  %v5382_v43 = vmul.f32 %v16356_v62, %v16353_v60  ;;  %v14118_v6 = vld [vmem:[#allocation4 + $0x554] sm:$0xf]  ;;  %vm5388_vm12 = vweird.f32 %v16356_v62 }
 0x323   : > { %v11685_v28 = vld [vmem:[#allocation4 + $0xe50] sm:$0xf]  ;;  %v11430_v54 = vor.u32 %v14346_v61, %v11429_v2  ;;  %4866 = vmatpush.bf16.msrb.mxu1 %v11174_v29  ;;  %v13990_v2 = vld [vmem:[#allocation4 + $0x154] sm:$0xf]  ;;  %vm5389_vm14 = vmor %vm5387_vm13, %vm5388_vm12 }
 0x324   : > { %v14410_v20 = vld [vmem:[#allocation4 + $0xe6c] sm:$0xf0]  ;;  %v10023_v61 = vld [vmem:[#allocation4 + $0x170] sm:$0xf0] }
 0x325   : > { %v10885_v44 = vld [vmem:[#allocation4 + $0x810] sm:$0xf]  ;;  %v11686_v16 = vor.u32 %v14410_v20, %v11685_v28  ;;  %4879 = vmatpush.bf16.msrb.mxu2 %v11430_v54  ;;  %v14054_v28 = vld [vmem:[#allocation4 + $0x354] sm:$0xf]  ;;  %v10826_v20 = vor.u32 %v14190_v55, %v10823_v52  ;;  %v10026_v54 = vor.u32 %v13990_v2, %v10023_v61  ;;  %v5488_v52 = vperm.slane %v16321_v11, 1 }
 0x326   : > { %v14210_v1 = vld [vmem:[#allocation4 + $0x82c] sm:$0xf0]  ;;  %v10791_v29 = vld [vmem:[#allocation4 + $0x770] sm:$0xf0]  ;;  %v10282_v3 = vor.u32 %v14054_v28, %v10279_v39  ;;  %v4687_v39 = vpop.f32.mrf.mxu3 }
 0x327   : > { %v11141_v41 = vld [vmem:[#allocation4 + $0xa10] sm:$0xf]  ;;  %v10886_v31 = vor.u32 %v14210_v1, %v10885_v44  ;;  %4892 = vmatpush.bf16.msrb.mxu3 %v11686_v16  ;;  %v10535_v44 = vld [vmem:[#allocation4 + $0x570] sm:$0xf0]  ;;  %v5383_v1 = vmul.f32 %v16356_v62, %v5382_v43 }
 0x328   : > { %v14274_v4 = vld [vmem:[#allocation4 + $0xa2c] sm:$0xf0]  ;;  %v10538_v16 = vor.u32 %v14118_v6, %v10535_v44  ;;  %v14110_v59 = vld [vmem:[#allocation4 + $0x514] sm:$0xf] }
 0x329   : > { %v11397_v19 = vld [vmem:[#allocation4 + $0xc10] sm:$0xf]  ;;  %v11142_v45 = vor.u32 %v14274_v4, %v11141_v41  ;;  %4854 = vmatpush.bf16.msrb.mxu0 %v10886_v31  ;;  %v14182_v41 = vld [vmem:[#allocation4 + $0x754] sm:$0xf] }
 0x32a   : > { %v14338_v18 = vld [vmem:[#allocation4 + $0xc2c] sm:$0xf0]  ;;  %v13982_v4 = vld [vmem:[#allocation4 + $0x114] sm:$0xf]  ;;  %v10794_v38 = vor.u32 %v14182_v41, %v10791_v29 }
 0x32b   : > { %v11653_v53 = vld [vmem:[#allocation4 + $0xe10] sm:$0xf]  ;;  %v11398_v8 = vor.u32 %v14338_v18, %v11397_v19  ;;  %4867 = vmatpush.bf16.msrb.mxu1 %v11142_v45  ;;  %v9991_v19 = vld [vmem:[#allocation4 + $0x130] sm:$0xf0]  ;;  %v5384_v18 = vmul.f32 0.5, %v5383_v1  ;;  %v4648_v45 = vpop.f32.mrf.mxu0 }
 0x32c   : > { %v14402_v56 = vld [vmem:[#allocation4 + $0xe2c] sm:$0xf0]  ;;  %4855 = vmatmul.bf16.vlgmr.msrb.gmra.mxu0 %v16247_v25  ;;  %v10503_v34 = vld [vmem:[#allocation4 + $0x530] sm:$0xf0]  ;;  %v9994_v58 = vor.u32 %v13982_v4, %v9991_v19 }
 0x32d   : > { %v11654_v46 = vor.u32 %v14402_v56, %v11653_v53  ;;  %4880 = vmatpush.bf16.msrb.mxu2 %v11398_v8  ;;  %4899 = vmatpush.bf16.msra.mxu0 %v10090_v26  ;;  %v14046_v53 = vld [vmem:[#allocation4 + $0x314] sm:$0xf]  ;;  %v5385_v57 = vsub.f32 1.5, %v5384_v18  ;;  %v10506_v5 = vor.u32 %v14110_v59, %v10503_v34  ;;  %v4661_v26 = vpop.f32.mrf.mxu1 }
 0x32e   : > { %4868 = vmatmul.bf16.vlgmr.msrb.gmra.mxu1 %v16252_v42  ;;  %v10247_v56 = vld [vmem:[#allocation4 + $0x330] sm:$0xf0] }
 0x32f   : > { %4893 = vmatpush.bf16.msrb.mxu3 %v11654_v46  ;;  %4912 = vmatpush.bf16.msra.mxu1 %v10346_v9  ;;  %v14174_v31 = vld [vmem:[#allocation4 + $0x714] sm:$0xf]  ;;  %v10250_v10 = vor.u32 %v14046_v53, %v10247_v56  ;;  %v5386_v30 = vmul.f32 %v16356_v62, %v5385_v57  ;;  %v4649_v46 = vadd.f32 %v4648_v45, %v16350_v12 }
 0x330   : > { %4881 = vmatmul.bf16.vlgmr.msrb.gmra.mxu2 %v16245_v32  ;;  %v10759_v21 = vld [vmem:[#allocation4 + $0x730] sm:$0xf0] }
 0x331   : > { %4925 = vmatpush.bf16.msra.mxu2 %v10602_v24  ;;  %4900 = vmatpush.bf16.msra.mxu0 %v10058_v15  ;;  %v13974_v8 = vld [vmem:[#allocation4 + $0xd4] sm:$0xf]  ;;  %v10762_v51 = vor.u32 %v14174_v31, %v10759_v21  ;;  %v5390_v60 = vsel %vm5389_vm14, %v16356_v62, %v5386_v30  ;;  %v4662_v14 = vadd.f32 %v4661_v26, %v4649_v46 }
 0x332   : > { %4894 = vmatmul.bf16.vlgmr.msrb.gmra.mxu3 %v16249_v50  ;;  %v9959_v9 = vld [vmem:[#allocation4 + $0xf0] sm:$0xf0]  ;;  %v5452_v12 = vmul.f32 %v5390_v60, %v16342_v40 }
 0x333   : > { %4938 = vmatpush.bf16.msra.mxu3 %v10858_v7  ;;  %4913 = vmatpush.bf16.msra.mxu1 %v10314_v0  ;;  %v14038_v24 = vld [vmem:[#allocation4 + $0x2d4] sm:$0xf]  ;;  %v9962_v15 = vor.u32 %v13974_v8, %v9959_v9  ;;  %v4650_v19 = vpop.f32.mrf.mxu0 }
 0x334   : > { %v10215_v49 = vld [vmem:[#allocation4 + $0x2f0] sm:$0xf0]  ;;  %v5478_v28 = vmul.f32 %v5462_v35, %v5452_v12 }
 0x335   : > { %4926 = vmatpush.bf16.msra.mxu2 %v10570_v27  ;;  %4901 = vmatpush.bf16.msra.mxu0 %v10026_v54  ;;  %v14102_v7 = vld [vmem:[#allocation4 + $0x4d4] sm:$0xf]  ;;  %v10218_v43 = vor.u32 %v14038_v24, %v10215_v49 }
 0x336   : > { %v10471_v63 = vld [vmem:[#allocation4 + $0x4f0] sm:$0xf0]  ;;  %v16375_v41 = vadd.f32 %v5488_v52, %v5478_v28 }
 0x337   : > { %4939 = vmatpush.bf16.msra.mxu3 %v10826_v20  ;;  %4914 = vmatpush.bf16.msra.mxu1 %v10282_v3  ;;  %v14166_v36 = vld [vmem:[#allocation4 + $0x6d4] sm:$0xf]  ;;  %v10474_v0 = vor.u32 %v14102_v7, %v10471_v63  ;;  %v4675_v20 = vadd.f32 %v4674_v13, %v4662_v14  ;;  %v4676_v7 = vpop.f32.mrf.mxu2 }
 0x338   : > { %v10727_v55 = vld [vmem:[#allocation4 + $0x6f0] sm:$0xf0]  ;;  %v5512_v59 = vmax.f32 %v16375_v41, 0.0 }
 0x339   : > { %4927 = vmatpush.bf16.msra.mxu2 %v10538_v16  ;;  %4902 = vmatpush.bf16.msra.mxu0 %v9994_v58  ;;  %v13966_v27 = vld [vmem:[#allocation4 + $0x94] sm:$0xf]  ;;  %v10730_v62 = vor.u32 %v14166_v36, %v10727_v55  ;;  %v16377_v29 = vadd.f32 %v4687_v39, %v4675_v20  ;;  %v4689_v55 = vpop.f32.mrf.mxu3 }
 0x33a   : > { %v9927_v2 = vld [vmem:[#allocation4 + $0xb0] sm:$0xf0] }
 0x33b   : > { %4940 = vmatpush.bf16.msra.mxu3 %v10794_v38  ;;  %4915 = vmatpush.bf16.msra.mxu1 %v10250_v10  ;;  %v14030_v61 = vld [vmem:[#allocation4 + $0x294] sm:$0xf]  ;;  %v9930_v54 = vor.u32 %v13966_v27, %v9927_v2  ;;  %v4663_v38 = vpop.f32.mrf.mxu1  ;;  %v5226_v34 = vsel %vm1167_vm2, %v16377_v29, 0.0 }
 0x33c   : > { %v10183_v6 = vld [vmem:[#allocation4 + $0x2b0] sm:$0xf0]  ;;  %v5227_v58 = vrot.slane %v5226_v34, 4 }
 0x33d   : > { %4928 = vmatpush.bf16.msra.mxu2 %v10506_v5  ;;  %v14094_v44 = vld [vmem:[#allocation4 + $0x494] sm:$0xf]  ;;  %4903 = vmatpush.bf16.msra.mxu0 %v9962_v15  ;;  %v10186_v18 = vor.u32 %v14030_v61, %v10183_v6 }
 0x33e   : > { %v10439_v40 = vld [vmem:[#allocation4 + $0x4b0] sm:$0xf0]  ;;  %v5228_v26 = vadd.f32 %v5227_v58, %v5226_v34 }
 0x33f   : > { %4941 = vmatpush.bf16.msra.mxu3 %v10762_v51  ;;  %v14158_v1 = vld [vmem:[#allocation4 + $0x694] sm:$0xf]  ;;  %4916 = vmatpush.bf16.msra.mxu1 %v10218_v43  ;;  %v10442_v3 = vor.u32 %v14094_v44, %v10439_v40 }
 0x340   : > { %v10695_v11 = vld [vmem:[#allocation4 + $0x6b0] sm:$0xf0]  ;;  %v5229_v12 = vrot.slane %v5228_v26, 2 }
 0x341   : > { %v13958_v4 = vld [vmem:[#allocation4 + $0x54] sm:$0xf]  ;;  %4929 = vmatpush.bf16.msra.mxu2 %v10474_v0  ;;  %v10698_v57 = vor.u32 %v14158_v1, %v10695_v11  ;;  %4904 = vmatpush.bf16.msra.mxu0 %v9930_v54 }
 0x342   : > { %v9895_v16 = vld [vmem:[#allocation4 + $0x70] sm:$0xf0]  ;;  %v5230_v2 = vadd.f32 %v5229_v12, %v5228_v26 }
 0x343   : > { %v14022_v53 = vld [vmem:[#allocation4 + $0x254] sm:$0xf]  ;;  %4942 = vmatpush.bf16.msra.mxu3 %v10730_v62  ;;  %v9898_v8 = vor.u32 %v13958_v4, %v9895_v16  ;;  %4917 = vmatpush.bf16.msra.mxu1 %v10186_v18 }
 0x344   : > { %v10151_v56 = vld [vmem:[#allocation4 + $0x270] sm:$0xf0]  ;;  %v5231_v40 = vrot.slane %v5230_v2, 1 }
 0x345   : > { %v14086_v31 = vld [vmem:[#allocation4 + $0x454] sm:$0xf]  ;;  %4930 = vmatpush.bf16.msra.mxu2 %v10442_v3  ;;  %v10154_v9 = vor.u32 %v14022_v53, %v10151_v56  ;;  %4905 = vmatpush.bf16.msra.mxu0 %v9898_v8 }
 0x346   : > { %v10407_v21 = vld [vmem:[#allocation4 + $0x470] sm:$0xf0]  ;;  %v5232_v53 = vadd.f32 %v5231_v40, %v5230_v2 }
 0x347   : > { %v14150_v10 = vld [vmem:[#allocation4 + $0x654] sm:$0xf]  ;;  %v10410_v24 = vor.u32 %v14086_v31, %v10407_v21  ;;  %4943 = vmatpush.bf16.msra.mxu3 %v10698_v57  ;;  %4918 = vmatpush.bf16.msra.mxu1 %v10154_v9 }
 0x348   : > { %v10663_v45 = vld [vmem:[#allocation4 + $0x670] sm:$0xf0]  ;;  %v5277_v57 = vmul.f32 %v16290_v47, %v5232_v53 }
 0x349   : > { %v13950_v30 = vld [vmem:[#allocation4 + $0x14] sm:$0xf]  ;;  %v10666_v63 = vor.u32 %v14150_v10, %v10663_v45  ;;  %4931 = vmatpush.bf16.msra.mxu2 %v10410_v24 }
 0x34a   : > { %v9863_v5 = vld [vmem:[#allocation4 + $0x30] sm:$0xf0]  ;;  %v16385_v26 = vsub.f32 %v16377_v29, %v5277_v57  ;;  %v4726_v57 = vpop.f32.mrf.mxu2 }
 0x34b   : > { %v14014_v46 = vld [vmem:[#allocation4 + $0x214] sm:$0xf]  ;;  %v9866_v43 = vor.u32 %v13950_v30, %v9863_v5  ;;  %4944 = vmatpush.bf16.msra.mxu3 %v10666_v63 }
 0x34c   : > { %v10119_v49 = vld [vmem:[#allocation4 + $0x230] sm:$0xf0] }
 0x34d   : > { %v14078_v35 = vld [vmem:[#allocation4 + $0x414] sm:$0xf]  ;;  %v10122_v61 = vor.u32 %v14014_v46, %v10119_v49  ;;  %4906 = vmatpush.bf16.msra.mxu0 %v9866_v43 }
 0x34e   : > { %v10375_v51 = vld [vmem:[#allocation4 + $0x430] sm:$0xf0] }
 0x34f   : > { %v14142_v60 = vld [vmem:[#allocation4 + $0x614] sm:$0xf]  ;;  %v10378_v28 = vor.u32 %v14078_v35, %v10375_v51  ;;  %4919 = vmatpush.bf16.msra.mxu1 %v10122_v61  ;;  %v5293_v35 = vmul.f32 %v16385_v26, %v16385_v26 }
 0x350   : > { %v10631_v14 = vld [vmem:[#allocation4 + $0x630] sm:$0xf0]  ;;  %4907 = vmatmul.bf16.vlgmr.msra.gmra.mxu0 %v16220_v22 }
 0x351   : > { %v14262_v36 = vld [vmem:[#allocation4 + $0x9d4] sm:$0xf]  ;;  %v10634_v39 = vor.u32 %v14142_v60, %v10631_v14  ;;  %4932 = vmatpush.bf16.msra.mxu2 %v10378_v28 }
 0x352   : > { %v11111_v52 = vld [vmem:[#allocation4 + $0x9f0] sm:$0xf0]  ;;  %4920 = vmatmul.bf16.vlgmr.msra.gmra.mxu1 %v16227_v17 }
 0x353   : > { %v14326_v15 = vld [vmem:[#allocation4 + $0xbd4] sm:$0xf]  ;;  %v11114_v6 = vor.u32 %v14262_v36, %v11111_v52  ;;  %4945 = vmatpush.bf16.msra.mxu3 %v10634_v39  ;;  %v5313_v52 = vsel %vm1167_vm2, %v5293_v35, 0.0  ;;  %v4713_v39 = vpop.f32.mrf.mxu1 }
 0x354   : > { %v11367_v0 = vld [vmem:[#allocation4 + $0xbf0] sm:$0xf0]  ;;  %4933 = vmatmul.bf16.vlgmr.msra.gmra.mxu2 %v16216_v33 }
 0x355   : > { %v14390_v13 = vld [vmem:[#allocation4 + $0xdd4] sm:$0xf]  ;;  %v11370_v1 = vor.u32 %v14326_v15, %v11367_v0  ;;  %4951 = vmatpush.bf16.msrb.mxu0 %v11114_v6  ;;  %v5314_v0 = vrot.slane %v5313_v52, 4 }
 0x356   : > { %v11623_v27 = vld [vmem:[#allocation4 + $0xdf0] sm:$0xf0]  ;;  %4946 = vmatmul.bf16.vlgmr.msra.gmra.mxu3 %v16223_v23 }
 0x357   : > { %v14454_v62 = vld [vmem:[#allocation4 + $0xfd4] sm:$0xf]  ;;  %v11626_v11 = vor.u32 %v14390_v13, %v11623_v27  ;;  %4964 = vmatpush.bf16.msrb.mxu1 %v11370_v1  ;;  %v4700_v27 = vpop.f32.mrf.mxu0  ;;  %v5315_v6 = vadd.f32 %v5314_v0, %v5313_v52 }
 0x358   : > { %v11879_v20 = vld [vmem:[#allocation4 + $0xff0] sm:$0xf0] }
 0x359   : > { %v14254_v44 = vld [vmem:[#allocation4 + $0x994] sm:$0xf]  ;;  %v11882_v19 = vor.u32 %v14454_v62, %v11879_v20  ;;  %4977 = vmatpush.bf16.msrb.mxu2 %v11626_v11 }
 0x35a   : > { %v11079_v54 = vld [vmem:[#allocation4 + $0x9b0] sm:$0xf0] }
 0x35b   : > { %v14318_v4 = vld [vmem:[#allocation4 + $0xb94] sm:$0xf]  ;;  %v11082_v34 = vor.u32 %v14254_v44, %v11079_v54  ;;  %4990 = vmatpush.bf16.msrb.mxu3 %v11882_v19  ;;  %v4714_v54 = vadd.f32 %v4713_v39, %v4700_v27 }
 0x35c   : > { %v11335_v18 = vld [vmem:[#allocation4 + $0xbb0] sm:$0xf0] }
 0x35d   : > { %v14382_v3 = vld [vmem:[#allocation4 + $0xd94] sm:$0xf]  ;;  %v11338_v31 = vor.u32 %v14318_v4, %v11335_v18  ;;  %4952 = vmatpush.bf16.msrb.mxu0 %v11082_v34  ;;  %v5316_v18 = vrot.slane %v5315_v6, 2 }
 0x35e   : > { %v11591_v16 = vld [vmem:[#allocation4 + $0xdb0] sm:$0xf0] }
 0x35f   : > { %v14446_v56 = vld [vmem:[#allocation4 + $0xf94] sm:$0xf]  ;;  %v11594_v21 = vor.u32 %v14382_v3, %v11591_v16  ;;  %4965 = vmatpush.bf16.msrb.mxu1 %v11338_v31  ;;  %v5317_v31 = vadd.f32 %v5316_v18, %v5315_v6  ;;  %v4702_v35 = vpop.f32.mrf.mxu0  ;;  %v10093_v18 = vld [vmem:[#allocation4 + $0x1d8] sm:$0xf] }
 0x360   : > { %v11847_v38 = vld [vmem:[#allocation4 + $0xfb0] sm:$0xf0]  ;;  %v14067_v35 = vld [vmem:[#allocation4 + $0x3b4] sm:$0xf0] }
 0x361   : > { %v14246_v58 = vld [vmem:[#allocation4 + $0x954] sm:$0xf]  ;;  %v11850_v8 = vor.u32 %v14446_v56, %v11847_v38  ;;  %4978 = vmatpush.bf16.msrb.mxu2 %v11594_v21 }
 0x362   : > { %v11047_v10 = vld [vmem:[#allocation4 + $0x970] sm:$0xf0] }
 0x363   : > { %v14310_v45 = vld [vmem:[#allocation4 + $0xb54] sm:$0xf]  ;;  %v11050_v49 = vor.u32 %v14246_v58, %v11047_v10  ;;  %4991 = vmatpush.bf16.msrb.mxu3 %v11850_v8  ;;  %v4727_v8 = vadd.f32 %v4726_v57, %v4714_v54 }
 0x364   : > { %v11303_v30 = vld [vmem:[#allocation4 + $0xb70] sm:$0xf0] }
 0x365   : > { %v14374_v5 = vld [vmem:[#allocation4 + $0xd54] sm:$0xf]  ;;  %v11306_v51 = vor.u32 %v14310_v45, %v11303_v30  ;;  %4953 = vmatpush.bf16.msrb.mxu0 %v11050_v49  ;;  %v4739_v30 = vpop.f32.mrf.mxu3 }
 0x366   : > { %v11559_v46 = vld [vmem:[#allocation4 + $0xd70] sm:$0xf0]  ;;  %v16393_v49 = vadd.f32 %v4739_v30, %v4727_v8 }
 0x367   : > { %v14438_v9 = vld [vmem:[#allocation4 + $0xf54] sm:$0xf]  ;;  %v11562_v7 = vor.u32 %v14374_v5, %v11559_v46  ;;  %4966 = vmatpush.bf16.msrb.mxu1 %v11306_v51 }
 0x368   : > { %v11815_v24 = vld [vmem:[#allocation4 + $0xf70] sm:$0xf0] }
 0x369   : > { %v14238_v63 = vld [vmem:[#allocation4 + $0x914] sm:$0xf]  ;;  %v11818_v14 = vor.u32 %v14438_v9, %v11815_v24  ;;  %4979 = vmatpush.bf16.msrb.mxu2 %v11562_v7  ;;  %v5318_v9 = vrot.slane %v5317_v31, 1 }
 0x36a   : > { %v11015_v29 = vld [vmem:[#allocation4 + $0x930] sm:$0xf0] }
 0x36b   : > { %v14302_v60 = vld [vmem:[#allocation4 + $0xb14] sm:$0xf]  ;;  %v11018_v13 = vor.u32 %v14238_v63, %v11015_v29  ;;  %4992 = vmatpush.bf16.msrb.mxu3 %v11818_v14  ;;  %v4715_v14 = vpop.f32.mrf.mxu1 }
 0x36c   : > { %v11271_v36 = vld [vmem:[#allocation4 + $0xb30] sm:$0xf0] }
 0x36d   : > { %v14366_v55 = vld [vmem:[#allocation4 + $0xd14] sm:$0xf]  ;;  %v11274_v2 = vor.u32 %v14302_v60, %v11271_v36  ;;  %4954 = vmatpush.bf16.msrb.mxu0 %v11018_v13  ;;  %v5319_v36 = vadd.f32 %v5318_v9, %v5317_v31  ;;  %v10317_v9 = vld [vmem:[#allocation4 + $0x398] sm:$0xf] }
 0x36e   : > { %v11527_v12 = vld [vmem:[#allocation4 + $0xd30] sm:$0xf0] }
 0x36f   : > { %v14430_v15 = vld [vmem:[#allocation4 + $0xf14] sm:$0xf]  ;;  %v11530_v61 = vor.u32 %v14366_v55, %v11527_v12  ;;  %4967 = vmatpush.bf16.msrb.mxu1 %v11274_v2  ;;  %v5357_v13 = vmul.f32 %v5319_v36, %v16290_v47 }
 0x370   : > { %v11783_v43 = vld [vmem:[#allocation4 + $0xf30] sm:$0xf0] }
 0x371   : > { %v14230_v28 = vld [vmem:[#allocation4 + $0x8d4] sm:$0xf]  ;;  %v11786_v44 = vor.u32 %v14430_v15, %v11783_v43  ;;  %4980 = vmatpush.bf16.msrb.mxu2 %v11530_v61 }
 0x372   : > { %v10983_v62 = vld [vmem:[#allocation4 + $0x8f0] sm:$0xf0] }
 0x373   : > { %v14294_v20 = vld [vmem:[#allocation4 + $0xad4] sm:$0xf]  ;;  %v10986_v3 = vor.u32 %v14230_v28, %v10983_v62  ;;  %4993 = vmatpush.bf16.msrb.mxu3 %v11786_v44 }
 0x374   : > { %v11239_v40 = vld [vmem:[#allocation4 + $0xaf0] sm:$0xf0] }
 0x375   : > { %v14358_v1 = vld [vmem:[#allocation4 + $0xcd4] sm:$0xf]  ;;  %v11242_v16 = vor.u32 %v14294_v20, %v11239_v40  ;;  %4955 = vmatpush.bf16.msrb.mxu0 %v10986_v3  ;;  %v4728_v40 = vpop.f32.mrf.mxu2  ;;  %v14011_v3 = vld [vmem:[#allocation4 + $0x1f4] sm:$0xf0] }
 0x376   : > { %v11495_v11 = vld [vmem:[#allocation4 + $0xcf0] sm:$0xf0] }
 0x377   : > { %v14422_v4 = vld [vmem:[#allocation4 + $0xed4] sm:$0xf]  ;;  %v11498_v53 = vor.u32 %v14358_v1, %v11495_v11  ;;  %4968 = vmatpush.bf16.msrb.mxu1 %v11242_v16  ;;  %v16396_v1 = vadd.f32 1e-05, %v5357_v13  ;;  %v10349_v16 = vld [vmem:[#allocation4 + $0x3d8] sm:$0xf] }
 0x378   : > { %v11751_v19 = vld [vmem:[#allocation4 + $0xef0] sm:$0xf0]  ;;  %v14059_v13 = vld [vmem:[#allocation4 + $0x374] sm:$0xf0] }
 0x379   : > { %v14222_v56 = vld [vmem:[#allocation4 + $0x894] sm:$0xf]  ;;  %v11754_v21 = vor.u32 %v14422_v4, %v11751_v19  ;;  %4981 = vmatpush.bf16.msrb.mxu2 %v11498_v53  ;;  %v4741_v19 = vpop.f32.mrf.mxu3  ;;  %15073 = vrsqrt.f32 %v16396_v1  ;;  %vm5397_vm0 = vweird.f32 %v16396_v1 }
 0x37a   : > { %v10951_v38 = vld [vmem:[#allocation4 + $0x8b0] sm:$0xf0] }
 0x37b   : > { %v14286_v34 = vld [vmem:[#allocation4 + $0xa94] sm:$0xf]  ;;  %v10954_v24 = vor.u32 %v14222_v56, %v10951_v38  ;;  %4994 = vmatpush.bf16.msrb.mxu3 %v11754_v21  ;;  %v14075_v56 = vld [vmem:[#allocation4 + $0x3f4] sm:$0xf0] }
 0x37c   : > { %v11207_v58 = vld [vmem:[#allocation4 + $0xab0] sm:$0xf0]  ;;  %v10605_v38 = vld [vmem:[#allocation4 + $0x5d8] sm:$0xf]  ;;  %v10350_v8 = vor.u32 %v14075_v56, %v10349_v16 }
 0x37d   : > { %v14350_v10 = vld [vmem:[#allocation4 + $0xc94] sm:$0xf]  ;;  %v11210_v51 = vor.u32 %v14286_v34, %v11207_v58  ;;  %4956 = vmatpush.bf16.msrb.mxu0 %v10954_v24  ;;  %v14139_v34 = vld [vmem:[#allocation4 + $0x5f4] sm:$0xf0] }
 0x37e   : > { %v11463_v45 = vld [vmem:[#allocation4 + $0xcb0] sm:$0xf0]  ;;  %v10861_v21 = vld [vmem:[#allocation4 + $0x7d8] sm:$0xf]  ;;  %v10606_v30 = vor.u32 %v14139_v34, %v10605_v38 }
 0x37f   : > { %v14414_v5 = vld [vmem:[#allocation4 + $0xe94] sm:$0xf]  ;;  %v11466_v7 = vor.u32 %v14350_v10, %v11463_v45  ;;  %4969 = vmatpush.bf16.msrb.mxu1 %v11210_v51  ;;  %v14203_v58 = vld [vmem:[#allocation4 + $0x7f4] sm:$0xf0]  ;;  %v10094_v45 = vor.u32 %v14011_v3, %v10093_v18 }
 0x380   : > { %v11719_v46 = vld [vmem:[#allocation4 + $0xeb0] sm:$0xf0]  ;;  %v10862_v24 = vor.u32 %v14203_v58, %v10861_v21  ;;  %v10573_v51 = vld [vmem:[#allocation4 + $0x598] sm:$0xf] }
 0x381   : > { %v14214_v63 = vld [vmem:[#allocation4 + $0x854] sm:$0xf]  ;;  %v11722_v55 = vor.u32 %v14414_v5, %v11719_v46  ;;  %4982 = vmatpush.bf16.msrb.mxu2 %v11466_v7  ;;  %v10061_v5 = vld [vmem:[#allocation4 + $0x198] sm:$0xf] }
 0x382   : > { %v10919_v29 = vld [vmem:[#allocation4 + $0x870] sm:$0xf0]  ;;  %v14003_v46 = vld [vmem:[#allocation4 + $0x1b4] sm:$0xf0] }
 0x383   : > { %v14278_v60 = vld [vmem:[#allocation4 + $0xa54] sm:$0xf]  ;;  %v10922_v27 = vor.u32 %v14214_v63, %v10919_v29  ;;  %4995 = vmatpush.bf16.msrb.mxu3 %v11722_v55  ;;  %v14131_v7 = vld [vmem:[#allocation4 + $0x5b4] sm:$0xf0]  ;;  %v10062_v14 = vor.u32 %v14003_v46, %v10061_v5  ;;  %v10318_v55 = vor.u32 %v14067_v35, %v10317_v9  ;;  %v16414_v46 = vld [vmem:[#allocation12] sm:$0xff] }
 0x384   : > { %v11175_v12 = vld [vmem:[#allocation4 + $0xa70] sm:$0xf0]  ;;  %v10829_v63 = vld [vmem:[#allocation4 + $0x798] sm:$0xf]  ;;  %v5463_v9 = vperm.slane %v16414_v46, 2 }
 0x385   : > { %v14342_v52 = vld [vmem:[#allocation4 + $0xc54] sm:$0xf]  ;;  %v11178_v62 = vor.u32 %v14278_v60, %v11175_v12  ;;  %4957 = vmatpush.bf16.msrb.mxu0 %v10922_v27  ;;  %v14195_v29 = vld [vmem:[#allocation4 + $0x7b4] sm:$0xf0]  ;;  %v16399_v60 = vpop.eup %15073  ;;  %v10574_v12 = vor.u32 %v14131_v7, %v10573_v51 }
 0x386   : > { %v11431_v15 = vld [vmem:[#allocation4 + $0xc70] sm:$0xf0]  ;;  %v5392_v36 = vmul.f32 %v16399_v60, %v16396_v1  ;;  %v10541_v27 = vld [vmem:[#allocation4 + $0x558] sm:$0xf]  ;;  %vm5398_vm15 = vweird.f32 %v16399_v60 }
 0x387   : > { %v14406_v43 = vld [vmem:[#allocation4 + $0xe54] sm:$0xf]  ;;  %v11434_v20 = vor.u32 %v14342_v52, %v11431_v15  ;;  %4970 = vmatpush.bf16.msrb.mxu1 %v11178_v62  ;;  %v10029_v52 = vld [vmem:[#allocation4 + $0x158] sm:$0xf]  ;;  %vm5399_vm1 = vmor %vm5397_vm0, %vm5398_vm15 }
 0x388   : > { %v11687_v0 = vld [vmem:[#allocation4 + $0xe70] sm:$0xf0]  ;;  %v13995_v15 = vld [vmem:[#allocation4 + $0x174] sm:$0xf0] }
 0x389   : > { %v14206_v2 = vld [vmem:[#allocation4 + $0x814] sm:$0xf]  ;;  %v11690_v11 = vor.u32 %v14406_v43, %v11687_v0  ;;  %4983 = vmatpush.bf16.msrb.mxu2 %v11434_v20  ;;  %v10285_v43 = vld [vmem:[#allocation4 + $0x358] sm:$0xf]  ;;  %v10830_v0 = vor.u32 %v14195_v29, %v10829_v63  ;;  %v10030_v20 = vor.u32 %v13995_v15, %v10029_v52  ;;  %v4778_v15 = vpop.f32.mrf.mxu2 }
 0x38a   : > { %v10887_v61 = vld [vmem:[#allocation4 + $0x830] sm:$0xf0]  ;;  %v14187_v62 = vld [vmem:[#allocation4 + $0x774] sm:$0xf0]  ;;  %v10286_v40 = vor.u32 %v14059_v13, %v10285_v43 }
 0x38b   : > { %v14270_v28 = vld [vmem:[#allocation4 + $0xa14] sm:$0xf]  ;;  %v10890_v53 = vor.u32 %v14206_v2, %v10887_v61  ;;  %4996 = vmatpush.bf16.msrb.mxu3 %v11690_v11  ;;  %v14123_v2 = vld [vmem:[#allocation4 + $0x574] sm:$0xf0]  ;;  %v5393_v61 = vmul.f32 %v16399_v60, %v5392_v36 }
 0x38c   : > { %v11143_v39 = vld [vmem:[#allocation4 + $0xa30] sm:$0xf0]  ;;  %v10542_v11 = vor.u32 %v14123_v2, %v10541_v27  ;;  %v10509_v18 = vld [vmem:[#allocation4 + $0x518] sm:$0xf] }
 0x38d   : > { %v14334_v6 = vld [vmem:[#allocation4 + $0xc14] sm:$0xf]  ;;  %v11146_v57 = vor.u32 %v14270_v28, %v11143_v39  ;;  %4958 = vmatpush.bf16.msrb.mxu0 %v10890_v53  ;;  %v10797_v28 = vld [vmem:[#allocation4 + $0x758] sm:$0xf] }
 0x38e   : > { %v11399_v44 = vld [vmem:[#allocation4 + $0xc30] sm:$0xf0]  ;;  %v9997_v39 = vld [vmem:[#allocation4 + $0x118] sm:$0xf]  ;;  %v10798_v19 = vor.u32 %v14187_v62, %v10797_v28 }
 0x38f   : > { %v14398_v54 = vld [vmem:[#allocation4 + $0xe14] sm:$0xf]  ;;  %v11402_v31 = vor.u32 %v14334_v6, %v11399_v44  ;;  %4971 = vmatpush.bf16.msrb.mxu1 %v11146_v57  ;;  %v13987_v6 = vld [vmem:[#allocation4 + $0x134] sm:$0xf0]  ;;  %v5394_v44 = vmul.f32 0.5, %v5393_v61  ;;  %v4752_v57 = vpop.f32.mrf.mxu0  ;;  %v4791_v61 = vpop.f32.mrf.mxu3 }
 0x390   : > { %v11655_v4 = vld [vmem:[#allocation4 + $0xe30] sm:$0xf0]  ;;  %4959 = vmatmul.bf16.vlgmr.msrb.gmra.mxu0 %v16247_v25  ;;  %v14115_v3 = vld [vmem:[#allocation4 + $0x534] sm:$0xf0]  ;;  %v9998_v38 = vor.u32 %v13987_v6, %v9997_v39 }
 0x391   : > { %v11658_v10 = vor.u32 %v14398_v54, %v11655_v4  ;;  %4984 = vmatpush.bf16.msrb.mxu2 %v11402_v31  ;;  %5003 = vmatpush.bf16.msra.mxu0 %v10094_v45  ;;  %v10253_v54 = vld [vmem:[#allocation4 + $0x318] sm:$0xf]  ;;  %v5395_v16 = vsub.f32 1.5, %v5394_v44  ;;  %v10510_v58 = vor.u32 %v14115_v3, %v10509_v18  ;;  %v4765_v45 = vpop.f32.mrf.mxu1 }
 0x392   : > { %4972 = vmatmul.bf16.vlgmr.msrb.gmra.mxu1 %v16252_v42  ;;  %v14051_v4 = vld [vmem:[#allocation4 + $0x334] sm:$0xf0] }
 0x393   : > { %4997 = vmatpush.bf16.msrb.mxu3 %v11658_v10  ;;  %5016 = vmatpush.bf16.msra.mxu1 %v10350_v8  ;;  %v10765_v53 = vld [vmem:[#allocation4 + $0x718] sm:$0xf]  ;;  %v10254_v34 = vor.u32 %v14051_v4, %v10253_v54  ;;  %v5396_v21 = vmul.f32 %v16399_v60, %v5395_v16  ;;  %v4753_v10 = vadd.f32 %v4752_v57, %v16393_v49 }
 0x394   : > { %4985 = vmatmul.bf16.vlgmr.msrb.gmra.mxu2 %v16245_v32  ;;  %v14179_v56 = vld [vmem:[#allocation4 + $0x734] sm:$0xf0] }
 0x395   : > { %5029 = vmatpush.bf16.msra.mxu2 %v10606_v30  ;;  %5004 = vmatpush.bf16.msra.mxu0 %v10062_v14  ;;  %v9965_v31 = vld [vmem:[#allocation4 + $0xd8] sm:$0xf]  ;;  %v5400_v51 = vsel %vm5399_vm1, %v16399_v60, %v5396_v21  ;;  %v4766_v7 = vadd.f32 %v4765_v45, %v4753_v10  ;;  %v16419_v14 = vld [vmem:[#allocation13] sm:$0xff] }
 0x396   : > { %4998 = vmatmul.bf16.vlgmr.msrb.gmra.mxu3 %v16249_v50  ;;  %v13979_v8 = vld [vmem:[#allocation4 + $0xf4] sm:$0xf0]  ;;  %v5453_v29 = vmul.f32 %v5400_v51, %v16385_v26  ;;  %v5489_v36 = vperm.slane %v16419_v14, 2 }
 0x397   : > { %5042 = vmatpush.bf16.msra.mxu3 %v10862_v24  ;;  %5017 = vmatpush.bf16.msra.mxu1 %v10318_v55  ;;  %v10221_v30 = vld [vmem:[#allocation4 + $0x2d8] sm:$0xf]  ;;  %v10766_v24 = vor.u32 %v14179_v56, %v10765_v53  ;;  %v9966_v55 = vor.u32 %v13979_v8, %v9965_v31  ;;  %v4779_v2 = vadd.f32 %v4778_v15, %v4766_v7  ;;  %v4754_v54 = vpop.f32.mrf.mxu0 }
 0x398   : > { %v14043_v5 = vld [vmem:[#allocation4 + $0x2f4] sm:$0xf0]  ;;  %v5479_v60 = vmul.f32 %v5463_v9, %v5453_v29 }
 0x399   : > { %5030 = vmatpush.bf16.msra.mxu2 %v10574_v12  ;;  %5005 = vmatpush.bf16.msra.mxu0 %v10030_v20  ;;  %v10477_v35 = vld [vmem:[#allocation4 + $0x4d8] sm:$0xf]  ;;  %v10222_v12 = vor.u32 %v14043_v5, %v10221_v30  ;;  %v16424_v44 = vadd.f32 %v4791_v61, %v4779_v2  ;;  %v4767_v53 = vpop.f32.mrf.mxu1 }
 0x39a   : > { %v14107_v1 = vld [vmem:[#allocation4 + $0x4f4] sm:$0xf0]  ;;  %v16422_v6 = vadd.f32 %v5489_v36, %v5479_v60 }
 0x39b   : > { %5043 = vmatpush.bf16.msra.mxu3 %v10830_v0  ;;  %5018 = vmatpush.bf16.msra.mxu1 %v10286_v40  ;;  %v10733_v63 = vld [vmem:[#allocation4 + $0x6d8] sm:$0xf]  ;;  %v10478_v52 = vor.u32 %v14107_v1, %v10477_v35 }
 0x39c   : > { %v14171_v49 = vld [vmem:[#allocation4 + $0x6f4] sm:$0xf0]  ;;  %v5513_v56 = vmax.f32 %v16422_v6, 0.0 }
 0x39d   : > { %5031 = vmatpush.bf16.msra.mxu2 %v10542_v11  ;;  %5006 = vmatpush.bf16.msra.mxu0 %v9998_v38  ;;  %v9933_v43 = vld [vmem:[#allocation4 + $0x98] sm:$0xf]  ;;  %v10734_v27 = vor.u32 %v14171_v49, %v10733_v63  ;;  %v5233_v38 = vsel %vm1167_vm2, %v16424_v44, 0.0  ;;  %v4780_v63 = vpop.f32.mrf.mxu2 }
 0x39e   : > { %v13971_v0 = vld [vmem:[#allocation4 + $0xb4] sm:$0xf0]  ;;  %v5234_v21 = vrot.slane %v5233_v38, 4 }
 0x39f   : > { %5044 = vmatpush.bf16.msra.mxu3 %v10798_v19  ;;  %5019 = vmatpush.bf16.msra.mxu1 %v10254_v34  ;;  %v10189_v13 = vld [vmem:[#allocation4 + $0x298] sm:$0xf]  ;;  %v9934_v40 = vor.u32 %v13971_v0, %v9933_v43 }
 0x3a0   : > { %v14035_v26 = vld [vmem:[#allocation4 + $0x2b4] sm:$0xf0]  ;;  %v5235_v9 = vadd.f32 %v5234_v21, %v5233_v38 }
 0x3a1   : > { %5032 = vmatpush.bf16.msra.mxu2 %v10510_v58  ;;  %v10445_v28 = vld [vmem:[#allocation4 + $0x498] sm:$0xf]  ;;  %5007 = vmatpush.bf16.msra.mxu0 %v9966_v55  ;;  %v10190_v4 = vor.u32 %v14035_v26, %v10189_v13 }
 0x3a2   : > { %v14099_v62 = vld [vmem:[#allocation4 + $0x4b4] sm:$0xf0] }
 0x3a3   : > { %5045 = vmatpush.bf16.msra.mxu3 %v10766_v24  ;;  %v10701_v20 = vld [vmem:[#allocation4 + $0x698] sm:$0xf]  ;;  %5020 = vmatpush.bf16.msra.mxu1 %v10222_v12  ;;  %v10446_v19 = vor.u32 %v14099_v62, %v10445_v28  ;;  %v4793_v12 = vpop.f32.mrf.mxu3 }
 0x3a4   : > { %v14163_v39 = vld [vmem:[#allocation4 + $0x6b4] sm:$0xf0] }
 0x3a5   : > { %v9901_v11 = vld [vmem:[#allocation4 + $0x58] sm:$0xf]  ;;  %5033 = vmatpush.bf16.msra.mxu2 %v10478_v52  ;;  %v10702_v34 = vor.u32 %v14163_v39, %v10701_v20  ;;  %5008 = vmatpush.bf16.msra.mxu0 %v9934_v40  ;;  %v5236_v52 = vrot.slane %v5235_v9, 2 }
 0x3a6   : > { %v13963_v18 = vld [vmem:[#allocation4 + $0x74] sm:$0xf0] }
 0x3a7   : > { %v10157_v3 = vld [vmem:[#allocation4 + $0x258] sm:$0xf]  ;;  %5046 = vmatpush.bf16.msra.mxu3 %v10734_v27  ;;  %v9902_v45 = vor.u32 %v13963_v18, %v9901_v11  ;;  %5021 = vmatpush.bf16.msra.mxu1 %v10190_v4  ;;  %v5237_v2 = vadd.f32 %v5236_v52, %v5235_v9 }
 0x3a8   : > { %v14027_v16 = vld [vmem:[#allocation4 + $0x274] sm:$0xf0] }
 0x3a9   : > { %v10413_v57 = vld [vmem:[#allocation4 + $0x458] sm:$0xf]  ;;  %5034 = vmatpush.bf16.msra.mxu2 %v10446_v19  ;;  %v10158_v24 = vor.u32 %v14027_v16, %v10157_v3  ;;  %5009 = vmatpush.bf16.msra.mxu0 %v9902_v45  ;;  %v5238_v11 = vrot.slane %v5237_v2, 1 }
 0x3aa   : > { %v14091_v31 = vld [vmem:[#allocation4 + $0x474] sm:$0xf0] }
 0x3ab   : > { %v10669_v58 = vld [vmem:[#allocation4 + $0x658] sm:$0xf]  ;;  %v10414_v35 = vor.u32 %v14091_v31, %v10413_v57  ;;  %5047 = vmatpush.bf16.msra.mxu3 %v10702_v34  ;;  %5022 = vmatpush.bf16.msra.mxu1 %v10158_v24  ;;  %v5239_v34 = vadd.f32 %v5238_v11, %v5237_v2 }
 0x3ac   : > { %v14155_v10 = vld [vmem:[#allocation4 + $0x674] sm:$0xf0] }
 0x3ad   : > { %v9869_v8 = vld [vmem:[#allocation4 + $0x18] sm:$0xf]  ;;  %v10670_v49 = vor.u32 %v14155_v10, %v10669_v58  ;;  %5035 = vmatpush.bf16.msra.mxu2 %v10414_v35  ;;  %v5278_v58 = vmul.f32 %v16290_v47, %v5239_v34 }
 0x3ae   : > { %v13955_v30 = vld [vmem:[#allocation4 + $0x34] sm:$0xf0] }
 0x3af   : > { %v10125_v5 = vld [vmem:[#allocation4 + $0x218] sm:$0xf]  ;;  %v9870_v0 = vor.u32 %v13955_v30, %v9869_v8  ;;  %5048 = vmatpush.bf16.msra.mxu3 %v10670_v49 }
 0x3b0   : > { %v14019_v1 = vld [vmem:[#allocation4 + $0x234] sm:$0xf0] }
 0x3b1   : > { %v10381_v51 = vld [vmem:[#allocation4 + $0x418] sm:$0xf]  ;;  %v10126_v61 = vor.u32 %v14019_v1, %v10125_v5  ;;  %5010 = vmatpush.bf16.msra.mxu0 %v9870_v0 }
 0x3b2   : > { %v14083_v7 = vld [vmem:[#allocation4 + $0x434] sm:$0xf0] }
 0x3b3   : > { %v10637_v29 = vld [vmem:[#allocation4 + $0x618] sm:$0xf]  ;;  %v10382_v26 = vor.u32 %v14083_v7, %v10381_v51  ;;  %5023 = vmatpush.bf16.msra.mxu1 %v10126_v61  ;;  %v16432_v51 = vsub.f32 %v16424_v44, %v5278_v58 }
 0x3b4   : > { %v14147_v36 = vld [vmem:[#allocation4 + $0x634] sm:$0xf0]  ;;  %5011 = vmatmul.bf16.vlgmr.msra.gmra.mxu0 %v16220_v22 }
 0x3b5   : > { %v11117_v55 = vld [vmem:[#allocation4 + $0x9d8] sm:$0xf]  ;;  %v10638_v20 = vor.u32 %v14147_v36, %v10637_v29  ;;  %5036 = vmatpush.bf16.msra.mxu2 %v10382_v26  ;;  %v5294_v29 = vmul.f32 %v16432_v51, %v16432_v51 }
 0x3b6   : > { %v14267_v15 = vld [vmem:[#allocation4 + $0x9f4] sm:$0xf0]  ;;  %5024 = vmatmul.bf16.vlgmr.msra.gmra.mxu1 %v16227_v17 }
 0x3b7   : > { %v11373_v43 = vld [vmem:[#allocation4 + $0xbd8] sm:$0xf]  ;;  %v11118_v39 = vor.u32 %v14267_v15, %v11117_v55  ;;  %5049 = vmatpush.bf16.msra.mxu3 %v10638_v20 }
 0x3b8   : > { %v14331_v13 = vld [vmem:[#allocation4 + $0xbf4] sm:$0xf0]  ;;  %5037 = vmatmul.bf16.vlgmr.msra.gmra.mxu2 %v16216_v33 }
 0x3b9   : > { %v11629_v60 = vld [vmem:[#allocation4 + $0xdd8] sm:$0xf]  ;;  %v11374_v54 = vor.u32 %v14331_v13, %v11373_v43  ;;  %5055 = vmatpush.bf16.msrb.mxu0 %v11118_v39 }
 0x3ba   : > { %v14395_v27 = vld [vmem:[#allocation4 + $0xdf4] sm:$0xf0]  ;;  %5050 = vmatmul.bf16.vlgmr.msra.gmra.mxu3 %v16223_v23 }
 0x3bb   : > { %v11885_v28 = vld [vmem:[#allocation4 + $0xfd8] sm:$0xf]  ;;  %v11630_v4 = vor.u32 %v14395_v27, %v11629_v60  ;;  %5068 = vmatpush.bf16.msrb.mxu1 %v11374_v54  ;;  %v5320_v60 = vsel %vm1167_vm2, %v5294_v29, 0.0  ;;  %v4817_v54 = vpop.f32.mrf.mxu1 }
 0x3bc   : > { %v14459_v62 = vld [vmem:[#allocation4 + $0xff4] sm:$0xf0]  ;;  %v5321_v61 = vrot.slane %v5320_v60, 4 }
 0x3bd   : > { %v11085_v40 = vld [vmem:[#allocation4 + $0x998] sm:$0xf]  ;;  %v11886_v3 = vor.u32 %v14459_v62, %v11885_v28  ;;  %5081 = vmatpush.bf16.msrb.mxu2 %v11630_v4  ;;  %v4804_v28 = vpop.f32.mrf.mxu0 }
 0x3be   : > { %v14259_v19 = vld [vmem:[#allocation4 + $0x9b4] sm:$0xf0]  ;;  %v5322_v4 = vadd.f32 %v5321_v61, %v5320_v60 }
 0x3bf   : > { %v11341_v18 = vld [vmem:[#allocation4 + $0xb98] sm:$0xf]  ;;  %v11086_v21 = vor.u32 %v14259_v19, %v11085_v40  ;;  %5094 = vmatpush.bf16.msrb.mxu3 %v11886_v3 }
 0x3c0   : > { %v14323_v16 = vld [vmem:[#allocation4 + $0xbb4] sm:$0xf0] }
 0x3c1   : > { %v11597_v53 = vld [vmem:[#allocation4 + $0xd98] sm:$0xf]  ;;  %v11342_v10 = vor.u32 %v14323_v16, %v11341_v18  ;;  %5056 = vmatpush.bf16.msrb.mxu0 %v11086_v21 }
 0x3c2   : > { %v14387_v38 = vld [vmem:[#allocation4 + $0xdb4] sm:$0xf0] }
 0x3c3   : > { %v11853_v57 = vld [vmem:[#allocation4 + $0xf98] sm:$0xf]  ;;  %v11598_v45 = vor.u32 %v14387_v38, %v11597_v53  ;;  %5069 = vmatpush.bf16.msrb.mxu1 %v11342_v10  ;;  %v4818_v53 = vadd.f32 %v4817_v54, %v4804_v28  ;;  %v4819_v60 = vpop.f32.mrf.mxu1 }
 0x3c4   : > { %v14451_v31 = vld [vmem:[#allocation4 + $0xfb4] sm:$0xf0]  ;;  %v10575_v60 = vld [vmem:[#allocation4 + $0x5b8] sm:$0xf0] }
 0x3c5   : > { %v11053_v8 = vld [vmem:[#allocation4 + $0x958] sm:$0xf]  ;;  %v11854_v9 = vor.u32 %v14451_v31, %v11853_v57  ;;  %5082 = vmatpush.bf16.msrb.mxu2 %v11598_v45  ;;  %v5323_v57 = vrot.slane %v5322_v4, 2 }
 0x3c6   : > { %v14251_v30 = vld [vmem:[#allocation4 + $0x974] sm:$0xf0] }
 0x3c7   : > { %v11309_v5 = vld [vmem:[#allocation4 + $0xb58] sm:$0xf]  ;;  %v11054_v49 = vor.u32 %v14251_v30, %v11053_v8  ;;  %5095 = vmatpush.bf16.msrb.mxu3 %v11854_v9  ;;  %v4830_v30 = vpop.f32.mrf.mxu2 }
 0x3c8   : > { %v14315_v24 = vld [vmem:[#allocation4 + $0xb74] sm:$0xf0] }
 0x3c9   : > { %v11565_v35 = vld [vmem:[#allocation4 + $0xd58] sm:$0xf]  ;;  %v11310_v36 = vor.u32 %v14315_v24, %v11309_v5  ;;  %5057 = vmatpush.bf16.msrb.mxu0 %v11054_v49  ;;  %v5324_v5 = vadd.f32 %v5323_v57, %v5322_v4 }
 0x3ca   : > { %v14379_v1 = vld [vmem:[#allocation4 + $0xd74] sm:$0xf0] }
 0x3cb   : > { %v11821_v7 = vld [vmem:[#allocation4 + $0xf58] sm:$0xf]  ;;  %v11566_v55 = vor.u32 %v14379_v1, %v11565_v35  ;;  %5070 = vmatpush.bf16.msrb.mxu1 %v11310_v36  ;;  %v5325_v36 = vrot.slane %v5324_v5, 1 }
 0x3cc   : > { %v14443_v63 = vld [vmem:[#allocation4 + $0xf74] sm:$0xf0] }
 0x3cd   : > { %v11021_v12 = vld [vmem:[#allocation4 + $0x918] sm:$0xf]  ;;  %v11822_v15 = vor.u32 %v14443_v63, %v11821_v7  ;;  %5083 = vmatpush.bf16.msrb.mxu2 %v11566_v55  ;;  %v4831_v7 = vadd.f32 %v4830_v30, %v4818_v53  ;;  %v4843_v63 = vpop.f32.mrf.mxu3 }
 0x3ce   : > { %v14243_v44 = vld [vmem:[#allocation4 + $0x934] sm:$0xf0] }
 0x3cf   : > { %v11277_v52 = vld [vmem:[#allocation4 + $0xb18] sm:$0xf]  ;;  %v11022_v26 = vor.u32 %v14243_v44, %v11021_v12  ;;  %5096 = vmatpush.bf16.msrb.mxu3 %v11822_v15  ;;  %v16440_v12 = vadd.f32 %v4843_v63, %v4831_v7  ;;  %v4806_v44 = vpop.f32.mrf.mxu0  ;;  %v14199_v7 = vld [vmem:[#allocation4 + $0x7dc] sm:$0xf] }
 0x3d0   : > { %v14307_v43 = vld [vmem:[#allocation4 + $0xb34] sm:$0xf0]  ;;  %v10863_v63 = vld [vmem:[#allocation4 + $0x7f8] sm:$0xf0] }
 0x3d1   : > { %v11533_v0 = vld [vmem:[#allocation4 + $0xd18] sm:$0xf]  ;;  %v11278_v62 = vor.u32 %v14307_v43, %v11277_v52  ;;  %5058 = vmatpush.bf16.msrb.mxu0 %v11022_v26  ;;  %v13999_v44 = vld [vmem:[#allocation4 + $0x19c] sm:$0xf] }
 0x3d2   : > { %v14371_v13 = vld [vmem:[#allocation4 + $0xd34] sm:$0xf0] }
 0x3d3   : > { %v11789_v27 = vld [vmem:[#allocation4 + $0xf18] sm:$0xf]  ;;  %v11534_v20 = vor.u32 %v14371_v13, %v11533_v0  ;;  %5071 = vmatpush.bf16.msrb.mxu1 %v11278_v62 }
 0x3d4   : > { %v14435_v2 = vld [vmem:[#allocation4 + $0xf34] sm:$0xf0] }
 0x3d5   : > { %v10989_v39 = vld [vmem:[#allocation4 + $0x8d8] sm:$0xf]  ;;  %v11790_v19 = vor.u32 %v14435_v2, %v11789_v27  ;;  %5084 = vmatpush.bf16.msrb.mxu2 %v11534_v20  ;;  %v5326_v27 = vadd.f32 %v5325_v36, %v5324_v5  ;;  %v10351_v5 = vld [vmem:[#allocation4 + $0x3f8] sm:$0xf0] }
 0x3d6   : > { %v14235_v40 = vld [vmem:[#allocation4 + $0x8f4] sm:$0xf0] }
 0x3d7   : > { %v11245_v11 = vld [vmem:[#allocation4 + $0xad8] sm:$0xf]  ;;  %v10990_v31 = vor.u32 %v14235_v40, %v10989_v39  ;;  %5097 = vmatpush.bf16.msrb.mxu3 %v11790_v19  ;;  %v5358_v39 = vmul.f32 %v5326_v27, %v16290_v47  ;;  %v14191_v27 = vld [vmem:[#allocation4 + $0x79c] sm:$0xf] }
 0x3d8   : > { %v14299_v18 = vld [vmem:[#allocation4 + $0xaf4] sm:$0xf0] }
 0x3d9   : > { %v11501_v3 = vld [vmem:[#allocation4 + $0xcd8] sm:$0xf]  ;;  %v11246_v21 = vor.u32 %v14299_v18, %v11245_v11  ;;  %5059 = vmatpush.bf16.msrb.mxu0 %v10990_v31 }
 0x3da   : > { %v14363_v16 = vld [vmem:[#allocation4 + $0xcf4] sm:$0xf0] }
 0x3db   : > { %v11757_v38 = vld [vmem:[#allocation4 + $0xed8] sm:$0xf]  ;;  %v11502_v58 = vor.u32 %v14363_v16, %v11501_v3  ;;  %5072 = vmatpush.bf16.msrb.mxu1 %v11246_v21 }
 0x3dc   : > { %v14427_v34 = vld [vmem:[#allocation4 + $0xef4] sm:$0xf0] }
 0x3dd   : > { %v10957_v10 = vld [vmem:[#allocation4 + $0x898] sm:$0xf]  ;;  %v11758_v9 = vor.u32 %v14427_v34, %v11757_v38  ;;  %5085 = vmatpush.bf16.msrb.mxu2 %v11502_v58  ;;  %v4832_v38 = vpop.f32.mrf.mxu2  ;;  %v16443_v34 = vadd.f32 1e-05, %v5358_v39  ;;  %v4845_v58 = vpop.f32.mrf.mxu3  ;;  %v13991_v39 = vld [vmem:[#allocation4 + $0x15c] sm:$0xf] }
 0x3de   : > { %v14227_v45 = vld [vmem:[#allocation4 + $0x8b4] sm:$0xf0] }
 0x3df   : > { %v11213_v8 = vld [vmem:[#allocation4 + $0xa98] sm:$0xf]  ;;  %v10958_v55 = vor.u32 %v14227_v45, %v10957_v10  ;;  %5098 = vmatpush.bf16.msrb.mxu3 %v11758_v9  ;;  %v14007_v10 = vld [vmem:[#allocation4 + $0x1dc] sm:$0xf]  ;;  %15075 = vrsqrt.f32 %v16443_v34  ;;  %vm5407_vm4 = vweird.f32 %v16443_v34 }
 0x3e0   : > { %v14291_v24 = vld [vmem:[#allocation4 + $0xab4] sm:$0xf0]  ;;  %v10095_v45 = vld [vmem:[#allocation4 + $0x1f8] sm:$0xf0] }
 0x3e1   : > { %v11469_v35 = vld [vmem:[#allocation4 + $0xc98] sm:$0xf]  ;;  %v11214_v52 = vor.u32 %v14291_v24, %v11213_v8  ;;  %5060 = vmatpush.bf16.msrb.mxu0 %v10958_v55  ;;  %v14071_v8 = vld [vmem:[#allocation4 + $0x3dc] sm:$0xf] }
 0x3e2   : > { %v14355_v1 = vld [vmem:[#allocation4 + $0xcb4] sm:$0xf0]  ;;  %v14135_v9 = vld [vmem:[#allocation4 + $0x5dc] sm:$0xf]  ;;  %v10354_v36 = vor.u32 %v14071_v8, %v10351_v5 }
 0x3e3   : > { %v11725_v49 = vld [vmem:[#allocation4 + $0xe98] sm:$0xf]  ;;  %v11470_v15 = vor.u32 %v14355_v1, %v11469_v35  ;;  %5073 = vmatpush.bf16.msrb.mxu1 %v11214_v52  ;;  %v10607_v24 = vld [vmem:[#allocation4 + $0x5f8] sm:$0xf0] }
 0x3e4   : > { %v14419_v29 = vld [vmem:[#allocation4 + $0xeb4] sm:$0xf0]  ;;  %v10610_v55 = vor.u32 %v14135_v9, %v10607_v24  ;;  %v10063_v52 = vld [vmem:[#allocation4 + $0x1b8] sm:$0xf0] }
 0x3e5   : > { %v10925_v43 = vld [vmem:[#allocation4 + $0x858] sm:$0xf]  ;;  %v11726_v2 = vor.u32 %v14419_v29, %v11725_v49  ;;  %5086 = vmatpush.bf16.msrb.mxu2 %v11470_v15  ;;  %v10098_v29 = vor.u32 %v14007_v10, %v10095_v45  ;;  %v14063_v15 = vld [vmem:[#allocation4 + $0x39c] sm:$0xf] }
 0x3e6   : > { %v14219_v0 = vld [vmem:[#allocation4 + $0x874] sm:$0xf0]  ;;  %v14047_v45 = vld [vmem:[#allocation4 + $0x31c] sm:$0xf] }
 0x3e7   : > { %v11181_v13 = vld [vmem:[#allocation4 + $0xa58] sm:$0xf]  ;;  %v10926_v40 = vor.u32 %v14219_v0, %v10925_v43  ;;  %5099 = vmatpush.bf16.msrb.mxu3 %v11726_v2  ;;  %v10866_v43 = vor.u32 %v14199_v7, %v10863_v63  ;;  %v10319_v0 = vld [vmem:[#allocation4 + $0x3b8] sm:$0xf0] }
 0x3e8   : > { %v14283_v61 = vld [vmem:[#allocation4 + $0xa74] sm:$0xf0]  ;;  %v10831_v2 = vld [vmem:[#allocation4 + $0x7b8] sm:$0xf0] }
 0x3e9   : > { %v11437_v26 = vld [vmem:[#allocation4 + $0xc58] sm:$0xf]  ;;  %v11182_v19 = vor.u32 %v14283_v61, %v11181_v13  ;;  %5061 = vmatpush.bf16.msrb.mxu0 %v10926_v40  ;;  %v14127_v13 = vld [vmem:[#allocation4 + $0x59c] sm:$0xf]  ;;  %v16446_v61 = vpop.eup %15075 }
 0x3ea   : > { %v14347_v28 = vld [vmem:[#allocation4 + $0xc74] sm:$0xf0]  ;;  %v10031_v40 = vld [vmem:[#allocation4 + $0x178] sm:$0xf0]  ;;  %vm5408_vm3 = vweird.f32 %v16446_v61 }
 0x3eb   : > { %v11693_v62 = vld [vmem:[#allocation4 + $0xe58] sm:$0xf]  ;;  %v11438_v18 = vor.u32 %v14347_v28, %v11437_v26  ;;  %5074 = vmatpush.bf16.msrb.mxu1 %v11182_v19  ;;  %v10066_v26 = vor.u32 %v13999_v44, %v10063_v52  ;;  %v5402_v28 = vmul.f32 %v16446_v61, %v16443_v34  ;;  %v14119_v19 = vld [vmem:[#allocation4 + $0x55c] sm:$0xf]  ;;  %v10034_v38 = vor.u32 %v13991_v39, %v10031_v40  ;;  %v4869_v52 = vpop.f32.mrf.mxu1  ;;  %vm5409_vm7 = vmor %vm5407_vm4, %vm5408_vm3 }
 0x3ec   : > { %v14411_v20 = vld [vmem:[#allocation4 + $0xe74] sm:$0xf0]  ;;  %v10255_v8 = vld [vmem:[#allocation4 + $0x338] sm:$0xf0] }
 0x3ed   : > { %v10893_v11 = vld [vmem:[#allocation4 + $0x818] sm:$0xf]  ;;  %v11694_v57 = vor.u32 %v14411_v20, %v11693_v62  ;;  %5087 = vmatpush.bf16.msrb.mxu2 %v11438_v18  ;;  %v10322_v62 = vor.u32 %v14063_v15, %v10319_v0  ;;  %v10578_v20 = vor.u32 %v14127_v13, %v10575_v60  ;;  %v10543_v18 = vld [vmem:[#allocation4 + $0x578] sm:$0xf0]  ;;  %v10258_v63 = vor.u32 %v14047_v45, %v10255_v8 }
 0x3ee   : > { %v14211_v54 = vld [vmem:[#allocation4 + $0x834] sm:$0xf0]  ;;  %v10546_v10 = vor.u32 %v14119_v19, %v10543_v18  ;;  %v14111_v5 = vld [vmem:[#allocation4 + $0x51c] sm:$0xf]  ;;  %v5464_v13 = vperm.slane %v16414_v46, 3  ;;  %v4882_v46 = vpop.f32.mrf.mxu2 }
 0x3ef   : > { %v11149_v4 = vld [vmem:[#allocation4 + $0xa18] sm:$0xf]  ;;  %v10894_v30 = vor.u32 %v14211_v54, %v10893_v11  ;;  %5100 = vmatpush.bf16.msrb.mxu3 %v11694_v57  ;;  %v14055_v11 = vld [vmem:[#allocation4 + $0x35c] sm:$0xf]  ;;  %v10834_v54 = vor.u32 %v14191_v27, %v10831_v2 }
 0x3f0   : > { %v14275_v3 = vld [vmem:[#allocation4 + $0xa34] sm:$0xf0]  ;;  %v13983_v57 = vld [vmem:[#allocation4 + $0x11c] sm:$0xf] }
 0x3f1   : > { %v11405_v16 = vld [vmem:[#allocation4 + $0xc18] sm:$0xf]  ;;  %v11150_v35 = vor.u32 %v14275_v3, %v11149_v4  ;;  %5062 = vmatpush.bf16.msrb.mxu0 %v10894_v30  ;;  %v10287_v4 = vld [vmem:[#allocation4 + $0x378] sm:$0xf0]  ;;  %v5403_v3 = vmul.f32 %v16446_v61, %v5402_v28 }
 0x3f2   : > { %v14339_v53 = vld [vmem:[#allocation4 + $0xc34] sm:$0xf0]  ;;  %v10290_v58 = vor.u32 %v14055_v11, %v10287_v4  ;;  %v10511_v9 = vld [vmem:[#allocation4 + $0x538] sm:$0xf0] }
 0x3f3   : > { %v11661_v31 = vld [vmem:[#allocation4 + $0xe18] sm:$0xf]  ;;  %v11406_v1 = vor.u32 %v14339_v53, %v11405_v16  ;;  %5075 = vmatpush.bf16.msrb.mxu1 %v11150_v35  ;;  %v14183_v16 = vld [vmem:[#allocation4 + $0x75c] sm:$0xf] }
 0x3f4   : > { %v14403_v21 = vld [vmem:[#allocation4 + $0xe34] sm:$0xf0]  ;;  %5063 = vmatmul.bf16.vlgmr.msrb.gmra.mxu0 %v16247_v25  ;;  %v10799_v53 = vld [vmem:[#allocation4 + $0x778] sm:$0xf0] }
 0x3f5   : > { %v11662_v49 = vor.u32 %v14403_v21, %v11661_v31  ;;  %5088 = vmatpush.bf16.msrb.mxu2 %v11406_v1  ;;  %5107 = vmatpush.bf16.msra.mxu0 %v10098_v29  ;;  %v9999_v31 = vld [vmem:[#allocation4 + $0x138] sm:$0xf0]  ;;  %v5404_v21 = vmul.f32 0.5, %v5403_v3  ;;  %v10802_v30 = vor.u32 %v14183_v16, %v10799_v53  ;;  %v4895_v16 = vpop.f32.mrf.mxu3 }
 0x3f6   : > { %5076 = vmatmul.bf16.vlgmr.msrb.gmra.mxu1 %v16252_v42  ;;  %v14175_v35 = vld [vmem:[#allocation4 + $0x71c] sm:$0xf]  ;;  %v10002_v7 = vor.u32 %v13983_v57, %v9999_v31 }
 0x3f7   : > { %5101 = vmatpush.bf16.msrb.mxu3 %v11662_v49  ;;  %5120 = vmatpush.bf16.msra.mxu1 %v10354_v36  ;;  %v5405_v24 = vsub.f32 1.5, %v5404_v21  ;;  %v10767_v1 = vld [vmem:[#allocation4 + $0x738] sm:$0xf0]  ;;  %v4856_v49 = vpop.f32.mrf.mxu0 }
 0x3f8   : > { %5089 = vmatmul.bf16.vlgmr.msrb.gmra.mxu2 %v16245_v32  ;;  %v13975_v29 = vld [vmem:[#allocation4 + $0xdc] sm:$0xf]  ;;  %v4857_v44 = vadd.f32 %v4856_v49, %v16440_v12  ;;  %v10770_v60 = vor.u32 %v14175_v35, %v10767_v1  ;;  %v4871_v35 = vpop.f32.mrf.mxu1 }
 0x3f9   : > { %5133 = vmatpush.bf16.msra.mxu2 %v10610_v55  ;;  %5108 = vmatpush.bf16.msra.mxu0 %v10066_v26  ;;  %v5406_v36 = vmul.f32 %v16446_v61, %v5405_v24  ;;  %v10514_v55 = vor.u32 %v14111_v5, %v10511_v9  ;;  %v9967_v15 = vld [vmem:[#allocation4 + $0xf8] sm:$0xf0] }
 0x3fa   : > { %5102 = vmatmul.bf16.vlgmr.msrb.gmra.mxu3 %v16249_v50  ;;  %v10223_v0 = vld [vmem:[#allocation4 + $0x2f8] sm:$0xf0]  ;;  %v4870_v26 = vadd.f32 %v4869_v52, %v4857_v44  ;;  %v9970_v39 = vor.u32 %v13975_v29, %v9967_v15 }
 0x3fb   : > { %5146 = vmatpush.bf16.msra.mxu3 %v10866_v43  ;;  %5121 = vmatpush.bf16.msra.mxu1 %v10322_v62  ;;  %v14039_v43 = vld [vmem:[#allocation4 + $0x2dc] sm:$0xf]  ;;  %v5410_v34 = vsel %vm5409_vm7, %v16446_v61, %v5406_v36 }
 0x3fc   : > { %v14103_v27 = vld [vmem:[#allocation4 + $0x4dc] sm:$0xf]  ;;  %v5454_v12 = vmul.f32 %v5410_v34, %v16432_v51  ;;  %v10226_v40 = vor.u32 %v14039_v43, %v10223_v0  ;;  %v4883_v3 = vadd.f32 %v4882_v46, %v4870_v26 }
 0x3fd   : > { %5134 = vmatpush.bf16.msra.mxu2 %v10578_v20  ;;  %5109 = vmatpush.bf16.msra.mxu0 %v10034_v38  ;;  %v10479_v2 = vld [vmem:[#allocation4 + $0x4f8] sm:$0xf0]  ;;  %v5490_v20 = vperm.slane %v16419_v14, 3 }
 0x3fe   : > { %v14167_v28 = vld [vmem:[#allocation4 + $0x6dc] sm:$0xf]  ;;  %v10482_v11 = vor.u32 %v14103_v27, %v10479_v2  ;;  %v5480_v18 = vmul.f32 %v5464_v13, %v5454_v12  ;;  %v16467_v21 = vadd.f32 %v4895_v16, %v4883_v3 }
 0x3ff   : > { %5147 = vmatpush.bf16.msra.mxu3 %v10834_v54  ;;  %5122 = vmatpush.bf16.msra.mxu1 %v10290_v58  ;;  %v10735_v62 = vld [vmem:[#allocation4 + $0x6f8] sm:$0xf0]  ;;  %v4858_v45 = vpop.f32.mrf.mxu0 }
 0x400   : > { %v13967_v54 = vld [vmem:[#allocation4 + $0x9c] sm:$0xf]  ;;  %v10738_v61 = vor.u32 %v14167_v28, %v10735_v62  ;;  %v16465_v31 = vadd.f32 %v5490_v20, %v5480_v18  ;;  %v4884_v28 = vpop.f32.mrf.mxu2 }
 0x401   : > { %5135 = vmatpush.bf16.msra.mxu2 %v10546_v10  ;;  %5110 = vmatpush.bf16.msra.mxu0 %v10002_v7  ;;  %v9935_v4 = vld [vmem:[#allocation4 + $0xb8] sm:$0xf0]  ;;  %v5240_v7 = vsel %vm1167_vm2, %v16467_v21, 0.0 }
 0x402   : > { %v14031_v19 = vld [vmem:[#allocation4 + $0x29c] sm:$0xf]  ;;  %v9938_v58 = vor.u32 %v13967_v54, %v9935_v4  ;;  %v5514_v1 = vmax.f32 %v16465_v31, 0.0  ;;  %v5241_v36 = vrot.slane %v5240_v7, 4 }
 0x403   : > { %5148 = vmatpush.bf16.msra.mxu3 %v10802_v30  ;;  %5123 = vmatpush.bf16.msra.mxu1 %v10258_v63  ;;  %v10191_v53 = vld [vmem:[#allocation4 + $0x2b8] sm:$0xf0] }
 0x404   : > { %v14095_v38 = vld [vmem:[#allocation4 + $0x49c] sm:$0xf]  ;;  %v10194_v8 = vor.u32 %v14031_v19, %v10191_v53  ;;  %v5242_v13 = vadd.f32 %v5241_v36, %v5240_v7 }
 0x405   : > { %5136 = vmatpush.bf16.msra.mxu2 %v10514_v55  ;;  %v10447_v51 = vld [vmem:[#allocation4 + $0x4b8] sm:$0xf0]  ;;  %5111 = vmatpush.bf16.msra.mxu0 %v9970_v39 }
 0x406   : > { %v14159_v57 = vld [vmem:[#allocation4 + $0x69c] sm:$0xf]  ;;  %v10450_v30 = vor.u32 %v14095_v38, %v10447_v51 }
 0x407   : > { %5149 = vmatpush.bf16.msra.mxu3 %v10770_v60  ;;  %v10703_v14 = vld [vmem:[#allocation4 + $0x6b8] sm:$0xf0]  ;;  %5124 = vmatpush.bf16.msra.mxu1 %v10226_v40  ;;  %v4897_v40 = vpop.f32.mrf.mxu3 }
 0x408   : > { %v13959_v10 = vld [vmem:[#allocation4 + $0x5c] sm:$0xf]  ;;  %v10706_v63 = vor.u32 %v14159_v57, %v10703_v14 }
 0x409   : > { %5137 = vmatpush.bf16.msra.mxu2 %v10482_v11  ;;  %v9903_v5 = vld [vmem:[#allocation4 + $0x78] sm:$0xf0]  ;;  %5112 = vmatpush.bf16.msra.mxu0 %v9938_v58  ;;  %v5243_v11 = vrot.slane %v5242_v13, 2 }
 0x40a   : > { %v14023_v9 = vld [vmem:[#allocation4 + $0x25c] sm:$0xf]  ;;  %v9906_v52 = vor.u32 %v13959_v10, %v9903_v5 }
 0x40b   : > { %v10159_v24 = vld [vmem:[#allocation4 + $0x278] sm:$0xf0]  ;;  %5150 = vmatpush.bf16.msra.mxu3 %v10738_v61  ;;  %5125 = vmatpush.bf16.msra.mxu1 %v10194_v8  ;;  %v5244_v3 = vadd.f32 %v5243_v11, %v5242_v13 }
 0x40c   : > { %v14087_v49 = vld [vmem:[#allocation4 + $0x45c] sm:$0xf]  ;;  %v10162_v60 = vor.u32 %v14023_v9, %v10159_v24 }
 0x40d   : > { %v10415_v29 = vld [vmem:[#allocation4 + $0x478] sm:$0xf0]  ;;  %5138 = vmatpush.bf16.msra.mxu2 %v10450_v30  ;;  %5113 = vmatpush.bf16.msra.mxu0 %v9906_v52  ;;  %v5245_v10 = vrot.slane %v5244_v3, 1 }
 0x40e   : > { %v14151_v55 = vld [vmem:[#allocation4 + $0x65c] sm:$0xf]  ;;  %v10418_v27 = vor.u32 %v14087_v49, %v10415_v29 }
 0x40f   : > { %v10671_v44 = vld [vmem:[#allocation4 + $0x678] sm:$0xf0]  ;;  %5151 = vmatpush.bf16.msra.mxu3 %v10706_v63  ;;  %5126 = vmatpush.bf16.msra.mxu1 %v10162_v60  ;;  %v5246_v63 = vadd.f32 %v5245_v10, %v5244_v3 }
 0x410   : > { %v13951_v15 = vld [vmem:[#allocation4 + $0x1c] sm:$0xf]  ;;  %v10674_v62 = vor.u32 %v14151_v55, %v10671_v44 }
 0x411   : > { %v9871_v43 = vld [vmem:[#allocation4 + $0x38] sm:$0xf0]  ;;  %5139 = vmatpush.bf16.msra.mxu2 %v10418_v27  ;;  %v5279_v55 = vmul.f32 %v16290_v47, %v5246_v63 }
 0x412   : > { %v14015_v0 = vld [vmem:[#allocation4 + $0x21c] sm:$0xf]  ;;  %v9874_v4 = vor.u32 %v13951_v15, %v9871_v43 }
 0x413   : > { %v10127_v2 = vld [vmem:[#allocation4 + $0x238] sm:$0xf0]  ;;  %5152 = vmatpush.bf16.msra.mxu3 %v10674_v62 }
 0x414   : > { %v14079_v34 = vld [vmem:[#allocation4 + $0x41c] sm:$0xf]  ;;  %v10130_v16 = vor.u32 %v14015_v0, %v10127_v2  ;;  %5114 = vmatpush.bf16.msra.mxu0 %v9874_v4 }
 0x415   : > { %v10383_v26 = vld [vmem:[#allocation4 + $0x438] sm:$0xf0] }
 0x416   : > { %v14143_v12 = vld [vmem:[#allocation4 + $0x61c] sm:$0xf]  ;;  %v10386_v53 = vor.u32 %v14079_v34, %v10383_v26  ;;  %5127 = vmatpush.bf16.msra.mxu1 %v10130_v16  ;;  %v16475_v34 = vsub.f32 %v16467_v21, %v5279_v55  ;;  %v4934_v55 = vpop.f32.mrf.mxu2 }
 0x417   : > { %v10639_v20 = vld [vmem:[#allocation4 + $0x638] sm:$0xf0]  ;;  %5115 = vmatmul.bf16.vlgmr.msra.gmra.mxu0 %v16220_v22 }
 0x418   : > { %v14263_v39 = vld [vmem:[#allocation4 + $0x9dc] sm:$0xf]  ;;  %v10642_v57 = vor.u32 %v14143_v12, %v10639_v20  ;;  %5140 = vmatpush.bf16.msra.mxu2 %v10386_v53  ;;  %v5295_v12 = vmul.f32 %v16475_v34, %v16475_v34 }
 0x419   : > { %v11119_v46 = vld [vmem:[#allocation4 + $0x9f8] sm:$0xf0]  ;;  %5128 = vmatmul.bf16.vlgmr.msra.gmra.mxu1 %v16227_v17 }
 0x41a   : > { %v14327_v54 = vld [vmem:[#allocation4 + $0xbdc] sm:$0xf]  ;;  %v11122_v14 = vor.u32 %v14263_v39, %v11119_v46  ;;  %5153 = vmatpush.bf16.msra.mxu3 %v10642_v57  ;;  %v4921_v57 = vpop.f32.mrf.mxu1 }
 0x41b   : > { %v11375_v19 = vld [vmem:[#allocation4 + $0xbf8] sm:$0xf0]  ;;  %5141 = vmatmul.bf16.vlgmr.msra.gmra.mxu2 %v16216_v33 }
 0x41c   : > { %v14391_v18 = vld [vmem:[#allocation4 + $0xddc] sm:$0xf]  ;;  %v11378_v45 = vor.u32 %v14327_v54, %v11375_v19  ;;  %5159 = vmatpush.bf16.msrb.mxu0 %v11122_v14 }
 0x41d   : > { %v11631_v61 = vld [vmem:[#allocation4 + $0xdf8] sm:$0xf0]  ;;  %5154 = vmatmul.bf16.vlgmr.msra.gmra.mxu3 %v16223_v23  ;;  %v5327_v23 = vsel %vm1167_vm2, %v5295_v12, 0.0 }
 0x41e   : > { %v14455_v38 = vld [vmem:[#allocation4 + $0xfdc] sm:$0xf]  ;;  %v11634_v8 = vor.u32 %v14391_v18, %v11631_v61  ;;  %5172 = vmatpush.bf16.msrb.mxu1 %v11378_v45  ;;  %v5328_v17 = vrot.slane %v5327_v23, 4  ;;  %v4908_v61 = vpop.f32.mrf.mxu0 }
 0x41f   : > { %v11887_v51 = vld [vmem:[#allocation4 + $0xff8] sm:$0xf0] }
 0x420   : > { %v14255_v58 = vld [vmem:[#allocation4 + $0x99c] sm:$0xf]  ;;  %v11890_v9 = vor.u32 %v14455_v38, %v11887_v51  ;;  %5185 = vmatpush.bf16.msrb.mxu2 %v11634_v8  ;;  %v5329_v14 = vadd.f32 %v5328_v17, %v5327_v23 }
 0x421   : > { %v11087_v30 = vld [vmem:[#allocation4 + $0x9b8] sm:$0xf0] }
 0x422   : > { %v14319_v5 = vld [vmem:[#allocation4 + $0xb9c] sm:$0xf]  ;;  %v11090_v36 = vor.u32 %v14255_v58, %v11087_v30  ;;  %5198 = vmatpush.bf16.msrb.mxu3 %v11890_v9  ;;  %v4922_v30 = vadd.f32 %v4921_v57, %v4908_v61 }
 0x423   : > { %v11343_v24 = vld [vmem:[#allocation4 + $0xbb8] sm:$0xf0] }
 0x424   : > { %v14383_v35 = vld [vmem:[#allocation4 + $0xd9c] sm:$0xf]  ;;  %v11346_v44 = vor.u32 %v14319_v5, %v11343_v24  ;;  %5160 = vmatpush.bf16.msrb.mxu0 %v11090_v36  ;;  %v5330_v24 = vrot.slane %v5329_v14, 2 }
 0x425   : > { %v11599_v7 = vld [vmem:[#allocation4 + $0xdb8] sm:$0xf0] }
 0x426   : > { %v14447_v49 = vld [vmem:[#allocation4 + $0xf9c] sm:$0xf]  ;;  %v11602_v52 = vor.u32 %v14383_v35, %v11599_v7  ;;  %5173 = vmatpush.bf16.msrb.mxu1 %v11346_v44  ;;  %v5331_v44 = vadd.f32 %v5330_v24, %v5329_v14  ;;  %v4910_v12 = vpop.f32.mrf.mxu0  ;;  %v4936_v14 = vpop.f32.mrf.mxu2 }
 0x427   : > { %v11855_v29 = vld [vmem:[#allocation4 + $0xfb8] sm:$0xf0] }
 0x428   : > { %v14247_v15 = vld [vmem:[#allocation4 + $0x95c] sm:$0xf]  ;;  %v11858_v13 = vor.u32 %v14447_v49, %v11855_v29  ;;  %5186 = vmatpush.bf16.msrb.mxu2 %v11602_v52 }
 0x429   : > { %v11055_v43 = vld [vmem:[#allocation4 + $0x978] sm:$0xf0] }
 0x42a   : > { %v14311_v0 = vld [vmem:[#allocation4 + $0xb5c] sm:$0xf]  ;;  %v11058_v62 = vor.u32 %v14247_v15, %v11055_v43  ;;  %5199 = vmatpush.bf16.msrb.mxu3 %v11858_v13  ;;  %v4935_v13 = vadd.f32 %v4934_v55, %v4922_v30 }
 0x42b   : > { %v11311_v60 = vld [vmem:[#allocation4 + $0xb78] sm:$0xf0] }
 0x42c   : > { %v14375_v27 = vld [vmem:[#allocation4 + $0xd5c] sm:$0xf]  ;;  %v11314_v33 = vor.u32 %v14311_v0, %v11311_v60  ;;  %5161 = vmatpush.bf16.msrb.mxu0 %v11058_v62  ;;  %v4947_v60 = vpop.f32.mrf.mxu3 }
 0x42d   : > { %v11567_v2 = vld [vmem:[#allocation4 + $0xd78] sm:$0xf0]  ;;  %v16483_v62 = vadd.f32 %v4947_v60, %v4935_v13  ;;  %v16491_v13 = vld [vmem:[#allocation12] sm:$0xff] }
 0x42e   : > { %v14439_v26 = vld [vmem:[#allocation4 + $0xf5c] sm:$0xf]  ;;  %v11570_v20 = vor.u32 %v14375_v27, %v11567_v2  ;;  %5174 = vmatpush.bf16.msrb.mxu1 %v11314_v33 }
 0x42f   : > { %v11823_v28 = vld [vmem:[#allocation4 + $0xf78] sm:$0xf0] }
 0x430   : > { %v14239_v39 = vld [vmem:[#allocation4 + $0x91c] sm:$0xf]  ;;  %v11826_v11 = vor.u32 %v14439_v26, %v11823_v28  ;;  %5187 = vmatpush.bf16.msrb.mxu2 %v11570_v20  ;;  %v5332_v26 = vrot.slane %v5331_v44, 1 }
 0x431   : > { %v11023_v21 = vld [vmem:[#allocation4 + $0x938] sm:$0xf0] }
 0x432   : > { %v14303_v40 = vld [vmem:[#allocation4 + $0xb1c] sm:$0xf]  ;;  %v11026_v18 = vor.u32 %v14239_v39, %v11023_v21  ;;  %5200 = vmatpush.bf16.msrb.mxu3 %v11826_v11  ;;  %v4923_v11 = vpop.f32.mrf.mxu1 }
 0x433   : > { %v11279_v46 = vld [vmem:[#allocation4 + $0xb38] sm:$0xf0] }
 0x434   : > { %v14367_v22 = vld [vmem:[#allocation4 + $0xd1c] sm:$0xf]  ;;  %v11282_v3 = vor.u32 %v14303_v40, %v11279_v46  ;;  %5162 = vmatpush.bf16.msrb.mxu0 %v11026_v18  ;;  %v5333_v46 = vadd.f32 %v5332_v26, %v5331_v44  ;;  %v4949_v30 = vpop.f32.mrf.mxu3 }
 0x435   : > { %v11535_v54 = vld [vmem:[#allocation4 + $0xd38] sm:$0xf0] }
 0x436   : > { %v14431_v4 = vld [vmem:[#allocation4 + $0xf1c] sm:$0xf]  ;;  %v11538_v16 = vor.u32 %v14367_v22, %v11535_v54  ;;  %5175 = vmatpush.bf16.msrb.mxu1 %v11282_v3  ;;  %v5359_v18 = vmul.f32 %v5333_v46, %v16290_v47 }
 0x437   : > { %v11791_v19 = vld [vmem:[#allocation4 + $0xf38] sm:$0xf0] }
 0x438   : > { %v14231_v53 = vld [vmem:[#allocation4 + $0x8dc] sm:$0xf]  ;;  %v11794_v58 = vor.u32 %v14431_v4, %v11791_v19  ;;  %5188 = vmatpush.bf16.msrb.mxu2 %v11538_v16 }
 0x439   : > { %v10991_v38 = vld [vmem:[#allocation4 + $0x8f8] sm:$0xf0] }
 0x43a   : > { %v14295_v51 = vld [vmem:[#allocation4 + $0xadc] sm:$0xf]  ;;  %v10994_v35 = vor.u32 %v14231_v53, %v10991_v38  ;;  %5201 = vmatpush.bf16.msrb.mxu3 %v11794_v58  ;;  %v5367_v58 = vadd.f32 1e-05, %v5359_v18 }
 0x43b   : > { %v11247_v10 = vld [vmem:[#allocation4 + $0xaf8] sm:$0xf0] }
 0x43c   : > { %v14359_v45 = vld [vmem:[#allocation4 + $0xcdc] sm:$0xf]  ;;  %v11250_v7 = vor.u32 %v14295_v51, %v11247_v10  ;;  %5163 = vmatpush.bf16.msrb.mxu0 %v10994_v35  ;;  %15077 = vrsqrt.f32 %v5367_v58  ;;  %vm5417_vm9 = vweird.f32 %v5367_v58  ;;  %v4999_v12 = vpop.f32.mrf.mxu3 }
 0x43d   : > { %v11503_v8 = vld [vmem:[#allocation4 + $0xcf8] sm:$0xf0] }
 0x43e   : > { %v14423_v5 = vld [vmem:[#allocation4 + $0xedc] sm:$0xf]  ;;  %v11506_v63 = vor.u32 %v14359_v45, %v11503_v8  ;;  %5176 = vmatpush.bf16.msrb.mxu1 %v11250_v7 }
 0x43f   : > { %v11759_v9 = vld [vmem:[#allocation4 + $0xef8] sm:$0xf0] }
 0x440   : > { %v14223_v49 = vld [vmem:[#allocation4 + $0x89c] sm:$0xf]  ;;  %v11762_v52 = vor.u32 %v14423_v5, %v11759_v9  ;;  %5189 = vmatpush.bf16.msrb.mxu2 %v11506_v63 }
 0x441   : > { %v10959_v29 = vld [vmem:[#allocation4 + $0x8b8] sm:$0xf0] }
 0x442   : > { %v14287_v36 = vld [vmem:[#allocation4 + $0xa9c] sm:$0xf]  ;;  %v10962_v28 = vor.u32 %v14223_v49, %v10959_v29  ;;  %5202 = vmatpush.bf16.msrb.mxu3 %v11762_v52  ;;  %v15078_v49 = vpop.eup %15077  ;;  %v4960_v52 = vpop.f32.mrf.mxu0 }
 0x443   : > { %v11215_v15 = vld [vmem:[#allocation4 + $0xab8] sm:$0xf0]  ;;  %v5412_v29 = vmul.f32 %v15078_v49, %v5367_v58  ;;  %vm5418_vm8 = vweird.f32 %v15078_v49 }
 0x444   : > { %v14351_v43 = vld [vmem:[#allocation4 + $0xc9c] sm:$0xf]  ;;  %v11218_v33 = vor.u32 %v14287_v36, %v11215_v15  ;;  %5164 = vmatpush.bf16.msrb.mxu0 %v10962_v28  ;;  %vm5419_vm10 = vmor %vm5417_vm9, %vm5418_vm8 }
 0x445   : > { %v11471_v0 = vld [vmem:[#allocation4 + $0xcb8] sm:$0xf0]  ;;  %v5413_v36 = vmul.f32 %v15078_v49, %v5412_v29 }
 0x446   : > { %v14415_v27 = vld [vmem:[#allocation4 + $0xe9c] sm:$0xf]  ;;  %v11474_v20 = vor.u32 %v14351_v43, %v11471_v0  ;;  %5177 = vmatpush.bf16.msrb.mxu1 %v11218_v33  ;;  %v4961_v43 = vadd.f32 %v4960_v52, %v16483_v62  ;;  %v4973_v0 = vpop.f32.mrf.mxu1 }
 0x447   : > { %v11727_v2 = vld [vmem:[#allocation4 + $0xeb8] sm:$0xf0]  ;;  %v5414_v55 = vmul.f32 0.5, %v5413_v36 }
 0x448   : > { %v14215_v39 = vld [vmem:[#allocation4 + $0x85c] sm:$0xf]  ;;  %v11730_v22 = vor.u32 %v14415_v27, %v11727_v2  ;;  %5190 = vmatpush.bf16.msrb.mxu2 %v11474_v20  ;;  %v4974_v60 = vadd.f32 %v4973_v0, %v4961_v43  ;;  %v16495_v27 = vld [vmem:[#allocation13] sm:$0xff]  ;;  %v4986_v2 = vpop.f32.mrf.mxu2 }
 0x449   : > { %v10927_v21 = vld [vmem:[#allocation4 + $0x878] sm:$0xf0]  ;;  %v5415_v44 = vsub.f32 1.5, %v5414_v55 }
 0x44a   : > { %v14279_v40 = vld [vmem:[#allocation4 + $0xa5c] sm:$0xf]  ;;  %v10930_v61 = vor.u32 %v14215_v39, %v10927_v21  ;;  %5203 = vmatpush.bf16.msrb.mxu3 %v11730_v22  ;;  %v4987_v28 = vadd.f32 %v4986_v2, %v4974_v60  ;;  %v4962_v20 = vpop.f32.mrf.mxu0  ;;  %v5001_v22 = vpop.f32.mrf.mxu3  ;;  %v5466_v60 = vperm.slane %v16491_v13, 5 }
 0x44b   : > { %v11183_v54 = vld [vmem:[#allocation4 + $0xa78] sm:$0xf0]  ;;  %v5416_v15 = vmul.f32 %v15078_v49, %v5415_v44 }
 0x44c   : > { %v14343_v23 = vld [vmem:[#allocation4 + $0xc5c] sm:$0xf]  ;;  %v11186_v16 = vor.u32 %v14279_v40, %v11183_v54  ;;  %5165 = vmatpush.bf16.msrb.mxu0 %v10930_v61  ;;  %v5000_v62 = vadd.f32 %v4999_v12, %v4987_v28 }
 0x44d   : > { %v11439_v4 = vld [vmem:[#allocation4 + $0xc78] sm:$0xf0] }
 0x44e   : > { %v14407_v19 = vld [vmem:[#allocation4 + $0xe5c] sm:$0xf]  ;;  %v11442_v53 = vor.u32 %v14343_v23, %v11439_v4  ;;  %5178 = vmatpush.bf16.msrb.mxu1 %v11186_v16  ;;  %v4975_v39 = vpop.f32.mrf.mxu1  ;;  %v5247_v40 = vsel %vm1167_vm2, %v5000_v62, 0.0 }
 0x44f   : > { %v11695_v17 = vld [vmem:[#allocation4 + $0xe78] sm:$0xf0]  ;;  %v5248_v11 = vrot.slane %v5247_v40, 4 }
 0x450   : > { %v14207_v3 = vld [vmem:[#allocation4 + $0x81c] sm:$0xf]  ;;  %v11698_v10 = vor.u32 %v14407_v19, %v11695_v17  ;;  %5191 = vmatpush.bf16.msrb.mxu2 %v11442_v53 }
 0x451   : > { %v10895_v38 = vld [vmem:[#allocation4 + $0x838] sm:$0xf0]  ;;  %v5249_v46 = vadd.f32 %v5248_v11, %v5247_v40 }
 0x452   : > { %v14271_v51 = vld [vmem:[#allocation4 + $0xa1c] sm:$0xf]  ;;  %v10898_v24 = vor.u32 %v14207_v3, %v10895_v38  ;;  %5204 = vmatpush.bf16.msrb.mxu3 %v11698_v10  ;;  %v5012_v53 = vpop.f32.mrf.mxu0 }
 0x453   : > { %v11151_v57 = vld [vmem:[#allocation4 + $0xa38] sm:$0xf0]  ;;  %v5250_v54 = vrot.slane %v5249_v46, 2 }
 0x454   : > { %v14335_v45 = vld [vmem:[#allocation4 + $0xc1c] sm:$0xf]  ;;  %v11154_v35 = vor.u32 %v14271_v51, %v11151_v57  ;;  %5166 = vmatpush.bf16.msrb.mxu0 %v10898_v24 }
 0x455   : > { %v11407_v8 = vld [vmem:[#allocation4 + $0xc38] sm:$0xf0]  ;;  %v5251_v23 = vadd.f32 %v5250_v54, %v5249_v46 }
 0x456   : > { %v14399_v5 = vld [vmem:[#allocation4 + $0xe1c] sm:$0xf]  ;;  %v11410_v7 = vor.u32 %v14335_v45, %v11407_v8  ;;  %5179 = vmatpush.bf16.msrb.mxu1 %v11154_v35  ;;  %v5025_v38 = vpop.f32.mrf.mxu1  ;;  %v5051_v8 = vpop.f32.mrf.mxu3 }
 0x457   : > { %v11663_v9 = vld [vmem:[#allocation4 + $0xe38] sm:$0xf0]  ;;  %5167 = vmatmul.bf16.vlgmr.msrb.gmra.mxu0 %v16247_v25  ;;  %v5465_v25 = vperm.slane %v16491_v13, 4  ;;  %v5252_v4 = vrot.slane %v5251_v23, 1  ;;  %v5026_v57 = vadd.f32 %v5025_v38, %v5012_v53 }
 0x458   : > { %v11666_v63 = vor.u32 %v14399_v5, %v11663_v9  ;;  %5192 = vmatpush.bf16.msrb.mxu2 %v11410_v7 }
 0x459   : > { %5180 = vmatmul.bf16.vlgmr.msrb.gmra.mxu1 %v16252_v42  ;;  %v5420_v42 = vsel %vm5419_vm10, %v15078_v49, %v5416_v15  ;;  %v5253_v19 = vadd.f32 %v5252_v4, %v5251_v23 }
 0x45a   : > { %5205 = vmatpush.bf16.msrb.mxu3 %v11666_v63  ;;  %v5014_v9 = vpop.f32.mrf.mxu0 }
 0x45b   : > { %5193 = vmatmul.bf16.vlgmr.msrb.gmra.mxu2 %v16245_v32  ;;  %v5455_v32 = vmul.f32 %v5420_v42, %v16475_v34  ;;  %v4988_v34 = vpop.f32.mrf.mxu2  ;;  %v5280_v17 = vmul.f32 %v16290_v47, %v5253_v19 }
 0x45d   : > { %5206 = vmatmul.bf16.vlgmr.msrb.gmra.mxu3 %v16249_v50  ;;  %v5491_v50 = vperm.slane %v16495_v27, 4  ;;  %v5481_v26 = vmul.f32 %v5465_v25, %v5455_v32  ;;  %v5288_v18 = vsub.f32 %v5000_v62, %v5280_v17 }
 0x45e   : > { %v5027_v24 = vpop.f32.mrf.mxu1  ;;  %v5053_v29 = vpop.f32.mrf.mxu3 }
 0x45f   : > { %v16498_v33 = vadd.f32 %v5491_v50, %v5481_v26  ;;  %v5296_v61 = vmul.f32 %v5288_v18, %v5288_v18  ;;  %v5492_v26 = vperm.slane %v16495_v27, 5 }
 0x461   : > { %v5515_v21 = vmax.f32 %v16498_v33, 0.0  ;;  %v5334_v3 = vsel %vm1167_vm2, %v5296_v61, 0.0 }
 0x462   : > { %v5335_v16 = vrot.slane %v5334_v3, 4 }
 0x463   : > { %v5038_v58 = vpop.f32.mrf.mxu2 }
 0x464   : > { %v5336_v51 = vadd.f32 %v5335_v16, %v5334_v3  ;;  %v5039_v45 = vadd.f32 %v5038_v58, %v5026_v57 }
 0x466   : > { %v5337_v14 = vrot.slane %v5336_v51, 2  ;;  %v5052_v5 = vadd.f32 %v5051_v8, %v5039_v45 }
 0x468   : > { %v5338_v10 = vadd.f32 %v5337_v14, %v5336_v51 }
 0x46a   : > { %v5339_v30 = vrot.slane %v5338_v10, 1 }
 0x46b   : > { %v5040_v63 = vpop.f32.mrf.mxu2 }
 0x46c   : > { %v5340_v35 = vadd.f32 %v5339_v30, %v5338_v10 }
 0x46e   : > { %v5360_v7 = vmul.f32 %v5340_v35, %v16290_v47 }
 0x470   : > { %v5368_v49 = vadd.f32 1e-05, %v5360_v7 }
 0x471   : > { %v5064_v43 = vpop.f32.mrf.mxu0 }
 0x472   : > { %15079 = vrsqrt.f32 %v5368_v49  ;;  %vm5427_vm12 = vweird.f32 %v5368_v49  ;;  %v5065_v25 = vadd.f32 %v5064_v43, %v5052_v5 }
 0x473   : > { %v5077_v42 = vpop.f32.mrf.mxu1 }
 0x474   : > { %v5078_v50 = vadd.f32 %v5077_v42, %v5065_v25 }
 0x478   : > { %v15080_v36 = vpop.eup %15079 }
 0x479   : > { %v5422_v55 = vmul.f32 %v15080_v36, %v5368_v49  ;;  %vm5428_vm11 = vweird.f32 %v15080_v36  ;;  %v5066_v11 = vpop.f32.mrf.mxu0 }
 0x47a   : > { %vm5429_vm13 = vmor %vm5427_vm12, %vm5428_vm11 }
 0x47b   : > { %v5423_v44 = vmul.f32 %v15080_v36, %v5422_v55  ;;  %v5090_v28 = vpop.f32.mrf.mxu2  ;;  %v5079_v46 = vpop.f32.mrf.mxu1 }
 0x47c   : > { %v5091_v62 = vadd.f32 %v5090_v28, %v5078_v50 }
 0x47d   : > { %v5424_v52 = vmul.f32 0.5, %v5423_v44  ;;  %v5103_v20 = vpop.f32.mrf.mxu3 }
 0x47e   : > { %v5104_v40 = vadd.f32 %v5103_v20, %v5091_v62  ;;  %v5493_v62 = vperm.slane %v16495_v27, 6 }
 0x47f   : > { %v5425_v15 = vsub.f32 1.5, %v5424_v52 }
 0x480   : > { %v5254_v22 = vsel %vm1167_vm2, %v5104_v40, 0.0 }
 0x481   : > { %v5426_v0 = vmul.f32 %v15080_v36, %v5425_v15  ;;  %v5255_v54 = vrot.slane %v5254_v22, 4 }
 0x483   : > { %v5430_v32 = vsel %vm5429_vm13, %v15080_v36, %v5426_v0  ;;  %v5256_v23 = vadd.f32 %v5255_v54, %v5254_v22  ;;  %v5092_v4 = vpop.f32.mrf.mxu2 }
 0x484   : > { %v5456_v2 = vmul.f32 %v5430_v32, %v5288_v18 }
 0x485   : > { %v5105_v19 = vpop.f32.mrf.mxu3  ;;  %v5257_v17 = vrot.slane %v5256_v23, 2 }
 0x486   : > { %v5482_v12 = vmul.f32 %v5466_v60, %v5456_v2 }
 0x487   : > { %v5258_v18 = vadd.f32 %v5257_v17, %v5256_v23 }
 0x488   : > { %v16507_v39 = vadd.f32 %v5492_v26, %v5482_v12  ;;  %v5467_v26 = vperm.slane %v16491_v13, 6 }
 0x489   : > { %v5259_v61 = vrot.slane %v5258_v18, 1 }
 0x48a   : > { %v5516_v34 = vmax.f32 %v16507_v39, 0.0 }
 0x48b   : > { %v5260_v3 = vadd.f32 %v5259_v61, %v5258_v18 }
 0x48d   : > { %v5281_v16 = vmul.f32 %v16290_v47, %v5260_v3 }
 0x48f   : > { %v5289_v53 = vsub.f32 %v5104_v40, %v5281_v16 }
 0x491   : > { %v5297_v38 = vmul.f32 %v5289_v53, %v5289_v53 }
 0x493   : > { %v5341_v51 = vsel %vm1167_vm2, %v5297_v38, 0.0 }
 0x494   : > { %v5342_v57 = vrot.slane %v5341_v51, 4  ;;  %v5116_v14 = vpop.f32.mrf.mxu0 }
 0x496   : > { %v5129_v58 = vpop.f32.mrf.mxu1  ;;  %v5343_v10 = vadd.f32 %v5342_v57, %v5341_v51 }
 0x497   : > { %v5130_v55 = vadd.f32 %v5129_v58, %v5116_v14 }
 0x498   : > { %v5344_v45 = vrot.slane %v5343_v10, 2 }
 0x49a   : > { %v5345_v30 = vadd.f32 %v5344_v45, %v5343_v10 }
 0x49c   : > { %v5346_v9 = vrot.slane %v5345_v30, 1  ;;  %v5118_v24 = vpop.f32.mrf.mxu0 }
 0x49e   : > { %v5142_v8 = vpop.f32.mrf.mxu2  ;;  %v5131_v35 = vpop.f32.mrf.mxu1  ;;  %v5347_v7 = vadd.f32 %v5346_v9, %v5345_v30 }
 0x49f   : > { %v5143_v15 = vadd.f32 %v5142_v8, %v5130_v55 }
 0x4a0   : > { %v5155_v5 = vpop.f32.mrf.mxu3  ;;  %v5361_v63 = vmul.f32 %v5347_v7, %v16290_v47 }
 0x4a1   : > { %v5156_v25 = vadd.f32 %v5155_v5, %v5143_v15 }
 0x4a2   : > { %v5369_v29 = vadd.f32 1e-05, %v5361_v63 }
 0x4a4   : > { %15081 = vrsqrt.f32 %v5369_v29  ;;  %vm5437_vm15 = vweird.f32 %v5369_v29 }
 0x4a6   : > { %v5144_v49 = vpop.f32.mrf.mxu2 }
 0x4a8   : > { %v5157_v36 = vpop.f32.mrf.mxu3 }
 0x4aa   : > { %v15082_v44 = vpop.eup %15081 }
 0x4ab   : > { %v5432_v52 = vmul.f32 %v15082_v44, %v5369_v29  ;;  %vm5438_vm14 = vweird.f32 %v15082_v44 }
 0x4ac   : > { %vm5439_vm0 = vmor %vm5437_vm15, %vm5438_vm14 }
 0x4ad   : > { %v5433_v43 = vmul.f32 %v15082_v44, %v5432_v52 }
 0x4af   : > { %v5434_v0 = vmul.f32 0.5, %v5433_v43  ;;  %v5468_v43 = vperm.slane %v16491_v13, 7 }
 0x4b1   : > { %v5435_v60 = vsub.f32 1.5, %v5434_v0 }
 0x4b3   : > { %v5436_v2 = vmul.f32 %v15082_v44, %v5435_v60 }
 0x4b5   : > { %v5440_v28 = vsel %vm5439_vm0, %v15082_v44, %v5436_v2 }
 0x4b6   : > { %v5457_v12 = vmul.f32 %v5440_v28, %v5289_v53 }
 0x4b8   : > { %v5483_v11 = vmul.f32 %v5467_v26, %v5457_v12 }
 0x4ba   : > { %v16516_v4 = vadd.f32 %v5493_v62, %v5483_v11 }
 0x4bc   : > { %v5517_v17 = vmax.f32 %v16516_v4, 0.0 }
 0x4d4   : > { %v5168_v42 = vpop.f32.mrf.mxu0 }
 0x4d5   : > { %v5169_v50 = vadd.f32 %v5168_v42, %v5156_v25  ;;  %v5494_v42 = vperm.slane %v16495_v27, 7 }
 0x4d6   : > { %v5181_v32 = vpop.f32.mrf.mxu1 }
 0x4d7   : > { %v5182_v20 = vadd.f32 %v5181_v32, %v5169_v50 }
 0x4dc   : > { %v5170_v54 = vpop.f32.mrf.mxu0 }
 0x4de   : > { %v5194_v40 = vpop.f32.mrf.mxu2  ;;  %v5183_v23 = vpop.f32.mrf.mxu1 }
 0x4df   : > { %v5195_v46 = vadd.f32 %v5194_v40, %v5182_v20 }
 0x4e0   : > { %v5207_v22 = vpop.f32.mrf.mxu3 }
 0x4e1   : > { %v5208_v19 = vadd.f32 %v5207_v22, %v5195_v46 }
 0x4e3   : > { %v5261_v18 = vsel %vm1167_vm2, %v5208_v19, 0.0 }
 0x4e4   : > { %v5262_v61 = vrot.slane %v5261_v18, 4 }
 0x4e6   : > { %v5263_v3 = vadd.f32 %v5262_v61, %v5261_v18  ;;  %v5196_v16 = vpop.f32.mrf.mxu2 }
 0x4e8   : > { %v5209_v53 = vpop.f32.mrf.mxu3  ;;  %v5264_v38 = vrot.slane %v5263_v3, 2 }
 0x4ea   : > { %v5265_v51 = vadd.f32 %v5264_v38, %v5263_v3 }
 0x4ec   : > { %v5266_v57 = vrot.slane %v5265_v51, 1 }
 0x4ee   : > { %v5267_v14 = vadd.f32 %v5266_v57, %v5265_v51 }
 0x4f0   : > { %v5282_v58 = vmul.f32 %v16290_v47, %v5267_v14 }
 0x4f2   : > { %v5290_v10 = vsub.f32 %v5208_v19, %v5282_v58 }
 0x4f4   : > { %v5298_v45 = vmul.f32 %v5290_v10, %v5290_v10 }
 0x4f6   : > { %v5348_v8 = vsel %vm1167_vm2, %v5298_v45, 0.0 }
 0x4f7   : > { %v5349_v30 = vrot.slane %v5348_v8, 4 }
 0x4f9   : > { %v5350_v5 = vadd.f32 %v5349_v30, %v5348_v8 }
 0x4fb   : > { %v5351_v9 = vrot.slane %v5350_v5, 2 }
 0x4fd   : > { %v5352_v24 = vadd.f32 %v5351_v9, %v5350_v5 }
 0x4ff   : > { %v5353_v35 = vrot.slane %v5352_v24, 1 }
 0x501   : > { %v5354_v7 = vadd.f32 %v5353_v35, %v5352_v24 }
 0x503   : > { %v5362_v63 = vmul.f32 %v5354_v7, %v16290_v47 }
 0x505   : > { %v5370_v49 = vadd.f32 1e-05, %v5362_v63 }
 0x507   : > { %15083 = vrsqrt.f32 %v5370_v49  ;;  %vm5447_vm3 = vweird.f32 %v5370_v49 }
 0x50d   : > { %v15084_v29 = vpop.eup %15083 }
 0x50e   : > { %v5442_v36 = vmul.f32 %v15084_v29, %v5370_v49  ;;  %vm5448_vm1 = vweird.f32 %v15084_v29 }
 0x50f   : > { %vm5449_vm4 = vmor %vm5447_vm3, %vm5448_vm1 }
 0x510   : > { %v5443_v55 = vmul.f32 %v15084_v29, %v5442_v36 }
 0x512   : > { %v5444_v44 = vmul.f32 0.5, %v5443_v55 }
 0x514   : > { %v5445_v52 = vsub.f32 1.5, %v5444_v44 }
 0x516   : > { %v5446_v15 = vmul.f32 %v15084_v29, %v5445_v52 }
 0x518   : > { %v5450_v0 = vsel %vm5449_vm4, %v15084_v29, %v5446_v15 }
 0x519   : > { %v5458_v25 = vmul.f32 %v5450_v0, %v5290_v10 }
 0x51b   : > { %v5484_v60 = vmul.f32 %v5468_v43, %v5458_v25 }
 0x51d   : > { %v16525_v32 = vadd.f32 %v5494_v42, %v5484_v60 }
 0x51f   : > { %v5518_v50 = vmax.f32 %v16525_v32, 0.0 }
 0x520   : > { %15335 = dma.done.wait [#allocation6 + $0x1], 65536 }
 0x521   : > { %15336 = vsyncadd [#allocation6 + $0x1], 4294901760  ;;  %v12117_v2 = vld [vmem:[#allocation5 + $0x1c0] sm:$0xf]  ;;  %v12855_v4 = vld [vmem:[#allocation5 + $0x7a0] sm:$0xf0] }
 0x522   : > { %v14520_v26 = vld [vmem:[#allocation5 + $0x1dc] sm:$0xf0]  ;;  %v14564_v32 = vld [vmem:[#allocation5 + $0x344] sm:$0xf] }
 0x523   : > { %v12373_v28 = vld [vmem:[#allocation5 + $0x3c0] sm:$0xf]  ;;  %v12118_v12 = vor.u32 %v14520_v26, %v12117_v2  ;;  %v14692_v39 = vld [vmem:[#allocation5 + $0x744] sm:$0xf] }
 0x524   : > { %v14584_v62 = vld [vmem:[#allocation5 + $0x3dc] sm:$0xf0] }
 0x525   : > { %v12629_v20 = vld [vmem:[#allocation5 + $0x5c0] sm:$0xf]  ;;  %v12374_v11 = vor.u32 %v14584_v62, %v12373_v28  ;;  %8602 = vmatpush.bf16.msra.mxu0 %v12118_v12 }
 0x526   : > { %v14648_v40 = vld [vmem:[#allocation5 + $0x5dc] sm:$0xf0] }
 0x527   : > { %v12630_v13 = vor.u32 %v14648_v40, %v12629_v20  ;;  %v12885_v46 = vld [vmem:[#allocation5 + $0x7c0] sm:$0xf]  ;;  %8615 = vmatpush.bf16.msra.mxu1 %v12374_v11 }
 0x528   : > { %v14712_v22 = vld [vmem:[#allocation5 + $0x7dc] sm:$0xf0] }
 0x529   : > { %v12085_v54 = vld [vmem:[#allocation5 + $0x180] sm:$0xf]  ;;  %v12886_v27 = vor.u32 %v14712_v22, %v12885_v46  ;;  %8628 = vmatpush.bf16.msra.mxu2 %v12630_v13 }
 0x52a   : > { %v14512_v23 = vld [vmem:[#allocation5 + $0x19c] sm:$0xf0] }
 0x52b   : > { %v12341_v19 = vld [vmem:[#allocation5 + $0x380] sm:$0xf]  ;;  %v12086_v61 = vor.u32 %v14512_v23, %v12085_v54  ;;  %8641 = vmatpush.bf16.msra.mxu3 %v12886_v27 }
 0x52c   : > { %v14576_v18 = vld [vmem:[#allocation5 + $0x39c] sm:$0xf0] }
 0x52d   : > { %v12342_v3 = vor.u32 %v14576_v18, %v12341_v19  ;;  %v12597_v16 = vld [vmem:[#allocation5 + $0x580] sm:$0xf]  ;;  %8603 = vmatpush.bf16.msra.mxu0 %v12086_v61 }
 0x52e   : > { %v14640_v53 = vld [vmem:[#allocation5 + $0x59c] sm:$0xf0] }
 0x52f   : > { %v12853_v38 = vld [vmem:[#allocation5 + $0x780] sm:$0xf]  ;;  %v12598_v51 = vor.u32 %v14640_v53, %v12597_v16  ;;  %8616 = vmatpush.bf16.msra.mxu1 %v12342_v3 }
 0x530   : > { %v14704_v57 = vld [vmem:[#allocation5 + $0x79c] sm:$0xf0] }
 0x531   : > { %v12053_v14 = vld [vmem:[#allocation5 + $0x140] sm:$0xf]  ;;  %v12854_v10 = vor.u32 %v14704_v57, %v12853_v38  ;;  %8629 = vmatpush.bf16.msra.mxu2 %v12598_v51 }
 0x532   : > { %v14504_v58 = vld [vmem:[#allocation5 + $0x15c] sm:$0xf0] }
 0x533   : > { %v12309_v45 = vld [vmem:[#allocation5 + $0x340] sm:$0xf]  ;;  %v12054_v5 = vor.u32 %v14504_v58, %v12053_v14  ;;  %8642 = vmatpush.bf16.msra.mxu3 %v12854_v10 }
 0x534   : > { %v14568_v8 = vld [vmem:[#allocation5 + $0x35c] sm:$0xf0] }
 0x535   : > { %v12565_v30 = vld [vmem:[#allocation5 + $0x540] sm:$0xf]  ;;  %v12310_v7 = vor.u32 %v14568_v8, %v12309_v45  ;;  %8604 = vmatpush.bf16.msra.mxu0 %v12054_v5 }
 0x536   : > { %v14632_v9 = vld [vmem:[#allocation5 + $0x55c] sm:$0xf0] }
 0x537   : > { %v12821_v24 = vld [vmem:[#allocation5 + $0x740] sm:$0xf]  ;;  %v12566_v63 = vor.u32 %v14632_v9, %v12565_v30  ;;  %8617 = vmatpush.bf16.msra.mxu1 %v12310_v7 }
 0x538   : > { %v14696_v35 = vld [vmem:[#allocation5 + $0x75c] sm:$0xf0] }
 0x539   : > { %v12021_v49 = vld [vmem:[#allocation5 + $0x100] sm:$0xf]  ;;  %v12822_v55 = vor.u32 %v14696_v35, %v12821_v24  ;;  %8630 = vmatpush.bf16.msra.mxu2 %v12566_v63 }
 0x53a   : > { %v14496_v29 = vld [vmem:[#allocation5 + $0x11c] sm:$0xf0] }
 0x53b   : > { %v12277_v36 = vld [vmem:[#allocation5 + $0x300] sm:$0xf]  ;;  %v12022_v25 = vor.u32 %v14496_v29, %v12021_v49  ;;  %8643 = vmatpush.bf16.msra.mxu3 %v12822_v55 }
 0x53c   : > { %v14560_v44 = vld [vmem:[#allocation5 + $0x31c] sm:$0xf0] }
 0x53d   : > { %v12533_v52 = vld [vmem:[#allocation5 + $0x500] sm:$0xf]  ;;  %v12278_v42 = vor.u32 %v14560_v44, %v12277_v36  ;;  %8605 = vmatpush.bf16.msra.mxu0 %v12022_v25 }
 0x53e   : > { %v14624_v15 = vld [vmem:[#allocation5 + $0x51c] sm:$0xf0] }
 0x53f   : > { %v12789_v43 = vld [vmem:[#allocation5 + $0x700] sm:$0xf]  ;;  %v12534_v60 = vor.u32 %v14624_v15, %v12533_v52  ;;  %8618 = vmatpush.bf16.msra.mxu1 %v12278_v42 }
 0x540   : > { %v14688_v0 = vld [vmem:[#allocation5 + $0x71c] sm:$0xf0] }
 0x541   : > { %v11989_v2 = vld [vmem:[#allocation5 + $0xc0] sm:$0xf]  ;;  %v12790_v12 = vor.u32 %v14688_v0, %v12789_v43  ;;  %8631 = vmatpush.bf16.msra.mxu2 %v12534_v60 }
 0x542   : > { %v14488_v26 = vld [vmem:[#allocation5 + $0xdc] sm:$0xf0] }
 0x543   : > { %v12245_v28 = vld [vmem:[#allocation5 + $0x2c0] sm:$0xf]  ;;  %v11990_v46 = vor.u32 %v14488_v26, %v11989_v2  ;;  %8644 = vmatpush.bf16.msra.mxu3 %v12790_v12 }
 0x544   : > { %v14552_v62 = vld [vmem:[#allocation5 + $0x2dc] sm:$0xf0] }
 0x545   : > { %v12501_v20 = vld [vmem:[#allocation5 + $0x4c0] sm:$0xf]  ;;  %v12246_v22 = vor.u32 %v14552_v62, %v12245_v28  ;;  %8606 = vmatpush.bf16.msra.mxu0 %v11990_v46 }
 0x546   : > { %v14616_v40 = vld [vmem:[#allocation5 + $0x4dc] sm:$0xf0] }
 0x547   : > { %v12757_v11 = vld [vmem:[#allocation5 + $0x6c0] sm:$0xf]  ;;  %v12502_v54 = vor.u32 %v14616_v40, %v12501_v20  ;;  %8619 = vmatpush.bf16.msra.mxu1 %v12246_v22 }
 0x548   : > { %v14680_v13 = vld [vmem:[#allocation5 + $0x6dc] sm:$0xf0] }
 0x549   : > { %v11957_v27 = vld [vmem:[#allocation5 + $0x80] sm:$0xf]  ;;  %v12758_v18 = vor.u32 %v14680_v13, %v12757_v11  ;;  %8632 = vmatpush.bf16.msra.mxu2 %v12502_v54 }
 0x54a   : > { %v14480_v23 = vld [vmem:[#allocation5 + $0x9c] sm:$0xf0] }
 0x54b   : > { %v12213_v19 = vld [vmem:[#allocation5 + $0x280] sm:$0xf]  ;;  %v11958_v51 = vor.u32 %v14480_v23, %v11957_v27  ;;  %8645 = vmatpush.bf16.msra.mxu3 %v12758_v18 }
 0x54c   : > { %v14544_v61 = vld [vmem:[#allocation5 + $0x29c] sm:$0xf0] }
 0x54d   : > { %v12469_v3 = vld [vmem:[#allocation5 + $0x480] sm:$0xf]  ;;  %v12214_v57 = vor.u32 %v14544_v61, %v12213_v19  ;;  %8607 = vmatpush.bf16.msra.mxu0 %v11958_v51 }
 0x54e   : > { %v14608_v16 = vld [vmem:[#allocation5 + $0x49c] sm:$0xf0] }
 0x54f   : > { %v12725_v53 = vld [vmem:[#allocation5 + $0x680] sm:$0xf]  ;;  %v12470_v14 = vor.u32 %v14608_v16, %v12469_v3  ;;  %8620 = vmatpush.bf16.msra.mxu1 %v12214_v57 }
 0x550   : > { %v14672_v38 = vld [vmem:[#allocation5 + $0x69c] sm:$0xf0] }
 0x551   : > { %v11925_v58 = vld [vmem:[#allocation5 + $0x40] sm:$0xf]  ;;  %v12726_v8 = vor.u32 %v14672_v38, %v12725_v53  ;;  %8633 = vmatpush.bf16.msra.mxu2 %v12470_v14  ;;  %v16531_v38 = vpack.c.bf16 %v5513_v56, %v5513_v56  ;;  %v16536_v14 = vpack.c.bf16 %v5511_v37, %v5511_v37  ;;  %v16546_v56 = vpack.c.bf16 %v5512_v59, %v5512_v59 }
 0x552   : > { %v14472_v10 = vld [vmem:[#allocation5 + $0x5c] sm:$0xf0] }
 0x553   : > { %v12181_v45 = vld [vmem:[#allocation5 + $0x240] sm:$0xf]  ;;  %v11926_v7 = vor.u32 %v14472_v10, %v11925_v58  ;;  %8646 = vmatpush.bf16.msra.mxu3 %v12726_v8  ;;  %v16541_v58 = vpack.c.bf16 %v5514_v1, %v5514_v1 }
 0x554   : > { %v14536_v30 = vld [vmem:[#allocation5 + $0x25c] sm:$0xf0] }
 0x555   : > { %v12437_v5 = vld [vmem:[#allocation5 + $0x440] sm:$0xf]  ;;  %v12182_v29 = vor.u32 %v14536_v30, %v12181_v45  ;;  %8608 = vmatpush.bf16.msra.mxu0 %v11926_v7 }
 0x556   : > { %v14600_v9 = vld [vmem:[#allocation5 + $0x45c] sm:$0xf0] }
 0x557   : > { %v12693_v24 = vld [vmem:[#allocation5 + $0x640] sm:$0xf]  ;;  %v12438_v36 = vor.u32 %v14600_v9, %v12437_v5  ;;  %8621 = vmatpush.bf16.msra.mxu1 %v12182_v29 }
 0x558   : > { %v14664_v35 = vld [vmem:[#allocation5 + $0x65c] sm:$0xf0] }
 0x559   : > { %v11893_v63 = vld [vmem:[#allocation5] sm:$0xf]  ;;  %v12694_v15 = vor.u32 %v14664_v35, %v12693_v24  ;;  %8634 = vmatpush.bf16.msra.mxu2 %v12438_v36 }
 0x55a   : > { %v14464_v49 = vld [vmem:[#allocation5 + $0x1c] sm:$0xf0] }
 0x55b   : > { %v12149_v55 = vld [vmem:[#allocation5 + $0x200] sm:$0xf]  ;;  %v11894_v26 = vor.u32 %v14464_v49, %v11893_v63  ;;  %8647 = vmatpush.bf16.msra.mxu3 %v12694_v15 }
 0x55c   : > { %v14528_v44 = vld [vmem:[#allocation5 + $0x21c] sm:$0xf0] }
 0x55d   : > { %v12405_v52 = vld [vmem:[#allocation5 + $0x400] sm:$0xf]  ;;  %v12150_v20 = vor.u32 %v14528_v44, %v12149_v55  ;;  %8609 = vmatpush.bf16.msra.mxu0 %v11894_v26 }
 0x55e   : > { %v14592_v43 = vld [vmem:[#allocation5 + $0x41c] sm:$0xf0] }
 0x55f   : > { %v12661_v0 = vld [vmem:[#allocation5 + $0x600] sm:$0xf]  ;;  %v12406_v40 = vor.u32 %v14592_v43, %v12405_v52  ;;  %8622 = vmatpush.bf16.msra.mxu1 %v12150_v20 }
 0x560   : > { %v14656_v25 = vld [vmem:[#allocation5 + $0x61c] sm:$0xf0]  ;;  %8610 = vmatmul.bf16.vlgmr.msra.gmra.mxu0 %v16536_v14 }
 0x561   : > { %v13141_v42 = vld [vmem:[#allocation5 + $0x9c0] sm:$0xf]  ;;  %v12662_v46 = vor.u32 %v14656_v25, %v12661_v0  ;;  %8635 = vmatpush.bf16.msra.mxu2 %v12406_v40 }
 0x562   : > { %v14776_v60 = vld [vmem:[#allocation5 + $0x9dc] sm:$0xf0]  ;;  %8623 = vmatmul.bf16.vlgmr.msra.gmra.mxu1 %v16546_v56 }
 0x563   : > { %v13397_v2 = vld [vmem:[#allocation5 + $0xbc0] sm:$0xf]  ;;  %v13142_v22 = vor.u32 %v14776_v60, %v13141_v42  ;;  %8648 = vmatpush.bf16.msra.mxu3 %v12662_v46 }
 0x564   : > { %v14840_v28 = vld [vmem:[#allocation5 + $0xbdc] sm:$0xf0]  ;;  %8636 = vmatmul.bf16.vlgmr.msra.gmra.mxu2 %v16531_v38 }
 0x565   : > { %v13653_v12 = vld [vmem:[#allocation5 + $0xdc0] sm:$0xf]  ;;  %v13398_v54 = vor.u32 %v14840_v28, %v13397_v2  ;;  %8654 = vmatpush.bf16.msrb.mxu0 %v13142_v22 }
 0x566   : > { %v14904_v62 = vld [vmem:[#allocation5 + $0xddc] sm:$0xf0]  ;;  %8649 = vmatmul.bf16.vlgmr.msra.gmra.mxu3 %v16541_v58 }
 0x567   : > { %v13909_v11 = vld [vmem:[#allocation5 + $0xfc0] sm:$0xf]  ;;  %v13654_v27 = vor.u32 %v14904_v62, %v13653_v12  ;;  %8667 = vmatpush.bf16.msrb.mxu1 %v13398_v54 }
 0x568   : > { %v14968_v13 = vld [vmem:[#allocation5 + $0xfdc] sm:$0xf0] }
 0x569   : > { %v13109_v23 = vld [vmem:[#allocation5 + $0x980] sm:$0xf]  ;;  %v13910_v61 = vor.u32 %v14968_v13, %v13909_v11  ;;  %8680 = vmatpush.bf16.msrb.mxu2 %v13654_v27 }
 0x56a   : > { %v14768_v19 = vld [vmem:[#allocation5 + $0x99c] sm:$0xf0] }
 0x56b   : > { %v13365_v18 = vld [vmem:[#allocation5 + $0xb80] sm:$0xf]  ;;  %v13110_v6 = vor.u32 %v14768_v19, %v13109_v23  ;;  %8693 = vmatpush.bf16.msrb.mxu3 %v13910_v61 }
 0x56c   : > { %v14832_v3 = vld [vmem:[#allocation5 + $0xb9c] sm:$0xf0] }
 0x56d   : > { %v13621_v16 = vld [vmem:[#allocation5 + $0xd80] sm:$0xf]  ;;  %v13366_v10 = vor.u32 %v14832_v3, %v13365_v18  ;;  %8655 = vmatpush.bf16.msrb.mxu0 %v13110_v6 }
 0x56e   : > { %v14896_v53 = vld [vmem:[#allocation5 + $0xd9c] sm:$0xf0] }
 0x56f   : > { %v13877_v51 = vld [vmem:[#allocation5 + $0xf80] sm:$0xf]  ;;  %v13622_v48 = vor.u32 %v14896_v53, %v13621_v16  ;;  %8668 = vmatpush.bf16.msrb.mxu1 %v13366_v10 }
 0x570   : > { %v14960_v57 = vld [vmem:[#allocation5 + $0xf9c] sm:$0xf0] }
 0x571   : > { %v13077_v45 = vld [vmem:[#allocation5 + $0x940] sm:$0xf]  ;;  %v13878_v31 = vor.u32 %v14960_v57, %v13877_v51  ;;  %8681 = vmatpush.bf16.msrb.mxu2 %v13622_v48 }
 0x572   : > { %v14760_v37 = vld [vmem:[#allocation5 + $0x95c] sm:$0xf0] }
 0x573   : > { %v13333_v8 = vld [vmem:[#allocation5 + $0xb40] sm:$0xf]  ;;  %v13078_v41 = vor.u32 %v14760_v37, %v13077_v45  ;;  %8694 = vmatpush.bf16.msrb.mxu3 %v13878_v31 }
 0x574   : > { %v14824_v30 = vld [vmem:[#allocation5 + $0xb5c] sm:$0xf0] }
 0x575   : > { %v13589_v1 = vld [vmem:[#allocation5 + $0xd40] sm:$0xf]  ;;  %v13334_v59 = vor.u32 %v14824_v30, %v13333_v8  ;;  %8656 = vmatpush.bf16.msrb.mxu0 %v13078_v41 }
 0x576   : > { %v14888_v5 = vld [vmem:[#allocation5 + $0xd5c] sm:$0xf0] }
 0x577   : > { %v13845_v9 = vld [vmem:[#allocation5 + $0xf40] sm:$0xf]  ;;  %v13590_v35 = vor.u32 %v14888_v5, %v13589_v1  ;;  %8669 = vmatpush.bf16.msrb.mxu1 %v13334_v59 }
 0x578   : > { %v14952_v24 = vld [vmem:[#allocation5 + $0xf5c] sm:$0xf0] }
 0x579   : > { %v13045_v7 = vld [vmem:[#allocation5 + $0x900] sm:$0xf]  ;;  %v13846_v29 = vor.u32 %v14952_v24, %v13845_v9  ;;  %8682 = vmatpush.bf16.msrb.mxu2 %v13590_v35 }
 0x57a   : > { %v14752_v63 = vld [vmem:[#allocation5 + $0x91c] sm:$0xf0] }
 0x57b   : > { %v13301_v49 = vld [vmem:[#allocation5 + $0xb00] sm:$0xf]  ;;  %v13046_v43 = vor.u32 %v14752_v63, %v13045_v7  ;;  %8695 = vmatpush.bf16.msrb.mxu3 %v13846_v29 }
 0x57c   : > { %v14816_v36 = vld [vmem:[#allocation5 + $0xb1c] sm:$0xf0] }
 0x57d   : > { %v13557_v55 = vld [vmem:[#allocation5 + $0xd00] sm:$0xf]  ;;  %v13302_v0 = vor.u32 %v14816_v36, %v13301_v49  ;;  %8657 = vmatpush.bf16.msrb.mxu0 %v13046_v43 }
 0x57e   : > { %v14880_v44 = vld [vmem:[#allocation5 + $0xd1c] sm:$0xf0] }
 0x57f   : > { %v13813_v52 = vld [vmem:[#allocation5 + $0xf00] sm:$0xf]  ;;  %v13558_v25 = vor.u32 %v14880_v44, %v13557_v55  ;;  %8670 = vmatpush.bf16.msrb.mxu1 %v13302_v0  ;;  %v14516_v44 = vld [vmem:[#allocation5 + $0x1c4] sm:$0xf] }
 0x580   : > { %v14944_v15 = vld [vmem:[#allocation5 + $0xf1c] sm:$0xf0]  ;;  %v12375_v0 = vld [vmem:[#allocation5 + $0x3e0] sm:$0xf0] }
 0x581   : > { %v13013_v42 = vld [vmem:[#allocation5 + $0x8c0] sm:$0xf]  ;;  %v13814_v26 = vor.u32 %v14944_v15, %v13813_v52  ;;  %8683 = vmatpush.bf16.msrb.mxu2 %v13558_v25  ;;  %v12119_v52 = vld [vmem:[#allocation5 + $0x1e0] sm:$0xf0] }
 0x582   : > { %v14744_v60 = vld [vmem:[#allocation5 + $0x8dc] sm:$0xf0]  ;;  %v14580_v15 = vld [vmem:[#allocation5 + $0x3c4] sm:$0xf] }
 0x583   : > { %v13269_v2 = vld [vmem:[#allocation5 + $0xac0] sm:$0xf]  ;;  %v13014_v11 = vor.u32 %v14744_v60, %v13013_v42  ;;  %8696 = vmatpush.bf16.msrb.mxu3 %v13814_v26  ;;  %v14644_v25 = vld [vmem:[#allocation5 + $0x5c4] sm:$0xf] }
 0x584   : > { %v14808_v28 = vld [vmem:[#allocation5 + $0xadc] sm:$0xf0]  ;;  %v12631_v42 = vld [vmem:[#allocation5 + $0x5e0] sm:$0xf0] }
 0x585   : > { %v13525_v12 = vld [vmem:[#allocation5 + $0xcc0] sm:$0xf]  ;;  %v13270_v13 = vor.u32 %v14808_v28, %v13269_v2  ;;  %8658 = vmatpush.bf16.msrb.mxu0 %v13014_v11  ;;  %v14708_v26 = vld [vmem:[#allocation5 + $0x7c4] sm:$0xf] }
 0x586   : > { %v14872_v62 = vld [vmem:[#allocation5 + $0xcdc] sm:$0xf0]  ;;  %v12887_v28 = vld [vmem:[#allocation5 + $0x7e0] sm:$0xf0] }
 0x587   : > { %v13781_v20 = vld [vmem:[#allocation5 + $0xec0] sm:$0xf]  ;;  %v13526_v46 = vor.u32 %v14872_v62, %v13525_v12  ;;  %8671 = vmatpush.bf16.msrb.mxu1 %v13270_v13  ;;  %v12122_v62 = vor.u32 %v14516_v44, %v12119_v52  ;;  %v14508_v11 = vld [vmem:[#allocation5 + $0x184] sm:$0xf] }
 0x588   : > { %v14936_v40 = vld [vmem:[#allocation5 + $0xedc] sm:$0xf0]  ;;  %v12087_v13 = vld [vmem:[#allocation5 + $0x1a0] sm:$0xf0] }
 0x589   : > { %v12981_v22 = vld [vmem:[#allocation5 + $0x880] sm:$0xf]  ;;  %v13782_v23 = vor.u32 %v14936_v40, %v13781_v20  ;;  %8684 = vmatpush.bf16.msrb.mxu2 %v13526_v46  ;;  %v12378_v20 = vor.u32 %v14580_v15, %v12375_v0  ;;  %v12634_v40 = vor.u32 %v14644_v25, %v12631_v42  ;;  %v14572_v46 = vld [vmem:[#allocation5 + $0x384] sm:$0xf] }
 0x58a   : > { %v14736_v54 = vld [vmem:[#allocation5 + $0x89c] sm:$0xf0]  ;;  %v12247_v44 = vld [vmem:[#allocation5 + $0x2e0] sm:$0xf0] }
 0x58b   : > { %v13237_v27 = vld [vmem:[#allocation5 + $0xa80] sm:$0xf]  ;;  %v12982_v53 = vor.u32 %v14736_v54, %v12981_v22  ;;  %8697 = vmatpush.bf16.msrb.mxu3 %v13782_v23  ;;  %v12890_v22 = vor.u32 %v14708_v26, %v12887_v28  ;;  %v16555_v54 = vpack.c.bf16 %v5517_v17, %v5517_v17  ;;  %v14636_v23 = vld [vmem:[#allocation5 + $0x584] sm:$0xf]  ;;  %v12090_v17 = vor.u32 %v14508_v11, %v12087_v13 }
 0x58c   : > { %v14800_v19 = vld [vmem:[#allocation5 + $0xa9c] sm:$0xf0]  ;;  %v14612_v52 = vld [vmem:[#allocation5 + $0x4c4] sm:$0xf] }
 0x58d   : > { %v13493_v18 = vld [vmem:[#allocation5 + $0xc80] sm:$0xf]  ;;  %v13238_v51 = vor.u32 %v14800_v19, %v13237_v27  ;;  %8659 = vmatpush.bf16.msrb.mxu0 %v12982_v53  ;;  %v12343_v27 = vld [vmem:[#allocation5 + $0x3a0] sm:$0xf0] }
 0x58e   : > { %v14864_v61 = vld [vmem:[#allocation5 + $0xc9c] sm:$0xf0]  ;;  %v12599_v19 = vld [vmem:[#allocation5 + $0x5a0] sm:$0xf0]  ;;  %v12346_v33 = vor.u32 %v14572_v46, %v12343_v27 }
 0x58f   : > { %v13749_v3 = vld [vmem:[#allocation5 + $0xe80] sm:$0xf]  ;;  %v13494_v57 = vor.u32 %v14864_v61, %v13493_v18  ;;  %8672 = vmatpush.bf16.msrb.mxu1 %v13238_v51  ;;  %v16560_v18 = vpack.c.bf16 %v5515_v21, %v5515_v21  ;;  %v16565_v61 = vpack.c.bf16 %v5518_v50, %v5518_v50  ;;  %v12602_v21 = vor.u32 %v14636_v23, %v12599_v19  ;;  %v14500_v53 = vld [vmem:[#allocation5 + $0x144] sm:$0xf] }
 0x590   : > { %v14928_v16 = vld [vmem:[#allocation5 + $0xe9c] sm:$0xf0]  ;;  %v12055_v51 = vld [vmem:[#allocation5 + $0x160] sm:$0xf0] }
 0x591   : > { %v12949_v6 = vld [vmem:[#allocation5 + $0x840] sm:$0xf]  ;;  %v13750_v45 = vor.u32 %v14928_v16, %v13749_v3  ;;  %8685 = vmatpush.bf16.msrb.mxu2 %v13494_v57  ;;  %v14700_v3 = vld [vmem:[#allocation5 + $0x784] sm:$0xf]  ;;  %v16570_v16 = vpack.c.bf16 %v5516_v34, %v5516_v34 }
 0x592   : > { %v14728_v10 = vld [vmem:[#allocation5 + $0x85c] sm:$0xf0]  ;;  %v12858_v50 = vor.u32 %v14700_v3, %v12855_v4  ;;  %v12311_v57 = vld [vmem:[#allocation5 + $0x360] sm:$0xf0] }
 0x593   : > { %v13205_v48 = vld [vmem:[#allocation5 + $0xa40] sm:$0xf]  ;;  %v12950_v5 = vor.u32 %v14728_v10, %v12949_v6  ;;  %8698 = vmatpush.bf16.msrb.mxu3 %v13750_v45  ;;  %v14628_v6 = vld [vmem:[#allocation5 + $0x544] sm:$0xf]  ;;  %v12314_v45 = vor.u32 %v14564_v32, %v12311_v57 }
 0x594   : > { %v14792_v37 = vld [vmem:[#allocation5 + $0xa5c] sm:$0xf0]  ;;  %v12567_v10 = vld [vmem:[#allocation5 + $0x560] sm:$0xf0] }
 0x595   : > { %v13461_v8 = vld [vmem:[#allocation5 + $0xc40] sm:$0xf]  ;;  %v13206_v41 = vor.u32 %v14792_v37, %v13205_v48  ;;  %8660 = vmatpush.bf16.msrb.mxu0 %v12950_v5  ;;  %v12823_v34 = vld [vmem:[#allocation5 + $0x760] sm:$0xf0]  ;;  %v12058_v48 = vor.u32 %v14500_v53, %v12055_v51  ;;  %v12570_v37 = vor.u32 %v14628_v6, %v12567_v10 }
 0x596   : > { %v14856_v31 = vld [vmem:[#allocation5 + $0xc5c] sm:$0xf0]  ;;  %v12279_v5 = vld [vmem:[#allocation5 + $0x320] sm:$0xf0] }
 0x597   : > { %v13717_v30 = vld [vmem:[#allocation5 + $0xe40] sm:$0xf]  ;;  %v13462_v59 = vor.u32 %v14856_v31, %v13461_v8  ;;  %8673 = vmatpush.bf16.msrb.mxu1 %v13206_v41  ;;  %v14492_v8 = vld [vmem:[#allocation5 + $0x104] sm:$0xf] }
 0x598   : > { %v14920_v1 = vld [vmem:[#allocation5 + $0xe5c] sm:$0xf0]  ;;  %v12023_v31 = vld [vmem:[#allocation5 + $0x120] sm:$0xf0] }
 0x599   : > { %v12917_v9 = vld [vmem:[#allocation5 + $0x800] sm:$0xf]  ;;  %v13718_v49 = vor.u32 %v14920_v1, %v13717_v30  ;;  %8686 = vmatpush.bf16.msrb.mxu2 %v13462_v59  ;;  %v14556_v30 = vld [vmem:[#allocation5 + $0x304] sm:$0xf]  ;;  %v12826_v1 = vor.u32 %v14692_v39, %v12823_v34 }
 0x59a   : > { %v14720_v24 = vld [vmem:[#allocation5 + $0x81c] sm:$0xf0]  ;;  %v14684_v41 = vld [vmem:[#allocation5 + $0x704] sm:$0xf] }
 0x59b   : > { %v13173_v35 = vld [vmem:[#allocation5 + $0xa00] sm:$0xf]  ;;  %v12918_v43 = vor.u32 %v14720_v24, %v12917_v9  ;;  %8699 = vmatpush.bf16.msrb.mxu3 %v13718_v49  ;;  %v14620_v9 = vld [vmem:[#allocation5 + $0x504] sm:$0xf] }
 0x59c   : > { %v14784_v7 = vld [vmem:[#allocation5 + $0xa1c] sm:$0xf0]  ;;  %v12535_v24 = vld [vmem:[#allocation5 + $0x520] sm:$0xf0] }
 0x59d   : > { %v13429_v63 = vld [vmem:[#allocation5 + $0xc00] sm:$0xf]  ;;  %v13174_v60 = vor.u32 %v14784_v7, %v13173_v35  ;;  %8661 = vmatpush.bf16.msrb.mxu0 %v12918_v43  ;;  %v12791_v59 = vld [vmem:[#allocation5 + $0x720] sm:$0xf0]  ;;  %v12026_v35 = vor.u32 %v14492_v8, %v12023_v31  ;;  %v12282_v7 = vor.u32 %v14556_v30, %v12279_v5 }
 0x59e   : > { %v14848_v29 = vld [vmem:[#allocation5 + $0xc1c] sm:$0xf0]  ;;  %v14484_v49 = vld [vmem:[#allocation5 + $0xc4] sm:$0xf] }
 0x59f   : > { %v13685_v36 = vld [vmem:[#allocation5 + $0xe00] sm:$0xf]  ;;  %v13430_v2 = vor.u32 %v14848_v29, %v13429_v63  ;;  %8674 = vmatpush.bf16.msrb.mxu1 %v13174_v60  ;;  %v12538_v63 = vor.u32 %v14620_v9, %v12535_v24  ;;  %v11991_v29 = vld [vmem:[#allocation5 + $0xe0] sm:$0xf0] }
 0x5a0   : > { %v14912_v55 = vld [vmem:[#allocation5 + $0xe1c] sm:$0xf0]  ;;  %8662 = vmatmul.bf16.vlgmr.msrb.gmra.mxu0 %v16560_v18  ;;  %v12503_v15 = vld [vmem:[#allocation5 + $0x4e0] sm:$0xf0]  ;;  %v11994_v25 = vor.u32 %v14484_v49, %v11991_v29 }
 0x5a1   : > { %v13686_v12 = vor.u32 %v14912_v55, %v13685_v36  ;;  %8687 = vmatpush.bf16.msrb.mxu2 %v13430_v2  ;;  %8706 = vmatpush.bf16.msra.mxu0 %v12122_v62  ;;  %v14548_v36 = vld [vmem:[#allocation5 + $0x2c4] sm:$0xf]  ;;  %v12794_v55 = vor.u32 %v14684_v41, %v12791_v59  ;;  %v12506_v60 = vor.u32 %v14612_v52, %v12503_v15 }
 0x5a2   : > { %8675 = vmatmul.bf16.vlgmr.msrb.gmra.mxu1 %v16570_v16  ;;  %v14676_v43 = vld [vmem:[#allocation5 + $0x6c4] sm:$0xf]  ;;  %v12250_v42 = vor.u32 %v14548_v36, %v12247_v44 }
 0x5a3   : > { %8700 = vmatpush.bf16.msrb.mxu3 %v13686_v12  ;;  %8719 = vmatpush.bf16.msra.mxu1 %v12378_v20  ;;  %v12759_v0 = vld [vmem:[#allocation5 + $0x6e0] sm:$0xf0] }
 0x5a4   : > { %8688 = vmatmul.bf16.vlgmr.msrb.gmra.mxu2 %v16555_v54  ;;  %v14476_v2 = vld [vmem:[#allocation5 + $0x84] sm:$0xf]  ;;  %v12762_v12 = vor.u32 %v14676_v43, %v12759_v0 }
 0x5a5   : > { %8732 = vmatpush.bf16.msra.mxu2 %v12634_v40  ;;  %8707 = vmatpush.bf16.msra.mxu0 %v12090_v17  ;;  %v11959_v26 = vld [vmem:[#allocation5 + $0xa0] sm:$0xf0] }
 0x5a6   : > { %8701 = vmatmul.bf16.vlgmr.msrb.gmra.mxu3 %v16565_v61  ;;  %v14540_v28 = vld [vmem:[#allocation5 + $0x284] sm:$0xf]  ;;  %v11962_v46 = vor.u32 %v14476_v2, %v11959_v26 }
 0x5a7   : > { %8745 = vmatpush.bf16.msra.mxu3 %v12890_v22  ;;  %8720 = vmatpush.bf16.msra.mxu1 %v12346_v33  ;;  %v12215_v62 = vld [vmem:[#allocation5 + $0x2a0] sm:$0xf0] }
 0x5a8   : > { %v14604_v20 = vld [vmem:[#allocation5 + $0x484] sm:$0xf]  ;;  %v12218_v22 = vor.u32 %v14540_v28, %v12215_v62 }
 0x5a9   : > { %8733 = vmatpush.bf16.msra.mxu2 %v12602_v21  ;;  %8708 = vmatpush.bf16.msra.mxu0 %v12058_v48  ;;  %v12471_v40 = vld [vmem:[#allocation5 + $0x4a0] sm:$0xf0] }
 0x5aa   : > { %v14668_v11 = vld [vmem:[#allocation5 + $0x684] sm:$0xf]  ;;  %v12474_v27 = vor.u32 %v14604_v20, %v12471_v40 }
 0x5ab   : > { %8746 = vmatpush.bf16.msra.mxu3 %v12858_v50  ;;  %8721 = vmatpush.bf16.msra.mxu1 %v12314_v45  ;;  %v12727_v13 = vld [vmem:[#allocation5 + $0x6a0] sm:$0xf0] }
 0x5ac   : > { %v14468_v23 = vld [vmem:[#allocation5 + $0x44] sm:$0xf]  ;;  %v12730_v4 = vor.u32 %v14668_v11, %v12727_v13 }
 0x5ad   : > { %8734 = vmatpush.bf16.msra.mxu2 %v12570_v37  ;;  %8709 = vmatpush.bf16.msra.mxu0 %v12026_v35  ;;  %v11927_v19 = vld [vmem:[#allocation5 + $0x60] sm:$0xf0] }
 0x5ae   : > { %v14532_v3 = vld [vmem:[#allocation5 + $0x244] sm:$0xf]  ;;  %v11930_v32 = vor.u32 %v14468_v23, %v11927_v19 }
 0x5af   : > { %8747 = vmatpush.bf16.msra.mxu3 %v12826_v1  ;;  %8722 = vmatpush.bf16.msra.mxu1 %v12282_v7  ;;  %v12183_v17 = vld [vmem:[#allocation5 + $0x260] sm:$0xf0] }
 0x5b0   : > { %v14596_v33 = vld [vmem:[#allocation5 + $0x444] sm:$0xf]  ;;  %v12186_v6 = vor.u32 %v14532_v3, %v12183_v17 }
 0x5b1   : > { %8735 = vmatpush.bf16.msra.mxu2 %v12538_v63  ;;  %8710 = vmatpush.bf16.msra.mxu0 %v11994_v25  ;;  %v12439_v21 = vld [vmem:[#allocation5 + $0x460] sm:$0xf0] }
 0x5b2   : > { %v14660_v53 = vld [vmem:[#allocation5 + $0x644] sm:$0xf]  ;;  %v12442_v10 = vor.u32 %v14596_v33, %v12439_v21 }
 0x5b3   : > { %8748 = vmatpush.bf16.msra.mxu3 %v12794_v55  ;;  %8723 = vmatpush.bf16.msra.mxu1 %v12250_v42  ;;  %v12695_v51 = vld [vmem:[#allocation5 + $0x660] sm:$0xf0] }
 0x5b4   : > { %v14460_v50 = vld [vmem:[#allocation5 + $0x4] sm:$0xf]  ;;  %v12698_v45 = vor.u32 %v14660_v53, %v12695_v51 }
 0x5b5   : > { %8736 = vmatpush.bf16.msra.mxu2 %v12506_v60  ;;  %8711 = vmatpush.bf16.msra.mxu0 %v11962_v46  ;;  %v11895_v57 = vld [vmem:[#allocation5 + $0x20] sm:$0xf0] }
 0x5b6   : > { %v14524_v39 = vld [vmem:[#allocation5 + $0x204] sm:$0xf]  ;;  %v11898_v9 = vor.u32 %v14460_v50, %v11895_v57 }
 0x5b7   : > { %8749 = vmatpush.bf16.msra.mxu3 %v12762_v12  ;;  %8724 = vmatpush.bf16.msra.mxu1 %v12218_v22  ;;  %v12151_v34 = vld [vmem:[#allocation5 + $0x220] sm:$0xf0] }
 0x5b8   : > { %v14588_v48 = vld [vmem:[#allocation5 + $0x404] sm:$0xf]  ;;  %v12154_v35 = vor.u32 %v14524_v39, %v12151_v34 }
 0x5b9   : > { %8737 = vmatpush.bf16.msra.mxu2 %v12474_v27  ;;  %v12407_v37 = vld [vmem:[#allocation5 + $0x420] sm:$0xf0]  ;;  %8712 = vmatpush.bf16.msra.mxu0 %v11930_v32 }
 0x5ba   : > { %v14652_v8 = vld [vmem:[#allocation5 + $0x604] sm:$0xf]  ;;  %v12410_v7 = vor.u32 %v14588_v48, %v12407_v37 }
 0x5bb   : > { %8750 = vmatpush.bf16.msra.mxu3 %v12730_v4  ;;  %v12663_v31 = vld [vmem:[#allocation5 + $0x620] sm:$0xf0]  ;;  %8725 = vmatpush.bf16.msra.mxu1 %v12186_v6 }
 0x5bc   : > { %v14772_v30 = vld [vmem:[#allocation5 + $0x9c4] sm:$0xf]  ;;  %v12666_v29 = vor.u32 %v14652_v8, %v12663_v31 }
 0x5bd   : > { %v13143_v1 = vld [vmem:[#allocation5 + $0x9e0] sm:$0xf0]  ;;  %8738 = vmatpush.bf16.msra.mxu2 %v12442_v10  ;;  %8713 = vmatpush.bf16.msra.mxu0 %v11898_v9 }
 0x5be   : > { %v14836_v5 = vld [vmem:[#allocation5 + $0xbc4] sm:$0xf]  ;;  %v13146_v36 = vor.u32 %v14772_v30, %v13143_v1 }
 0x5bf   : > { %v13399_v24 = vld [vmem:[#allocation5 + $0xbe0] sm:$0xf0]  ;;  %8751 = vmatpush.bf16.msra.mxu3 %v12698_v45  ;;  %8726 = vmatpush.bf16.msra.mxu1 %v12154_v35 }
 0x5c0   : > { %v14900_v41 = vld [vmem:[#allocation5 + $0xdc4] sm:$0xf]  ;;  %v13402_v55 = vor.u32 %v14836_v5, %v13399_v24  ;;  %8714 = vmatmul.bf16.vlgmr.msra.gmra.mxu0 %v16536_v14 }
 0x5c1   : > { %v13655_v59 = vld [vmem:[#allocation5 + $0xde0] sm:$0xf0]  ;;  %8739 = vmatpush.bf16.msra.mxu2 %v12410_v7  ;;  %8758 = vmatpush.bf16.msrb.mxu0 %v13146_v36 }
 0x5c2   : > { %v14964_v63 = vld [vmem:[#allocation5 + $0xfc4] sm:$0xf]  ;;  %v13658_v44 = vor.u32 %v14900_v41, %v13655_v59  ;;  %8727 = vmatmul.bf16.vlgmr.msra.gmra.mxu1 %v16546_v56 }
 0x5c3   : > { %v13911_v49 = vld [vmem:[#allocation5 + $0xfe0] sm:$0xf0]  ;;  %8752 = vmatpush.bf16.msra.mxu3 %v12666_v29  ;;  %8771 = vmatpush.bf16.msrb.mxu1 %v13402_v55 }
 0x5c4   : > { %v14764_v52 = vld [vmem:[#allocation5 + $0x984] sm:$0xf]  ;;  %v13914_v0 = vor.u32 %v14964_v63, %v13911_v49  ;;  %8740 = vmatmul.bf16.vlgmr.msra.gmra.mxu2 %v16531_v38 }
 0x5c5   : > { %v13111_v15 = vld [vmem:[#allocation5 + $0x9a0] sm:$0xf0]  ;;  %8784 = vmatpush.bf16.msrb.mxu2 %v13658_v44 }
 0x5c6   : > { %v14828_v43 = vld [vmem:[#allocation5 + $0xb84] sm:$0xf]  ;;  %v13114_v28 = vor.u32 %v14764_v52, %v13111_v15  ;;  %8753 = vmatmul.bf16.vlgmr.msra.gmra.mxu3 %v16541_v58 }
 0x5c7   : > { %v13367_v25 = vld [vmem:[#allocation5 + $0xba0] sm:$0xf0]  ;;  %8797 = vmatpush.bf16.msrb.mxu3 %v13914_v0 }
 0x5c8   : > { %v14892_v42 = vld [vmem:[#allocation5 + $0xd84] sm:$0xf]  ;;  %v13370_v12 = vor.u32 %v14828_v43, %v13367_v25  ;;  %8759 = vmatpush.bf16.msrb.mxu0 %v13114_v28 }
 0x5c9   : > { %v13623_v60 = vld [vmem:[#allocation5 + $0xda0] sm:$0xf0] }
 0x5ca   : > { %v14956_v2 = vld [vmem:[#allocation5 + $0xf84] sm:$0xf]  ;;  %v13626_v62 = vor.u32 %v14892_v42, %v13623_v60  ;;  %8772 = vmatpush.bf16.msrb.mxu1 %v13370_v12 }
 0x5cb   : > { %v13879_v26 = vld [vmem:[#allocation5 + $0xfa0] sm:$0xf0] }
 0x5cc   : > { %v14756_v20 = vld [vmem:[#allocation5 + $0x944] sm:$0xf]  ;;  %v13882_v13 = vor.u32 %v14956_v2, %v13879_v26  ;;  %8785 = vmatpush.bf16.msrb.mxu2 %v13626_v62 }
 0x5cd   : > { %v13079_v40 = vld [vmem:[#allocation5 + $0x960] sm:$0xf0] }
 0x5ce   : > { %v14820_v11 = vld [vmem:[#allocation5 + $0xb44] sm:$0xf]  ;;  %v13082_v3 = vor.u32 %v14756_v20, %v13079_v40  ;;  %8798 = vmatpush.bf16.msrb.mxu3 %v13882_v13 }
 0x5cf   : > { %v13335_v46 = vld [vmem:[#allocation5 + $0xb60] sm:$0xf0] }
 0x5d0   : > { %v14884_v22 = vld [vmem:[#allocation5 + $0xd44] sm:$0xf]  ;;  %v13338_v4 = vor.u32 %v14820_v11, %v13335_v46  ;;  %8760 = vmatpush.bf16.msrb.mxu0 %v13082_v3 }
 0x5d1   : > { %v13591_v27 = vld [vmem:[#allocation5 + $0xd60] sm:$0xf0] }
 0x5d2   : > { %v14948_v23 = vld [vmem:[#allocation5 + $0xf44] sm:$0xf]  ;;  %v13594_v17 = vor.u32 %v14884_v22, %v13591_v27  ;;  %8773 = vmatpush.bf16.msrb.mxu1 %v13338_v4 }
 0x5d3   : > { %v13847_v19 = vld [vmem:[#allocation5 + $0xf60] sm:$0xf0] }
 0x5d4   : > { %v14748_v33 = vld [vmem:[#allocation5 + $0x904] sm:$0xf]  ;;  %v13850_v51 = vor.u32 %v14948_v23, %v13847_v19  ;;  %8786 = vmatpush.bf16.msrb.mxu2 %v13594_v17 }
 0x5d5   : > { %v13047_v21 = vld [vmem:[#allocation5 + $0x920] sm:$0xf0] }
 0x5d6   : > { %v14812_v53 = vld [vmem:[#allocation5 + $0xb04] sm:$0xf]  ;;  %v13050_v39 = vor.u32 %v14748_v33, %v13047_v21  ;;  %8799 = vmatpush.bf16.msrb.mxu3 %v13850_v51  ;;  %v14521_v51 = vld [vmem:[#allocation5 + $0x1e4] sm:$0xf0] }
 0x5d7   : > { %v13303_v32 = vld [vmem:[#allocation5 + $0xb20] sm:$0xf0] }
 0x5d8   : > { %v14876_v50 = vld [vmem:[#allocation5 + $0xd04] sm:$0xf]  ;;  %v13306_v34 = vor.u32 %v14812_v53, %v13303_v32  ;;  %8761 = vmatpush.bf16.msrb.mxu0 %v13050_v39  ;;  %v12125_v53 = vld [vmem:[#allocation5 + $0x1c8] sm:$0xf] }
 0x5d9   : > { %v13559_v57 = vld [vmem:[#allocation5 + $0xd20] sm:$0xf0]  ;;  %v12381_v32 = vld [vmem:[#allocation5 + $0x3c8] sm:$0xf] }
 0x5da   : > { %v14940_v6 = vld [vmem:[#allocation5 + $0xf04] sm:$0xf]  ;;  %v13562_v48 = vor.u32 %v14876_v50, %v13559_v57  ;;  %8774 = vmatpush.bf16.msrb.mxu1 %v13306_v34  ;;  %v14585_v57 = vld [vmem:[#allocation5 + $0x3e4] sm:$0xf0] }
 0x5db   : > { %v13815_v10 = vld [vmem:[#allocation5 + $0xf20] sm:$0xf0] }
 0x5dc   : > { %v14740_v45 = vld [vmem:[#allocation5 + $0x8c4] sm:$0xf]  ;;  %v13818_v31 = vor.u32 %v14940_v6, %v13815_v10  ;;  %8787 = vmatpush.bf16.msrb.mxu2 %v13562_v48  ;;  %v12637_v6 = vld [vmem:[#allocation5 + $0x5c8] sm:$0xf] }
 0x5dd   : > { %v13015_v37 = vld [vmem:[#allocation5 + $0x8e0] sm:$0xf0]  ;;  %v14649_v10 = vld [vmem:[#allocation5 + $0x5e4] sm:$0xf0] }
 0x5de   : > { %v14804_v8 = vld [vmem:[#allocation5 + $0xac4] sm:$0xf]  ;;  %v13018_v41 = vor.u32 %v14740_v45, %v13015_v37  ;;  %8800 = vmatpush.bf16.msrb.mxu3 %v13818_v31  ;;  %v12893_v48 = vld [vmem:[#allocation5 + $0x7c8] sm:$0xf]  ;;  %v12382_v31 = vor.u32 %v14585_v57, %v12381_v32 }
 0x5df   : > { %v13271_v30 = vld [vmem:[#allocation5 + $0xae0] sm:$0xf0]  ;;  %v14713_v45 = vld [vmem:[#allocation5 + $0x7e4] sm:$0xf0] }
 0x5e0   : > { %v14868_v1 = vld [vmem:[#allocation5 + $0xcc4] sm:$0xf]  ;;  %v13274_v59 = vor.u32 %v14804_v8, %v13271_v30  ;;  %8762 = vmatpush.bf16.msrb.mxu0 %v13018_v41  ;;  %v12126_v8 = vor.u32 %v14521_v51, %v12125_v53  ;;  %v12638_v30 = vor.u32 %v14649_v10, %v12637_v6  ;;  %v14577_v41 = vld [vmem:[#allocation5 + $0x3a4] sm:$0xf0] }
 0x5e1   : > { %v13527_v5 = vld [vmem:[#allocation5 + $0xce0] sm:$0xf0]  ;;  %v14553_v53 = vld [vmem:[#allocation5 + $0x2e4] sm:$0xf0] }
 0x5e2   : > { %v14932_v9 = vld [vmem:[#allocation5 + $0xec4] sm:$0xf]  ;;  %v13530_v35 = vor.u32 %v14868_v1, %v13527_v5  ;;  %8775 = vmatpush.bf16.msrb.mxu1 %v13274_v59  ;;  %v12093_v1 = vld [vmem:[#allocation5 + $0x188] sm:$0xf] }
 0x5e3   : > { %v13783_v24 = vld [vmem:[#allocation5 + $0xee0] sm:$0xf0]  ;;  %v14513_v5 = vld [vmem:[#allocation5 + $0x1a4] sm:$0xf0] }
 0x5e4   : > { %v14732_v7 = vld [vmem:[#allocation5 + $0x884] sm:$0xf]  ;;  %v13786_v29 = vor.u32 %v14932_v9, %v13783_v24  ;;  %8788 = vmatpush.bf16.msrb.mxu2 %v13530_v35  ;;  %v12349_v9 = vld [vmem:[#allocation5 + $0x388] sm:$0xf]  ;;  %v12894_v24 = vor.u32 %v14713_v45, %v12893_v48 }
 0x5e5   : > { %v12983_v63 = vld [vmem:[#allocation5 + $0x8a0] sm:$0xf0]  ;;  %v12605_v59 = vld [vmem:[#allocation5 + $0x588] sm:$0xf] }
 0x5e6   : > { %v14796_v49 = vld [vmem:[#allocation5 + $0xa84] sm:$0xf]  ;;  %v12986_v43 = vor.u32 %v14732_v7, %v12983_v63  ;;  %8801 = vmatpush.bf16.msrb.mxu3 %v13786_v29  ;;  %v14641_v35 = vld [vmem:[#allocation5 + $0x5a4] sm:$0xf0]  ;;  %v12350_v29 = vor.u32 %v14577_v41, %v12349_v9 }
 0x5e7   : > { %v13239_v36 = vld [vmem:[#allocation5 + $0xaa0] sm:$0xf0]  ;;  %v12861_v7 = vld [vmem:[#allocation5 + $0x788] sm:$0xf] }
 0x5e8   : > { %v14860_v55 = vld [vmem:[#allocation5 + $0xc84] sm:$0xf]  ;;  %v13242_v0 = vor.u32 %v14796_v49, %v13239_v36  ;;  %8763 = vmatpush.bf16.msrb.mxu0 %v12986_v43  ;;  %v14705_v63 = vld [vmem:[#allocation5 + $0x7a4] sm:$0xf0]  ;;  %v12094_v49 = vor.u32 %v14513_v5, %v12093_v1  ;;  %v12606_v36 = vor.u32 %v14641_v35, %v12605_v59 }
 0x5e9   : > { %v13495_v44 = vld [vmem:[#allocation5 + $0xca0] sm:$0xf0]  ;;  %v14569_v43 = vld [vmem:[#allocation5 + $0x364] sm:$0xf0] }
 0x5ea   : > { %v14924_v52 = vld [vmem:[#allocation5 + $0xe84] sm:$0xf]  ;;  %v13498_v25 = vor.u32 %v14860_v55, %v13495_v44  ;;  %8776 = vmatpush.bf16.msrb.mxu1 %v13242_v0  ;;  %v12061_v55 = vld [vmem:[#allocation5 + $0x148] sm:$0xf] }
 0x5eb   : > { %v13751_v15 = vld [vmem:[#allocation5 + $0xea0] sm:$0xf0]  ;;  %v14505_v44 = vld [vmem:[#allocation5 + $0x164] sm:$0xf0] }
 0x5ec   : > { %v14724_v42 = vld [vmem:[#allocation5 + $0x844] sm:$0xf]  ;;  %v13754_v26 = vor.u32 %v14924_v52, %v13751_v15  ;;  %8789 = vmatpush.bf16.msrb.mxu2 %v13498_v25  ;;  %v12317_v52 = vld [vmem:[#allocation5 + $0x348] sm:$0xf]  ;;  %v12862_v15 = vor.u32 %v14705_v63, %v12861_v7 }
 0x5ed   : > { %v12951_v60 = vld [vmem:[#allocation5 + $0x860] sm:$0xf0]  ;;  %v12573_v0 = vld [vmem:[#allocation5 + $0x548] sm:$0xf] }
 0x5ee   : > { %v14788_v2 = vld [vmem:[#allocation5 + $0xa44] sm:$0xf]  ;;  %v12954_v11 = vor.u32 %v14724_v42, %v12951_v60  ;;  %8802 = vmatpush.bf16.msrb.mxu3 %v13754_v26  ;;  %v14633_v25 = vld [vmem:[#allocation5 + $0x564] sm:$0xf0]  ;;  %v12318_v26 = vor.u32 %v14569_v43, %v12317_v52 }
 0x5ef   : > { %v13207_v28 = vld [vmem:[#allocation5 + $0xa60] sm:$0xf0]  ;;  %v12829_v42 = vld [vmem:[#allocation5 + $0x748] sm:$0xf] }
 0x5f0   : > { %v14852_v12 = vld [vmem:[#allocation5 + $0xc44] sm:$0xf]  ;;  %v13210_v22 = vor.u32 %v14788_v2, %v13207_v28  ;;  %8764 = vmatpush.bf16.msrb.mxu0 %v12954_v11  ;;  %v14697_v60 = vld [vmem:[#allocation5 + $0x764] sm:$0xf0]  ;;  %v12062_v2 = vor.u32 %v14505_v44, %v12061_v55  ;;  %v12574_v28 = vor.u32 %v14633_v25, %v12573_v0 }
 0x5f1   : > { %v13463_v62 = vld [vmem:[#allocation5 + $0xc60] sm:$0xf0]  ;;  %v14561_v11 = vld [vmem:[#allocation5 + $0x324] sm:$0xf0] }
 0x5f2   : > { %v14916_v20 = vld [vmem:[#allocation5 + $0xe44] sm:$0xf]  ;;  %v13466_v27 = vor.u32 %v14852_v12, %v13463_v62  ;;  %8777 = vmatpush.bf16.msrb.mxu1 %v13210_v22  ;;  %v12029_v12 = vld [vmem:[#allocation5 + $0x108] sm:$0xf] }
 0x5f3   : > { %v13719_v40 = vld [vmem:[#allocation5 + $0xe60] sm:$0xf0]  ;;  %v14497_v62 = vld [vmem:[#allocation5 + $0x124] sm:$0xf0] }
 0x5f4   : > { %v14716_v13 = vld [vmem:[#allocation5 + $0x804] sm:$0xf]  ;;  %v13722_v4 = vor.u32 %v14916_v20, %v13719_v40  ;;  %8790 = vmatpush.bf16.msrb.mxu2 %v13466_v27  ;;  %v12285_v20 = vld [vmem:[#allocation5 + $0x308] sm:$0xf]  ;;  %v12830_v40 = vor.u32 %v14697_v60, %v12829_v42 }
 0x5f5   : > { %v12919_v46 = vld [vmem:[#allocation5 + $0x820] sm:$0xf0]  ;;  %v12797_v22 = vld [vmem:[#allocation5 + $0x708] sm:$0xf] }
 0x5f6   : > { %v14780_v23 = vld [vmem:[#allocation5 + $0xa04] sm:$0xf]  ;;  %v12922_v50 = vor.u32 %v14716_v13, %v12919_v46  ;;  %8803 = vmatpush.bf16.msrb.mxu3 %v13722_v4  ;;  %v12541_v13 = vld [vmem:[#allocation5 + $0x508] sm:$0xf] }
 0x5f7   : > { %v13175_v19 = vld [vmem:[#allocation5 + $0xa20] sm:$0xf0]  ;;  %v14625_v46 = vld [vmem:[#allocation5 + $0x524] sm:$0xf0] }
 0x5f8   : > { %v14844_v3 = vld [vmem:[#allocation5 + $0xc04] sm:$0xf]  ;;  %v13178_v39 = vor.u32 %v14780_v23, %v13175_v19  ;;  %8765 = vmatpush.bf16.msrb.mxu0 %v12922_v50  ;;  %v14689_v27 = vld [vmem:[#allocation5 + $0x724] sm:$0xf0]  ;;  %v12030_v23 = vor.u32 %v14497_v62, %v12029_v12  ;;  %v12286_v19 = vor.u32 %v14561_v11, %v12285_v20 }
 0x5f9   : > { %v13431_v17 = vld [vmem:[#allocation5 + $0xc20] sm:$0xf0]  ;;  %v11997_v4 = vld [vmem:[#allocation5 + $0xc8] sm:$0xf] }
 0x5fa   : > { %v14908_v33 = vld [vmem:[#allocation5 + $0xe04] sm:$0xf]  ;;  %v13434_v34 = vor.u32 %v14844_v3, %v13431_v17  ;;  %8778 = vmatpush.bf16.msrb.mxu1 %v13178_v39  ;;  %v12542_v3 = vor.u32 %v14625_v46, %v12541_v13  ;;  %v14489_v17 = vld [vmem:[#allocation5 + $0xe4] sm:$0xf0] }
 0x5fb   : > { %v13687_v21 = vld [vmem:[#allocation5 + $0xe20] sm:$0xf0]  ;;  %8766 = vmatmul.bf16.vlgmr.msrb.gmra.mxu0 %v16560_v18  ;;  %v12509_v51 = vld [vmem:[#allocation5 + $0x4c8] sm:$0xf]  ;;  %v11998_v6 = vor.u32 %v14489_v17, %v11997_v4 }
 0x5fc   : > { %v13690_v37 = vor.u32 %v14908_v33, %v13687_v21  ;;  %8791 = vmatpush.bf16.msrb.mxu2 %v13434_v34  ;;  %8810 = vmatpush.bf16.msra.mxu0 %v12126_v8  ;;  %v12253_v33 = vld [vmem:[#allocation5 + $0x2c8] sm:$0xf]  ;;  %v12798_v21 = vor.u32 %v14689_v27, %v12797_v22 }
 0x5fd   : > { %8779 = vmatmul.bf16.vlgmr.msrb.gmra.mxu1 %v16570_v16  ;;  %v14617_v32 = vld [vmem:[#allocation5 + $0x4e4] sm:$0xf0]  ;;  %v12254_v10 = vor.u32 %v14553_v53, %v12253_v33 }
 0x5fe   : > { %8804 = vmatpush.bf16.msrb.mxu3 %v13690_v37  ;;  %8823 = vmatpush.bf16.msra.mxu1 %v12382_v31  ;;  %v12765_v50 = vld [vmem:[#allocation5 + $0x6c8] sm:$0xf]  ;;  %v12510_v39 = vor.u32 %v14617_v32, %v12509_v51 }
 0x5ff   : > { %8792 = vmatmul.bf16.vlgmr.msrb.gmra.mxu2 %v16555_v54  ;;  %v14681_v57 = vld [vmem:[#allocation5 + $0x6e4] sm:$0xf0] }
 0x600   : > { %8836 = vmatpush.bf16.msra.mxu2 %v12638_v30  ;;  %8811 = vmatpush.bf16.msra.mxu0 %v12094_v49  ;;  %v11965_v34 = vld [vmem:[#allocation5 + $0x88] sm:$0xf]  ;;  %v12766_v37 = vor.u32 %v14681_v57, %v12765_v50 }
 0x601   : > { %8805 = vmatmul.bf16.vlgmr.msrb.gmra.mxu3 %v16565_v61  ;;  %v14481_v48 = vld [vmem:[#allocation5 + $0xa4] sm:$0xf0] }
 0x602   : > { %8849 = vmatpush.bf16.msra.mxu3 %v12894_v24  ;;  %8824 = vmatpush.bf16.msra.mxu1 %v12350_v29  ;;  %v12221_v45 = vld [vmem:[#allocation5 + $0x288] sm:$0xf]  ;;  %v11966_v9 = vor.u32 %v14481_v48, %v11965_v34 }
 0x603   : > { %v14545_v8 = vld [vmem:[#allocation5 + $0x2a4] sm:$0xf0] }
 0x604   : > { %8837 = vmatpush.bf16.msra.mxu2 %v12606_v36  ;;  %8812 = vmatpush.bf16.msra.mxu0 %v12062_v2  ;;  %v12477_v31 = vld [vmem:[#allocation5 + $0x488] sm:$0xf]  ;;  %v12222_v24 = vor.u32 %v14545_v8, %v12221_v45 }
 0x605   : > { %v14609_v30 = vld [vmem:[#allocation5 + $0x4a4] sm:$0xf0] }
 0x606   : > { %8850 = vmatpush.bf16.msra.mxu3 %v12862_v15  ;;  %8825 = vmatpush.bf16.msra.mxu1 %v12318_v26  ;;  %v12733_v1 = vld [vmem:[#allocation5 + $0x688] sm:$0xf]  ;;  %v12478_v41 = vor.u32 %v14609_v30, %v12477_v31 }
 0x607   : > { %v14673_v5 = vld [vmem:[#allocation5 + $0x6a4] sm:$0xf0] }
 0x608   : > { %8838 = vmatpush.bf16.msra.mxu2 %v12574_v28  ;;  %8813 = vmatpush.bf16.msra.mxu0 %v12030_v23  ;;  %v11933_v59 = vld [vmem:[#allocation5 + $0x48] sm:$0xf]  ;;  %v12734_v63 = vor.u32 %v14673_v5, %v12733_v1 }
 0x609   : > { %v14473_v35 = vld [vmem:[#allocation5 + $0x64] sm:$0xf0] }
 0x60a   : > { %8851 = vmatpush.bf16.msra.mxu3 %v12830_v40  ;;  %8826 = vmatpush.bf16.msra.mxu1 %v12286_v19  ;;  %v12189_v7 = vld [vmem:[#allocation5 + $0x248] sm:$0xf]  ;;  %v11934_v52 = vor.u32 %v14473_v35, %v11933_v59 }
 0x60b   : > { %v14537_v49 = vld [vmem:[#allocation5 + $0x264] sm:$0xf0] }
 0x60c   : > { %8839 = vmatpush.bf16.msra.mxu2 %v12542_v3  ;;  %8814 = vmatpush.bf16.msra.mxu0 %v11998_v6  ;;  %v12445_v29 = vld [vmem:[#allocation5 + $0x448] sm:$0xf]  ;;  %v12190_v0 = vor.u32 %v14537_v49, %v12189_v7 }
 0x60d   : > { %v14601_v36 = vld [vmem:[#allocation5 + $0x464] sm:$0xf0] }
 0x60e   : > { %8852 = vmatpush.bf16.msra.mxu3 %v12798_v21  ;;  %8827 = vmatpush.bf16.msra.mxu1 %v12254_v10  ;;  %v12701_v55 = vld [vmem:[#allocation5 + $0x648] sm:$0xf]  ;;  %v12446_v25 = vor.u32 %v14601_v36, %v12445_v29 }
 0x60f   : > { %v14665_v44 = vld [vmem:[#allocation5 + $0x664] sm:$0xf0] }
 0x610   : > { %8840 = vmatpush.bf16.msra.mxu2 %v12510_v39  ;;  %8815 = vmatpush.bf16.msra.mxu0 %v11966_v9  ;;  %v11901_v15 = vld [vmem:[#allocation5 + $0x8] sm:$0xf]  ;;  %v12702_v26 = vor.u32 %v14665_v44, %v12701_v55 }
 0x611   : > { %v14465_v43 = vld [vmem:[#allocation5 + $0x24] sm:$0xf0] }
 0x612   : > { %8853 = vmatpush.bf16.msra.mxu3 %v12766_v37  ;;  %8828 = vmatpush.bf16.msra.mxu1 %v12222_v24  ;;  %v12157_v42 = vld [vmem:[#allocation5 + $0x208] sm:$0xf]  ;;  %v11902_v13 = vor.u32 %v14465_v43, %v11901_v15 }
 0x613   : > { %v14529_v60 = vld [vmem:[#allocation5 + $0x224] sm:$0xf0] }
 0x614   : > { %8841 = vmatpush.bf16.msra.mxu2 %v12478_v41  ;;  %v12413_v2 = vld [vmem:[#allocation5 + $0x408] sm:$0xf]  ;;  %8816 = vmatpush.bf16.msra.mxu0 %v11934_v52  ;;  %v12158_v23 = vor.u32 %v14529_v60, %v12157_v42  ;;  %v8611_v60 = vpop.f32.mrf.mxu0 }
 0x615   : > { %v14593_v28 = vld [vmem:[#allocation5 + $0x424] sm:$0xf0] }
 0x616   : > { %8854 = vmatpush.bf16.msra.mxu3 %v12734_v63  ;;  %v12669_v12 = vld [vmem:[#allocation5 + $0x608] sm:$0xf]  ;;  %8829 = vmatpush.bf16.msra.mxu1 %v12190_v0  ;;  %v12414_v19 = vor.u32 %v14593_v28, %v12413_v2 }
 0x617   : > { %v14657_v62 = vld [vmem:[#allocation5 + $0x624] sm:$0xf0] }
 0x618   : > { %v13149_v20 = vld [vmem:[#allocation5 + $0x9c8] sm:$0xf]  ;;  %8842 = vmatpush.bf16.msra.mxu2 %v12446_v25  ;;  %v12670_v17 = vor.u32 %v14657_v62, %v12669_v12  ;;  %8817 = vmatpush.bf16.msra.mxu0 %v11902_v13 }
 0x619   : > { %v14777_v40 = vld [vmem:[#allocation5 + $0x9e4] sm:$0xf0] }
 0x61a   : > { %v13405_v11 = vld [vmem:[#allocation5 + $0xbc8] sm:$0xf]  ;;  %8855 = vmatpush.bf16.msra.mxu3 %v12702_v26  ;;  %v13150_v33 = vor.u32 %v14777_v40, %v13149_v20  ;;  %8830 = vmatpush.bf16.msra.mxu1 %v12158_v23  ;;  %v8624_v20 = vpop.f32.mrf.mxu1 }
 0x61b   : > { %v14841_v46 = vld [vmem:[#allocation5 + $0xbe4] sm:$0xf0]  ;;  %8818 = vmatmul.bf16.vlgmr.msra.gmra.mxu0 %v16536_v14 }
 0x61c   : > { %v13661_v22 = vld [vmem:[#allocation5 + $0xdc8] sm:$0xf]  ;;  %v13406_v21 = vor.u32 %v14841_v46, %v13405_v11  ;;  %8843 = vmatpush.bf16.msra.mxu2 %v12414_v19  ;;  %8862 = vmatpush.bf16.msrb.mxu0 %v13150_v33 }
 0x61d   : > { %v14905_v27 = vld [vmem:[#allocation5 + $0xde4] sm:$0xf0]  ;;  %8831 = vmatmul.bf16.vlgmr.msra.gmra.mxu1 %v16546_v56 }
 0x61e   : > { %v13917_v3 = vld [vmem:[#allocation5 + $0xfc8] sm:$0xf]  ;;  %v13662_v53 = vor.u32 %v14905_v27, %v13661_v22  ;;  %8856 = vmatpush.bf16.msra.mxu3 %v12670_v17  ;;  %8875 = vmatpush.bf16.msrb.mxu1 %v13406_v21  ;;  %v8625_v22 = vadd.f32 %v8624_v20, %v8611_v60 }
 0x61f   : > { %v14969_v4 = vld [vmem:[#allocation5 + $0xfe4] sm:$0xf0]  ;;  %8844 = vmatmul.bf16.vlgmr.msra.gmra.mxu2 %v16531_v38 }
 0x620   : > { %v13117_v51 = vld [vmem:[#allocation5 + $0x988] sm:$0xf]  ;;  %v13918_v57 = vor.u32 %v14969_v4, %v13917_v3  ;;  %8888 = vmatpush.bf16.msrb.mxu2 %v13662_v53  ;;  %v8637_v53 = vpop.f32.mrf.mxu2 }
 0x621   : > { %v14769_v32 = vld [vmem:[#allocation5 + $0x9a4] sm:$0xf0]  ;;  %8857 = vmatmul.bf16.vlgmr.msra.gmra.mxu3 %v16541_v58 }
 0x622   : > { %v13373_v50 = vld [vmem:[#allocation5 + $0xb88] sm:$0xf]  ;;  %v13118_v45 = vor.u32 %v14769_v32, %v13117_v51  ;;  %8901 = vmatpush.bf16.msrb.mxu3 %v13918_v57 }
 0x623   : > { %v14833_v6 = vld [vmem:[#allocation5 + $0xba4] sm:$0xf0] }
 0x624   : > { %v13629_v10 = vld [vmem:[#allocation5 + $0xd88] sm:$0xf]  ;;  %v13374_v37 = vor.u32 %v14833_v6, %v13373_v50  ;;  %8863 = vmatpush.bf16.msrb.mxu0 %v13118_v45  ;;  %v8638_v6 = vadd.f32 %v8637_v53, %v8625_v22  ;;  %v14573_v53 = vld [vmem:[#allocation5 + $0x38c] sm:$0xf] }
 0x625   : > { %v14897_v39 = vld [vmem:[#allocation5 + $0xda4] sm:$0xf0] }
 0x626   : > { %v13885_v34 = vld [vmem:[#allocation5 + $0xf88] sm:$0xf]  ;;  %v13630_v8 = vor.u32 %v14897_v39, %v13629_v10  ;;  %8876 = vmatpush.bf16.msrb.mxu1 %v13374_v37  ;;  %v8650_v10 = vpop.f32.mrf.mxu3  ;;  %v8613_v37 = vpop.f32.mrf.mxu0 }
 0x627   : > { %v14961_v48 = vld [vmem:[#allocation5 + $0xfa4] sm:$0xf0]  ;;  %v16588_v45 = vadd.f32 %v8650_v10, %v8638_v6  ;;  %v14701_v6 = vld [vmem:[#allocation5 + $0x78c] sm:$0xf] }
 0x628   : > { %v13085_v31 = vld [vmem:[#allocation5 + $0x948] sm:$0xf]  ;;  %v13886_v5 = vor.u32 %v14961_v48, %v13885_v34  ;;  %8889 = vmatpush.bf16.msrb.mxu2 %v13630_v8  ;;  %v12863_v10 = vld [vmem:[#allocation5 + $0x7a8] sm:$0xf0] }
 0x629   : > { %v14761_v30 = vld [vmem:[#allocation5 + $0x964] sm:$0xf0]  ;;  %v14501_v37 = vld [vmem:[#allocation5 + $0x14c] sm:$0xf] }
 0x62a   : > { %v13341_v1 = vld [vmem:[#allocation5 + $0xb48] sm:$0xf]  ;;  %v13086_v7 = vor.u32 %v14761_v30, %v13085_v31  ;;  %8902 = vmatpush.bf16.msrb.mxu3 %v13886_v5 }
 0x62b   : > { %v14825_v9 = vld [vmem:[#allocation5 + $0xb64] sm:$0xf0] }
 0x62c   : > { %v13597_v24 = vld [vmem:[#allocation5 + $0xd48] sm:$0xf]  ;;  %v13342_v63 = vor.u32 %v14825_v9, %v13341_v1  ;;  %8864 = vmatpush.bf16.msrb.mxu0 %v13086_v7  ;;  %v8626_v9 = vpop.f32.mrf.mxu1 }
 0x62d   : > { %v14889_v41 = vld [vmem:[#allocation5 + $0xd64] sm:$0xf0]  ;;  %v12575_v9 = vld [vmem:[#allocation5 + $0x568] sm:$0xf0] }
 0x62e   : > { %v13853_v59 = vld [vmem:[#allocation5 + $0xf48] sm:$0xf]  ;;  %v13598_v49 = vor.u32 %v14889_v41, %v13597_v24  ;;  %8877 = vmatpush.bf16.msrb.mxu1 %v13342_v63 }
 0x62f   : > { %v14953_v35 = vld [vmem:[#allocation5 + $0xf64] sm:$0xf0] }
 0x630   : > { %v13053_v29 = vld [vmem:[#allocation5 + $0x908] sm:$0xf]  ;;  %v13854_v44 = vor.u32 %v14953_v35, %v13853_v59  ;;  %8890 = vmatpush.bf16.msrb.mxu2 %v13598_v49 }
 0x631   : > { %v14753_v36 = vld [vmem:[#allocation5 + $0x924] sm:$0xf0] }
 0x632   : > { %v13309_v55 = vld [vmem:[#allocation5 + $0xb08] sm:$0xf]  ;;  %v13054_v42 = vor.u32 %v14753_v36, %v13053_v29  ;;  %8903 = vmatpush.bf16.msrb.mxu3 %v13854_v44 }
 0x633   : > { %v14817_v52 = vld [vmem:[#allocation5 + $0xb24] sm:$0xf0] }
 0x634   : > { %v13565_v15 = vld [vmem:[#allocation5 + $0xd08] sm:$0xf]  ;;  %v13310_v2 = vor.u32 %v14817_v52, %v13309_v55  ;;  %8865 = vmatpush.bf16.msrb.mxu0 %v13054_v42 }
 0x635   : > { %v14881_v43 = vld [vmem:[#allocation5 + $0xd24] sm:$0xf0] }
 0x636   : > { %v13821_v0 = vld [vmem:[#allocation5 + $0xf08] sm:$0xf]  ;;  %v13566_v26 = vor.u32 %v14881_v43, %v13565_v15  ;;  %8878 = vmatpush.bf16.msrb.mxu1 %v13310_v2 }
 0x637   : > { %v14945_v25 = vld [vmem:[#allocation5 + $0xf24] sm:$0xf0] }
 0x638   : > { %v13021_v28 = vld [vmem:[#allocation5 + $0x8c8] sm:$0xf]  ;;  %v13822_v40 = vor.u32 %v14945_v25, %v13821_v0  ;;  %8891 = vmatpush.bf16.msrb.mxu2 %v13566_v26  ;;  %v8639_v0 = vpop.f32.mrf.mxu2  ;;  %v8652_v26 = vpop.f32.mrf.mxu3 }
 0x639   : > { %v14745_v12 = vld [vmem:[#allocation5 + $0x8e4] sm:$0xf0]  ;;  %v8676_v26 = vpop.f32.mrf.mxu1 }
 0x63a   : > { %v13277_v62 = vld [vmem:[#allocation5 + $0xac8] sm:$0xf]  ;;  %v13022_v19 = vor.u32 %v14745_v12, %v13021_v28  ;;  %8904 = vmatpush.bf16.msrb.mxu3 %v13822_v40  ;;  %v14517_v28 = vld [vmem:[#allocation5 + $0x1cc] sm:$0xf] }
 0x63b   : > { %v14809_v11 = vld [vmem:[#allocation5 + $0xae4] sm:$0xf0]  ;;  %v12127_v12 = vld [vmem:[#allocation5 + $0x1e8] sm:$0xf0] }
 0x63c   : > { %v13533_v13 = vld [vmem:[#allocation5 + $0xcc8] sm:$0xf]  ;;  %v13278_v3 = vor.u32 %v14809_v11, %v13277_v62  ;;  %8866 = vmatpush.bf16.msrb.mxu0 %v13022_v19  ;;  %v14581_v62 = vld [vmem:[#allocation5 + $0x3cc] sm:$0xf] }
 0x63d   : > { %v14873_v46 = vld [vmem:[#allocation5 + $0xce4] sm:$0xf0]  ;;  %v12383_v40 = vld [vmem:[#allocation5 + $0x3e8] sm:$0xf0] }
 0x63e   : > { %v13789_v27 = vld [vmem:[#allocation5 + $0xec8] sm:$0xf]  ;;  %v13534_v4 = vor.u32 %v14873_v46, %v13533_v13  ;;  %8879 = vmatpush.bf16.msrb.mxu1 %v13278_v3  ;;  %v14645_v11 = vld [vmem:[#allocation5 + $0x5cc] sm:$0xf]  ;;  %v12130_v3 = vor.u32 %v14517_v28, %v12127_v12 }
 0x63f   : > { %v14937_v23 = vld [vmem:[#allocation5 + $0xee4] sm:$0xf0]  ;;  %v12639_v13 = vld [vmem:[#allocation5 + $0x5e8] sm:$0xf0] }
 0x640   : > { %v12989_v17 = vld [vmem:[#allocation5 + $0x888] sm:$0xf]  ;;  %v13790_v51 = vor.u32 %v14937_v23, %v13789_v27  ;;  %8892 = vmatpush.bf16.msrb.mxu2 %v13534_v4  ;;  %v14709_v27 = vld [vmem:[#allocation5 + $0x7cc] sm:$0xf]  ;;  %v12386_v4 = vor.u32 %v14581_v62, %v12383_v40 }
 0x641   : > { %v14737_v33 = vld [vmem:[#allocation5 + $0x8a4] sm:$0xf0]  ;;  %v12895_v23 = vld [vmem:[#allocation5 + $0x7e8] sm:$0xf0] }
 0x642   : > { %v13245_v21 = vld [vmem:[#allocation5 + $0xa88] sm:$0xf]  ;;  %v12990_v48 = vor.u32 %v14737_v33, %v12989_v17  ;;  %8905 = vmatpush.bf16.msrb.mxu3 %v13790_v51  ;;  %v12642_v17 = vor.u32 %v14645_v11, %v12639_v13  ;;  %v14509_v33 = vld [vmem:[#allocation5 + $0x18c] sm:$0xf]  ;;  %v12898_v51 = vor.u32 %v14709_v27, %v12895_v23 }
 0x643   : > { %v14801_v32 = vld [vmem:[#allocation5 + $0xaa4] sm:$0xf0]  ;;  %v14485_v28 = vld [vmem:[#allocation5 + $0xcc] sm:$0xf] }
 0x644   : > { %v13501_v50 = vld [vmem:[#allocation5 + $0xc88] sm:$0xf]  ;;  %v13246_v8 = vor.u32 %v14801_v32, %v13245_v21  ;;  %8867 = vmatpush.bf16.msrb.mxu0 %v12990_v48  ;;  %v12095_v21 = vld [vmem:[#allocation5 + $0x1a8] sm:$0xf0] }
 0x645   : > { %v14865_v57 = vld [vmem:[#allocation5 + $0xca4] sm:$0xf0]  ;;  %v12351_v32 = vld [vmem:[#allocation5 + $0x3a8] sm:$0xf0] }
 0x646   : > { %v13757_v39 = vld [vmem:[#allocation5 + $0xe88] sm:$0xf]  ;;  %v13502_v31 = vor.u32 %v14865_v57, %v13501_v50  ;;  %8880 = vmatpush.bf16.msrb.mxu1 %v13246_v8  ;;  %v14637_v50 = vld [vmem:[#allocation5 + $0x58c] sm:$0xf] }
 0x647   : > { %v14929_v34 = vld [vmem:[#allocation5 + $0xea4] sm:$0xf0]  ;;  %v12607_v57 = vld [vmem:[#allocation5 + $0x5a8] sm:$0xf0] }
 0x648   : > { %v12957_v30 = vld [vmem:[#allocation5 + $0x848] sm:$0xf]  ;;  %v13758_v24 = vor.u32 %v14929_v34, %v13757_v39  ;;  %8893 = vmatpush.bf16.msrb.mxu2 %v13502_v31  ;;  %v12098_v39 = vor.u32 %v14509_v33, %v12095_v21  ;;  %v12354_v34 = vor.u32 %v14573_v53, %v12351_v32  ;;  %v12610_v48 = vor.u32 %v14637_v50, %v12607_v57  ;;  %v12063_v8 = vld [vmem:[#allocation5 + $0x168] sm:$0xf0] }
 0x649   : > { %v14729_v1 = vld [vmem:[#allocation5 + $0x864] sm:$0xf0]  ;;  %v14565_v31 = vld [vmem:[#allocation5 + $0x34c] sm:$0xf] }
 0x64a   : > { %v13213_v5 = vld [vmem:[#allocation5 + $0xa48] sm:$0xf]  ;;  %v12958_v49 = vor.u32 %v14729_v1, %v12957_v30  ;;  %8906 = vmatpush.bf16.msrb.mxu3 %v13758_v24  ;;  %v12866_v30 = vor.u32 %v14701_v6, %v12863_v10  ;;  %v12319_v1 = vld [vmem:[#allocation5 + $0x368] sm:$0xf0] }
 0x64b   : > { %v14793_v41 = vld [vmem:[#allocation5 + $0xa64] sm:$0xf0]  ;;  %v14693_v24 = vld [vmem:[#allocation5 + $0x74c] sm:$0xf] }
 0x64c   : > { %v13469_v59 = vld [vmem:[#allocation5 + $0xc48] sm:$0xf]  ;;  %v13214_v55 = vor.u32 %v14793_v41, %v13213_v5  ;;  %8868 = vmatpush.bf16.msrb.mxu0 %v12958_v49  ;;  %v14629_v5 = vld [vmem:[#allocation5 + $0x54c] sm:$0xf] }
 0x64d   : > { %v14857_v35 = vld [vmem:[#allocation5 + $0xc64] sm:$0xf0]  ;;  %v12831_v41 = vld [vmem:[#allocation5 + $0x768] sm:$0xf0] }
 0x64e   : > { %v13725_v7 = vld [vmem:[#allocation5 + $0xe48] sm:$0xf]  ;;  %v13470_v44 = vor.u32 %v14857_v35, %v13469_v59  ;;  %8881 = vmatpush.bf16.msrb.mxu1 %v13214_v55  ;;  %v12066_v59 = vor.u32 %v14501_v37, %v12063_v8  ;;  %v12322_v35 = vor.u32 %v14565_v31, %v12319_v1  ;;  %v12031_v49 = vld [vmem:[#allocation5 + $0x128] sm:$0xf0] }
 0x64f   : > { %v14921_v63 = vld [vmem:[#allocation5 + $0xe64] sm:$0xf0]  ;;  %v12287_v55 = vld [vmem:[#allocation5 + $0x328] sm:$0xf0] }
 0x650   : > { %v12925_v29 = vld [vmem:[#allocation5 + $0x808] sm:$0xf]  ;;  %v13726_v25 = vor.u32 %v14921_v63, %v13725_v7  ;;  %8894 = vmatpush.bf16.msrb.mxu2 %v13470_v44  ;;  %v12578_v7 = vor.u32 %v14629_v5, %v12575_v9  ;;  %v14493_v63 = vld [vmem:[#allocation5 + $0x10c] sm:$0xf]  ;;  %v8678_v5 = vpop.f32.mrf.mxu1 }
 0x651   : > { %v14721_v36 = vld [vmem:[#allocation5 + $0x824] sm:$0xf0]  ;;  %v14621_v44 = vld [vmem:[#allocation5 + $0x50c] sm:$0xf]  ;;  %v12034_v0 = vor.u32 %v14493_v63, %v12031_v49 }
 0x652   : > { %v13181_v52 = vld [vmem:[#allocation5 + $0xa08] sm:$0xf]  ;;  %v12926_v20 = vor.u32 %v14721_v36, %v12925_v29  ;;  %8907 = vmatpush.bf16.msrb.mxu3 %v13726_v25  ;;  %v14557_v29 = vld [vmem:[#allocation5 + $0x30c] sm:$0xf]  ;;  %v12834_v36 = vor.u32 %v14693_v24, %v12831_v41  ;;  %v8663_v25 = vpop.f32.mrf.mxu0 }
 0x653   : > { %v14785_v15 = vld [vmem:[#allocation5 + $0xa24] sm:$0xf0]  ;;  %v11999_v12 = vld [vmem:[#allocation5 + $0xe8] sm:$0xf0] }
 0x654   : > { %v13437_v43 = vld [vmem:[#allocation5 + $0xc08] sm:$0xf]  ;;  %v13182_v46 = vor.u32 %v14785_v15, %v13181_v52  ;;  %8869 = vmatpush.bf16.msrb.mxu0 %v12926_v20  ;;  %v12543_v52 = vld [vmem:[#allocation5 + $0x528] sm:$0xf0]  ;;  %v12002_v23 = vor.u32 %v14485_v28, %v11999_v12 }
 0x655   : > { %v14849_v42 = vld [vmem:[#allocation5 + $0xc24] sm:$0xf0]  ;;  %v14685_v15 = vld [vmem:[#allocation5 + $0x70c] sm:$0xf] }
 0x656   : > { %v13693_v60 = vld [vmem:[#allocation5 + $0xe08] sm:$0xf]  ;;  %v13438_v22 = vor.u32 %v14849_v42, %v13437_v43  ;;  %8882 = vmatpush.bf16.msrb.mxu1 %v13182_v46  ;;  %v12799_v43 = vld [vmem:[#allocation5 + $0x728] sm:$0xf0]  ;;  %v12290_v42 = vor.u32 %v14557_v29, %v12287_v55 }
 0x657   : > { %v14913_v2 = vld [vmem:[#allocation5 + $0xe24] sm:$0xf0]  ;;  %8870 = vmatmul.bf16.vlgmr.msrb.gmra.mxu0 %v16560_v18  ;;  %v14549_v62 = vld [vmem:[#allocation5 + $0x2cc] sm:$0xf]  ;;  %v12802_v20 = vor.u32 %v14685_v15, %v12799_v43 }
 0x658   : > { %v13694_v19 = vor.u32 %v14913_v2, %v13693_v60  ;;  %8895 = vmatpush.bf16.msrb.mxu2 %v13438_v22  ;;  %8914 = vmatpush.bf16.msra.mxu0 %v12130_v3  ;;  %v12546_v60 = vor.u32 %v14621_v44, %v12543_v52  ;;  %v8664_v2 = vadd.f32 %v8663_v25, %v16588_v45  ;;  %v12255_v40 = vld [vmem:[#allocation5 + $0x2e8] sm:$0xf0] }
 0x659   : > { %8883 = vmatmul.bf16.vlgmr.msrb.gmra.mxu1 %v16570_v16  ;;  %v14613_v11 = vld [vmem:[#allocation5 + $0x4cc] sm:$0xf] }
 0x65a   : > { %8908 = vmatpush.bf16.msrb.mxu3 %v13694_v19  ;;  %8927 = vmatpush.bf16.msra.mxu1 %v12386_v4  ;;  %v12511_v13 = vld [vmem:[#allocation5 + $0x4e8] sm:$0xf0]  ;;  %v8677_v46 = vadd.f32 %v8676_v26, %v8664_v2  ;;  %v12258_v19 = vor.u32 %v14549_v62, %v12255_v40  ;;  %v8689_v4 = vpop.f32.mrf.mxu2 }
 0x65b   : > { %8896 = vmatmul.bf16.vlgmr.msrb.gmra.mxu2 %v16555_v54  ;;  %v14677_v22 = vld [vmem:[#allocation5 + $0x6cc] sm:$0xf]  ;;  %v12514_v3 = vor.u32 %v14613_v11, %v12511_v13 }
 0x65c   : > { %8940 = vmatpush.bf16.msra.mxu2 %v12642_v17  ;;  %8915 = vmatpush.bf16.msra.mxu0 %v12098_v39  ;;  %v12767_v27 = vld [vmem:[#allocation5 + $0x6e8] sm:$0xf0]  ;;  %v8690_v53 = vadd.f32 %v8689_v4, %v8677_v46 }
 0x65d   : > { %8909 = vmatmul.bf16.vlgmr.msrb.gmra.mxu3 %v16565_v61  ;;  %v14477_v45 = vld [vmem:[#allocation5 + $0x8c] sm:$0xf]  ;;  %v12770_v21 = vor.u32 %v14677_v22, %v12767_v27 }
 0x65e   : > { %8953 = vmatpush.bf16.msra.mxu3 %v12898_v51  ;;  %8928 = vmatpush.bf16.msra.mxu1 %v12354_v34  ;;  %v11967_v17 = vld [vmem:[#allocation5 + $0xa8] sm:$0xf0]  ;;  %v8702_v51 = vpop.f32.mrf.mxu3 }
 0x65f   : > { %v14541_v33 = vld [vmem:[#allocation5 + $0x28c] sm:$0xf]  ;;  %v16595_v39 = vadd.f32 %v8702_v51, %v8690_v53  ;;  %v11970_v34 = vor.u32 %v14477_v45, %v11967_v17 }
 0x660   : > { %8941 = vmatpush.bf16.msra.mxu2 %v12610_v48  ;;  %8916 = vmatpush.bf16.msra.mxu0 %v12066_v59  ;;  %v12223_v32 = vld [vmem:[#allocation5 + $0x2a8] sm:$0xf0]  ;;  %v8665_v48 = vpop.f32.mrf.mxu0 }
 0x661   : > { %v14605_v50 = vld [vmem:[#allocation5 + $0x48c] sm:$0xf]  ;;  %v12226_v37 = vor.u32 %v14541_v33, %v12223_v32  ;;  %v9434_v13 = vsel %vm1167_vm2, %v16595_v39, 0.0 }
 0x662   : > { %8954 = vmatpush.bf16.msra.mxu3 %v12866_v30  ;;  %8929 = vmatpush.bf16.msra.mxu1 %v12322_v35  ;;  %v12479_v57 = vld [vmem:[#allocation5 + $0x4a8] sm:$0xf0]  ;;  %v8691_v43 = vpop.f32.mrf.mxu2  ;;  %v9435_v51 = vrot.slane %v9434_v13, 4 }
 0x663   : > { %v14669_v6 = vld [vmem:[#allocation5 + $0x68c] sm:$0xf]  ;;  %v12482_v8 = vor.u32 %v14605_v50, %v12479_v57 }
 0x664   : > { %8942 = vmatpush.bf16.msra.mxu2 %v12578_v7  ;;  %8917 = vmatpush.bf16.msra.mxu0 %v12034_v0  ;;  %v12735_v10 = vld [vmem:[#allocation5 + $0x6a8] sm:$0xf0] }
 0x665   : > { %v14469_v31 = vld [vmem:[#allocation5 + $0x4c] sm:$0xf]  ;;  %v12738_v9 = vor.u32 %v14669_v6, %v12735_v10 }
 0x666   : > { %8955 = vmatpush.bf16.msra.mxu3 %v12834_v36  ;;  %8930 = vmatpush.bf16.msra.mxu1 %v12290_v42  ;;  %v11935_v30 = vld [vmem:[#allocation5 + $0x68] sm:$0xf0]  ;;  %v8704_v2 = vpop.f32.mrf.mxu3 }
 0x667   : > { %v14533_v1 = vld [vmem:[#allocation5 + $0x24c] sm:$0xf]  ;;  %v11938_v63 = vor.u32 %v14469_v31, %v11935_v30 }
 0x668   : > { %8943 = vmatpush.bf16.msra.mxu2 %v12546_v60  ;;  %8918 = vmatpush.bf16.msra.mxu0 %v12002_v23  ;;  %v12191_v24 = vld [vmem:[#allocation5 + $0x268] sm:$0xf0]  ;;  %v8715_v2 = vpop.f32.mrf.mxu0 }
 0x669   : > { %v14597_v41 = vld [vmem:[#allocation5 + $0x44c] sm:$0xf]  ;;  %v12194_v36 = vor.u32 %v14533_v1, %v12191_v24  ;;  %v9436_v1 = vadd.f32 %v9435_v51, %v9434_v13 }
 0x66a   : > { %8956 = vmatpush.bf16.msra.mxu3 %v12802_v20  ;;  %8931 = vmatpush.bf16.msra.mxu1 %v12258_v19  ;;  %v12447_v59 = vld [vmem:[#allocation5 + $0x468] sm:$0xf0] }
 0x66b   : > { %v14661_v35 = vld [vmem:[#allocation5 + $0x64c] sm:$0xf]  ;;  %v12450_v55 = vor.u32 %v14597_v41, %v12447_v59 }
 0x66c   : > { %8944 = vmatpush.bf16.msra.mxu2 %v12514_v3  ;;  %v12703_v7 = vld [vmem:[#allocation5 + $0x668] sm:$0xf0]  ;;  %8919 = vmatpush.bf16.msra.mxu0 %v11970_v34 }
 0x66d   : > { %v14461_v49 = vld [vmem:[#allocation5 + $0xc] sm:$0xf]  ;;  %v12706_v0 = vor.u32 %v14661_v35, %v12703_v7 }
 0x66e   : > { %8957 = vmatpush.bf16.msra.mxu3 %v12770_v21  ;;  %v11903_v29 = vld [vmem:[#allocation5 + $0x28] sm:$0xf0]  ;;  %8932 = vmatpush.bf16.msra.mxu1 %v12226_v37 }
 0x66f   : > { %v14525_v44 = vld [vmem:[#allocation5 + $0x20c] sm:$0xf]  ;;  %v11906_v62 = vor.u32 %v14461_v49, %v11903_v29 }
 0x670   : > { %8945 = vmatpush.bf16.msra.mxu2 %v12482_v8  ;;  %v12159_v52 = vld [vmem:[#allocation5 + $0x228] sm:$0xf0]  ;;  %8920 = vmatpush.bf16.msra.mxu0 %v11938_v63 }
 0x671   : > { %v14589_v15 = vld [vmem:[#allocation5 + $0x40c] sm:$0xf]  ;;  %v12162_v46 = vor.u32 %v14525_v44, %v12159_v52  ;;  %v9437_v52 = vrot.slane %v9436_v1, 2 }
 0x672   : > { %8958 = vmatpush.bf16.msra.mxu3 %v12738_v9  ;;  %v12415_v25 = vld [vmem:[#allocation5 + $0x428] sm:$0xf0]  ;;  %8933 = vmatpush.bf16.msra.mxu1 %v12194_v36 }
 0x673   : > { %v14653_v42 = vld [vmem:[#allocation5 + $0x60c] sm:$0xf]  ;;  %v12418_v22 = vor.u32 %v14589_v15, %v12415_v25 }
 0x674   : > { %v12671_v60 = vld [vmem:[#allocation5 + $0x628] sm:$0xf0]  ;;  %8946 = vmatpush.bf16.msra.mxu2 %v12450_v55  ;;  %8921 = vmatpush.bf16.msra.mxu0 %v11906_v62 }
 0x675   : > { %v14773_v26 = vld [vmem:[#allocation5 + $0x9cc] sm:$0xf]  ;;  %v12674_v19 = vor.u32 %v14653_v42, %v12671_v60 }
 0x676   : > { %v13151_v28 = vld [vmem:[#allocation5 + $0x9e8] sm:$0xf0]  ;;  %8959 = vmatpush.bf16.msra.mxu3 %v12706_v0  ;;  %8934 = vmatpush.bf16.msra.mxu1 %v12162_v46 }
 0x677   : > { %v14837_v12 = vld [vmem:[#allocation5 + $0xbcc] sm:$0xf]  ;;  %v13154_v3 = vor.u32 %v14773_v26, %v13151_v28  ;;  %8922 = vmatmul.bf16.vlgmr.msra.gmra.mxu0 %v16536_v14 }
 0x678   : > { %v13407_v20 = vld [vmem:[#allocation5 + $0xbe8] sm:$0xf0]  ;;  %8947 = vmatpush.bf16.msra.mxu2 %v12418_v22 }
 0x679   : > { %v14901_v40 = vld [vmem:[#allocation5 + $0xdcc] sm:$0xf]  ;;  %v13410_v45 = vor.u32 %v14837_v12, %v13407_v20  ;;  %8966 = vmatpush.bf16.msrb.mxu0 %v13154_v3  ;;  %8935 = vmatmul.bf16.vlgmr.msra.gmra.mxu1 %v16546_v56 }
 0x67a   : > { %v13663_v11 = vld [vmem:[#allocation5 + $0xde8] sm:$0xf0]  ;;  %8960 = vmatpush.bf16.msra.mxu3 %v12674_v19 }
 0x67b   : > { %v14965_v27 = vld [vmem:[#allocation5 + $0xfcc] sm:$0xf]  ;;  %v13666_v17 = vor.u32 %v14901_v40, %v13663_v11  ;;  %8979 = vmatpush.bf16.msrb.mxu1 %v13410_v45  ;;  %8948 = vmatmul.bf16.vlgmr.msra.gmra.mxu2 %v16531_v38  ;;  %v8728_v40 = vpop.f32.mrf.mxu1  ;;  %v9438_v11 = vadd.f32 %v9437_v52, %v9436_v1  ;;  %v8717_v1 = vpop.f32.mrf.mxu0 }
 0x67c   : > { %v13919_v23 = vld [vmem:[#allocation5 + $0xfe8] sm:$0xf0]  ;;  %v14706_v1 = vld [vmem:[#allocation5 + $0x7ac] sm:$0xf0] }
 0x67d   : > { %v14765_v4 = vld [vmem:[#allocation5 + $0x98c] sm:$0xf]  ;;  %v13922_v32 = vor.u32 %v14965_v27, %v13919_v23  ;;  %8992 = vmatpush.bf16.msrb.mxu2 %v13666_v17  ;;  %8961 = vmatmul.bf16.vlgmr.msra.gmra.mxu3 %v16541_v58  ;;  %v8729_v23 = vadd.f32 %v8728_v40, %v8715_v2 }
 0x67e   : > { %v13119_v33 = vld [vmem:[#allocation5 + $0x9a8] sm:$0xf0] }
 0x67f   : > { %v14829_v21 = vld [vmem:[#allocation5 + $0xb8c] sm:$0xf]  ;;  %v13122_v34 = vor.u32 %v14765_v4, %v13119_v33  ;;  %9005 = vmatpush.bf16.msrb.mxu3 %v13922_v32  ;;  %v8741_v32 = vpop.f32.mrf.mxu2 }
 0x680   : > { %v13375_v53 = vld [vmem:[#allocation5 + $0xba8] sm:$0xf0] }
 0x681   : > { %v14893_v50 = vld [vmem:[#allocation5 + $0xd8c] sm:$0xf]  ;;  %v13378_v48 = vor.u32 %v14829_v21, %v13375_v53  ;;  %8967 = vmatpush.bf16.msrb.mxu0 %v13122_v34  ;;  %v8742_v34 = vadd.f32 %v8741_v32, %v8729_v23  ;;  %v14586_v23 = vld [vmem:[#allocation5 + $0x3ec] sm:$0xf0] }
 0x682   : > { %v13631_v57 = vld [vmem:[#allocation5 + $0xda8] sm:$0xf0] }
 0x683   : > { %v14957_v6 = vld [vmem:[#allocation5 + $0xf8c] sm:$0xf]  ;;  %v13634_v37 = vor.u32 %v14893_v50, %v13631_v57  ;;  %8980 = vmatpush.bf16.msrb.mxu1 %v13378_v48  ;;  %v9439_v50 = vrot.slane %v9438_v11, 1  ;;  %v8754_v48 = vpop.f32.mrf.mxu3 }
 0x684   : > { %v13887_v10 = vld [vmem:[#allocation5 + $0xfa8] sm:$0xf0] }
 0x685   : > { %v14757_v8 = vld [vmem:[#allocation5 + $0x94c] sm:$0xf]  ;;  %v13890_v5 = vor.u32 %v14957_v6, %v13887_v10  ;;  %8993 = vmatpush.bf16.msrb.mxu2 %v13634_v37 }
 0x686   : > { %v13087_v31 = vld [vmem:[#allocation5 + $0x968] sm:$0xf0] }
 0x687   : > { %v14821_v30 = vld [vmem:[#allocation5 + $0xb4c] sm:$0xf]  ;;  %v13090_v7 = vor.u32 %v14757_v8, %v13087_v31  ;;  %9006 = vmatpush.bf16.msrb.mxu3 %v13890_v5 }
 0x688   : > { %v13343_v9 = vld [vmem:[#allocation5 + $0xb68] sm:$0xf0] }
 0x689   : > { %v14885_v24 = vld [vmem:[#allocation5 + $0xd4c] sm:$0xf]  ;;  %v13346_v49 = vor.u32 %v14821_v30, %v13343_v9  ;;  %8968 = vmatpush.bf16.msrb.mxu0 %v13090_v7  ;;  %v16603_v30 = vadd.f32 %v8754_v48, %v8742_v34  ;;  %v9440_v7 = vadd.f32 %v9439_v50, %v9438_v11  ;;  %v14578_v48 = vld [vmem:[#allocation5 + $0x3ac] sm:$0xf0] }
 0x68a   : > { %v13599_v41 = vld [vmem:[#allocation5 + $0xd68] sm:$0xf0] }
 0x68b   : > { %v14949_v59 = vld [vmem:[#allocation5 + $0xf4c] sm:$0xf]  ;;  %v13602_v29 = vor.u32 %v14885_v24, %v13599_v41  ;;  %8981 = vmatpush.bf16.msrb.mxu1 %v13346_v49  ;;  %v8756_v11 = vpop.f32.mrf.mxu3 }
 0x68c   : > { %v13855_v35 = vld [vmem:[#allocation5 + $0xf68] sm:$0xf0]  ;;  %v8767_v11 = vpop.f32.mrf.mxu0 }
 0x68d   : > { %v14749_v63 = vld [vmem:[#allocation5 + $0x90c] sm:$0xf]  ;;  %v13858_v15 = vor.u32 %v14949_v59, %v13855_v35  ;;  %8994 = vmatpush.bf16.msrb.mxu2 %v13602_v29  ;;  %v8730_v35 = vpop.f32.mrf.mxu1 }
 0x68e   : > { %v13055_v36 = vld [vmem:[#allocation5 + $0x928] sm:$0xf0]  ;;  %v12325_v35 = vld [vmem:[#allocation5 + $0x350] sm:$0xf] }
 0x68f   : > { %v14813_v55 = vld [vmem:[#allocation5 + $0xb0c] sm:$0xf]  ;;  %v13058_v60 = vor.u32 %v14749_v63, %v13055_v36  ;;  %9007 = vmatpush.bf16.msrb.mxu3 %v13858_v15 }
 0x690   : > { %v13311_v44 = vld [vmem:[#allocation5 + $0xb28] sm:$0xf0] }
 0x691   : > { %v14877_v43 = vld [vmem:[#allocation5 + $0xd0c] sm:$0xf]  ;;  %v13314_v26 = vor.u32 %v14813_v55, %v13311_v44  ;;  %8969 = vmatpush.bf16.msrb.mxu0 %v13058_v60 }
 0x692   : > { %v13567_v0 = vld [vmem:[#allocation5 + $0xd28] sm:$0xf0] }
 0x693   : > { %v14941_v25 = vld [vmem:[#allocation5 + $0xf0c] sm:$0xf]  ;;  %v13570_v28 = vor.u32 %v14877_v43, %v13567_v0  ;;  %8982 = vmatpush.bf16.msrb.mxu1 %v13314_v26  ;;  %v8743_v26 = vpop.f32.mrf.mxu2 }
 0x694   : > { %v13823_v42 = vld [vmem:[#allocation5 + $0xf28] sm:$0xf0]  ;;  %v12549_v26 = vld [vmem:[#allocation5 + $0x510] sm:$0xf] }
 0x695   : > { %v14741_v12 = vld [vmem:[#allocation5 + $0x8cc] sm:$0xf]  ;;  %v13826_v13 = vor.u32 %v14941_v25, %v13823_v42  ;;  %8995 = vmatpush.bf16.msrb.mxu2 %v13570_v28  ;;  %v9490_v28 = vmul.f32 %v9440_v7, %v16290_v47 }
 0x696   : > { %v13023_v62 = vld [vmem:[#allocation5 + $0x8e8] sm:$0xf0] }
 0x697   : > { %v14805_v20 = vld [vmem:[#allocation5 + $0xacc] sm:$0xf]  ;;  %v13026_v4 = vor.u32 %v14741_v12, %v13023_v62  ;;  %9008 = vmatpush.bf16.msrb.mxu3 %v13826_v13  ;;  %v12133_v13 = vld [vmem:[#allocation5 + $0x1d0] sm:$0xf] }
 0x698   : > { %v13279_v46 = vld [vmem:[#allocation5 + $0xae8] sm:$0xf0] }
 0x699   : > { %v14869_v22 = vld [vmem:[#allocation5 + $0xccc] sm:$0xf]  ;;  %v13282_v17 = vor.u32 %v14805_v20, %v13279_v46  ;;  %8970 = vmatpush.bf16.msrb.mxu0 %v13026_v4  ;;  %v14522_v46 = vld [vmem:[#allocation5 + $0x1ec] sm:$0xf0] }
 0x69a   : > { %v13535_v27 = vld [vmem:[#allocation5 + $0xce8] sm:$0xf0] }
 0x69b   : > { %v14933_v19 = vld [vmem:[#allocation5 + $0xecc] sm:$0xf]  ;;  %v13538_v33 = vor.u32 %v14869_v22, %v13535_v27  ;;  %8983 = vmatpush.bf16.msrb.mxu1 %v13282_v17  ;;  %v12389_v22 = vld [vmem:[#allocation5 + $0x3d0] sm:$0xf] }
 0x69c   : > { %v13791_v3 = vld [vmem:[#allocation5 + $0xee8] sm:$0xf0]  ;;  %v12901_v17 = vld [vmem:[#allocation5 + $0x7d0] sm:$0xf]  ;;  %v12390_v32 = vor.u32 %v14586_v23, %v12389_v22  ;;  %v8768_v22 = vadd.f32 %v8767_v11, %v16603_v30 }
 0x69d   : > { %v14733_v45 = vld [vmem:[#allocation5 + $0x88c] sm:$0xf]  ;;  %v13794_v57 = vor.u32 %v14933_v19, %v13791_v3  ;;  %8996 = vmatpush.bf16.msrb.mxu2 %v13538_v33  ;;  %v12645_v19 = vld [vmem:[#allocation5 + $0x5d0] sm:$0xf] }
 0x69e   : > { %v12991_v21 = vld [vmem:[#allocation5 + $0x8a8] sm:$0xf0]  ;;  %v14650_v3 = vld [vmem:[#allocation5 + $0x5ec] sm:$0xf0] }
 0x69f   : > { %v14797_v53 = vld [vmem:[#allocation5 + $0xa8c] sm:$0xf]  ;;  %v12994_v31 = vor.u32 %v14733_v45, %v12991_v21  ;;  %9009 = vmatpush.bf16.msrb.mxu3 %v13794_v57  ;;  %v14714_v33 = vld [vmem:[#allocation5 + $0x7ec] sm:$0xf0]  ;;  %v16607_v21 = vsub.f32 %v16595_v39, %v9490_v28  ;;  %v12646_v50 = vor.u32 %v14650_v3, %v12645_v19 }
 0x6a0   : > { %v13247_v51 = vld [vmem:[#allocation5 + $0xaa8] sm:$0xf0]  ;;  %v12101_v57 = vld [vmem:[#allocation5 + $0x190] sm:$0xf]  ;;  %v12902_v34 = vor.u32 %v14714_v33, %v12901_v17 }
 0x6a1   : > { %v14861_v6 = vld [vmem:[#allocation5 + $0xc8c] sm:$0xf]  ;;  %v13250_v5 = vor.u32 %v14797_v53, %v13247_v51  ;;  %8971 = vmatpush.bf16.msrb.mxu0 %v12994_v31  ;;  %v12134_v51 = vor.u32 %v14522_v46, %v12133_v13  ;;  %v12869_v31 = vld [vmem:[#allocation5 + $0x790] sm:$0xf]  ;;  %v9506_v39 = vmul.f32 %v16607_v21, %v16607_v21 }
 0x6a2   : > { %v13503_v10 = vld [vmem:[#allocation5 + $0xca8] sm:$0xf0]  ;;  %v12870_v7 = vor.u32 %v14706_v1, %v12869_v31  ;;  %v14626_v28 = vld [vmem:[#allocation5 + $0x52c] sm:$0xf0]  ;;  %v8806_v1 = vpop.f32.mrf.mxu3 }
 0x6a3   : > { %v14925_v37 = vld [vmem:[#allocation5 + $0xe8c] sm:$0xf]  ;;  %v13506_v9 = vor.u32 %v14861_v6, %v13503_v10  ;;  %8984 = vmatpush.bf16.msrb.mxu1 %v13250_v5  ;;  %v14514_v6 = vld [vmem:[#allocation5 + $0x1ac] sm:$0xf0]  ;;  %v12550_v46 = vor.u32 %v14626_v28, %v12549_v26 }
 0x6a4   : > { %v13759_v8 = vld [vmem:[#allocation5 + $0xea8] sm:$0xf0]  ;;  %v12357_v10 = vld [vmem:[#allocation5 + $0x390] sm:$0xf]  ;;  %v12102_v5 = vor.u32 %v14514_v6, %v12101_v57 }
 0x6a5   : > { %v14725_v24 = vld [vmem:[#allocation5 + $0x84c] sm:$0xf]  ;;  %v13762_v63 = vor.u32 %v14925_v37, %v13759_v8  ;;  %8997 = vmatpush.bf16.msrb.mxu2 %v13506_v9  ;;  %v12613_v37 = vld [vmem:[#allocation5 + $0x590] sm:$0xf]  ;;  %v12358_v9 = vor.u32 %v14578_v48, %v12357_v10  ;;  %v8793_v10 = vpop.f32.mrf.mxu2 }
 0x6a6   : > { %v12959_v41 = vld [vmem:[#allocation5 + $0x868] sm:$0xf0]  ;;  %v14642_v8 = vld [vmem:[#allocation5 + $0x5ac] sm:$0xf0] }
 0x6a7   : > { %v14789_v59 = vld [vmem:[#allocation5 + $0xa4c] sm:$0xf]  ;;  %v12962_v52 = vor.u32 %v14725_v24, %v12959_v41  ;;  %9010 = vmatpush.bf16.msrb.mxu3 %v13762_v63  ;;  %v12614_v24 = vor.u32 %v14642_v8, %v12613_v37  ;;  %v12069_v41 = vld [vmem:[#allocation5 + $0x150] sm:$0xf] }
 0x6a8   : > { %v13215_v49 = vld [vmem:[#allocation5 + $0xa68] sm:$0xf0]  ;;  %v14570_v63 = vld [vmem:[#allocation5 + $0x36c] sm:$0xf0] }
 0x6a9   : > { %v14853_v29 = vld [vmem:[#allocation5 + $0xc4c] sm:$0xf]  ;;  %v13218_v0 = vor.u32 %v14789_v59, %v13215_v49  ;;  %8972 = vmatpush.bf16.msrb.mxu0 %v12962_v52  ;;  %v14506_v59 = vld [vmem:[#allocation5 + $0x16c] sm:$0xf0] }
 0x6aa   : > { %v13471_v36 = vld [vmem:[#allocation5 + $0xc68] sm:$0xf0]  ;;  %v12581_v49 = vld [vmem:[#allocation5 + $0x550] sm:$0xf]  ;;  %v12070_v52 = vor.u32 %v14506_v59, %v12069_v41 }
 0x6ab   : > { %v14917_v55 = vld [vmem:[#allocation5 + $0xe4c] sm:$0xf]  ;;  %v13474_v25 = vor.u32 %v14853_v29, %v13471_v36  ;;  %8985 = vmatpush.bf16.msrb.mxu1 %v13218_v0  ;;  %v14634_v29 = vld [vmem:[#allocation5 + $0x56c] sm:$0xf0] }
 0x6ac   : > { %v13727_v44 = vld [vmem:[#allocation5 + $0xe68] sm:$0xf0]  ;;  %v12837_v36 = vld [vmem:[#allocation5 + $0x750] sm:$0xf] }
 0x6ad   : > { %v14717_v15 = vld [vmem:[#allocation5 + $0x80c] sm:$0xf]  ;;  %v13730_v12 = vor.u32 %v14917_v55, %v13727_v44  ;;  %8998 = vmatpush.bf16.msrb.mxu2 %v13474_v25  ;;  %v14698_v55 = vld [vmem:[#allocation5 + $0x76c] sm:$0xf0]  ;;  %v9514_v44 = vsel %vm1167_vm2, %v9506_v39, 0.0 }
 0x6ae   : > { %v12927_v43 = vld [vmem:[#allocation5 + $0x828] sm:$0xf0]  ;;  %v12037_v0 = vld [vmem:[#allocation5 + $0x110] sm:$0xf] }
 0x6af   : > { %v14781_v42 = vld [vmem:[#allocation5 + $0xa0c] sm:$0xf]  ;;  %v12930_v27 = vor.u32 %v14717_v15, %v12927_v43  ;;  %9011 = vmatpush.bf16.msrb.mxu3 %v13730_v12  ;;  %v12326_v15 = vor.u32 %v14570_v63, %v12325_v35  ;;  %v12582_v43 = vor.u32 %v14634_v29, %v12581_v49  ;;  %v14498_v25 = vld [vmem:[#allocation5 + $0x12c] sm:$0xf0]  ;;  %v8769_v63 = vpop.f32.mrf.mxu0 }
 0x6b0   : > { %v13183_v60 = vld [vmem:[#allocation5 + $0xa28] sm:$0xf0]  ;;  %v12805_v12 = vld [vmem:[#allocation5 + $0x710] sm:$0xf] }
 0x6b1   : > { %v14845_v2 = vld [vmem:[#allocation5 + $0xc0c] sm:$0xf]  ;;  %v13186_v4 = vor.u32 %v14781_v42, %v13183_v60  ;;  %8973 = vmatpush.bf16.msrb.mxu0 %v12930_v27  ;;  %v12293_v42 = vld [vmem:[#allocation5 + $0x310] sm:$0xf]  ;;  %v12838_v60 = vor.u32 %v14698_v55, %v12837_v36  ;;  %v8780_v27 = vpop.f32.mrf.mxu1 }
 0x6b2   : > { %v13439_v62 = vld [vmem:[#allocation5 + $0xc28] sm:$0xf0]  ;;  %v12005_v23 = vld [vmem:[#allocation5 + $0xd0] sm:$0xf] }
 0x6b3   : > { %v14909_v20 = vld [vmem:[#allocation5 + $0xe0c] sm:$0xf]  ;;  %v13442_v45 = vor.u32 %v14845_v2, %v13439_v62  ;;  %8986 = vmatpush.bf16.msrb.mxu1 %v13186_v4  ;;  %v14562_v2 = vld [vmem:[#allocation5 + $0x32c] sm:$0xf0] }
 0x6b4   : > { %v13695_v40 = vld [vmem:[#allocation5 + $0xe28] sm:$0xf0]  ;;  %8974 = vmatmul.bf16.vlgmr.msrb.gmra.mxu0 %v16560_v18  ;;  %v14690_v62 = vld [vmem:[#allocation5 + $0x72c] sm:$0xf0]  ;;  %v12294_v13 = vor.u32 %v14562_v2, %v12293_v42 }
 0x6b5   : > { %v13698_v53 = vor.u32 %v14909_v20, %v13695_v40  ;;  %8999 = vmatpush.bf16.msrb.mxu2 %v13442_v45  ;;  %9018 = vmatpush.bf16.msra.mxu0 %v12134_v51  ;;  %v9515_v20 = vrot.slane %v9514_v44, 4  ;;  %v12038_v40 = vor.u32 %v14498_v25, %v12037_v0  ;;  %v14490_v19 = vld [vmem:[#allocation5 + $0xec] sm:$0xf0]  ;;  %v12806_v4 = vor.u32 %v14690_v62, %v12805_v12 }
 0x6b6   : > { %8987 = vmatmul.bf16.vlgmr.msrb.gmra.mxu1 %v16570_v16  ;;  %v12261_v3 = vld [vmem:[#allocation5 + $0x2d0] sm:$0xf] }
 0x6b7   : > { %9012 = vmatpush.bf16.msrb.mxu3 %v13698_v53  ;;  %9031 = vmatpush.bf16.msra.mxu1 %v12390_v32  ;;  %v14554_v45 = vld [vmem:[#allocation5 + $0x2ec] sm:$0xf0]  ;;  %v8781_v53 = vadd.f32 %v8780_v27, %v8768_v22  ;;  %v9516_v37 = vadd.f32 %v9515_v20, %v9514_v44 }
 0x6b8   : > { %9000 = vmatmul.bf16.vlgmr.msrb.gmra.mxu2 %v16555_v54  ;;  %v12517_v17 = vld [vmem:[#allocation5 + $0x4d0] sm:$0xf]  ;;  %v12262_v57 = vor.u32 %v14554_v45, %v12261_v3 }
 0x6b9   : > { %9044 = vmatpush.bf16.msra.mxu2 %v12646_v50  ;;  %9019 = vmatpush.bf16.msra.mxu0 %v12102_v5  ;;  %v14618_v33 = vld [vmem:[#allocation5 + $0x4ec] sm:$0xf0]  ;;  %v12006_v50 = vor.u32 %v14490_v19, %v12005_v23  ;;  %v8794_v31 = vadd.f32 %v8793_v10, %v8781_v53  ;;  %v8795_v23 = vpop.f32.mrf.mxu2 }
 0x6ba   : > { %9013 = vmatmul.bf16.vlgmr.msrb.gmra.mxu3 %v16565_v61  ;;  %v12773_v51 = vld [vmem:[#allocation5 + $0x6d0] sm:$0xf]  ;;  %v12518_v6 = vor.u32 %v14618_v33, %v12517_v17  ;;  %v8808_v33 = vpop.f32.mrf.mxu3 }
 0x6bb   : > { %9057 = vmatpush.bf16.msra.mxu3 %v12902_v34  ;;  %9032 = vmatpush.bf16.msra.mxu1 %v12358_v9  ;;  %v14682_v32 = vld [vmem:[#allocation5 + $0x6ec] sm:$0xf0]  ;;  %v16617_v59 = vadd.f32 %v8806_v1, %v8794_v31 }
 0x6bc   : > { %v11973_v30 = vld [vmem:[#allocation5 + $0x90] sm:$0xf]  ;;  %v12774_v8 = vor.u32 %v14682_v32, %v12773_v51 }
 0x6bd   : > { %9045 = vmatpush.bf16.msra.mxu2 %v12614_v24  ;;  %9020 = vmatpush.bf16.msra.mxu0 %v12070_v52  ;;  %v14482_v34 = vld [vmem:[#allocation5 + $0xac] sm:$0xf0]  ;;  %v8782_v52 = vpop.f32.mrf.mxu1 }
 0x6be   : > { %v12229_v48 = vld [vmem:[#allocation5 + $0x290] sm:$0xf]  ;;  %v11974_v35 = vor.u32 %v14482_v34, %v11973_v30 }
 0x6bf   : > { %9058 = vmatpush.bf16.msra.mxu3 %v12870_v7  ;;  %9033 = vmatpush.bf16.msra.mxu1 %v12326_v15  ;;  %v14546_v39 = vld [vmem:[#allocation5 + $0x2ac] sm:$0xf0]  ;;  %v9517_v15 = vrot.slane %v9516_v37, 2 }
 0x6c0   : > { %v12485_v5 = vld [vmem:[#allocation5 + $0x490] sm:$0xf]  ;;  %v12230_v49 = vor.u32 %v14546_v39, %v12229_v48 }
 0x6c1   : > { %9046 = vmatpush.bf16.msra.mxu2 %v12582_v43  ;;  %9021 = vmatpush.bf16.msra.mxu0 %v12038_v40  ;;  %v14610_v9 = vld [vmem:[#allocation5 + $0x4ac] sm:$0xf0]  ;;  %v9441_v43 = vsel %vm1167_vm2, %v16617_v59, 0.0  ;;  %v9518_v19 = vadd.f32 %v9517_v15, %v9516_v37 }
 0x6c2   : > { %v12741_v24 = vld [vmem:[#allocation5 + $0x690] sm:$0xf]  ;;  %v12486_v29 = vor.u32 %v14610_v9, %v12485_v5 }
 0x6c3   : > { %9059 = vmatpush.bf16.msra.mxu3 %v12838_v60  ;;  %9034 = vmatpush.bf16.msra.mxu1 %v12294_v13  ;;  %v14674_v41 = vld [vmem:[#allocation5 + $0x6ac] sm:$0xf0]  ;;  %v9442_v60 = vrot.slane %v9441_v43, 4  ;;  %v9519_v31 = vrot.slane %v9518_v19, 1 }
 0x6c4   : > { %v11941_v7 = vld [vmem:[#allocation5 + $0x50] sm:$0xf]  ;;  %v12742_v0 = vor.u32 %v14674_v41, %v12741_v24 }
 0x6c5   : > { %9047 = vmatpush.bf16.msra.mxu2 %v12550_v46  ;;  %9022 = vmatpush.bf16.msra.mxu0 %v12006_v50  ;;  %v14474_v36 = vld [vmem:[#allocation5 + $0x6c] sm:$0xf0]  ;;  %v9443_v40 = vadd.f32 %v9442_v60, %v9441_v43  ;;  %v9520_v15 = vadd.f32 %v9519_v31, %v9518_v19 }
 0x6c6   : > { %v12197_v55 = vld [vmem:[#allocation5 + $0x250] sm:$0xf]  ;;  %v11942_v28 = vor.u32 %v14474_v36, %v11941_v7 }
 0x6c7   : > { %9060 = vmatpush.bf16.msra.mxu3 %v12806_v4  ;;  %9035 = vmatpush.bf16.msra.mxu1 %v12262_v57  ;;  %v14538_v44 = vld [vmem:[#allocation5 + $0x26c] sm:$0xf0]  ;;  %v9444_v53 = vrot.slane %v9443_v40, 2 }
 0x6c8   : > { %v12453_v25 = vld [vmem:[#allocation5 + $0x450] sm:$0xf]  ;;  %v12198_v11 = vor.u32 %v14538_v44, %v12197_v55 }
 0x6c9   : > { %9048 = vmatpush.bf16.msra.mxu2 %v12518_v6  ;;  %v14602_v42 = vld [vmem:[#allocation5 + $0x46c] sm:$0xf0]  ;;  %9023 = vmatpush.bf16.msra.mxu0 %v11974_v35  ;;  %v9445_v30 = vadd.f32 %v9444_v53, %v9443_v40 }
 0x6ca   : > { %v12709_v2 = vld [vmem:[#allocation5 + $0x650] sm:$0xf]  ;;  %v12454_v13 = vor.u32 %v14602_v42, %v12453_v25 }
 0x6cb   : > { %9061 = vmatpush.bf16.msra.mxu3 %v12774_v8  ;;  %v14666_v26 = vld [vmem:[#allocation5 + $0x66c] sm:$0xf0]  ;;  %9036 = vmatpush.bf16.msra.mxu1 %v12230_v49  ;;  %v9446_v9 = vrot.slane %v9445_v30, 1 }
 0x6cc   : > { %v11909_v12 = vld [vmem:[#allocation5 + $0x10] sm:$0xf]  ;;  %v12710_v3 = vor.u32 %v14666_v26, %v12709_v2 }
 0x6cd   : > { %v14466_v62 = vld [vmem:[#allocation5 + $0x2c] sm:$0xf0]  ;;  %9049 = vmatpush.bf16.msra.mxu2 %v12486_v29  ;;  %9024 = vmatpush.bf16.msra.mxu0 %v11942_v28  ;;  %v9447_v55 = vadd.f32 %v9446_v9, %v9445_v30  ;;  %v8819_v30 = vpop.f32.mrf.mxu0 }
 0x6ce   : > { %v12165_v20 = vld [vmem:[#allocation5 + $0x210] sm:$0xf]  ;;  %v11910_v50 = vor.u32 %v14466_v62, %v11909_v12 }
 0x6cf   : > { %v14530_v46 = vld [vmem:[#allocation5 + $0x22c] sm:$0xf0]  ;;  %9062 = vmatpush.bf16.msra.mxu3 %v12742_v0  ;;  %9037 = vmatpush.bf16.msra.mxu1 %v12198_v11  ;;  %v9491_v0 = vmul.f32 %v9447_v55, %v16290_v47 }
 0x6d0   : > { %v12421_v22 = vld [vmem:[#allocation5 + $0x410] sm:$0xf]  ;;  %v12166_v34 = vor.u32 %v14530_v46, %v12165_v20  ;;  %v9570_v46 = vmul.f32 %v9520_v15, %v16290_v47 }
 0x6d1   : > { %v14594_v27 = vld [vmem:[#allocation5 + $0x42c] sm:$0xf0]  ;;  %9050 = vmatpush.bf16.msra.mxu2 %v12454_v13  ;;  %9025 = vmatpush.bf16.msra.mxu0 %v11910_v50  ;;  %v16624_v40 = vsub.f32 %v16617_v59, %v9491_v0 }
 0x6d2   : > { %v12677_v4 = vld [vmem:[#allocation5 + $0x610] sm:$0xf]  ;;  %v12422_v48 = vor.u32 %v14594_v27, %v12421_v22 }
 0x6d3   : > { %v14658_v45 = vld [vmem:[#allocation5 + $0x62c] sm:$0xf0]  ;;  %9063 = vmatpush.bf16.msra.mxu3 %v12710_v3  ;;  %9038 = vmatpush.bf16.msra.mxu1 %v12166_v34  ;;  %v9507_v27 = vmul.f32 %v16624_v40, %v16624_v40 }
 0x6d4   : > { %v13157_v17 = vld [vmem:[#allocation5 + $0x9d0] sm:$0xf]  ;;  %v12678_v1 = vor.u32 %v14658_v45, %v12677_v4  ;;  %9026 = vmatmul.bf16.vlgmr.msra.gmra.mxu0 %v16536_v14 }
 0x6d5   : > { %v14778_v51 = vld [vmem:[#allocation5 + $0x9ec] sm:$0xf0]  ;;  %9051 = vmatpush.bf16.msra.mxu2 %v12422_v48 }
 0x6d6   : > { %v13413_v32 = vld [vmem:[#allocation5 + $0xbd0] sm:$0xf]  ;;  %v13158_v39 = vor.u32 %v14778_v51, %v13157_v17  ;;  %9039 = vmatmul.bf16.vlgmr.msra.gmra.mxu1 %v16546_v56  ;;  %v9521_v51 = vsel %vm1167_vm2, %v9507_v27, 0.0 }
 0x6d7   : > { %v14842_v57 = vld [vmem:[#allocation5 + $0xbec] sm:$0xf0]  ;;  %9064 = vmatpush.bf16.msra.mxu3 %v12678_v1  ;;  %v8832_v1 = vpop.f32.mrf.mxu1 }
 0x6d8   : > { %v13669_v6 = vld [vmem:[#allocation5 + $0xdd0] sm:$0xf]  ;;  %v13414_v24 = vor.u32 %v14842_v57, %v13413_v32  ;;  %9070 = vmatpush.bf16.msrb.mxu0 %v13158_v39  ;;  %9052 = vmatmul.bf16.vlgmr.msra.gmra.mxu2 %v16531_v38  ;;  %v16633_v57 = vadd.f32 1e-05, %v9570_v46  ;;  %v8821_v46 = vpop.f32.mrf.mxu0 }
 0x6d9   : > { %v14906_v10 = vld [vmem:[#allocation5 + $0xdec] sm:$0xf0] }
 0x6da   : > { %v13925_v37 = vld [vmem:[#allocation5 + $0xfd0] sm:$0xf]  ;;  %v13670_v41 = vor.u32 %v14906_v10, %v13669_v6  ;;  %9083 = vmatpush.bf16.msrb.mxu1 %v13414_v24  ;;  %9065 = vmatmul.bf16.vlgmr.msra.gmra.mxu3 %v16541_v58  ;;  %v9522_v6 = vrot.slane %v9521_v51, 4  ;;  %15089 = vrsqrt.f32 %v16633_v57  ;;  %vm9592_vm8 = vweird.f32 %v16633_v57 }
 0x6db   : > { %v14970_v8 = vld [vmem:[#allocation5 + $0xfec] sm:$0xf0] }
 0x6dc   : > { %v13125_v5 = vld [vmem:[#allocation5 + $0x990] sm:$0xf]  ;;  %v13926_v63 = vor.u32 %v14970_v8, %v13925_v37  ;;  %9096 = vmatpush.bf16.msrb.mxu2 %v13670_v41  ;;  %v9523_v39 = vadd.f32 %v9522_v6, %v9521_v51 }
 0x6dd   : > { %v14770_v35 = vld [vmem:[#allocation5 + $0x9ac] sm:$0xf0] }
 0x6de   : > { %v13381_v7 = vld [vmem:[#allocation5 + $0xb90] sm:$0xf]  ;;  %v13126_v43 = vor.u32 %v14770_v35, %v13125_v5  ;;  %9109 = vmatpush.bf16.msrb.mxu3 %v13926_v63  ;;  %v8833_v35 = vadd.f32 %v8832_v1, %v8819_v30 }
 0x6df   : > { %v14834_v49 = vld [vmem:[#allocation5 + $0xbac] sm:$0xf0] }
 0x6e0   : > { %v13637_v29 = vld [vmem:[#allocation5 + $0xd90] sm:$0xf]  ;;  %v13382_v25 = vor.u32 %v14834_v49, %v13381_v7  ;;  %9071 = vmatpush.bf16.msrb.mxu0 %v13126_v43  ;;  %v9524_v49 = vrot.slane %v9523_v39, 2  ;;  %v8845_v43 = vpop.f32.mrf.mxu2 }
 0x6e1   : > { %v14898_v36 = vld [vmem:[#allocation5 + $0xdac] sm:$0xf0] }
 0x6e2   : > { %v13893_v44 = vld [vmem:[#allocation5 + $0xf90] sm:$0xf]  ;;  %v13638_v42 = vor.u32 %v14898_v36, %v13637_v29  ;;  %9084 = vmatpush.bf16.msrb.mxu1 %v13382_v25  ;;  %v9525_v0 = vadd.f32 %v9524_v49, %v9523_v39  ;;  %v14518_v49 = vld [vmem:[#allocation5 + $0x1d4] sm:$0xf] }
 0x6e3   : > { %v14962_v52 = vld [vmem:[#allocation5 + $0xfac] sm:$0xf0] }
 0x6e4   : > { %v13093_v60 = vld [vmem:[#allocation5 + $0x950] sm:$0xf]  ;;  %v13894_v28 = vor.u32 %v14962_v52, %v13893_v44  ;;  %9097 = vmatpush.bf16.msrb.mxu2 %v13638_v42 }
 0x6e5   : > { %v14762_v2 = vld [vmem:[#allocation5 + $0x96c] sm:$0xf0] }
 0x6e6   : > { %v13349_v26 = vld [vmem:[#allocation5 + $0xb50] sm:$0xf]  ;;  %v13094_v22 = vor.u32 %v14762_v2, %v13093_v60  ;;  %9110 = vmatpush.bf16.msrb.mxu3 %v13894_v28  ;;  %v8858_v28 = vpop.f32.mrf.mxu3 }
 0x6e7   : > { %v14826_v12 = vld [vmem:[#allocation5 + $0xb6c] sm:$0xf0] }
 0x6e8   : > { %v13605_v62 = vld [vmem:[#allocation5 + $0xd50] sm:$0xf]  ;;  %v13350_v23 = vor.u32 %v14826_v12, %v13349_v26  ;;  %9072 = vmatpush.bf16.msrb.mxu0 %v13094_v22  ;;  %v8846_v26 = vadd.f32 %v8845_v43, %v8833_v35 }
 0x6e9   : > { %v14890_v20 = vld [vmem:[#allocation5 + $0xd6c] sm:$0xf0] }
 0x6ea   : > { %v13861_v11 = vld [vmem:[#allocation5 + $0xf50] sm:$0xf]  ;;  %v13606_v59 = vor.u32 %v14890_v20, %v13605_v62  ;;  %9085 = vmatpush.bf16.msrb.mxu1 %v13350_v23  ;;  %v9526_v20 = vrot.slane %v9525_v0, 1 }
 0x6eb   : > { %v14954_v13 = vld [vmem:[#allocation5 + $0xf6c] sm:$0xf0] }
 0x6ec   : > { %v13061_v19 = vld [vmem:[#allocation5 + $0x910] sm:$0xf]  ;;  %v13862_v45 = vor.u32 %v14954_v13, %v13861_v11  ;;  %9098 = vmatpush.bf16.msrb.mxu2 %v13606_v59  ;;  %v16636_v13 = vadd.f32 %v8858_v28, %v8846_v26 }
 0x6ed   : > { %v14754_v3 = vld [vmem:[#allocation5 + $0x92c] sm:$0xf0] }
 0x6ee   : > { %v13317_v4 = vld [vmem:[#allocation5 + $0xb10] sm:$0xf]  ;;  %v13062_v10 = vor.u32 %v14754_v3, %v13061_v19  ;;  %9111 = vmatpush.bf16.msrb.mxu3 %v13862_v45  ;;  %v8834_v3 = vpop.f32.mrf.mxu1  ;;  %v9527_v45 = vadd.f32 %v9526_v20, %v9525_v0  ;;  %v12103_v20 = vld [vmem:[#allocation5 + $0x1b0] sm:$0xf0] }
 0x6ef   : > { %v14818_v17 = vld [vmem:[#allocation5 + $0xb2c] sm:$0xf0]  ;;  %v12871_v3 = vld [vmem:[#allocation5 + $0x7b0] sm:$0xf0] }
 0x6f0   : > { %v13573_v33 = vld [vmem:[#allocation5 + $0xd10] sm:$0xf]  ;;  %v13318_v34 = vor.u32 %v14818_v17, %v13317_v4  ;;  %9073 = vmatpush.bf16.msrb.mxu0 %v13062_v10  ;;  %v16638_v4 = vpop.eup %15089  ;;  %v9571_v6 = vmul.f32 %v9527_v45, %v16290_v47 }
 0x6f1   : > { %v14882_v53 = vld [vmem:[#allocation5 + $0xd2c] sm:$0xf0]  ;;  %vm9593_vm7 = vweird.f32 %v16638_v4 }
 0x6f2   : > { %v13829_v32 = vld [vmem:[#allocation5 + $0xf10] sm:$0xf]  ;;  %v13574_v48 = vor.u32 %v14882_v53, %v13573_v33  ;;  %9086 = vmatpush.bf16.msrb.mxu1 %v13318_v34  ;;  %vm16662_vm10 = vmor %vm9592_vm8, %vm9593_vm7 }
 0x6f3   : > { %v14946_v50 = vld [vmem:[#allocation5 + $0xf2c] sm:$0xf0] }
 0x6f4   : > { %v13029_v37 = vld [vmem:[#allocation5 + $0x8d0] sm:$0xf]  ;;  %v13830_v5 = vor.u32 %v14946_v50, %v13829_v32  ;;  %9099 = vmatpush.bf16.msrb.mxu2 %v13574_v48 }
 0x6f5   : > { %v14746_v8 = vld [vmem:[#allocation5 + $0x8ec] sm:$0xf0] }
 0x6f6   : > { %v13285_v31 = vld [vmem:[#allocation5 + $0xad0] sm:$0xf]  ;;  %v13030_v29 = vor.u32 %v14746_v8, %v13029_v37  ;;  %9112 = vmatpush.bf16.msrb.mxu3 %v13830_v5  ;;  %v9587_v37 = vmul.f32 %v16638_v4, %v16633_v57 }
 0x6f7   : > { %v14810_v9 = vld [vmem:[#allocation5 + $0xaec] sm:$0xf0] }
 0x6f8   : > { %v13541_v24 = vld [vmem:[#allocation5 + $0xcd0] sm:$0xf]  ;;  %v13286_v36 = vor.u32 %v14810_v9, %v13285_v31  ;;  %9074 = vmatpush.bf16.msrb.mxu0 %v13030_v29  ;;  %v8847_v9 = vpop.f32.mrf.mxu2  ;;  %v12135_v29 = vld [vmem:[#allocation5 + $0x1f0] sm:$0xf0]  ;;  %v9588_v43 = vmul.f32 %v16638_v4, %v9587_v37 }
 0x6f9   : > { %v14874_v41 = vld [vmem:[#allocation5 + $0xcec] sm:$0xf0]  ;;  %v12138_v26 = vor.u32 %v14518_v49, %v12135_v29  ;;  %v12039_v9 = vld [vmem:[#allocation5 + $0x130] sm:$0xf0] }
 0x6fa   : > { %v13797_v7 = vld [vmem:[#allocation5 + $0xed0] sm:$0xf]  ;;  %v13542_v55 = vor.u32 %v14874_v41, %v13541_v24  ;;  %9087 = vmatpush.bf16.msrb.mxu1 %v13286_v36  ;;  %v16643_v24 = vadd.f32 1e-05, %v9571_v6  ;;  %v14582_v36 = vld [vmem:[#allocation5 + $0x3d4] sm:$0xf] }
 0x6fb   : > { %v14938_v63 = vld [vmem:[#allocation5 + $0xeec] sm:$0xf0]  ;;  %v14566_v6 = vld [vmem:[#allocation5 + $0x354] sm:$0xf] }
 0x6fc   : > { %v12997_v44 = vld [vmem:[#allocation5 + $0x890] sm:$0xf]  ;;  %v13798_v25 = vor.u32 %v14938_v63, %v13797_v7  ;;  %9100 = vmatpush.bf16.msrb.mxu2 %v13542_v55  ;;  %v8860_v63 = vpop.f32.mrf.mxu3  ;;  %15091 = vrsqrt.f32 %v16643_v24  ;;  %v12295_v49 = vld [vmem:[#allocation5 + $0x330] sm:$0xf0]  ;;  %vm9602_vm11 = vweird.f32 %v16643_v24 }
 0x6fd   : > { %v14738_v52 = vld [vmem:[#allocation5 + $0x8ac] sm:$0xf0]  ;;  %v14558_v63 = vld [vmem:[#allocation5 + $0x314] sm:$0xf] }
 0x6fe   : > { %v13253_v15 = vld [vmem:[#allocation5 + $0xa90] sm:$0xf]  ;;  %v12998_v11 = vor.u32 %v14738_v52, %v12997_v44  ;;  %9113 = vmatpush.bf16.msrb.mxu3 %v13798_v25  ;;  %v12391_v44 = vld [vmem:[#allocation5 + $0x3f0] sm:$0xf0] }
 0x6ff   : > { %v14802_v42 = vld [vmem:[#allocation5 + $0xaac] sm:$0xf0]  ;;  %v14646_v52 = vld [vmem:[#allocation5 + $0x5d4] sm:$0xf]  ;;  %v12394_v28 = vor.u32 %v14582_v36, %v12391_v44 }
 0x700   : > { %v13509_v60 = vld [vmem:[#allocation5 + $0xc90] sm:$0xf]  ;;  %v13254_v22 = vor.u32 %v14802_v42, %v13253_v15  ;;  %9075 = vmatpush.bf16.msrb.mxu0 %v12998_v11  ;;  %v12647_v15 = vld [vmem:[#allocation5 + $0x5f0] sm:$0xf0] }
 0x701   : > { %v14866_v2 = vld [vmem:[#allocation5 + $0xcac] sm:$0xf0]  ;;  %v14710_v42 = vld [vmem:[#allocation5 + $0x7d4] sm:$0xf] }
 0x702   : > { %v13765_v12 = vld [vmem:[#allocation5 + $0xe90] sm:$0xf]  ;;  %v13510_v27 = vor.u32 %v14866_v2, %v13509_v60  ;;  %9088 = vmatpush.bf16.msrb.mxu1 %v13254_v22  ;;  %v12903_v60 = vld [vmem:[#allocation5 + $0x7f0] sm:$0xf0]  ;;  %v16647_v45 = vpop.eup %15091 }
 0x703   : > { %v14930_v62 = vld [vmem:[#allocation5 + $0xeac] sm:$0xf0]  ;;  %v14574_v11 = vld [vmem:[#allocation5 + $0x394] sm:$0xf]  ;;  %v12906_v46 = vor.u32 %v14710_v42, %v12903_v60  ;;  %vm9603_vm9 = vweird.f32 %v16647_v45  ;;  %v12298_v42 = vor.u32 %v14558_v63, %v12295_v49  ;;  %v8871_v60 = vpop.f32.mrf.mxu0 }
 0x704   : > { %v12965_v23 = vld [vmem:[#allocation5 + $0x850] sm:$0xf]  ;;  %v13766_v17 = vor.u32 %v14930_v62, %v13765_v12  ;;  %9101 = vmatpush.bf16.msrb.mxu2 %v13510_v27  ;;  %v12650_v12 = vor.u32 %v14646_v52, %v12647_v15  ;;  %v14510_v62 = vld [vmem:[#allocation5 + $0x194] sm:$0xf]  ;;  %vm9604_vm12 = vmor %vm9602_vm11, %vm9603_vm9 }
 0x705   : > { %v14730_v59 = vld [vmem:[#allocation5 + $0x86c] sm:$0xf0]  ;;  %v12359_v22 = vld [vmem:[#allocation5 + $0x3b0] sm:$0xf0] }
 0x706   : > { %v13221_v19 = vld [vmem:[#allocation5 + $0xa50] sm:$0xf]  ;;  %v12966_v10 = vor.u32 %v14730_v59, %v12965_v23  ;;  %9114 = vmatpush.bf16.msrb.mxu3 %v13766_v17  ;;  %v14638_v27 = vld [vmem:[#allocation5 + $0x594] sm:$0xf]  ;;  %v9589_v59 = vmul.f32 0.5, %v9588_v43  ;;  %v12106_v17 = vor.u32 %v14510_v62, %v12103_v20 }
 0x707   : > { %v14794_v33 = vld [vmem:[#allocation5 + $0xa6c] sm:$0xf0]  ;;  %v12615_v23 = vld [vmem:[#allocation5 + $0x5b0] sm:$0xf0] }
 0x708   : > { %v13477_v53 = vld [vmem:[#allocation5 + $0xc50] sm:$0xf]  ;;  %v13222_v8 = vor.u32 %v14794_v33, %v13221_v19  ;;  %9076 = vmatpush.bf16.msrb.mxu0 %v12966_v10  ;;  %v14702_v19 = vld [vmem:[#allocation5 + $0x794] sm:$0xf]  ;;  %v9597_v33 = vmul.f32 %v16647_v45, %v16643_v24  ;;  %v9590_v37 = vsub.f32 1.5, %v9589_v59 }
 0x709   : > { %v14858_v51 = vld [vmem:[#allocation5 + $0xc6c] sm:$0xf0]  ;;  %v12874_v10 = vor.u32 %v14702_v19, %v12871_v3  ;;  %v14622_v36 = vld [vmem:[#allocation5 + $0x514] sm:$0xf] }
 0x70a   : > { %v13733_v32 = vld [vmem:[#allocation5 + $0xe50] sm:$0xf]  ;;  %v13478_v31 = vor.u32 %v14858_v51, %v13477_v53  ;;  %9089 = vmatpush.bf16.msrb.mxu1 %v13222_v8  ;;  %v12362_v53 = vor.u32 %v14574_v11, %v12359_v22  ;;  %v12618_v51 = vor.u32 %v14638_v27, %v12615_v23  ;;  %v9598_v8 = vmul.f32 %v16647_v45, %v9597_v33  ;;  %v14686_v15 = vld [vmem:[#allocation5 + $0x714] sm:$0xf] }
 0x70b   : > { %v14922_v50 = vld [vmem:[#allocation5 + $0xe6c] sm:$0xf0]  ;;  %v9591_v44 = vmul.f32 %v16638_v4, %v9590_v37  ;;  %v12807_v43 = vld [vmem:[#allocation5 + $0x730] sm:$0xf0] }
 0x70c   : > { %v12933_v30 = vld [vmem:[#allocation5 + $0x810] sm:$0xf]  ;;  %v13734_v41 = vor.u32 %v14922_v50, %v13733_v32  ;;  %9102 = vmatpush.bf16.msrb.mxu2 %v13478_v31  ;;  %v14502_v32 = vld [vmem:[#allocation5 + $0x154] sm:$0xf] }
 0x70d   : > { %v14722_v34 = vld [vmem:[#allocation5 + $0x82c] sm:$0xf0]  ;;  %v12071_v50 = vld [vmem:[#allocation5 + $0x170] sm:$0xf0]  ;;  %v9595_v24 = vsel %vm16662_vm10, %v16638_v4, %v9591_v44 }
 0x70e   : > { %v13189_v48 = vld [vmem:[#allocation5 + $0xa10] sm:$0xf]  ;;  %v12934_v55 = vor.u32 %v14722_v34, %v12933_v30  ;;  %9115 = vmatpush.bf16.msrb.mxu3 %v13734_v41  ;;  %v12327_v30 = vld [vmem:[#allocation5 + $0x370] sm:$0xf0]  ;;  %v9599_v41 = vmul.f32 0.5, %v9598_v8  ;;  %v9666_v4 = vmul.f32 %v9595_v24, %v16607_v21 }
 0x70f   : > { %v14786_v1 = vld [vmem:[#allocation5 + $0xa2c] sm:$0xf0]  ;;  %v14630_v34 = vld [vmem:[#allocation5 + $0x554] sm:$0xf] }
 0x710   : > { %v13445_v39 = vld [vmem:[#allocation5 + $0xc10] sm:$0xf]  ;;  %v13190_v0 = vor.u32 %v14786_v1, %v13189_v48  ;;  %9077 = vmatpush.bf16.msrb.mxu0 %v12934_v55  ;;  %v12583_v48 = vld [vmem:[#allocation5 + $0x570] sm:$0xf0]  ;;  %v9600_v52 = vsub.f32 1.5, %v9599_v41 }
 0x711   : > { %v14850_v5 = vld [vmem:[#allocation5 + $0xc2c] sm:$0xf0]  ;;  %v14694_v31 = vld [vmem:[#allocation5 + $0x754] sm:$0xf] }
 0x712   : > { %v13701_v35 = vld [vmem:[#allocation5 + $0xe10] sm:$0xf]  ;;  %v13446_v25 = vor.u32 %v14850_v5, %v13445_v39  ;;  %9090 = vmatpush.bf16.msrb.mxu1 %v13190_v0  ;;  %v12839_v1 = vld [vmem:[#allocation5 + $0x770] sm:$0xf0]  ;;  %v12074_v39 = vor.u32 %v14502_v32, %v12071_v50  ;;  %v8897_v32 = vpop.f32.mrf.mxu2 }
 0x713   : > { %v14914_v7 = vld [vmem:[#allocation5 + $0xe2c] sm:$0xf0]  ;;  %9078 = vmatmul.bf16.vlgmr.msrb.gmra.mxu0 %v16560_v18  ;;  %v14494_v5 = vld [vmem:[#allocation5 + $0x114] sm:$0xf]  ;;  %v12842_v29 = vor.u32 %v14694_v31, %v12839_v1 }
 0x714   : > { %v13702_v2 = vor.u32 %v14914_v7, %v13701_v35  ;;  %9103 = vmatpush.bf16.msrb.mxu2 %v13446_v25  ;;  %9122 = vmatpush.bf16.msra.mxu0 %v12138_v26  ;;  %v12330_v35 = vor.u32 %v14566_v6, %v12327_v30  ;;  %v12586_v7 = vor.u32 %v14630_v34, %v12583_v48  ;;  %v12551_v55 = vld [vmem:[#allocation5 + $0x530] sm:$0xf0]  ;;  %v8910_v48 = vpop.f32.mrf.mxu3 }
 0x715   : > { %9091 = vmatmul.bf16.vlgmr.msrb.gmra.mxu1 %v16570_v16  ;;  %v12042_v25 = vor.u32 %v14494_v5, %v12039_v9  ;;  %v9601_v26 = vmul.f32 %v16647_v45, %v9600_v52  ;;  %v12554_v57 = vor.u32 %v14622_v36, %v12551_v55  ;;  %v12007_v62 = vld [vmem:[#allocation5 + $0xf0] sm:$0xf0]  ;;  %v8873_v5 = vpop.f32.mrf.mxu0 }
 0x716   : > { %9116 = vmatpush.bf16.msrb.mxu3 %v13702_v2  ;;  %9135 = vmatpush.bf16.msra.mxu1 %v12394_v28  ;;  %v14486_v2 = vld [vmem:[#allocation5 + $0xd4] sm:$0xf]  ;;  %v8872_v28 = vadd.f32 %v8871_v60, %v16636_v13 }
 0x717   : > { %9104 = vmatmul.bf16.vlgmr.msrb.gmra.mxu2 %v16555_v54  ;;  %v14550_v20 = vld [vmem:[#allocation5 + $0x2d4] sm:$0xf]  ;;  %v9605_v23 = vsel %vm9604_vm12, %v16647_v45, %v9601_v26 }
 0x718   : > { %9148 = vmatpush.bf16.msra.mxu2 %v12650_v12  ;;  %9123 = vmatpush.bf16.msra.mxu0 %v12106_v17  ;;  %v8884_v12 = vpop.f32.mrf.mxu1  ;;  %v12263_v11 = vld [vmem:[#allocation5 + $0x2f0] sm:$0xf0]  ;;  %v9667_v3 = vmul.f32 %v9605_v23, %v16624_v40  ;;  %v12010_v17 = vor.u32 %v14486_v2, %v12007_v62 }
 0x719   : > { %9117 = vmatmul.bf16.vlgmr.msrb.gmra.mxu3 %v16565_v61  ;;  %v14614_v22 = vld [vmem:[#allocation5 + $0x4d4] sm:$0xf]  ;;  %v8885_v59 = vadd.f32 %v8884_v12, %v8872_v28 }
 0x71a   : > { %9161 = vmatpush.bf16.msra.mxu3 %v12906_v46  ;;  %9136 = vmatpush.bf16.msra.mxu1 %v12362_v53  ;;  %v12810_v46 = vor.u32 %v14686_v15, %v12807_v43  ;;  %v12519_v27 = vld [vmem:[#allocation5 + $0x4f0] sm:$0xf0]  ;;  %v12266_v53 = vor.u32 %v14550_v20, %v12263_v11  ;;  %v9682_v30 = vrot.slane %v9667_v3, 6  ;;  %v8899_v62 = vpop.f32.mrf.mxu2 }
 0x71b   : > { %v14678_v19 = vld [vmem:[#allocation5 + $0x6d4] sm:$0xf]  ;;  %v8898_v34 = vadd.f32 %v8897_v32, %v8885_v59 }
 0x71c   : > { %9149 = vmatpush.bf16.msra.mxu2 %v12618_v51  ;;  %9124 = vmatpush.bf16.msra.mxu0 %v12074_v39  ;;  %v12775_v13 = vld [vmem:[#allocation5 + $0x6f0] sm:$0xf0]  ;;  %v12522_v51 = vor.u32 %v14614_v22, %v12519_v27  ;;  %v16678_v1 = vsel %vm1167_vm2, %v9666_v4, %v9682_v30  ;;  %v8912_v27 = vpop.f32.mrf.mxu3 }
 0x71d   : > { %v14478_v33 = vld [vmem:[#allocation5 + $0x94] sm:$0xf]  ;;  %v12778_v45 = vor.u32 %v14678_v19, %v12775_v13  ;;  %v16680_v9 = vadd.f32 %v8910_v48, %v8898_v34 }
 0x71e   : > { %9162 = vmatpush.bf16.msra.mxu3 %v12874_v10  ;;  %9137 = vmatpush.bf16.msra.mxu1 %v12330_v35  ;;  %v11975_v50 = vld [vmem:[#allocation5 + $0xb0] sm:$0xf0] }
 0x71f   : > { %v14542_v6 = vld [vmem:[#allocation5 + $0x294] sm:$0xf]  ;;  %v11978_v39 = vor.u32 %v14478_v33, %v11975_v50  ;;  %v9448_v2 = vsel %vm1167_vm2, %v16680_v9, 0.0 }
 0x720   : > { %9150 = vmatpush.bf16.msra.mxu2 %v12586_v7  ;;  %9125 = vmatpush.bf16.msra.mxu0 %v12042_v25  ;;  %v12231_v10 = vld [vmem:[#allocation5 + $0x2b0] sm:$0xf0]  ;;  %v8886_v49 = vpop.f32.mrf.mxu1  ;;  %v9449_v19 = vrot.slane %v9448_v2, 4 }
 0x721   : > { %v14606_v37 = vld [vmem:[#allocation5 + $0x494] sm:$0xf]  ;;  %v12234_v21 = vor.u32 %v14542_v6, %v12231_v10 }
 0x722   : > { %9163 = vmatpush.bf16.msra.mxu3 %v12842_v29  ;;  %9138 = vmatpush.bf16.msra.mxu1 %v12298_v42  ;;  %v12487_v40 = vld [vmem:[#allocation5 + $0x4b0] sm:$0xf0]  ;;  %v9450_v48 = vadd.f32 %v9449_v19, %v9448_v2 }
 0x723   : > { %v14670_v8 = vld [vmem:[#allocation5 + $0x694] sm:$0xf]  ;;  %v12490_v41 = vor.u32 %v14606_v37, %v12487_v40 }
 0x724   : > { %9151 = vmatpush.bf16.msra.mxu2 %v12554_v57  ;;  %v12743_v31 = vld [vmem:[#allocation5 + $0x6b0] sm:$0xf0]  ;;  %9126 = vmatpush.bf16.msra.mxu0 %v12010_v17 }
 0x725   : > { %v14470_v35 = vld [vmem:[#allocation5 + $0x54] sm:$0xf]  ;;  %v12746_v29 = vor.u32 %v14670_v8, %v12743_v31 }
 0x726   : > { %9164 = vmatpush.bf16.msra.mxu3 %v12810_v46  ;;  %9139 = vmatpush.bf16.msra.mxu1 %v12266_v53  ;;  %v11943_v7 = vld [vmem:[#allocation5 + $0x70] sm:$0xf0] }
 0x727   : > { %v14534_v63 = vld [vmem:[#allocation5 + $0x254] sm:$0xf]  ;;  %v11946_v0 = vor.u32 %v14470_v35, %v11943_v7 }
 0x728   : > { %9152 = vmatpush.bf16.msra.mxu2 %v12522_v51  ;;  %v12199_v36 = vld [vmem:[#allocation5 + $0x270] sm:$0xf0]  ;;  %9127 = vmatpush.bf16.msra.mxu0 %v11978_v39 }
 0x729   : > { %v14598_v55 = vld [vmem:[#allocation5 + $0x454] sm:$0xf]  ;;  %v12202_v26 = vor.u32 %v14534_v63, %v12199_v36  ;;  %v9451_v36 = vrot.slane %v9450_v48, 2 }
 0x72a   : > { %9165 = vmatpush.bf16.msra.mxu3 %v12778_v45  ;;  %v12455_v44 = vld [vmem:[#allocation5 + $0x470] sm:$0xf0]  ;;  %9140 = vmatpush.bf16.msra.mxu1 %v12234_v21 }
 0x72b   : > { %v14662_v52 = vld [vmem:[#allocation5 + $0x654] sm:$0xf]  ;;  %v12458_v57 = vor.u32 %v14598_v55, %v12455_v44 }
 0x72c   : > { %v12711_v15 = vld [vmem:[#allocation5 + $0x670] sm:$0xf0]  ;;  %9153 = vmatpush.bf16.msra.mxu2 %v12490_v41  ;;  %9128 = vmatpush.bf16.msra.mxu0 %v11946_v0 }
 0x72d   : > { %v14462_v43 = vld [vmem:[#allocation5 + $0x14] sm:$0xf]  ;;  %v12714_v20 = vor.u32 %v14662_v52, %v12711_v15 }
 0x72e   : > { %v11911_v25 = vld [vmem:[#allocation5 + $0x30] sm:$0xf0]  ;;  %9166 = vmatpush.bf16.msra.mxu3 %v12746_v29  ;;  %9141 = vmatpush.bf16.msra.mxu1 %v12202_v26 }
 0x72f   : > { %v14526_v42 = vld [vmem:[#allocation5 + $0x214] sm:$0xf]  ;;  %v11914_v13 = vor.u32 %v14462_v43, %v11911_v25 }
 0x730   : > { %v12167_v60 = vld [vmem:[#allocation5 + $0x230] sm:$0xf0]  ;;  %9154 = vmatpush.bf16.msra.mxu2 %v12458_v57  ;;  %v9452_v57 = vadd.f32 %v9451_v36, %v9450_v48 }
 0x731   : > { %v14590_v28 = vld [vmem:[#allocation5 + $0x414] sm:$0xf]  ;;  %v12170_v33 = vor.u32 %v14526_v42, %v12167_v60  ;;  %9129 = vmatpush.bf16.msra.mxu0 %v11914_v13 }
 0x732   : > { %v12423_v12 = vld [vmem:[#allocation5 + $0x430] sm:$0xf0]  ;;  %9167 = vmatpush.bf16.msra.mxu3 %v12714_v20 }
 0x733   : > { %v14654_v11 = vld [vmem:[#allocation5 + $0x614] sm:$0xf]  ;;  %v12426_v53 = vor.u32 %v14590_v28, %v12423_v12  ;;  %9142 = vmatpush.bf16.msra.mxu1 %v12170_v33  ;;  %v9453_v33 = vrot.slane %v9452_v57, 1 }
 0x734   : > { %v12679_v46 = vld [vmem:[#allocation5 + $0x630] sm:$0xf0]  ;;  %9130 = vmatmul.bf16.vlgmr.msra.gmra.mxu0 %v16536_v14 }
 0x735   : > { %v14774_v22 = vld [vmem:[#allocation5 + $0x9d4] sm:$0xf]  ;;  %v12682_v50 = vor.u32 %v14654_v11, %v12679_v46  ;;  %9155 = vmatpush.bf16.msra.mxu2 %v12426_v53 }
 0x736   : > { %v13159_v24 = vld [vmem:[#allocation5 + $0x9f0] sm:$0xf0]  ;;  %9143 = vmatmul.bf16.vlgmr.msra.gmra.mxu1 %v16546_v56 }
 0x737   : > { %v14838_v23 = vld [vmem:[#allocation5 + $0xbd4] sm:$0xf]  ;;  %v13162_v6 = vor.u32 %v14774_v22, %v13159_v24  ;;  %9168 = vmatpush.bf16.msra.mxu3 %v12682_v50  ;;  %v16688_v24 = vpop.f32.mrf.mxu0 }
 0x738   : > { %v13415_v59 = vld [vmem:[#allocation5 + $0xbf0] sm:$0xf0]  ;;  %9156 = vmatmul.bf16.vlgmr.msra.gmra.mxu2 %v16531_v38 }
 0x739   : > { %v14902_v3 = vld [vmem:[#allocation5 + $0xdd4] sm:$0xf]  ;;  %v13418_v10 = vor.u32 %v14838_v23, %v13415_v59  ;;  %9174 = vmatpush.bf16.msrb.mxu0 %v13162_v6 }
 0x73a   : > { %v13671_v17 = vld [vmem:[#allocation5 + $0xdf0] sm:$0xf0]  ;;  %9169 = vmatmul.bf16.vlgmr.msra.gmra.mxu3 %v16541_v58 }
 0x73b   : > { %v14966_v51 = vld [vmem:[#allocation5 + $0xfd4] sm:$0xf]  ;;  %v13674_v4 = vor.u32 %v14902_v3, %v13671_v17  ;;  %9187 = vmatpush.bf16.msrb.mxu1 %v13418_v10  ;;  %v16690_v17 = vpop.f32.mrf.mxu1 }
 0x73c   : > { %v13927_v32 = vld [vmem:[#allocation5 + $0xff0] sm:$0xf0] }
 0x73d   : > { %v14766_v30 = vld [vmem:[#allocation5 + $0x994] sm:$0xf]  ;;  %v13930_v37 = vor.u32 %v14966_v51, %v13927_v32  ;;  %9200 = vmatpush.bf16.msrb.mxu2 %v13674_v4 }
 0x73e   : > { %v13127_v45 = vld [vmem:[#allocation5 + $0x9b0] sm:$0xf0] }
 0x73f   : > { %v14830_v34 = vld [vmem:[#allocation5 + $0xb94] sm:$0xf]  ;;  %v13130_v21 = vor.u32 %v14766_v30, %v13127_v45  ;;  %9213 = vmatpush.bf16.msrb.mxu3 %v13930_v37  ;;  %v16692_v37 = vpop.f32.mrf.mxu2 }
 0x740   : > { %v13383_v40 = vld [vmem:[#allocation5 + $0xbb0] sm:$0xf0] }
 0x741   : > { %v14894_v8 = vld [vmem:[#allocation5 + $0xd94] sm:$0xf]  ;;  %v13386_v35 = vor.u32 %v14830_v34, %v13383_v40  ;;  %9175 = vmatpush.bf16.msrb.mxu0 %v13130_v21  ;;  %v9454_v40 = vadd.f32 %v9453_v33, %v9452_v57  ;;  %v16694_v21 = vpop.f32.mrf.mxu3  ;;  %v12141_v33 = vld [vmem:[#allocation5 + $0x1d8] sm:$0xf] }
 0x742   : > { %v13639_v31 = vld [vmem:[#allocation5 + $0xdb0] sm:$0xf0] }
 0x743   : > { %v14958_v39 = vld [vmem:[#allocation5 + $0xf94] sm:$0xf]  ;;  %v13642_v7 = vor.u32 %v14894_v8, %v13639_v31  ;;  %9188 = vmatpush.bf16.msrb.mxu1 %v13386_v35 }
 0x744   : > { %v13895_v5 = vld [vmem:[#allocation5 + $0xfb0] sm:$0xf0] }
 0x745   : > { %v14758_v41 = vld [vmem:[#allocation5 + $0x954] sm:$0xf]  ;;  %v13898_v55 = vor.u32 %v14958_v39, %v13895_v5  ;;  %9201 = vmatpush.bf16.msrb.mxu2 %v13642_v7 }
 0x746   : > { %v13095_v63 = vld [vmem:[#allocation5 + $0x970] sm:$0xf0] }
 0x747   : > { %v14822_v49 = vld [vmem:[#allocation5 + $0xb54] sm:$0xf]  ;;  %v13098_v0 = vor.u32 %v14758_v41, %v13095_v63  ;;  %9214 = vmatpush.bf16.msrb.mxu3 %v13898_v55  ;;  %v8925_v63 = vpop.f32.mrf.mxu0 }
 0x748   : > { %v13351_v29 = vld [vmem:[#allocation5 + $0xb70] sm:$0xf0]  ;;  %v14579_v63 = vld [vmem:[#allocation5 + $0x3b4] sm:$0xf0] }
 0x749   : > { %v14886_v44 = vld [vmem:[#allocation5 + $0xd54] sm:$0xf]  ;;  %v13354_v25 = vor.u32 %v14822_v49, %v13351_v29  ;;  %9176 = vmatpush.bf16.msrb.mxu0 %v13098_v0 }
 0x74a   : > { %v13607_v52 = vld [vmem:[#allocation5 + $0xd70] sm:$0xf0] }
 0x74b   : > { %v14950_v15 = vld [vmem:[#allocation5 + $0xf54] sm:$0xf]  ;;  %v13610_v42 = vor.u32 %v14886_v44, %v13607_v52  ;;  %9189 = vmatpush.bf16.msrb.mxu1 %v13354_v25  ;;  %v8938_v52 = vpop.f32.mrf.mxu1 }
 0x74c   : > { %v13863_v43 = vld [vmem:[#allocation5 + $0xf70] sm:$0xf0] }
 0x74d   : > { %v14750_v60 = vld [vmem:[#allocation5 + $0x914] sm:$0xf]  ;;  %v13866_v28 = vor.u32 %v14950_v15, %v13863_v43  ;;  %9202 = vmatpush.bf16.msrb.mxu2 %v13610_v42  ;;  %v9492_v15 = vmul.f32 %v9454_v40, %v16290_v47 }
 0x74e   : > { %v13063_v2 = vld [vmem:[#allocation5 + $0x930] sm:$0xf0] }
 0x74f   : > { %v14814_v26 = vld [vmem:[#allocation5 + $0xb14] sm:$0xf]  ;;  %v13066_v22 = vor.u32 %v14750_v60, %v13063_v2  ;;  %9215 = vmatpush.bf16.msrb.mxu3 %v13866_v28 }
 0x750   : > { %v13319_v12 = vld [vmem:[#allocation5 + $0xb30] sm:$0xf0] }
 0x751   : > { %v14878_v62 = vld [vmem:[#allocation5 + $0xd14] sm:$0xf]  ;;  %v13322_v23 = vor.u32 %v14814_v26, %v13319_v12  ;;  %9177 = vmatpush.bf16.msrb.mxu0 %v13066_v22  ;;  %v8951_v22 = vpop.f32.mrf.mxu2 }
 0x752   : > { %v13575_v20 = vld [vmem:[#allocation5 + $0xd30] sm:$0xf0]  ;;  %v14499_v22 = vld [vmem:[#allocation5 + $0x134] sm:$0xf0] }
 0x753   : > { %v14942_v11 = vld [vmem:[#allocation5 + $0xf14] sm:$0xf]  ;;  %v13578_v59 = vor.u32 %v14878_v62, %v13575_v20  ;;  %9190 = vmatpush.bf16.msrb.mxu1 %v13322_v23 }
 0x754   : > { %v13831_v46 = vld [vmem:[#allocation5 + $0xf30] sm:$0xf0] }
 0x755   : > { %v14742_v27 = vld [vmem:[#allocation5 + $0x8d4] sm:$0xf]  ;;  %v13834_v53 = vor.u32 %v14942_v11, %v13831_v46  ;;  %9203 = vmatpush.bf16.msrb.mxu2 %v13578_v59 }
 0x756   : > { %v13031_v19 = vld [vmem:[#allocation5 + $0x8f0] sm:$0xf0] }
 0x757   : > { %v14806_v13 = vld [vmem:[#allocation5 + $0xad4] sm:$0xf]  ;;  %v13034_v10 = vor.u32 %v14742_v27, %v13031_v19  ;;  %9216 = vmatpush.bf16.msrb.mxu3 %v13834_v53  ;;  %v16698_v27 = vsub.f32 %v16680_v9, %v9492_v15  ;;  %v14523_v53 = vld [vmem:[#allocation5 + $0x1f4] sm:$0xf0] }
 0x758   : > { %v13287_v3 = vld [vmem:[#allocation5 + $0xaf0] sm:$0xf0]  ;;  %v12909_v9 = vld [vmem:[#allocation5 + $0x7d8] sm:$0xf]  ;;  %v12142_v40 = vor.u32 %v14523_v53, %v12141_v33 }
 0x759   : > { %v14870_v51 = vld [vmem:[#allocation5 + $0xcd4] sm:$0xf]  ;;  %v13290_v4 = vor.u32 %v14806_v13, %v13287_v3  ;;  %9178 = vmatpush.bf16.msrb.mxu0 %v13034_v10  ;;  %v8964_v3 = vpop.f32.mrf.mxu3  ;;  %v14651_v10 = vld [vmem:[#allocation5 + $0x5f4] sm:$0xf0] }
 0x75a   : > { %v13543_v32 = vld [vmem:[#allocation5 + $0xcf0] sm:$0xf0]  ;;  %v14627_v3 = vld [vmem:[#allocation5 + $0x534] sm:$0xf0] }
 0x75b   : > { %v14934_v50 = vld [vmem:[#allocation5 + $0xed4] sm:$0xf]  ;;  %v13546_v30 = vor.u32 %v14870_v51, %v13543_v32  ;;  %9191 = vmatpush.bf16.msrb.mxu1 %v13290_v4  ;;  %v12397_v51 = vld [vmem:[#allocation5 + $0x3d8] sm:$0xf] }
 0x75c   : > { %v13799_v6 = vld [vmem:[#allocation5 + $0xef0] sm:$0xf0]  ;;  %v12813_v53 = vld [vmem:[#allocation5 + $0x718] sm:$0xf] }
 0x75d   : > { %v14734_v45 = vld [vmem:[#allocation5 + $0x894] sm:$0xf]  ;;  %v13802_v8 = vor.u32 %v14934_v50, %v13799_v6  ;;  %9204 = vmatpush.bf16.msrb.mxu2 %v13546_v30  ;;  %v14587_v50 = vld [vmem:[#allocation5 + $0x3f4] sm:$0xf0] }
 0x75e   : > { %v12999_v34 = vld [vmem:[#allocation5 + $0x8b0] sm:$0xf0]  ;;  %v12653_v6 = vld [vmem:[#allocation5 + $0x5d8] sm:$0xf] }
 0x75f   : > { %v14798_v48 = vld [vmem:[#allocation5 + $0xa94] sm:$0xf]  ;;  %v13002_v7 = vor.u32 %v14734_v45, %v12999_v34  ;;  %9217 = vmatpush.bf16.msrb.mxu3 %v13802_v8  ;;  %v14715_v45 = vld [vmem:[#allocation5 + $0x7f4] sm:$0xf0]  ;;  %v9508_v34 = vmul.f32 %v16698_v27, %v16698_v27  ;;  %v8937_v8 = vadd.f32 %v16690_v17, %v16688_v24 }
 0x760   : > { %v13255_v31 = vld [vmem:[#allocation5 + $0xab0] sm:$0xf0] }
 0x761   : > { %v14862_v39 = vld [vmem:[#allocation5 + $0xc94] sm:$0xf]  ;;  %v13258_v49 = vor.u32 %v14798_v48, %v13255_v31  ;;  %9179 = vmatpush.bf16.msrb.mxu0 %v13002_v7  ;;  %v12398_v31 = vor.u32 %v14587_v50, %v12397_v51  ;;  %v12910_v7 = vor.u32 %v14715_v45, %v12909_v9  ;;  %v8950_v24 = vadd.f32 %v16692_v37, %v8937_v8  ;;  %v14691_v51 = vld [vmem:[#allocation5 + $0x734] sm:$0xf0]  ;;  %v8975_v50 = vpop.f32.mrf.mxu0 }
 0x762   : > { %v13511_v5 = vld [vmem:[#allocation5 + $0xcb0] sm:$0xf0]  ;;  %v14491_v9 = vld [vmem:[#allocation5 + $0xf4] sm:$0xf0] }
 0x763   : > { %v14926_v41 = vld [vmem:[#allocation5 + $0xe94] sm:$0xf]  ;;  %v13514_v29 = vor.u32 %v14862_v39, %v13511_v5  ;;  %9192 = vmatpush.bf16.msrb.mxu1 %v13258_v49  ;;  %v12654_v39 = vor.u32 %v14651_v10, %v12653_v6  ;;  %v12109_v5 = vld [vmem:[#allocation5 + $0x198] sm:$0xf] }
 0x764   : > { %v13767_v35 = vld [vmem:[#allocation5 + $0xeb0] sm:$0xf0]  ;;  %v12621_v49 = vld [vmem:[#allocation5 + $0x598] sm:$0xf] }
 0x765   : > { %v14726_v36 = vld [vmem:[#allocation5 + $0x854] sm:$0xf]  ;;  %v13770_v43 = vor.u32 %v14926_v41, %v13767_v35  ;;  %9205 = vmatpush.bf16.msrb.mxu2 %v13514_v29  ;;  %v14515_v41 = vld [vmem:[#allocation5 + $0x1b4] sm:$0xf0] }
 0x766   : > { %v12967_v55 = vld [vmem:[#allocation5 + $0x870] sm:$0xf0]  ;;  %v12365_v35 = vld [vmem:[#allocation5 + $0x398] sm:$0xf]  ;;  %v12110_v52 = vor.u32 %v14515_v41, %v12109_v5 }
 0x767   : > { %v14790_v44 = vld [vmem:[#allocation5 + $0xa54] sm:$0xf]  ;;  %v12970_v26 = vor.u32 %v14726_v36, %v12967_v55  ;;  %9218 = vmatpush.bf16.msrb.mxu3 %v13770_v43  ;;  %v14643_v29 = vld [vmem:[#allocation5 + $0x5b4] sm:$0xf0]  ;;  %v12366_v17 = vor.u32 %v14579_v63, %v12365_v35 }
 0x768   : > { %v13223_v0 = vld [vmem:[#allocation5 + $0xa70] sm:$0xf0]  ;;  %v12877_v36 = vld [vmem:[#allocation5 + $0x798] sm:$0xf]  ;;  %v12622_v15 = vor.u32 %v14643_v29, %v12621_v49  ;;  %v9001_v49 = vpop.f32.mrf.mxu2 }
 0x769   : > { %v14854_v25 = vld [vmem:[#allocation5 + $0xc54] sm:$0xf]  ;;  %v13226_v12 = vor.u32 %v14790_v44, %v13223_v0  ;;  %9180 = vmatpush.bf16.msrb.mxu0 %v12970_v26  ;;  %v14707_v55 = vld [vmem:[#allocation5 + $0x7b4] sm:$0xf0]  ;;  %v9528_v44 = vsel %vm1167_vm2, %v9508_v34, 0.0  ;;  %v12814_v34 = vor.u32 %v14691_v51, %v12813_v53 }
 0x76a   : > { %v13479_v42 = vld [vmem:[#allocation5 + $0xc70] sm:$0xf0]  ;;  %v12077_v43 = vld [vmem:[#allocation5 + $0x158] sm:$0xf] }
 0x76b   : > { %v14918_v60 = vld [vmem:[#allocation5 + $0xe54] sm:$0xf]  ;;  %v13482_v62 = vor.u32 %v14854_v25, %v13479_v42  ;;  %9193 = vmatpush.bf16.msrb.mxu1 %v13226_v12  ;;  %v14507_v0 = vld [vmem:[#allocation5 + $0x174] sm:$0xf0]  ;;  %v12878_v42 = vor.u32 %v14707_v55, %v12877_v36 }
 0x76c   : > { %v13735_v2 = vld [vmem:[#allocation5 + $0xe70] sm:$0xf0]  ;;  %v12333_v25 = vld [vmem:[#allocation5 + $0x358] sm:$0xf]  ;;  %v12078_v37 = vor.u32 %v14507_v0, %v12077_v43 }
 0x76d   : > { %v14718_v57 = vld [vmem:[#allocation5 + $0x814] sm:$0xf]  ;;  %v13738_v23 = vor.u32 %v14918_v60, %v13735_v2  ;;  %9206 = vmatpush.bf16.msrb.mxu2 %v13482_v62  ;;  %v14571_v60 = vld [vmem:[#allocation5 + $0x374] sm:$0xf0]  ;;  %v8963_v62 = vadd.f32 %v16694_v21, %v8950_v24  ;;  %v9014_v24 = vpop.f32.mrf.mxu3 }
 0x76e   : > { %v12935_v28 = vld [vmem:[#allocation5 + $0x830] sm:$0xf0]  ;;  %v12589_v2 = vld [vmem:[#allocation5 + $0x558] sm:$0xf] }
 0x76f   : > { %v14782_v20 = vld [vmem:[#allocation5 + $0xa14] sm:$0xf]  ;;  %v12938_v32 = vor.u32 %v14718_v57, %v12935_v28  ;;  %9219 = vmatpush.bf16.msrb.mxu3 %v13738_v23  ;;  %v14635_v26 = vld [vmem:[#allocation5 + $0x574] sm:$0xf0]  ;;  %v9529_v57 = vrot.slane %v9528_v44, 4  ;;  %v8976_v10 = vadd.f32 %v8975_v50, %v8963_v62 }
 0x770   : > { %v13191_v11 = vld [vmem:[#allocation5 + $0xa30] sm:$0xf0]  ;;  %v12845_v28 = vld [vmem:[#allocation5 + $0x758] sm:$0xf] }
 0x771   : > { %v14846_v46 = vld [vmem:[#allocation5 + $0xc14] sm:$0xf]  ;;  %v13194_v4 = vor.u32 %v14782_v20, %v13191_v11  ;;  %9181 = vmatpush.bf16.msrb.mxu0 %v12938_v32  ;;  %v14699_v12 = vld [vmem:[#allocation5 + $0x774] sm:$0xf0]  ;;  %v12334_v20 = vor.u32 %v14571_v60, %v12333_v25  ;;  %v12590_v11 = vor.u32 %v14635_v26, %v12589_v2  ;;  %v9530_v33 = vadd.f32 %v9529_v57, %v9528_v44  ;;  %v8977_v57 = vpop.f32.mrf.mxu0 }
 0x772   : > { %v13447_v59 = vld [vmem:[#allocation5 + $0xc30] sm:$0xf0]  ;;  %v12301_v23 = vld [vmem:[#allocation5 + $0x318] sm:$0xf] }
 0x773   : > { %v14910_v19 = vld [vmem:[#allocation5 + $0xe14] sm:$0xf]  ;;  %v13450_v30 = vor.u32 %v14846_v46, %v13447_v59  ;;  %9194 = vmatpush.bf16.msrb.mxu1 %v13194_v4  ;;  %v12045_v46 = vld [vmem:[#allocation5 + $0x118] sm:$0xf]  ;;  %v12846_v59 = vor.u32 %v14699_v12, %v12845_v28  ;;  %v8988_v4 = vpop.f32.mrf.mxu1 }
 0x774   : > { %v13703_v13 = vld [vmem:[#allocation5 + $0xe30] sm:$0xf0]  ;;  %9182 = vmatmul.bf16.vlgmr.msrb.gmra.mxu0 %v16560_v18  ;;  %v12046_v32 = vor.u32 %v14499_v22, %v12045_v46  ;;  %v12269_v45 = vld [vmem:[#allocation5 + $0x2d8] sm:$0xf] }
 0x775   : > { %v13706_v48 = vor.u32 %v14910_v19, %v13703_v13  ;;  %9207 = vmatpush.bf16.msrb.mxu2 %v13450_v30  ;;  %9226 = vmatpush.bf16.msra.mxu0 %v12142_v40  ;;  %v14563_v19 = vld [vmem:[#allocation5 + $0x334] sm:$0xf0] }
 0x776   : > { %9195 = vmatmul.bf16.vlgmr.msrb.gmra.mxu1 %v16570_v16  ;;  %v12557_v13 = vld [vmem:[#allocation5 + $0x518] sm:$0xf]  ;;  %v12302_v21 = vor.u32 %v14563_v19, %v12301_v23 }
 0x777   : > { %9220 = vmatpush.bf16.msrb.mxu3 %v13706_v48  ;;  %9239 = vmatpush.bf16.msra.mxu1 %v12398_v31  ;;  %v12558_v6 = vor.u32 %v14627_v3, %v12557_v13  ;;  %v12013_v30 = vld [vmem:[#allocation5 + $0xd8] sm:$0xf]  ;;  %v9531_v31 = vrot.slane %v9530_v33, 2 }
 0x778   : > { %9208 = vmatmul.bf16.vlgmr.msrb.gmra.mxu2 %v16555_v54  ;;  %v14555_v48 = vld [vmem:[#allocation5 + $0x2f4] sm:$0xf0]  ;;  %v12014_v35 = vor.u32 %v14491_v9, %v12013_v30 }
 0x779   : > { %9252 = vmatpush.bf16.msra.mxu2 %v12654_v39  ;;  %9227 = vmatpush.bf16.msra.mxu0 %v12110_v52  ;;  %v12525_v40 = vld [vmem:[#allocation5 + $0x4d8] sm:$0xf]  ;;  %v8989_v39 = vadd.f32 %v8988_v4, %v8976_v10  ;;  %v9532_v0 = vadd.f32 %v9531_v31, %v9530_v33  ;;  %v9016_v31 = vpop.f32.mrf.mxu3 }
 0x77a   : > { %9221 = vmatmul.bf16.vlgmr.msrb.gmra.mxu3 %v16565_v61  ;;  %v14619_v8 = vld [vmem:[#allocation5 + $0x4f4] sm:$0xf0] }
 0x77b   : > { %9265 = vmatpush.bf16.msra.mxu3 %v12910_v7  ;;  %9240 = vmatpush.bf16.msra.mxu1 %v12366_v17  ;;  %v12781_v5 = vld [vmem:[#allocation5 + $0x6d8] sm:$0xf]  ;;  %v12270_v7 = vor.u32 %v14555_v48, %v12269_v45  ;;  %v12526_v63 = vor.u32 %v14619_v8, %v12525_v40  ;;  %v9002_v52 = vadd.f32 %v9001_v49, %v8989_v39  ;;  %v9533_v19 = vrot.slane %v9532_v0, 1  ;;  %v9003_v45 = vpop.f32.mrf.mxu2 }
 0x77c   : > { %v14683_v41 = vld [vmem:[#allocation5 + $0x6f4] sm:$0xf0] }
 0x77d   : > { %9253 = vmatpush.bf16.msra.mxu2 %v12622_v15  ;;  %9228 = vmatpush.bf16.msra.mxu0 %v12078_v37  ;;  %v11981_v29 = vld [vmem:[#allocation5 + $0x98] sm:$0xf]  ;;  %v12782_v44 = vor.u32 %v14683_v41, %v12781_v5  ;;  %v16711_v60 = vadd.f32 %v9014_v24, %v9002_v52  ;;  %v9534_v24 = vadd.f32 %v9533_v19, %v9532_v0 }
 0x77e   : > { %v14483_v36 = vld [vmem:[#allocation5 + $0xb4] sm:$0xf0] }
 0x77f   : > { %9266 = vmatpush.bf16.msra.mxu3 %v12878_v42  ;;  %9241 = vmatpush.bf16.msra.mxu1 %v12334_v20  ;;  %v12237_v55 = vld [vmem:[#allocation5 + $0x298] sm:$0xf]  ;;  %v11982_v2 = vor.u32 %v14483_v36, %v11981_v29  ;;  %v9455_v46 = vsel %vm1167_vm2, %v16711_v60, 0.0  ;;  %v9572_v0 = vmul.f32 %v9534_v24, %v16290_v47 }
 0x780   : > { %v14547_v17 = vld [vmem:[#allocation5 + $0x2b4] sm:$0xf0]  ;;  %v9456_v13 = vrot.slane %v9455_v46, 4 }
 0x781   : > { %9254 = vmatpush.bf16.msra.mxu2 %v12590_v11  ;;  %9229 = vmatpush.bf16.msra.mxu0 %v12046_v32  ;;  %v12493_v15 = vld [vmem:[#allocation5 + $0x498] sm:$0xf]  ;;  %v12238_v28 = vor.u32 %v14547_v17, %v12237_v55  ;;  %v8990_v11 = vpop.f32.mrf.mxu1 }
 0x782   : > { %v14611_v43 = vld [vmem:[#allocation5 + $0x4b4] sm:$0xf0] }
 0x783   : > { %9267 = vmatpush.bf16.msra.mxu3 %v12846_v59  ;;  %9242 = vmatpush.bf16.msra.mxu1 %v12302_v21  ;;  %v12749_v25 = vld [vmem:[#allocation5 + $0x698] sm:$0xf]  ;;  %v12494_v12 = vor.u32 %v14611_v43, %v12493_v15  ;;  %v9457_v21 = vadd.f32 %v9456_v13, %v9455_v46 }
 0x784   : > { %v14675_v42 = vld [vmem:[#allocation5 + $0x6b4] sm:$0xf0] }
 0x785   : > { %9255 = vmatpush.bf16.msra.mxu2 %v12558_v6  ;;  %9230 = vmatpush.bf16.msra.mxu0 %v12014_v35  ;;  %v11949_v26 = vld [vmem:[#allocation5 + $0x58] sm:$0xf]  ;;  %v12750_v22 = vor.u32 %v14675_v42, %v12749_v25  ;;  %v9458_v39 = vrot.slane %v9457_v21, 2 }
 0x786   : > { %v14475_v37 = vld [vmem:[#allocation5 + $0x74] sm:$0xf0] }
 0x787   : > { %9268 = vmatpush.bf16.msra.mxu3 %v12814_v34  ;;  %9243 = vmatpush.bf16.msra.mxu1 %v12270_v7  ;;  %v12205_v62 = vld [vmem:[#allocation5 + $0x258] sm:$0xf]  ;;  %v11950_v53 = vor.u32 %v14475_v37, %v11949_v26  ;;  %v9459_v29 = vadd.f32 %v9458_v39, %v9457_v21 }
 0x788   : > { %v14539_v20 = vld [vmem:[#allocation5 + $0x274] sm:$0xf0] }
 0x789   : > { %9256 = vmatpush.bf16.msra.mxu2 %v12526_v63  ;;  %v12461_v23 = vld [vmem:[#allocation5 + $0x458] sm:$0xf]  ;;  %9231 = vmatpush.bf16.msra.mxu0 %v11982_v2  ;;  %v12206_v6 = vor.u32 %v14539_v20, %v12205_v62  ;;  %v9460_v25 = vrot.slane %v9459_v29, 1 }
 0x78a   : > { %v14603_v59 = vld [vmem:[#allocation5 + $0x474] sm:$0xf0] }
 0x78b   : > { %9269 = vmatpush.bf16.msra.mxu3 %v12782_v44  ;;  %v12717_v3 = vld [vmem:[#allocation5 + $0x658] sm:$0xf]  ;;  %9244 = vmatpush.bf16.msra.mxu1 %v12238_v28  ;;  %v12462_v10 = vor.u32 %v14603_v59, %v12461_v23  ;;  %v9461_v20 = vadd.f32 %v9460_v25, %v9459_v29  ;;  %v9027_v29 = vpop.f32.mrf.mxu0 }
 0x78c   : > { %v14667_v33 = vld [vmem:[#allocation5 + $0x674] sm:$0xf0] }
 0x78d   : > { %v11917_v51 = vld [vmem:[#allocation5 + $0x18] sm:$0xf]  ;;  %9257 = vmatpush.bf16.msra.mxu2 %v12494_v12  ;;  %v12718_v34 = vor.u32 %v14667_v33, %v12717_v3  ;;  %9232 = vmatpush.bf16.msra.mxu0 %v11950_v53  ;;  %v9493_v23 = vmul.f32 %v9461_v20, %v16290_v47 }
 0x78e   : > { %v14467_v32 = vld [vmem:[#allocation5 + $0x34] sm:$0xf0] }
 0x78f   : > { %v12173_v50 = vld [vmem:[#allocation5 + $0x218] sm:$0xf]  ;;  %9270 = vmatpush.bf16.msra.mxu3 %v12750_v22  ;;  %v11918_v35 = vor.u32 %v14467_v32, %v11917_v51  ;;  %9245 = vmatpush.bf16.msra.mxu1 %v12206_v6  ;;  %v16719_v21 = vsub.f32 %v16711_v60, %v9493_v23 }
 0x790   : > { %v14531_v4 = vld [vmem:[#allocation5 + $0x234] sm:$0xf0] }
 0x791   : > { %v12429_v30 = vld [vmem:[#allocation5 + $0x418] sm:$0xf]  ;;  %9258 = vmatpush.bf16.msra.mxu2 %v12462_v10  ;;  %v12174_v36 = vor.u32 %v14531_v4, %v12173_v50  ;;  %9233 = vmatpush.bf16.msra.mxu0 %v11918_v35  ;;  %v16723_v4 = vadd.f32 1e-05, %v9572_v0 }
 0x792   : > { %v14595_v9 = vld [vmem:[#allocation5 + $0x434] sm:$0xf0] }
 0x793   : > { %v12685_v48 = vld [vmem:[#allocation5 + $0x618] sm:$0xf]  ;;  %v12430_v55 = vor.u32 %v14595_v9, %v12429_v30  ;;  %9271 = vmatpush.bf16.msra.mxu3 %v12718_v34  ;;  %9246 = vmatpush.bf16.msra.mxu1 %v12174_v36  ;;  %v9509_v9 = vmul.f32 %v16719_v21, %v16719_v21  ;;  %15093 = vrsqrt.f32 %v16723_v4  ;;  %vm9612_vm14 = vweird.f32 %v16723_v4 }
 0x794   : > { %v14659_v40 = vld [vmem:[#allocation5 + $0x634] sm:$0xf0]  ;;  %9234 = vmatmul.bf16.vlgmr.msra.gmra.mxu0 %v16536_v14 }
 0x795   : > { %v13165_v8 = vld [vmem:[#allocation5 + $0x9d8] sm:$0xf]  ;;  %v12686_v17 = vor.u32 %v14659_v40, %v12685_v48  ;;  %9259 = vmatpush.bf16.msra.mxu2 %v12430_v55 }
 0x796   : > { %v14779_v5 = vld [vmem:[#allocation5 + $0x9f4] sm:$0xf0]  ;;  %9247 = vmatmul.bf16.vlgmr.msra.gmra.mxu1 %v16546_v56 }
 0x797   : > { %v13421_v41 = vld [vmem:[#allocation5 + $0xbd8] sm:$0xf]  ;;  %v13166_v15 = vor.u32 %v14779_v5, %v13165_v8  ;;  %9272 = vmatpush.bf16.msra.mxu3 %v12686_v17  ;;  %v9040_v17 = vpop.f32.mrf.mxu1 }
 0x798   : > { %v14843_v7 = vld [vmem:[#allocation5 + $0xbf4] sm:$0xf0]  ;;  %9260 = vmatmul.bf16.vlgmr.msra.gmra.mxu2 %v16531_v38 }
 0x799   : > { %v13677_v63 = vld [vmem:[#allocation5 + $0xdd8] sm:$0xf]  ;;  %v13422_v42 = vor.u32 %v14843_v7, %v13421_v41  ;;  %9278 = vmatpush.bf16.msrb.mxu0 %v13166_v15  ;;  %v9535_v41 = vsel %vm1167_vm2, %v9509_v9, 0.0  ;;  %v16730_v23 = vpop.eup %15093  ;;  %v9029_v9 = vpop.f32.mrf.mxu0 }
 0x79a   : > { %v14907_v49 = vld [vmem:[#allocation5 + $0xdf4] sm:$0xf0]  ;;  %9273 = vmatmul.bf16.vlgmr.msra.gmra.mxu3 %v16541_v58  ;;  %v12111_v9 = vld [vmem:[#allocation5 + $0x1b8] sm:$0xf0]  ;;  %vm9613_vm13 = vweird.f32 %v16730_v23 }
 0x79b   : > { %v13933_v44 = vld [vmem:[#allocation5 + $0xfd8] sm:$0xf]  ;;  %v13678_v2 = vor.u32 %v14907_v49, %v13677_v63  ;;  %9291 = vmatpush.bf16.msrb.mxu1 %v13422_v42  ;;  %v9536_v63 = vrot.slane %v9535_v41, 4  ;;  %vm16755_vm15 = vmor %vm9612_vm14, %vm9613_vm13 }
 0x79c   : > { %v14971_v52 = vld [vmem:[#allocation5 + $0xff4] sm:$0xf0] }
 0x79d   : > { %v13133_v43 = vld [vmem:[#allocation5 + $0x998] sm:$0xf]  ;;  %v13934_v28 = vor.u32 %v14971_v52, %v13933_v44  ;;  %9304 = vmatpush.bf16.msrb.mxu2 %v13678_v2  ;;  %v9537_v15 = vadd.f32 %v9536_v63, %v9535_v41 }
 0x79e   : > { %v14771_v26 = vld [vmem:[#allocation5 + $0x9b4] sm:$0xf0] }
 0x79f   : > { %v13389_v57 = vld [vmem:[#allocation5 + $0xb98] sm:$0xf]  ;;  %v13134_v22 = vor.u32 %v14771_v26, %v13133_v43  ;;  %9317 = vmatpush.bf16.msrb.mxu3 %v13934_v28  ;;  %v9041_v26 = vadd.f32 %v9040_v17, %v9027_v29 }
 0x7a0   : > { %v14835_v12 = vld [vmem:[#allocation5 + $0xbb4] sm:$0xf0] }
 0x7a1   : > { %v13645_v37 = vld [vmem:[#allocation5 + $0xd98] sm:$0xf]  ;;  %v13390_v59 = vor.u32 %v14835_v12, %v13389_v57  ;;  %9279 = vmatpush.bf16.msrb.mxu0 %v13134_v22  ;;  %v9538_v12 = vrot.slane %v9537_v15, 2  ;;  %v9053_v22 = vpop.f32.mrf.mxu2 }
 0x7a2   : > { %v14899_v62 = vld [vmem:[#allocation5 + $0xdb4] sm:$0xf0] }
 0x7a3   : > { %v13901_v11 = vld [vmem:[#allocation5 + $0xf98] sm:$0xf]  ;;  %v13646_v19 = vor.u32 %v14899_v62, %v13645_v37  ;;  %9292 = vmatpush.bf16.msrb.mxu1 %v13390_v59  ;;  %v9539_v59 = vadd.f32 %v9538_v12, %v9537_v15 }
 0x7a4   : > { %v14963_v46 = vld [vmem:[#allocation5 + $0xfb4] sm:$0xf0] }
 0x7a5   : > { %v13101_v13 = vld [vmem:[#allocation5 + $0x958] sm:$0xf]  ;;  %v13902_v53 = vor.u32 %v14963_v46, %v13901_v11  ;;  %9305 = vmatpush.bf16.msrb.mxu2 %v13646_v19 }
 0x7a6   : > { %v14763_v3 = vld [vmem:[#allocation5 + $0x974] sm:$0xf0] }
 0x7a7   : > { %v13357_v33 = vld [vmem:[#allocation5 + $0xb58] sm:$0xf]  ;;  %v13102_v30 = vor.u32 %v14763_v3, %v13101_v13  ;;  %9318 = vmatpush.bf16.msrb.mxu3 %v13902_v53  ;;  %v9054_v53 = vadd.f32 %v9053_v22, %v9041_v26  ;;  %v14647_v22 = vld [vmem:[#allocation5 + $0x5dc] sm:$0xf] }
 0x7a8   : > { %v14827_v51 = vld [vmem:[#allocation5 + $0xb74] sm:$0xf0] }
 0x7a9   : > { %v13613_v32 = vld [vmem:[#allocation5 + $0xd58] sm:$0xf]  ;;  %v13358_v45 = vor.u32 %v14827_v51, %v13357_v33  ;;  %9280 = vmatpush.bf16.msrb.mxu0 %v13102_v30  ;;  %v9066_v51 = vpop.f32.mrf.mxu3 }
 0x7aa   : > { %v14891_v50 = vld [vmem:[#allocation5 + $0xd74] sm:$0xf0]  ;;  %v16732_v30 = vadd.f32 %v9066_v51, %v9054_v53  ;;  %v12911_v53 = vld [vmem:[#allocation5 + $0x7f8] sm:$0xf0] }
 0x7ab   : > { %v13869_v6 = vld [vmem:[#allocation5 + $0xf58] sm:$0xf]  ;;  %v13614_v60 = vor.u32 %v14891_v50, %v13613_v32  ;;  %9293 = vmatpush.bf16.msrb.mxu1 %v13358_v45  ;;  %v9607_v45 = vmul.f32 %v16730_v23, %v16723_v4 }
 0x7ac   : > { %v14955_v10 = vld [vmem:[#allocation5 + $0xf74] sm:$0xf0] }
 0x7ad   : > { %v13069_v34 = vld [vmem:[#allocation5 + $0x918] sm:$0xf]  ;;  %v13870_v8 = vor.u32 %v14955_v10, %v13869_v6  ;;  %9306 = vmatpush.bf16.msrb.mxu2 %v13614_v60  ;;  %v9540_v6 = vrot.slane %v9539_v59, 1 }
 0x7ae   : > { %v14755_v48 = vld [vmem:[#allocation5 + $0x934] sm:$0xf0] }
 0x7af   : > { %v13325_v40 = vld [vmem:[#allocation5 + $0xb18] sm:$0xf]  ;;  %v13070_v49 = vor.u32 %v14755_v48, %v13069_v34  ;;  %9319 = vmatpush.bf16.msrb.mxu3 %v13870_v8 }
 0x7b0   : > { %v14819_v31 = vld [vmem:[#allocation5 + $0xb34] sm:$0xf0] }
 0x7b1   : > { %v13581_v39 = vld [vmem:[#allocation5 + $0xd18] sm:$0xf]  ;;  %v13326_v36 = vor.u32 %v14819_v31, %v13325_v40  ;;  %9281 = vmatpush.bf16.msrb.mxu0 %v13070_v49  ;;  %v9042_v31 = vpop.f32.mrf.mxu1 }
 0x7b2   : > { %v14883_v5 = vld [vmem:[#allocation5 + $0xd34] sm:$0xf0]  ;;  %v14703_v31 = vld [vmem:[#allocation5 + $0x79c] sm:$0xf] }
 0x7b3   : > { %v13837_v35 = vld [vmem:[#allocation5 + $0xf18] sm:$0xf]  ;;  %v13582_v55 = vor.u32 %v14883_v5, %v13581_v39  ;;  %9294 = vmatpush.bf16.msrb.mxu1 %v13326_v36  ;;  %v9541_v39 = vadd.f32 %v9540_v6, %v9539_v59  ;;  %v12655_v59 = vld [vmem:[#allocation5 + $0x5f8] sm:$0xf0] }
 0x7b4   : > { %v14947_v7 = vld [vmem:[#allocation5 + $0xf34] sm:$0xf0]  ;;  %v12658_v6 = vor.u32 %v14647_v22, %v12655_v59  ;;  %v12559_v22 = vld [vmem:[#allocation5 + $0x538] sm:$0xf0] }
 0x7b5   : > { %v13037_v44 = vld [vmem:[#allocation5 + $0x8d8] sm:$0xf]  ;;  %v13838_v43 = vor.u32 %v14947_v7, %v13837_v35  ;;  %9307 = vmatpush.bf16.msrb.mxu2 %v13582_v55  ;;  %v9573_v29 = vmul.f32 %v9541_v39, %v16290_v47  ;;  %v12879_v39 = vld [vmem:[#allocation5 + $0x7b8] sm:$0xf0] }
 0x7b6   : > { %v14747_v52 = vld [vmem:[#allocation5 + $0x8f4] sm:$0xf0] }
 0x7b7   : > { %v13293_v24 = vld [vmem:[#allocation5 + $0xad8] sm:$0xf]  ;;  %v13038_v37 = vor.u32 %v14747_v52, %v13037_v44  ;;  %9320 = vmatpush.bf16.msrb.mxu3 %v13838_v43  ;;  %v16738_v26 = vadd.f32 1e-05, %v9573_v29  ;;  %v12079_v29 = vld [vmem:[#allocation5 + $0x178] sm:$0xf0] }
 0x7b8   : > { %v14811_v25 = vld [vmem:[#allocation5 + $0xaf4] sm:$0xf0] }
 0x7b9   : > { %v13549_v42 = vld [vmem:[#allocation5 + $0xcd8] sm:$0xf]  ;;  %v13294_v62 = vor.u32 %v14811_v25, %v13293_v24  ;;  %9282 = vmatpush.bf16.msrb.mxu0 %v13038_v37  ;;  %v9608_v24 = vmul.f32 %v16730_v23, %v9607_v45  ;;  %v9068_v37 = vpop.f32.mrf.mxu3  ;;  %15095 = vrsqrt.f32 %v16738_v26  ;;  %v14575_v45 = vld [vmem:[#allocation5 + $0x39c] sm:$0xf]  ;;  %vm9622_vm1 = vweird.f32 %v16738_v26 }
 0x7ba   : > { %v14875_v2 = vld [vmem:[#allocation5 + $0xcf4] sm:$0xf0] }
 0x7bb   : > { %v13805_v57 = vld [vmem:[#allocation5 + $0xed8] sm:$0xf]  ;;  %v13550_v20 = vor.u32 %v14875_v2, %v13549_v42  ;;  %9295 = vmatpush.bf16.msrb.mxu1 %v13294_v62  ;;  %v9055_v2 = vpop.f32.mrf.mxu2  ;;  %v14519_v62 = vld [vmem:[#allocation5 + $0x1dc] sm:$0xf] }
 0x7bc   : > { %v14939_v28 = vld [vmem:[#allocation5 + $0xef4] sm:$0xf0]  ;;  %v14495_v2 = vld [vmem:[#allocation5 + $0x11c] sm:$0xf] }
 0x7bd   : > { %v13005_v11 = vld [vmem:[#allocation5 + $0x898] sm:$0xf]  ;;  %v13806_v19 = vor.u32 %v14939_v28, %v13805_v57  ;;  %9308 = vmatpush.bf16.msrb.mxu2 %v13550_v20  ;;  %v12143_v20 = vld [vmem:[#allocation5 + $0x1f8] sm:$0xf0] }
 0x7be   : > { %v14739_v46 = vld [vmem:[#allocation5 + $0x8b4] sm:$0xf0] }
 0x7bf   : > { %v13261_v0 = vld [vmem:[#allocation5 + $0xa98] sm:$0xf]  ;;  %v13006_v10 = vor.u32 %v14739_v46, %v13005_v11  ;;  %9321 = vmatpush.bf16.msrb.mxu3 %v13806_v19  ;;  %v14583_v11 = vld [vmem:[#allocation5 + $0x3dc] sm:$0xf]  ;;  %v9609_v19 = vmul.f32 0.5, %v9608_v24 }
 0x7c0   : > { %v14803_v13 = vld [vmem:[#allocation5 + $0xab4] sm:$0xf0]  ;;  %v12591_v24 = vld [vmem:[#allocation5 + $0x578] sm:$0xf0] }
 0x7c1   : > { %v13517_v3 = vld [vmem:[#allocation5 + $0xc98] sm:$0xf]  ;;  %v13262_v60 = vor.u32 %v14803_v13, %v13261_v0  ;;  %9283 = vmatpush.bf16.msrb.mxu0 %v13006_v10  ;;  %v12399_v0 = vld [vmem:[#allocation5 + $0x3f8] sm:$0xf0] }
 0x7c2   : > { %v14867_v33 = vld [vmem:[#allocation5 + $0xcb4] sm:$0xf0]  ;;  %v14511_v10 = vld [vmem:[#allocation5 + $0x19c] sm:$0xf] }
 0x7c3   : > { %v13773_v32 = vld [vmem:[#allocation5 + $0xe98] sm:$0xf]  ;;  %v13518_v34 = vor.u32 %v14867_v33, %v13517_v3  ;;  %9296 = vmatpush.bf16.msrb.mxu1 %v13262_v60  ;;  %v14711_v33 = vld [vmem:[#allocation5 + $0x7dc] sm:$0xf] }
 0x7c4   : > { %v14931_v50 = vld [vmem:[#allocation5 + $0xeb4] sm:$0xf0]  ;;  %v12914_v60 = vor.u32 %v14711_v33, %v12911_v53  ;;  %v9079_v53 = vpop.f32.mrf.mxu0 }
 0x7c5   : > { %v12973_v48 = vld [vmem:[#allocation5 + $0x858] sm:$0xf]  ;;  %v13774_v5 = vor.u32 %v14931_v50, %v13773_v32  ;;  %9309 = vmatpush.bf16.msrb.mxu2 %v13518_v34  ;;  %v12146_v32 = vor.u32 %v14519_v62, %v12143_v20  ;;  %v12402_v50 = vor.u32 %v14583_v11, %v12399_v0  ;;  %v12367_v34 = vld [vmem:[#allocation5 + $0x3b8] sm:$0xf0] }
 0x7c6   : > { %v14731_v40 = vld [vmem:[#allocation5 + $0x874] sm:$0xf0]  ;;  %v14559_v62 = vld [vmem:[#allocation5 + $0x31c] sm:$0xf] }
 0x7c7   : > { %v13229_v8 = vld [vmem:[#allocation5 + $0xa58] sm:$0xf]  ;;  %v12974_v36 = vor.u32 %v14731_v40, %v12973_v48  ;;  %9322 = vmatpush.bf16.msrb.mxu3 %v13774_v5  ;;  %v14639_v48 = vld [vmem:[#allocation5 + $0x59c] sm:$0xf]  ;;  %v16741_v5 = vpop.eup %15095 }
 0x7c8   : > { %v14795_v41 = vld [vmem:[#allocation5 + $0xa74] sm:$0xf0]  ;;  %v12623_v40 = vld [vmem:[#allocation5 + $0x5b8] sm:$0xf0]  ;;  %vm9623_vm0 = vweird.f32 %v16741_v5 }
 0x7c9   : > { %v13485_v35 = vld [vmem:[#allocation5 + $0xc58] sm:$0xf]  ;;  %v13230_v17 = vor.u32 %v14795_v41, %v13229_v8  ;;  %9284 = vmatpush.bf16.msrb.mxu0 %v12974_v36  ;;  %v9610_v8 = vsub.f32 1.5, %v9609_v19  ;;  %v12114_v41 = vor.u32 %v14511_v10, %v12111_v9  ;;  %v14567_v36 = vld [vmem:[#allocation5 + $0x35c] sm:$0xf]  ;;  %vm9624_vm3 = vmor %vm9622_vm1, %vm9623_vm0 }
 0x7ca   : > { %v14859_v7 = vld [vmem:[#allocation5 + $0xc74] sm:$0xf0]  ;;  %v12303_v20 = vld [vmem:[#allocation5 + $0x338] sm:$0xf0] }
 0x7cb   : > { %v13741_v63 = vld [vmem:[#allocation5 + $0xe58] sm:$0xf]  ;;  %v13486_v15 = vor.u32 %v14859_v7, %v13485_v35  ;;  %9297 = vmatpush.bf16.msrb.mxu1 %v13230_v17  ;;  %v9617_v35 = vmul.f32 %v16741_v5, %v16738_v26  ;;  %v12370_v7 = vor.u32 %v14575_v45, %v12367_v34  ;;  %v9611_v17 = vmul.f32 %v16730_v23, %v9610_v8  ;;  %v14623_v0 = vld [vmem:[#allocation5 + $0x51c] sm:$0xf] }
 0x7cc   : > { %v14923_v49 = vld [vmem:[#allocation5 + $0xe74] sm:$0xf0]  ;;  %v14687_v19 = vld [vmem:[#allocation5 + $0x71c] sm:$0xf]  ;;  %v12306_v33 = vor.u32 %v14559_v62, %v12303_v20 }
 0x7cd   : > { %v12941_v55 = vld [vmem:[#allocation5 + $0x818] sm:$0xf]  ;;  %v13742_v57 = vor.u32 %v14923_v49, %v13741_v63  ;;  %9310 = vmatpush.bf16.msrb.mxu2 %v13486_v15  ;;  %v12626_v63 = vor.u32 %v14639_v48, %v12623_v40  ;;  %v14503_v49 = vld [vmem:[#allocation5 + $0x15c] sm:$0xf]  ;;  %v9618_v15 = vmul.f32 %v16741_v5, %v9617_v35  ;;  %v9615_v4 = vsel %vm16755_vm15, %v16730_v23, %v9611_v17  ;;  %v9092_v23 = vpop.f32.mrf.mxu1 }
 0x7ce   : > { %v14723_v44 = vld [vmem:[#allocation5 + $0x834] sm:$0xf0]  ;;  %v12015_v10 = vld [vmem:[#allocation5 + $0xf8] sm:$0xf0] }
 0x7cf   : > { %v13197_v52 = vld [vmem:[#allocation5 + $0xa18] sm:$0xf]  ;;  %v12942_v46 = vor.u32 %v14723_v44, %v12941_v55  ;;  %9323 = vmatpush.bf16.msrb.mxu3 %v13742_v57  ;;  %v12882_v55 = vor.u32 %v14703_v31, %v12879_v39  ;;  %v12335_v44 = vld [vmem:[#allocation5 + $0x378] sm:$0xf0] }
 0x7d0   : > { %v14787_v43 = vld [vmem:[#allocation5 + $0xa34] sm:$0xf0]  ;;  %v12047_v57 = vld [vmem:[#allocation5 + $0x138] sm:$0xf0] }
 0x7d1   : > { %v13453_v25 = vld [vmem:[#allocation5 + $0xc18] sm:$0xf]  ;;  %v13198_v13 = vor.u32 %v14787_v43, %v13197_v52  ;;  %9285 = vmatpush.bf16.msrb.mxu0 %v12942_v46  ;;  %v14631_v52 = vld [vmem:[#allocation5 + $0x55c] sm:$0xf] }
 0x7d2   : > { %v14851_v42 = vld [vmem:[#allocation5 + $0xc34] sm:$0xf0]  ;;  %v14695_v43 = vld [vmem:[#allocation5 + $0x75c] sm:$0xf]  ;;  %v12594_v37 = vor.u32 %v14631_v52, %v12591_v24  ;;  %v9118_v24 = vpop.f32.mrf.mxu3 }
 0x7d3   : > { %v13709_v28 = vld [vmem:[#allocation5 + $0xe18] sm:$0xf]  ;;  %v13454_v3 = vor.u32 %v14851_v42, %v13453_v25  ;;  %9298 = vmatpush.bf16.msrb.mxu1 %v13198_v13  ;;  %v12847_v25 = vld [vmem:[#allocation5 + $0x778] sm:$0xf0]  ;;  %v12082_v42 = vor.u32 %v14503_v49, %v12079_v29 }
 0x7d4   : > { %v14915_v12 = vld [vmem:[#allocation5 + $0xe34] sm:$0xf0]  ;;  %9286 = vmatmul.bf16.vlgmr.msrb.gmra.mxu0 %v16560_v18  ;;  %v12850_v46 = vor.u32 %v14695_v43, %v12847_v25  ;;  %v12815_v13 = vld [vmem:[#allocation5 + $0x738] sm:$0xf0] }
 0x7d5   : > { %v13710_v51 = vor.u32 %v14915_v12, %v13709_v28  ;;  %9311 = vmatpush.bf16.msrb.mxu2 %v13454_v3  ;;  %9330 = vmatpush.bf16.msra.mxu0 %v12146_v32  ;;  %v9619_v28 = vmul.f32 0.5, %v9618_v15  ;;  %v12338_v12 = vor.u32 %v14567_v36, %v12335_v44  ;;  %v12050_v3 = vor.u32 %v14495_v2, %v12047_v57  ;;  %v14551_v9 = vld [vmem:[#allocation5 + $0x2dc] sm:$0xf] }
 0x7d6   : > { %9299 = vmatmul.bf16.vlgmr.msrb.gmra.mxu1 %v16570_v16  ;;  %v12271_v45 = vld [vmem:[#allocation5 + $0x2f8] sm:$0xf0]  ;;  %v12818_v34 = vor.u32 %v14687_v19, %v12815_v13 }
 0x7d7   : > { %9324 = vmatpush.bf16.msrb.mxu3 %v13710_v51  ;;  %9343 = vmatpush.bf16.msra.mxu1 %v12402_v50  ;;  %v9620_v59 = vsub.f32 1.5, %v9619_v28  ;;  %v14487_v51 = vld [vmem:[#allocation5 + $0xdc] sm:$0xf]  ;;  %v12562_v50 = vor.u32 %v14623_v0, %v12559_v22  ;;  %v9081_v28 = vpop.f32.mrf.mxu0  ;;  %v9094_v0 = vpop.f32.mrf.mxu1 }
 0x7d8   : > { %9312 = vmatmul.bf16.vlgmr.msrb.gmra.mxu2 %v16555_v54  ;;  %v14615_v48 = vld [vmem:[#allocation5 + $0x4dc] sm:$0xf] }
 0x7d9   : > { %9356 = vmatpush.bf16.msra.mxu2 %v12658_v6  ;;  %9331 = vmatpush.bf16.msra.mxu0 %v12114_v41  ;;  %v9621_v32 = vmul.f32 %v16741_v5, %v9620_v59  ;;  %v9080_v6 = vadd.f32 %v9079_v53, %v16732_v30  ;;  %v12527_v40 = vld [vmem:[#allocation5 + $0x4f8] sm:$0xf0]  ;;  %v12018_v41 = vor.u32 %v14487_v51, %v12015_v10 }
 0x7da   : > { %9325 = vmatmul.bf16.vlgmr.msrb.gmra.mxu3 %v16565_v61  ;;  %v14679_v31 = vld [vmem:[#allocation5 + $0x6dc] sm:$0xf] }
 0x7db   : > { %9369 = vmatpush.bf16.msra.mxu3 %v12914_v60  ;;  %9344 = vmatpush.bf16.msra.mxu1 %v12370_v7  ;;  %v9668_v60 = vmul.f32 %v9615_v4, %v16698_v27  ;;  %v9625_v26 = vsel %vm9624_vm3, %v16741_v5, %v9621_v32  ;;  %v9093_v8 = vadd.f32 %v9092_v23, %v9080_v6  ;;  %v12783_v39 = vld [vmem:[#allocation5 + $0x6f8] sm:$0xf0] }
 0x7dc   : > { %v9669_v30 = vmul.f32 %v9625_v26, %v16719_v21  ;;  %v14479_v35 = vld [vmem:[#allocation5 + $0x9c] sm:$0xf]  ;;  %v12274_v27 = vor.u32 %v14551_v9, %v12271_v45  ;;  %v12530_v7 = vor.u32 %v14615_v48, %v12527_v40  ;;  %v12786_v5 = vor.u32 %v14679_v31, %v12783_v39 }
 0x7dd   : > { %9357 = vmatpush.bf16.msra.mxu2 %v12626_v63  ;;  %9332 = vmatpush.bf16.msra.mxu0 %v12082_v42  ;;  %v9105_v63 = vpop.f32.mrf.mxu2  ;;  %v11983_v49 = vld [vmem:[#allocation5 + $0xb8] sm:$0xf0] }
 0x7de   : > { %v14543_v29 = vld [vmem:[#allocation5 + $0x29c] sm:$0xf]  ;;  %v9684_v44 = vrot.slane %v9669_v30, 2  ;;  %v9106_v52 = vadd.f32 %v9105_v63, %v9093_v8  ;;  %v11986_v2 = vor.u32 %v14479_v35, %v11983_v49 }
 0x7df   : > { %9370 = vmatpush.bf16.msra.mxu3 %v12882_v55  ;;  %9345 = vmatpush.bf16.msra.mxu1 %v12338_v12  ;;  %v12239_v36 = vld [vmem:[#allocation5 + $0x2b8] sm:$0xf0]  ;;  %v9683_v55 = vrot.slane %v9668_v60, 4 }
 0x7e0   : > { %v14607_v17 = vld [vmem:[#allocation5 + $0x49c] sm:$0xf]  ;;  %v16772_v42 = vadd.f32 %v9118_v24, %v9106_v52 }
 0x7e1   : > { %9358 = vmatpush.bf16.msra.mxu2 %v12594_v37  ;;  %9333 = vmatpush.bf16.msra.mxu0 %v12050_v3  ;;  %v12495_v15 = vld [vmem:[#allocation5 + $0x4b8] sm:$0xf0]  ;;  %v9690_v25 = vsel %vm1173_vm5, %v9683_v55, %v9684_v44  ;;  %v12242_v37 = vor.u32 %v14543_v29, %v12239_v36 }
 0x7e2   : > { %v14671_v21 = vld [vmem:[#allocation5 + $0x69c] sm:$0xf]  ;;  %v9692_v12 = vsel %vm1175_vm6, %v16678_v1, %v9690_v25  ;;  %v12498_v62 = vor.u32 %v14607_v17, %v12495_v15  ;;  %v9462_v24 = vsel %vm1167_vm2, %v16772_v42, 0.0 }
 0x7e3   : > { %9371 = vmatpush.bf16.msra.mxu3 %v12850_v46  ;;  %9346 = vmatpush.bf16.msra.mxu1 %v12306_v33  ;;  %v12751_v43 = vld [vmem:[#allocation5 + $0x6b8] sm:$0xf0]  ;;  %9698 = vst [vmem:[#allocation15] sm:$0xff] %v9692_v12  ;;  %v9463_v28 = vrot.slane %v9462_v24, 4 }
 0x7e4   : > { %v14471_v57 = vld [vmem:[#allocation5 + $0x5c] sm:$0xf]  ;;  %v12754_v22 = vor.u32 %v14671_v21, %v12751_v43 }
 0x7e5   : > { %9359 = vmatpush.bf16.msra.mxu2 %v12562_v50  ;;  %9334 = vmatpush.bf16.msra.mxu0 %v12018_v41  ;;  %v11951_v20 = vld [vmem:[#allocation5 + $0x78] sm:$0xf0]  ;;  %v9107_v23 = vpop.f32.mrf.mxu2 }
 0x7e6   : > { %v14535_v11 = vld [vmem:[#allocation5 + $0x25c] sm:$0xf]  ;;  %v11954_v3 = vor.u32 %v14471_v57, %v11951_v20 }
 0x7e7   : > { %9372 = vmatpush.bf16.msra.mxu3 %v12818_v34  ;;  %9347 = vmatpush.bf16.msra.mxu1 %v12274_v27  ;;  %v12207_v46 = vld [vmem:[#allocation5 + $0x278] sm:$0xf0]  ;;  %v9120_v34 = vpop.f32.mrf.mxu3 }
 0x7e8   : > { %v14599_v4 = vld [vmem:[#allocation5 + $0x45c] sm:$0xf]  ;;  %v12210_v1 = vor.u32 %v14535_v11, %v12207_v46 }
 0x7e9   : > { %9360 = vmatpush.bf16.msra.mxu2 %v12530_v7  ;;  %v12463_v59 = vld [vmem:[#allocation5 + $0x478] sm:$0xf0]  ;;  %9335 = vmatpush.bf16.msra.mxu0 %v11986_v2 }
 0x7ea   : > { %v14663_v19 = vld [vmem:[#allocation5 + $0x65c] sm:$0xf]  ;;  %v12466_v51 = vor.u32 %v14599_v4, %v12463_v59 }
 0x7eb   : > { %9373 = vmatpush.bf16.msra.mxu3 %v12786_v5  ;;  %v12719_v13 = vld [vmem:[#allocation5 + $0x678] sm:$0xf0]  ;;  %9348 = vmatpush.bf16.msra.mxu1 %v12242_v37 }
 0x7ec   : > { %v14463_v33 = vld [vmem:[#allocation5 + $0x1c] sm:$0xf]  ;;  %v12722_v10 = vor.u32 %v14663_v19, %v12719_v13  ;;  %v9464_v13 = vadd.f32 %v9463_v28, %v9462_v24 }
 0x7ed   : > { %v11919_v53 = vld [vmem:[#allocation5 + $0x38] sm:$0xf0]  ;;  %9361 = vmatpush.bf16.msra.mxu2 %v12498_v62  ;;  %9336 = vmatpush.bf16.msra.mxu0 %v11954_v3 }
 0x7ee   : > { %v14527_v32 = vld [vmem:[#allocation5 + $0x21c] sm:$0xf]  ;;  %v11922_v8 = vor.u32 %v14463_v33, %v11919_v53 }
 0x7ef   : > { %v12175_v50 = vld [vmem:[#allocation5 + $0x238] sm:$0xf0]  ;;  %9374 = vmatpush.bf16.msra.mxu3 %v12754_v22  ;;  %9349 = vmatpush.bf16.msra.mxu1 %v12210_v1 }
 0x7f0   : > { %v14591_v6 = vld [vmem:[#allocation5 + $0x41c] sm:$0xf]  ;;  %v12178_v41 = vor.u32 %v14527_v32, %v12175_v50 }
 0x7f1   : > { %v12431_v9 = vld [vmem:[#allocation5 + $0x438] sm:$0xf0]  ;;  %9362 = vmatpush.bf16.msra.mxu2 %v12466_v51  ;;  %9337 = vmatpush.bf16.msra.mxu0 %v11922_v8 }
 0x7f2   : > { %v14655_v45 = vld [vmem:[#allocation5 + $0x61c] sm:$0xf]  ;;  %v12434_v35 = vor.u32 %v14591_v6, %v12431_v9  ;;  %v9131_v9 = vpop.f32.mrf.mxu0 }
 0x7f3   : > { %v12687_v60 = vld [vmem:[#allocation5 + $0x638] sm:$0xf0]  ;;  %9375 = vmatpush.bf16.msra.mxu3 %v12722_v10  ;;  %9350 = vmatpush.bf16.msra.mxu1 %v12178_v41 }
 0x7f4   : > { %v14775_v48 = vld [vmem:[#allocation5 + $0x9dc] sm:$0xf]  ;;  %v12690_v63 = vor.u32 %v14655_v45, %v12687_v60  ;;  %9338 = vmatmul.bf16.vlgmr.msra.gmra.mxu0 %v16536_v14 }
 0x7f5   : > { %v13167_v40 = vld [vmem:[#allocation5 + $0x9f8] sm:$0xf0]  ;;  %9363 = vmatpush.bf16.msra.mxu2 %v12434_v35 }
 0x7f6   : > { %v14839_v26 = vld [vmem:[#allocation5 + $0xbdc] sm:$0xf]  ;;  %v13170_v49 = vor.u32 %v14775_v48, %v13167_v40  ;;  %9351 = vmatmul.bf16.vlgmr.msra.gmra.mxu1 %v16546_v56  ;;  %v9465_v56 = vrot.slane %v9464_v13, 2  ;;  %v9144_v40 = vpop.f32.mrf.mxu1 }
 0x7f7   : > { %v13423_v31 = vld [vmem:[#allocation5 + $0xbf8] sm:$0xf0]  ;;  %9376 = vmatpush.bf16.msra.mxu3 %v12690_v63 }
 0x7f8   : > { %v14903_v39 = vld [vmem:[#allocation5 + $0xddc] sm:$0xf]  ;;  %v13426_v36 = vor.u32 %v14839_v26, %v13423_v31  ;;  %9382 = vmatpush.bf16.msrb.mxu0 %v13170_v49  ;;  %9364 = vmatmul.bf16.vlgmr.msra.gmra.mxu2 %v16531_v38 }
 0x7f9   : > { %v13679_v30 = vld [vmem:[#allocation5 + $0xdf8] sm:$0xf0] }
 0x7fa   : > { %v14967_v27 = vld [vmem:[#allocation5 + $0xfdc] sm:$0xf]  ;;  %v13682_v55 = vor.u32 %v14903_v39, %v13679_v30  ;;  %9395 = vmatpush.bf16.msrb.mxu1 %v13426_v36  ;;  %9377 = vmatmul.bf16.vlgmr.msra.gmra.mxu3 %v16541_v58  ;;  %v9145_v30 = vadd.f32 %v9144_v40, %v9131_v9 }
 0x7fb   : > { %v13935_v7 = vld [vmem:[#allocation5 + $0xff8] sm:$0xf0] }
 0x7fc   : > { %v14767_v29 = vld [vmem:[#allocation5 + $0x99c] sm:$0xf]  ;;  %v13938_v17 = vor.u32 %v14967_v27, %v13935_v7  ;;  %9408 = vmatpush.bf16.msrb.mxu2 %v13682_v55  ;;  %v9466_v7 = vadd.f32 %v9465_v56, %v9464_v13 }
 0x7fd   : > { %v13135_v44 = vld [vmem:[#allocation5 + $0x9b8] sm:$0xf0] }
 0x7fe   : > { %v14831_v5 = vld [vmem:[#allocation5 + $0xb9c] sm:$0xf]  ;;  %v13138_v2 = vor.u32 %v14767_v29, %v13135_v44  ;;  %9421 = vmatpush.bf16.msrb.mxu3 %v13938_v17  ;;  %v9157_v44 = vpop.f32.mrf.mxu2 }
 0x7ff   : > { %v13391_v52 = vld [vmem:[#allocation5 + $0xbb8] sm:$0xf0] }
 0x800   : > { %v14895_v15 = vld [vmem:[#allocation5 + $0xd9c] sm:$0xf]  ;;  %v13394_v12 = vor.u32 %v14831_v5, %v13391_v52  ;;  %9383 = vmatpush.bf16.msrb.mxu0 %v13138_v2 }
 0x801   : > { %v13647_v21 = vld [vmem:[#allocation5 + $0xdb8] sm:$0xf0] }
 0x802   : > { %v14959_v43 = vld [vmem:[#allocation5 + $0xf9c] sm:$0xf]  ;;  %v13650_v37 = vor.u32 %v14895_v15, %v13647_v21  ;;  %9396 = vmatpush.bf16.msrb.mxu1 %v13394_v12  ;;  %v9158_v15 = vadd.f32 %v9157_v44, %v9145_v30  ;;  %v9170_v21 = vpop.f32.mrf.mxu3  ;;  %v9133_v12 = vpop.f32.mrf.mxu0 }
 0x803   : > { %v13903_v25 = vld [vmem:[#allocation5 + $0xfb8] sm:$0xf0] }
 0x804   : > { %v14759_v57 = vld [vmem:[#allocation5 + $0x95c] sm:$0xf]  ;;  %v13906_v11 = vor.u32 %v14959_v43, %v13903_v25  ;;  %9409 = vmatpush.bf16.msrb.mxu2 %v13650_v37  ;;  %v9171_v28 = vadd.f32 %v9170_v21, %v9158_v15  ;;  %v9467_v37 = vrot.slane %v9466_v7, 1 }
 0x805   : > { %v13103_v62 = vld [vmem:[#allocation5 + $0x978] sm:$0xf0] }
 0x806   : > { %v14823_v20 = vld [vmem:[#allocation5 + $0xb5c] sm:$0xf]  ;;  %v13106_v19 = vor.u32 %v14759_v57, %v13103_v62  ;;  %9422 = vmatpush.bf16.msrb.mxu3 %v13906_v11 }
 0x807   : > { %v13359_v46 = vld [vmem:[#allocation5 + $0xb78] sm:$0xf0] }
 0x808   : > { %v14887_v0 = vld [vmem:[#allocation5 + $0xd5c] sm:$0xf]  ;;  %v13362_v3 = vor.u32 %v14823_v20, %v13359_v46  ;;  %9384 = vmatpush.bf16.msrb.mxu0 %v13106_v19 }
 0x809   : > { %v13615_v22 = vld [vmem:[#allocation5 + $0xd78] sm:$0xf0] }
 0x80a   : > { %v14951_v4 = vld [vmem:[#allocation5 + $0xf5c] sm:$0xf]  ;;  %v13618_v33 = vor.u32 %v14887_v0, %v13615_v22  ;;  %9397 = vmatpush.bf16.msrb.mxu1 %v13362_v3  ;;  %v9146_v0 = vpop.f32.mrf.mxu1  ;;  %v9172_v9 = vpop.f32.mrf.mxu3 }
 0x80b   : > { %v13871_v59 = vld [vmem:[#allocation5 + $0xf78] sm:$0xf0]  ;;  %v9183_v30 = vpop.f32.mrf.mxu0 }
 0x80c   : > { %v14751_v53 = vld [vmem:[#allocation5 + $0x91c] sm:$0xf]  ;;  %v13874_v51 = vor.u32 %v14951_v4, %v13871_v59  ;;  %9410 = vmatpush.bf16.msrb.mxu2 %v13618_v33 }
 0x80d   : > { %v13071_v38 = vld [vmem:[#allocation5 + $0x938] sm:$0xf0] }
 0x80e   : > { %v14815_v1 = vld [vmem:[#allocation5 + $0xb1c] sm:$0xf]  ;;  %v13074_v58 = vor.u32 %v14751_v53, %v13071_v38  ;;  %9423 = vmatpush.bf16.msrb.mxu3 %v13874_v51  ;;  %v9468_v53 = vadd.f32 %v9467_v37, %v9466_v7 }
 0x80f   : > { %v13327_v32 = vld [vmem:[#allocation5 + $0xb38] sm:$0xf0] }
 0x810   : > { %v14879_v50 = vld [vmem:[#allocation5 + $0xd1c] sm:$0xf]  ;;  %v13330_v45 = vor.u32 %v14815_v1, %v13327_v32  ;;  %9385 = vmatpush.bf16.msrb.mxu0 %v13074_v58 }
 0x811   : > { %v13583_v6 = vld [vmem:[#allocation5 + $0xd38] sm:$0xf0] }
 0x812   : > { %v14943_v14 = vld [vmem:[#allocation5 + $0xf1c] sm:$0xf]  ;;  %v13586_v60 = vor.u32 %v14879_v50, %v13583_v6  ;;  %9398 = vmatpush.bf16.msrb.mxu1 %v13330_v45  ;;  %v9159_v6 = vpop.f32.mrf.mxu2 }
 0x813   : > { %v13839_v23 = vld [vmem:[#allocation5 + $0xf38] sm:$0xf0] }
 0x814   : > { %v14743_v10 = vld [vmem:[#allocation5 + $0x8dc] sm:$0xf]  ;;  %v13842_v26 = vor.u32 %v14943_v14, %v13839_v23  ;;  %9411 = vmatpush.bf16.msrb.mxu2 %v13586_v60 }
 0x815   : > { %v13039_v34 = vld [vmem:[#allocation5 + $0x8f8] sm:$0xf0] }
 0x816   : > { %v14807_v48 = vld [vmem:[#allocation5 + $0xadc] sm:$0xf]  ;;  %v13042_v27 = vor.u32 %v14743_v10, %v13039_v34  ;;  %9424 = vmatpush.bf16.msrb.mxu3 %v13842_v26  ;;  %v9494_v34 = vmul.f32 %v9468_v53, %v16290_v47 }
 0x817   : > { %v13295_v8 = vld [vmem:[#allocation5 + $0xaf8] sm:$0xf0] }
 0x818   : > { %v14871_v31 = vld [vmem:[#allocation5 + $0xcdc] sm:$0xf]  ;;  %v13298_v63 = vor.u32 %v14807_v48, %v13295_v8  ;;  %9386 = vmatpush.bf16.msrb.mxu0 %v13042_v27  ;;  %v16784_v8 = vsub.f32 %v16772_v42, %v9494_v34  ;;  %v9196_v42 = vpop.f32.mrf.mxu1 }
 0x819   : > { %v13551_v39 = vld [vmem:[#allocation5 + $0xcf8] sm:$0xf0] }
 0x81a   : > { %v14935_v41 = vld [vmem:[#allocation5 + $0xedc] sm:$0xf]  ;;  %v13554_v49 = vor.u32 %v14871_v31, %v13551_v39  ;;  %9399 = vmatpush.bf16.msrb.mxu1 %v13298_v63  ;;  %v9510_v31 = vmul.f32 %v16784_v8, %v16784_v8  ;;  %v9209_v7 = vpop.f32.mrf.mxu2 }
 0x81b   : > { %v13807_v35 = vld [vmem:[#allocation5 + $0xef8] sm:$0xf0] }
 0x81c   : > { %v14735_v29 = vld [vmem:[#allocation5 + $0x89c] sm:$0xf]  ;;  %v13810_v5 = vor.u32 %v14935_v41, %v13807_v35  ;;  %9412 = vmatpush.bf16.msrb.mxu2 %v13554_v49  ;;  %v9542_v39 = vsel %vm1167_vm2, %v9510_v31, 0.0  ;;  %v9184_v41 = vadd.f32 %v9183_v30, %v9171_v28 }
 0x81d   : > { %v13007_v36 = vld [vmem:[#allocation5 + $0x8b8] sm:$0xf0]  ;;  %v9543_v35 = vrot.slane %v9542_v39, 4 }
 0x81e   : > { %v14799_v55 = vld [vmem:[#allocation5 + $0xa9c] sm:$0xf]  ;;  %v13010_v2 = vor.u32 %v14735_v29, %v13007_v36  ;;  %9425 = vmatpush.bf16.msrb.mxu3 %v13810_v5  ;;  %v9197_v27 = vadd.f32 %v9196_v42, %v9184_v41 }
 0x81f   : > { %v13263_v52 = vld [vmem:[#allocation5 + $0xab8] sm:$0xf0]  ;;  %v9544_v63 = vadd.f32 %v9543_v35, %v9542_v39 }
 0x820   : > { %v14863_v24 = vld [vmem:[#allocation5 + $0xc9c] sm:$0xf]  ;;  %v13266_v62 = vor.u32 %v14799_v55, %v13263_v52  ;;  %9387 = vmatpush.bf16.msrb.mxu0 %v13010_v2  ;;  %v9210_v49 = vadd.f32 %v9209_v7, %v9197_v27  ;;  %v9198_v36 = vpop.f32.mrf.mxu1 }
 0x821   : > { %v13519_v17 = vld [vmem:[#allocation5 + $0xcb8] sm:$0xf0] }
 0x822   : > { %v14927_v43 = vld [vmem:[#allocation5 + $0xe9c] sm:$0xf]  ;;  %v13522_v20 = vor.u32 %v14863_v24, %v13519_v17  ;;  %9400 = vmatpush.bf16.msrb.mxu1 %v13266_v62 }
 0x823   : > { %v13775_v25 = vld [vmem:[#allocation5 + $0xeb8] sm:$0xf0] }
 0x824   : > { %v14727_v57 = vld [vmem:[#allocation5 + $0x85c] sm:$0xf]  ;;  %v13778_v22 = vor.u32 %v14927_v43, %v13775_v25  ;;  %9413 = vmatpush.bf16.msrb.mxu2 %v13522_v20 }
 0x825   : > { %v12975_v11 = vld [vmem:[#allocation5 + $0x878] sm:$0xf0] }
 0x826   : > { %v14791_v46 = vld [vmem:[#allocation5 + $0xa5c] sm:$0xf]  ;;  %v12978_v33 = vor.u32 %v14727_v57, %v12975_v11  ;;  %9426 = vmatpush.bf16.msrb.mxu3 %v13778_v22 }
 0x827   : > { %v13231_v4 = vld [vmem:[#allocation5 + $0xa78] sm:$0xf0] }
 0x828   : > { %v14855_v59 = vld [vmem:[#allocation5 + $0xc5c] sm:$0xf]  ;;  %v13234_v38 = vor.u32 %v14791_v46, %v13231_v4  ;;  %9388 = vmatpush.bf16.msrb.mxu0 %v12978_v33  ;;  %v9248_v0 = vpop.f32.mrf.mxu1 }
 0x829   : > { %v13487_v19 = vld [vmem:[#allocation5 + $0xc78] sm:$0xf0] }
 0x82a   : > { %v14919_v13 = vld [vmem:[#allocation5 + $0xe5c] sm:$0xf]  ;;  %v13490_v1 = vor.u32 %v14855_v59, %v13487_v19  ;;  %9401 = vmatpush.bf16.msrb.mxu1 %v13234_v38 }
 0x82b   : > { %v13743_v3 = vld [vmem:[#allocation5 + $0xe78] sm:$0xf0] }
 0x82c   : > { %v14719_v51 = vld [vmem:[#allocation5 + $0x81c] sm:$0xf]  ;;  %v13746_v14 = vor.u32 %v14919_v13, %v13743_v3  ;;  %9414 = vmatpush.bf16.msrb.mxu2 %v13490_v1 }
 0x82d   : > { %v12943_v32 = vld [vmem:[#allocation5 + $0x838] sm:$0xf0] }
 0x82e   : > { %v14783_v50 = vld [vmem:[#allocation5 + $0xa1c] sm:$0xf]  ;;  %v12946_v60 = vor.u32 %v14719_v51, %v12943_v32  ;;  %9427 = vmatpush.bf16.msrb.mxu3 %v13746_v14 }
 0x82f   : > { %v13199_v23 = vld [vmem:[#allocation5 + $0xa38] sm:$0xf0] }
 0x830   : > { %v14847_v58 = vld [vmem:[#allocation5 + $0xc1c] sm:$0xf]  ;;  %v13202_v48 = vor.u32 %v14783_v50, %v13199_v23  ;;  %9389 = vmatpush.bf16.msrb.mxu0 %v12946_v60  ;;  %v9250_v51 = vpop.f32.mrf.mxu1 }
 0x831   : > { %v13455_v10 = vld [vmem:[#allocation5 + $0xc38] sm:$0xf0] }
 0x832   : > { %v14911_v56 = vld [vmem:[#allocation5 + $0xe1c] sm:$0xf]  ;;  %v13458_v40 = vor.u32 %v14847_v58, %v13455_v10  ;;  %9402 = vmatpush.bf16.msrb.mxu1 %v13202_v48 }
 0x833   : > { %v13711_v45 = vld [vmem:[#allocation5 + $0xe38] sm:$0xf0]  ;;  %9390 = vmatmul.bf16.vlgmr.msrb.gmra.mxu0 %v16560_v18  ;;  %v9222_v18 = vpop.f32.mrf.mxu3 }
 0x834   : > { %v13714_v26 = vor.u32 %v14911_v56, %v13711_v45  ;;  %9415 = vmatpush.bf16.msrb.mxu2 %v13458_v40  ;;  %v9223_v29 = vadd.f32 %v9222_v18, %v9210_v49 }
 0x835   : > { %9403 = vmatmul.bf16.vlgmr.msrb.gmra.mxu1 %v16570_v16  ;;  %v9185_v16 = vpop.f32.mrf.mxu0 }
 0x836   : > { %9428 = vmatpush.bf16.msrb.mxu3 %v13714_v26  ;;  %v9469_v55 = vsel %vm1167_vm2, %v9223_v29, 0.0 }
 0x837   : > { %9416 = vmatmul.bf16.vlgmr.msrb.gmra.mxu2 %v16555_v54  ;;  %v9545_v54 = vrot.slane %v9544_v63, 2  ;;  %v9470_v44 = vrot.slane %v9469_v55, 4 }
 0x839   : > { %9429 = vmatmul.bf16.vlgmr.msrb.gmra.mxu3 %v16565_v61  ;;  %v9471_v5 = vadd.f32 %v9470_v44, %v9469_v55  ;;  %v9211_v61 = vpop.f32.mrf.mxu2  ;;  %v9546_v52 = vadd.f32 %v9545_v54, %v9544_v63 }
 0x83b   : > { %v9224_v24 = vpop.f32.mrf.mxu3  ;;  %v9472_v17 = vrot.slane %v9471_v5, 2  ;;  %v9547_v21 = vrot.slane %v9546_v52, 1 }
 0x83d   : > { %v9473_v15 = vadd.f32 %v9472_v17, %v9471_v5  ;;  %v9548_v2 = vadd.f32 %v9547_v21, %v9546_v52  ;;  %v9235_v46 = vpop.f32.mrf.mxu0 }
 0x83e   : > { %v9249_v4 = vadd.f32 %v9248_v0, %v9235_v46 }
 0x83f   : > { %v9474_v43 = vrot.slane %v9473_v15, 1  ;;  %v9574_v12 = vmul.f32 %v9548_v2, %v16290_v47 }
 0x841   : > { %v9475_v25 = vadd.f32 %v9474_v43, %v9473_v15  ;;  %v9582_v20 = vadd.f32 1e-05, %v9574_v12  ;;  %v9261_v19 = vpop.f32.mrf.mxu2 }
 0x842   : > { %v9262_v3 = vadd.f32 %v9261_v19, %v9249_v4 }
 0x843   : > { %v9495_v57 = vmul.f32 %v9475_v25, %v16290_v47  ;;  %15097 = vrsqrt.f32 %v9582_v20  ;;  %v9274_v33 = vpop.f32.mrf.mxu3  ;;  %vm9632_vm8 = vweird.f32 %v9582_v20 }
 0x844   : > { %v9275_v38 = vadd.f32 %v9274_v33, %v9262_v3 }
 0x845   : > { %v9503_v28 = vsub.f32 %v9223_v29, %v9495_v57  ;;  %v9237_v1 = vpop.f32.mrf.mxu0 }
 0x847   : > { %v9511_v37 = vmul.f32 %v9503_v28, %v9503_v28 }
 0x849   : > { %v9549_v62 = vsel %vm1167_vm2, %v9511_v37, 0.0  ;;  %v15098_v32 = vpop.eup %15097  ;;  %v9263_v23 = vpop.f32.mrf.mxu2 }
 0x84a   : > { %v9550_v11 = vrot.slane %v9549_v62, 4  ;;  %v9627_v14 = vmul.f32 %v15098_v32, %v9582_v20  ;;  %vm9633_vm4 = vweird.f32 %v15098_v32 }
 0x84b   : > { %v9276_v10 = vpop.f32.mrf.mxu3  ;;  %vm9634_vm9 = vmor %vm9632_vm8, %vm9633_vm4 }
 0x84c   : > { %v9551_v22 = vadd.f32 %v9550_v11, %v9549_v62  ;;  %v9628_v9 = vmul.f32 %v15098_v32, %v9627_v14 }
 0x84e   : > { %v9552_v59 = vrot.slane %v9551_v22, 2  ;;  %v9629_v56 = vmul.f32 0.5, %v9628_v9 }
 0x850   : > { %v9553_v13 = vadd.f32 %v9552_v59, %v9551_v22  ;;  %v9630_v34 = vsub.f32 1.5, %v9629_v56 }
 0x851   : > { %v9287_v39 = vpop.f32.mrf.mxu0 }
 0x852   : > { %v9554_v53 = vrot.slane %v9553_v13, 1  ;;  %v9631_v26 = vmul.f32 %v15098_v32, %v9630_v34  ;;  %v9288_v41 = vadd.f32 %v9287_v39, %v9275_v38 }
 0x853   : > { %v9300_v42 = vpop.f32.mrf.mxu1 }
 0x854   : > { %v9555_v50 = vadd.f32 %v9554_v53, %v9553_v13  ;;  %v9635_v35 = vsel %vm9634_vm9, %v15098_v32, %v9631_v26  ;;  %v9301_v63 = vadd.f32 %v9300_v42, %v9288_v41 }
 0x855   : > { %v9670_v18 = vmul.f32 %v9635_v35, %v16784_v8 }
 0x856   : > { %v9575_v6 = vmul.f32 %v9555_v50, %v16290_v47 }
 0x858   : > { %v9583_v58 = vadd.f32 1e-05, %v9575_v6 }
 0x859   : > { %v9289_v55 = vpop.f32.mrf.mxu0 }
 0x85a   : > { %15099 = vrsqrt.f32 %v9583_v58  ;;  %vm9642_vm10 = vweird.f32 %v9583_v58 }
 0x85b   : > { %v9313_v49 = vpop.f32.mrf.mxu2  ;;  %v9302_v44 = vpop.f32.mrf.mxu1 }
 0x85c   : > { %v9314_v54 = vadd.f32 %v9313_v49, %v9301_v63 }
 0x85d   : > { %v9326_v16 = vpop.f32.mrf.mxu3 }
 0x85e   : > { %v9327_v5 = vadd.f32 %v9326_v16, %v9314_v54 }
 0x860   : > { %v15100_v45 = vpop.eup %15099  ;;  %v9476_v24 = vsel %vm1167_vm2, %v9327_v5, 0.0 }
 0x861   : > { %v9637_v60 = vmul.f32 %v15100_v45, %v9583_v58  ;;  %vm9643_vm7 = vweird.f32 %v15100_v45  ;;  %v9477_v17 = vrot.slane %v9476_v24, 4 }
 0x862   : > { %vm9644_vm11 = vmor %vm9642_vm10, %vm9643_vm7 }
 0x863   : > { %v9638_v48 = vmul.f32 %v15100_v45, %v9637_v60  ;;  %v9315_v61 = vpop.f32.mrf.mxu2  ;;  %v9478_v15 = vadd.f32 %v9477_v17, %v9476_v24 }
 0x865   : > { %v9639_v40 = vmul.f32 0.5, %v9638_v48  ;;  %v9328_v52 = vpop.f32.mrf.mxu3  ;;  %v9479_v21 = vrot.slane %v9478_v15, 2 }
 0x867   : > { %v9640_v31 = vsub.f32 1.5, %v9639_v40  ;;  %v9480_v25 = vadd.f32 %v9479_v21, %v9478_v15 }
 0x869   : > { %v9641_v30 = vmul.f32 %v15100_v45, %v9640_v31  ;;  %v9481_v8 = vrot.slane %v9480_v25, 1 }
 0x86b   : > { %v9645_v27 = vsel %vm9644_vm11, %v15100_v45, %v9641_v30  ;;  %v9482_v37 = vadd.f32 %v9481_v8, %v9480_v25 }
 0x86c   : > { %v9671_v7 = vmul.f32 %v9645_v27, %v9503_v28 }
 0x86d   : > { %v9496_v20 = vmul.f32 %v9482_v37, %v16290_v47 }
 0x86e   : > { %v9685_v29 = vrot.slane %v9671_v7, 6 }
 0x86f   : > { %v16804_v0 = vsub.f32 %v9327_v5, %v9496_v20 }
 0x870   : > { %v16800_v36 = vsel %vm1167_vm2, %v9670_v18, %v9685_v29 }
 0x871   : > { %v9339_v43 = vpop.f32.mrf.mxu0  ;;  %v9512_v4 = vmul.f32 %v16804_v0, %v16804_v0 }
 0x873   : > { %v9352_v2 = vpop.f32.mrf.mxu1  ;;  %v9556_v19 = vsel %vm1167_vm2, %v9512_v4, 0.0 }
 0x874   : > { %v9353_v22 = vadd.f32 %v9352_v2, %v9339_v43  ;;  %v9557_v13 = vrot.slane %v9556_v19, 4 }
 0x876   : > { %v9558_v1 = vadd.f32 %v9557_v13, %v9556_v19 }
 0x878   : > { %v9559_v50 = vrot.slane %v9558_v1, 2 }
 0x879   : > { %v9341_v12 = vpop.f32.mrf.mxu0 }
 0x87a   : > { %v9560_v9 = vadd.f32 %v9559_v50, %v9558_v1 }
 0x87b   : > { %v9365_v57 = vpop.f32.mrf.mxu2  ;;  %v9354_v62 = vpop.f32.mrf.mxu1 }
 0x87c   : > { %v9366_v59 = vadd.f32 %v9365_v57, %v9353_v22  ;;  %v9561_v48 = vrot.slane %v9560_v9, 1 }
 0x87d   : > { %v9378_v28 = vpop.f32.mrf.mxu3 }
 0x87e   : > { %v9379_v3 = vadd.f32 %v9378_v28, %v9366_v59  ;;  %v9562_v39 = vadd.f32 %v9561_v48, %v9560_v9 }
 0x880   : > { %v9576_v42 = vmul.f32 %v9562_v39, %v16290_v47 }
 0x882   : > { %v9584_v7 = vadd.f32 1e-05, %v9576_v42 }
 0x883   : > { %v9367_v11 = vpop.f32.mrf.mxu2 }
 0x884   : > { %15101 = vrsqrt.f32 %v9584_v7  ;;  %vm9652_vm12 = vweird.f32 %v9584_v7 }
 0x885   : > { %v9380_v46 = vpop.f32.mrf.mxu3 }
 0x88a   : > { %v15102_v54 = vpop.eup %15101 }
 0x88b   : > { %v9647_v5 = vmul.f32 %v15102_v54, %v9584_v7 }
 0x88d   : > { %v9648_v24 = vmul.f32 %v15102_v54, %v9647_v5 }
 0x88f   : > { %v9649_v15 = vmul.f32 0.5, %v9648_v24 }
 0x891   : > { %v9650_v21 = vsub.f32 1.5, %v9649_v15 }
 0x893   : > { %v9651_v2 = vmul.f32 %v15102_v54, %v9650_v21 }
 0x8b0   : > { %v9391_v33 = vpop.f32.mrf.mxu0 }
 0x8b1   : > { %v9392_v38 = vadd.f32 %v9391_v33, %v9379_v3 }
 0x8b2   : > { %v9404_v53 = vpop.f32.mrf.mxu1 }
 0x8b3   : > { %v9405_v51 = vadd.f32 %v9404_v53, %v9392_v38 }
 0x8b8   : > { %v9393_v23 = vpop.f32.mrf.mxu0 }
 0x8ba   : > { %v9417_v32 = vpop.f32.mrf.mxu2  ;;  %v9406_v58 = vpop.f32.mrf.mxu1 }
 0x8bb   : > { %v9418_v6 = vadd.f32 %v9417_v32, %v9405_v51 }
 0x8bc   : > { %v9430_v14 = vpop.f32.mrf.mxu3 }
 0x8bd   : > { %v9431_v10 = vadd.f32 %v9430_v14, %v9418_v6 }
 0x8bf   : > { %v9483_v56 = vsel %vm1167_vm2, %v9431_v10, 0.0 }
 0x8c0   : > { %v9484_v45 = vrot.slane %v9483_v56, 4 }
 0x8c2   : > { %v9485_v60 = vadd.f32 %v9484_v45, %v9483_v56  ;;  %v9419_v34 = vpop.f32.mrf.mxu2 }
 0x8c4   : > { %v9432_v40 = vpop.f32.mrf.mxu3  ;;  %v9486_v26 = vrot.slane %v9485_v60, 2 }
 0x8c6   : > { %v9487_v31 = vadd.f32 %v9486_v26, %v9485_v60 }
 0x8c8   : > { %v9488_v30 = vrot.slane %v9487_v31, 1 }
 0x8ca   : > { %v9489_v41 = vadd.f32 %v9488_v30, %v9487_v31 }
 0x8cc   : > { %v9497_v35 = vmul.f32 %v9489_v41, %v16290_v47 }
 0x8ce   : > { %v9505_v27 = vsub.f32 %v9431_v10, %v9497_v35 }
 0x8d0   : > { %v9513_v63 = vmul.f32 %v9505_v27, %v9505_v27 }
 0x8d2   : > { %v9563_v49 = vsel %vm1167_vm2, %v9513_v63, 0.0  ;;  %vm9653_vm2 = vweird.f32 %v15102_v54 }
 0x8d3   : > { %v9564_v18 = vrot.slane %v9563_v49, 4  ;;  %vm9654_vm13 = vmor %vm9652_vm12, %vm9653_vm2 }
 0x8d4   : > { %v9655_v28 = vsel %vm9654_vm13, %v15102_v54, %v9651_v2 }
 0x8d5   : > { %v9565_v29 = vadd.f32 %v9564_v18, %v9563_v49 }
 0x8d7   : > { %v9566_v16 = vrot.slane %v9565_v29, 2 }
 0x8d9   : > { %v9567_v55 = vadd.f32 %v9566_v16, %v9565_v29 }
 0x8db   : > { %v9568_v44 = vrot.slane %v9567_v55, 1 }
 0x8dd   : > { %v9569_v61 = vadd.f32 %v9568_v44, %v9567_v55 }
 0x8df   : > { %v9577_v52 = vmul.f32 %v9569_v61, %v16290_v47  ;;  %v9672_v47 = vmul.f32 %v9655_v28, %v16804_v0 }
 0x8e1   : > { %v9585_v17 = vadd.f32 1e-05, %v9577_v52  ;;  %v9686_v11 = vrot.slane %v9672_v47, 4 }
 0x8e3   : > { %15103 = vrsqrt.f32 %v9585_v17  ;;  %vm9662_vm15 = vweird.f32 %v9585_v17 }
 0x8e9   : > { %v15104_v43 = vpop.eup %15103 }
 0x8ea   : > { %v9657_v25 = vmul.f32 %v15104_v43, %v9585_v17  ;;  %vm9663_vm14 = vweird.f32 %v15104_v43 }
 0x8eb   : > { %vm9664_vm0 = vmor %vm9662_vm15, %vm9663_vm14 }
 0x8ec   : > { %v9658_v8 = vmul.f32 %v15104_v43, %v9657_v25 }
 0x8ee   : > { %v9659_v57 = vmul.f32 0.5, %v9658_v8 }
 0x8f0   : > { %v9660_v12 = vsub.f32 1.5, %v9659_v57 }
 0x8f2   : > { %v9661_v37 = vmul.f32 %v15104_v43, %v9660_v12 }
 0x8f4   : > { %v9665_v62 = vsel %vm9664_vm0, %v15104_v43, %v9661_v37 }
 0x8f5   : > { %v9673_v20 = vmul.f32 %v9665_v62, %v9505_v27 }
 0x8f7   : > { %v9687_v46 = vrot.slane %v9673_v20, 2 }
 0x8f9   : > { %v9694_v22 = vsel %vm1173_vm5, %v9686_v11, %v9687_v46 }
 0x8fa   : > { %v9695_v4 = vsel %vm1175_vm6, %v16800_v36, %v9694_v22 }
 0x8fb   : > { %9699 = vst [vmem:[#allocation15 + $0x8] sm:$0xff] %v9695_v4 }
 0x8fc PF: > { %p15015_p10 = scmp.eq.s32.totalorder %s9819_s30, 1  ;;  %s9708_s9 = sshll.u32 %s16839_s7, 4  ;;  %s9709_s9 = int_to_ptr.hbm [resolvable:$true] %s9708_s9 }
 0x8fd   : > { %s15363_s12 = smov [#allocation15]  }
 0x8fe   : > { %s9706_s14 = sshll.u32 %s15363_s12, 4  ;;  %s9707_s14 = int_to_ptr.vmem [resolvable:$true] %s9706_s14 }
 0x8ff   : > { %14991 = dma.vmem_to_hbm [thread:$0]  (%p15015_p10), %s9707_s14, 256, %s9709_s9, [#allocation9]  }
 0x900   : > { %15338 = dma.done.wait (%p15015_p10), [#allocation9], 256  }
 0x901   : > { %15340 = vsyncadd (%p15015_p10), [#allocation9], 4294967040 }
 0x902 PF: > { %s21_s26 = sadd.s32 1, %s15351_s26   ;;  %s17129_s24 = smov %s15347_s25 }
 0x903   : > { %p18_p11 = scmp.ge.s32.totalorder %s21_s26, 4   ;;  %s17130_s25 = smov %s17132_s13 }
 0x905   :  { %20 = sbr.rel (!%p18_p11) target bundleno = 5 (0x5), region = 119 }
 0x90a   :  { %9722 = vsyncpa [#allocation8], 1 }
 0x90b   :  { %9724 = vsyncpa [#allocation8 + $0x1], 1 }
 0x90c   :  { %9725 = vsyncpa [#allocation11], 1 }
 0x90d   :  { %9726 = vsyncpa [#allocation14], 1 }
 0x90e   :  { %9727 = vsyncpa [#allocation9], 1 }
 0x90f   :  { %9729 = vsyncpa [#allocation9 + $0x1], 1 }
 0x910   :  { %9730 = vsyncmov [#allocation6] }
 0x913   :  { %s9731_s30 = vpop.sfrf %9730 }
 0x914   :  { %p13943_p12 = scmp.ne.s32.totalorder %s9731_s30, 0 }
 0x916   :  { %9735 = shalt.err (%p13943_p12)  }
 0x917   :  { %9737 = vsyncmov [#allocation6 + $0x1] }
 0x91a   :  { %s9738_s15 = vpop.sfrf %9737 }
 0x91b   :  { %p13944_p13 = scmp.ne.s32.totalorder %s9738_s15, 0 }
 0x91d   :  { %9742 = shalt.err (%p13944_p13)  }

</bundles_post_ra>
